<compile_context>
chip_gen: v5e
topology: v5e:2x2
jax: 0.10.0
libtpu: 0.0.40
codegen_flags: <defaults>
</compile_context>

<pallas_src>
import functools

import jax
import jax.numpy as jnp
from jax.experimental import pallas as pl
from jax.experimental.pallas import tpu as pltpu

CPAD = 128                      # conv output channels zero-padded to one full lane group
STAGES = [(3, 16), (16, 32), (32, 64)]   # (Cin, Cout) per conv stage
STRIDES = [1, 2, 2]
VMEM_LIMIT = 48 * 1024 * 1024   # above the 32 MiB scoped default, below v7x's 64 MiB physical


def _round_up(x, m):
    return (x + m - 1) // m * m


def _row_tile(ho, wh):
    """Largest row tile <= 64 dividing ho whose flat tile (tr*wh) stays sublane aligned."""
    if ho <= 64:
        return ho
    for t in range(64, 0, -1):
        if ho % t == 0 and (t * wh) % 8 == 0:
            return t
    return ho


# --------------------------------------------------------------------------------------
# Kernel 1: 3x3 conv (pad=1) + bias + ReLU as 9 accumulated contiguous-window GEMMs
# --------------------------------------------------------------------------------------
def _conv3x3_relu_kernel(x_ref, w_ref, b_ref, o_ref, *, stride, hh, wh, tr, n_row):
    # x_ref: [1, s*s*hh*wh + wh, cin]  stride-phase-major flattened padded input (bf16)
    # w_ref: [9, cin, CPAD]            tap-major weights (bf16, zero-padded channels)
    # b_ref: [1, CPAD]                 bias (f32)
    # o_ref: [1, tr*wh, CPAD]          one output row tile (flat, lane-dense, bf16)
    s = stride
    l = tr * wh
    if n_row == 1:
        row_off = 0                                    # fully static slice starts
    else:
        row_off = pl.multiple_of(pl.program_id(1) * l, 8)

    acc = jnp.zeros((l, CPAD), jnp.float32)
    for di in range(3):
        for dj in range(3):
            ph = (di % s) * s + (dj % s)               # which stride phase
            a, b = di // s, dj // s                    # row/col offset inside the phase
            start = ph * hh * wh + a * wh + b + row_off
            win = x_ref[0, pl.ds(start, l), :]         # [l, cin] contiguous window
            acc = acc + jnp.dot(win, w_ref[di * 3 + dj],
                                preferred_element_type=jnp.float32)
    out = jnp.maximum(acc + b_ref[...], 0.0)           # bias + ReLU in f32
    o_ref[...] = out[None].astype(o_ref.dtype)


def conv3x3_relu(x, w_taps, b, stride):
    """3x3 conv (pad=1, given stride) + ReLU.

    x:      [NS, H, W, Cin]  bf16 NHWC
    w_taps: [9, Cin, CPAD]   bf16 (tap-major, output channels zero-padded to CPAD)
    b:      [CPAD]           f32
    returns [NS, Ho, Wo, CPAD] bf16
    """
    ns, h, w_, cin = x.shape
    s = stride
    ho = (h + 2 - 3) // s + 1
    wo = (w_ + 2 - 3) // s + 1

    # spatial pad=1, then pad so every stride phase has an identical shape
    hp = _round_up(h + 2, s)
    wp = _round_up(w_ + 2, s)
    xp = jnp.pad(x, ((0, 0), (1, hp - h - 1), (1, wp - w_ - 1), (0, 0)))
    hh, wh = hp // s, wp // s

    # stride-phase decomposition: each 3x3 tap becomes a *contiguous* window of one
    # phase, so no 9x im2col matrix is ever written to HBM (xf is ~1x input bytes).
    if s == 1:
        xf = xp.reshape(ns, hh * wh, cin)
    else:
        phases = [xp[:, p::s, q::s, :].reshape(ns, hh * wh, cin)
                  for p in range(s) for q in range(s)]
        xf = jnp.concatenate(phases, axis=1)
    xf = jnp.pad(xf, ((0, 0), (0, wh), (0, 0)))        # safety tail for junk trailing columns
    total = s * s * hh * wh + wh

    tr = _row_tile(ho, wh)
    n_row = ho // tr
    l = tr * wh

    kernel = functools.partial(_conv3x3_relu_kernel,
                               stride=s, hh=hh, wh=wh, tr=tr, n_row=n_row)

    flops = 2 * ns * ho * wh * 9 * cin * CPAD
    bytes_accessed = xf.size * 2 + w_taps.size * 2 + b.size * 4 + ns * ho * wh * CPAD * 2

    out_flat = pl.pallas_call(
        kernel,
        out_shape=jax.ShapeDtypeStruct((ns, ho * wh, CPAD), jnp.bfloat16),
        grid=(ns, n_row),
        in_specs=[
            pl.BlockSpec((1, total, cin), lambda n, r: (n, 0, 0)),
            pl.BlockSpec((9, cin, CPAD), lambda n, r: (0, 0, 0)),
            pl.BlockSpec((1, CPAD), lambda n, r: (0, 0)),
        ],
        out_specs=pl.BlockSpec((1, l, CPAD), lambda n, r: (n, r, 0)),
        compiler_params=pltpu.CompilerParams(
            dimension_semantics=("parallel", "parallel"),
            vmem_limit_bytes=VMEM_LIMIT),
        cost_estimate=pl.CostEstimate(
            flops=flops, transcendentals=0, bytes_accessed=bytes_accessed),
    )(xf, w_taps, b.reshape(1, CPAD))

    # drop the junk columns (wh >= wo) and restore NHWC; pure XLA glue
    return out_flat.reshape(ns, ho, wh, CPAD)[:, :, :wo, :]


# --------------------------------------------------------------------------------------
# Kernel 2: LPIPS per-layer comparison, tiled over rows with a scratch accumulator
# --------------------------------------------------------------------------------------
def _lpips_layer_kernel(f0_ref, f1_ref, w_ref, o_ref, acc_ref, *, inv_count):
    i = pl.program_id(0)

    @pl.when(i == 0)
    def _():
        acc_ref[...] = jnp.zeros_like(acc_ref)

    f0 = f0_ref[...].astype(jnp.float32)               # elementwise in f32 (v5e-safe)
    f1 = f1_ref[...].astype(jnp.float32)
    eps = 1e-10
    # LPIPS normalize_tensor(): x / (sqrt(sum_c x^2) + eps); divide done on the EUP
    inv0 = pl.reciprocal(jnp.sqrt(jnp.sum(f0 * f0, axis=-1, keepdims=True)) + eps,
                         approx=True)
    inv1 = pl.reciprocal(jnp.sqrt(jnp.sum(f1 * f1, axis=-1, keepdims=True)) + eps,
                         approx=True)
    d = (f0 * inv0 - f1 * inv1) ** 2
    acc_ref[...] += jnp.sum(d * w_ref[...])            # learned 1x1 "lin" channel weights

    @pl.when(i == pl.num_programs(0) - 1)
    def _():
        o_ref[...] = acc_ref[...] * inv_count          # mean over the TRUE N*H*W count


def lpips_layer_score(f0, f1, lin_w):
    """Channel-normalized, lin-weighted, spatially+batch averaged squared difference."""
    n, ho, wo, c = f0.shape
    rows = n * ho * wo
    f0r = f0.reshape(rows, c)
    f1r = f1.reshape(rows, c)

    blk = min(1024, _round_up(rows, 8))
    rows_p = _round_up(rows, blk)
    if rows_p != rows:
        # zero-padded rows contribute exactly 0 (0 * reciprocal(eps) = 0)
        f0r = jnp.pad(f0r, ((0, rows_p - rows), (0, 0)))
        f1r = jnp.pad(f1r, ((0, rows_p - rows), (0, 0)))
    n_blk = rows_p // blk

    kernel = functools.partial(_lpips_layer_kernel, inv_count=1.0 / rows)
    out = pl.pallas_call(
        kernel,
        out_shape=jax.ShapeDtypeStruct((1, 1), jnp.float32),
        grid=(n_blk,),
        in_specs=[
            pl.BlockSpec((blk, c), lambda i: (i, 0)),
            pl.BlockSpec((blk, c), lambda i: (i, 0)),
            pl.BlockSpec((1, c), lambda i: (0, 0)),
        ],
        out_specs=pl.BlockSpec((1, 1), lambda i: (0, 0)),
        scratch_shapes=[pltpu.VMEM((1, 1), jnp.float32)],
        compiler_params=pltpu.CompilerParams(
            dimension_semantics=("arbitrary",),
            vmem_limit_bytes=VMEM_LIMIT),
        cost_estimate=pl.CostEstimate(
            flops=10 * rows_p * c, transcendentals=4 * rows_p,
            bytes_accessed=2 * rows_p * c * 2 + c * 4 + 4),
    )(f0r, f1r, lin_w.reshape(1, c).astype(jnp.float32))
    return out[0, 0]


# --------------------------------------------------------------------------------------
# Deterministic synthetic parameters + channel padding to CPAD lanes
# --------------------------------------------------------------------------------------
def init_params():
    key = jax.random.PRNGKey(42)
    keys = jax.random.split(key, 3 * len(STAGES))
    conv_w, conv_b, lin_w = [], [], []
    for i, (cin, cout) in enumerate(STAGES):
        w = jax.random.normal(keys[3 * i], (3, 3, cin, cout), jnp.float32) / jnp.sqrt(9.0 * cin)
        b = 0.1 * jax.random.normal(keys[3 * i + 1], (cout,), jnp.float32)
        lw = jnp.abs(jax.random.normal(keys[3 * i + 2], (cout,), jnp.float32)) / cout
        conv_w.append(w)
        conv_b.append(b)
        lin_w.append(lw)
    return conv_w, conv_b, lin_w


def prep_params(conv_w, conv_b, lin_w):
    """Zero-pad channels to CPAD lanes (inert for norms / weighted sums), tap-major bf16."""
    pw, pb, plw = [], [], []
    for i, (w, b, lw) in enumerate(zip(conv_w, conv_b, lin_w)):
        kh, kw, cin, cout = w.shape
        cin_pad = cin if i == 0 else CPAD          # previous stage output is already CPAD wide
        wp = jnp.zeros((kh, kw, cin_pad, CPAD), jnp.float32).at[:, :, :cin, :cout].set(w)
        pw.append(wp.reshape(kh * kw, cin_pad, CPAD).astype(jnp.bfloat16))
        pb.append(jnp.zeros((CPAD,), jnp.float32).at[:cout].set(b))
        plw.append(jnp.zeros((CPAD,), jnp.float32).at[:cout].set(lw))
    return pw, pb, plw


# --------------------------------------------------------------------------------------
# PerceptualLoss.forward equivalent
# --------------------------------------------------------------------------------------
def perceptual_loss(preds, images, params, normalize=True):
    """preds, images: [N, 3, H, W] in [0,1] (NCHW).  Returns scalar batch-mean LPIPS."""
    conv_w, conv_b, lin_w = params
    n = preds.shape[0]

    # single backbone pass over preds and images, concatenated along the batch axis
    x = jnp.concatenate([preds, images], axis=0)
    x = jnp.transpose(x, (0, 2, 3, 1)).astype(jnp.float32)      # NCHW -> NHWC
    if normalize:
        x = 2.0 * x - 1.0                                        # [0,1] -> [-1,1]
    shift = jnp.array([-0.030, -0.088, -0.188], jnp.float32).reshape(1, 1, 1, 3)
    scale = jnp.array([0.458, 0.448, 0.450], jnp.float32).reshape(1, 1, 1, 3)
    x = ((x - shift) / scale).astype(jnp.bfloat16)               # LPIPS scaling layer

    total = jnp.zeros((), jnp.float32)
    for w, b, lw, s in zip(conv_w, conv_b, lin_w, STRIDES):
        x = conv3x3_relu(x, w, b, s)                             # [2N, Ho, Wo, CPAD] bf16
        # TODO(synk): fuse this comparison into the conv epilogue to skip the HBM round trip.
        total = total + lpips_layer_score(x[:n], x[n:], lw)
    return total


if __name__ == "__main__":
    key = jax.random.PRNGKey(0)
    k1, k2 = jax.random.split(key)
    n, c, h, w = 2, 3, 16, 16
    # LPIPS with normalize=True expects 3-channel images in [0, 1]
    preds = jax.random.uniform(k1, (n, c, h, w), jnp.float32)
    images = jax.random.uniform(k2, (n, c, h, w), jnp.float32)

    params = prep_params(*init_params())
    loss_fn = jax.jit(functools.partial(perceptual_loss, params=params, normalize=True))
    loss = loss_fn(preds, images)
    jax.block_until_ready(loss)
    assert loss.shape == () and bool(jnp.isfinite(loss))
    print("KERNEL_OK")
</pallas_src>

<mosaic_0001>
module attributes {stable_mosaic.version = 11 : i64} {
  func.func @_conv3x3_relu_kernel(%arg0: i32, %arg1: i32, %arg2: memref<1x342x3xbf16, #tpu.memory_space<vmem>>, %arg3: memref<9x3x128xbf16, #tpu.memory_space<vmem>>, %arg4: memref<1x128xf32, #tpu.memory_space<vmem>>, %arg5: memref<1x288x128xbf16, #tpu.memory_space<vmem>>) attributes {dimension_semantics = [#tpu.dimension_semantics<parallel>, #tpu.dimension_semantics<parallel>], iteration_bounds = array<i64: 4, 1>, scalar_prefetch = 0 : i64, scratch_operands = 0 : i64, tpu.core_type = #tpu.core_type<tc>, window_params = [{transform_indices = @transform_0, window_bounds = array<i64: 1, 342, 3>}, {pipeline_mode = #tpu.pipeline_mode<synchronous>, transform_indices = @transform_1, window_bounds = array<i64: 9, 3, 128>}, {pipeline_mode = #tpu.pipeline_mode<synchronous>, transform_indices = @transform_2, window_bounds = array<i64: 1, 128>}, {transform_indices = @transform_3, window_bounds = array<i64: 1, 288, 128>}]} {
    %cst = arith.constant 0.000000e+00 : f32
    %0 = vector.broadcast %cst : f32 to vector<288x128xf32>
    %c0 = arith.constant 0 : index
    %c0_0 = arith.constant 0 : index
    %c0_1 = arith.constant 0 : index
    %1 = vector.load %arg2[%c0, %c0_0, %c0_1] : memref<1x342x3xbf16, #tpu.memory_space<vmem>>, vector<1x288x3xbf16>
    %2 = vector.shape_cast %1 : vector<1x288x3xbf16> to vector<288x3xbf16>
    %c0_2 = arith.constant 0 : index
    %c0_3 = arith.constant 0 : index
    %c0_4 = arith.constant 0 : index
    %3 = vector.load %arg3[%c0_2, %c0_3, %c0_4] : memref<9x3x128xbf16, #tpu.memory_space<vmem>>, vector<1x3x128xbf16>
    %4 = vector.shape_cast %3 : vector<1x3x128xbf16> to vector<3x128xbf16>
    %cst_5 = arith.constant dense<0.000000e+00> : vector<288x128xf32>
    %5 = tpu.matmul %2, %4, %cst_5 {dimension_numbers = #tpu.dot_dimension_numbers<[1], [0], [0], [1], [0, 0, 1, 1], [], []>} : vector<288x3xbf16>, vector<3x128xbf16>, vector<288x128xf32> -> vector<288x128xf32>
    %6 = arith.addf %0, %5 : vector<288x128xf32>
    %c0_6 = arith.constant 0 : index
    %c1 = arith.constant 1 : index
    %c0_7 = arith.constant 0 : index
    %7 = vector.load %arg2[%c0_6, %c1, %c0_7] : memref<1x342x3xbf16, #tpu.memory_space<vmem>>, vector<1x288x3xbf16>
    %8 = vector.shape_cast %7 : vector<1x288x3xbf16> to vector<288x3xbf16>
    %c1_8 = arith.constant 1 : index
    %c0_9 = arith.constant 0 : index
    %c0_10 = arith.constant 0 : index
    %9 = vector.load %arg3[%c1_8, %c0_9, %c0_10] : memref<9x3x128xbf16, #tpu.memory_space<vmem>>, vector<1x3x128xbf16>
    %10 = vector.shape_cast %9 : vector<1x3x128xbf16> to vector<3x128xbf16>
    %cst_11 = arith.constant dense<0.000000e+00> : vector<288x128xf32>
    %11 = tpu.matmul %8, %10, %cst_11 {dimension_numbers = #tpu.dot_dimension_numbers<[1], [0], [0], [1], [0, 0, 1, 1], [], []>} : vector<288x3xbf16>, vector<3x128xbf16>, vector<288x128xf32> -> vector<288x128xf32>
    %12 = arith.addf %6, %11 : vector<288x128xf32>
    %c0_12 = arith.constant 0 : index
    %c2 = arith.constant 2 : index
    %c0_13 = arith.constant 0 : index
    %13 = vector.load %arg2[%c0_12, %c2, %c0_13] : memref<1x342x3xbf16, #tpu.memory_space<vmem>>, vector<1x288x3xbf16>
    %14 = vector.shape_cast %13 : vector<1x288x3xbf16> to vector<288x3xbf16>
    %c2_14 = arith.constant 2 : index
    %c0_15 = arith.constant 0 : index
    %c0_16 = arith.constant 0 : index
    %15 = vector.load %arg3[%c2_14, %c0_15, %c0_16] : memref<9x3x128xbf16, #tpu.memory_space<vmem>>, vector<1x3x128xbf16>
    %16 = vector.shape_cast %15 : vector<1x3x128xbf16> to vector<3x128xbf16>
    %cst_17 = arith.constant dense<0.000000e+00> : vector<288x128xf32>
    %17 = tpu.matmul %14, %16, %cst_17 {dimension_numbers = #tpu.dot_dimension_numbers<[1], [0], [0], [1], [0, 0, 1, 1], [], []>} : vector<288x3xbf16>, vector<3x128xbf16>, vector<288x128xf32> -> vector<288x128xf32>
    %18 = arith.addf %12, %17 : vector<288x128xf32>
    %c0_18 = arith.constant 0 : index
    %c18 = arith.constant 18 : index
    %c0_19 = arith.constant 0 : index
    %19 = vector.load %arg2[%c0_18, %c18, %c0_19] : memref<1x342x3xbf16, #tpu.memory_space<vmem>>, vector<1x288x3xbf16>
    %20 = vector.shape_cast %19 : vector<1x288x3xbf16> to vector<288x3xbf16>
    %c3 = arith.constant 3 : index
    %c0_20 = arith.constant 0 : index
    %c0_21 = arith.constant 0 : index
    %21 = vector.load %arg3[%c3, %c0_20, %c0_21] : memref<9x3x128xbf16, #tpu.memory_space<vmem>>, vector<1x3x128xbf16>
    %22 = vector.shape_cast %21 : vector<1x3x128xbf16> to vector<3x128xbf16>
    %cst_22 = arith.constant dense<0.000000e+00> : vector<288x128xf32>
    %23 = tpu.matmul %20, %22, %cst_22 {dimension_numbers = #tpu.dot_dimension_numbers<[1], [0], [0], [1], [0, 0, 1, 1], [], []>} : vector<288x3xbf16>, vector<3x128xbf16>, vector<288x128xf32> -> vector<288x128xf32>
    %24 = arith.addf %18, %23 : vector<288x128xf32>
    %c0_23 = arith.constant 0 : index
    %c19 = arith.constant 19 : index
    %c0_24 = arith.constant 0 : index
    %25 = vector.load %arg2[%c0_23, %c19, %c0_24] : memref<1x342x3xbf16, #tpu.memory_space<vmem>>, vector<1x288x3xbf16>
    %26 = vector.shape_cast %25 : vector<1x288x3xbf16> to vector<288x3xbf16>
    %c4 = arith.constant 4 : index
    %c0_25 = arith.constant 0 : index
    %c0_26 = arith.constant 0 : index
    %27 = vector.load %arg3[%c4, %c0_25, %c0_26] : memref<9x3x128xbf16, #tpu.memory_space<vmem>>, vector<1x3x128xbf16>
    %28 = vector.shape_cast %27 : vector<1x3x128xbf16> to vector<3x128xbf16>
    %cst_27 = arith.constant dense<0.000000e+00> : vector<288x128xf32>
    %29 = tpu.matmul %26, %28, %cst_27 {dimension_numbers = #tpu.dot_dimension_numbers<[1], [0], [0], [1], [0, 0, 1, 1], [], []>} : vector<288x3xbf16>, vector<3x128xbf16>, vector<288x128xf32> -> vector<288x128xf32>
    %30 = arith.addf %24, %29 : vector<288x128xf32>
    %c0_28 = arith.constant 0 : index
    %c20 = arith.constant 20 : index
    %c0_29 = arith.constant 0 : index
    %31 = vector.load %arg2[%c0_28, %c20, %c0_29] : memref<1x342x3xbf16, #tpu.memory_space<vmem>>, vector<1x288x3xbf16>
    %32 = vector.shape_cast %31 : vector<1x288x3xbf16> to vector<288x3xbf16>
    %c5 = arith.constant 5 : index
    %c0_30 = arith.constant 0 : index
    %c0_31 = arith.constant 0 : index
    %33 = vector.load %arg3[%c5, %c0_30, %c0_31] : memref<9x3x128xbf16, #tpu.memory_space<vmem>>, vector<1x3x128xbf16>
    %34 = vector.shape_cast %33 : vector<1x3x128xbf16> to vector<3x128xbf16>
    %cst_32 = arith.constant dense<0.000000e+00> : vector<288x128xf32>
    %35 = tpu.matmul %32, %34, %cst_32 {dimension_numbers = #tpu.dot_dimension_numbers<[1], [0], [0], [1], [0, 0, 1, 1], [], []>} : vector<288x3xbf16>, vector<3x128xbf16>, vector<288x128xf32> -> vector<288x128xf32>
    %36 = arith.addf %30, %35 : vector<288x128xf32>
    %c0_33 = arith.constant 0 : index
    %c36 = arith.constant 36 : index
    %c0_34 = arith.constant 0 : index
    %37 = vector.load %arg2[%c0_33, %c36, %c0_34] : memref<1x342x3xbf16, #tpu.memory_space<vmem>>, vector<1x288x3xbf16>
    %38 = vector.shape_cast %37 : vector<1x288x3xbf16> to vector<288x3xbf16>
    %c6 = arith.constant 6 : index
    %c0_35 = arith.constant 0 : index
    %c0_36 = arith.constant 0 : index
    %39 = vector.load %arg3[%c6, %c0_35, %c0_36] : memref<9x3x128xbf16, #tpu.memory_space<vmem>>, vector<1x3x128xbf16>
    %40 = vector.shape_cast %39 : vector<1x3x128xbf16> to vector<3x128xbf16>
    %cst_37 = arith.constant dense<0.000000e+00> : vector<288x128xf32>
    %41 = tpu.matmul %38, %40, %cst_37 {dimension_numbers = #tpu.dot_dimension_numbers<[1], [0], [0], [1], [0, 0, 1, 1], [], []>} : vector<288x3xbf16>, vector<3x128xbf16>, vector<288x128xf32> -> vector<288x128xf32>
    %42 = arith.addf %36, %41 : vector<288x128xf32>
    %c0_38 = arith.constant 0 : index
    %c37 = arith.constant 37 : index
    %c0_39 = arith.constant 0 : index
    %43 = vector.load %arg2[%c0_38, %c37, %c0_39] : memref<1x342x3xbf16, #tpu.memory_space<vmem>>, vector<1x288x3xbf16>
    %44 = vector.shape_cast %43 : vector<1x288x3xbf16> to vector<288x3xbf16>
    %c7 = arith.constant 7 : index
    %c0_40 = arith.constant 0 : index
    %c0_41 = arith.constant 0 : index
    %45 = vector.load %arg3[%c7, %c0_40, %c0_41] : memref<9x3x128xbf16, #tpu.memory_space<vmem>>, vector<1x3x128xbf16>
    %46 = vector.shape_cast %45 : vector<1x3x128xbf16> to vector<3x128xbf16>
    %cst_42 = arith.constant dense<0.000000e+00> : vector<288x128xf32>
    %47 = tpu.matmul %44, %46, %cst_42 {dimension_numbers = #tpu.dot_dimension_numbers<[1], [0], [0], [1], [0, 0, 1, 1], [], []>} : vector<288x3xbf16>, vector<3x128xbf16>, vector<288x128xf32> -> vector<288x128xf32>
    %48 = arith.addf %42, %47 : vector<288x128xf32>
    %c0_43 = arith.constant 0 : index
    %c38 = arith.constant 38 : index
    %c0_44 = arith.constant 0 : index
    %49 = vector.load %arg2[%c0_43, %c38, %c0_44] : memref<1x342x3xbf16, #tpu.memory_space<vmem>>, vector<1x288x3xbf16>
    %50 = vector.shape_cast %49 : vector<1x288x3xbf16> to vector<288x3xbf16>
    %c8 = arith.constant 8 : index
    %c0_45 = arith.constant 0 : index
    %c0_46 = arith.constant 0 : index
    %51 = vector.load %arg3[%c8, %c0_45, %c0_46] : memref<9x3x128xbf16, #tpu.memory_space<vmem>>, vector<1x3x128xbf16>
    %52 = vector.shape_cast %51 : vector<1x3x128xbf16> to vector<3x128xbf16>
    %cst_47 = arith.constant dense<0.000000e+00> : vector<288x128xf32>
    %53 = tpu.matmul %50, %52, %cst_47 {dimension_numbers = #tpu.dot_dimension_numbers<[1], [0], [0], [1], [0, 0, 1, 1], [], []>} : vector<288x3xbf16>, vector<3x128xbf16>, vector<288x128xf32> -> vector<288x128xf32>
    %54 = arith.addf %48, %53 : vector<288x128xf32>
    %c0_48 = arith.constant 0 : index
    %c0_49 = arith.constant 0 : index
    %55 = vector.load %arg4[%c0_48, %c0_49] : memref<1x128xf32, #tpu.memory_space<vmem>>, vector<1x128xf32>
    %56 = vector.broadcast %55 : vector<1x128xf32> to vector<288x128xf32>
    %57 = arith.addf %54, %56 : vector<288x128xf32>
    %cst_50 = arith.constant 0.000000e+00 : f32
    %58 = vector.broadcast %cst_50 : f32 to vector<288x128xf32>
    %59 = arith.maximumf %57, %58 : vector<288x128xf32>
    %60 = vector.shape_cast %59 : vector<288x128xf32> to vector<1x288x128xf32>
    %61 = arith.truncf %60 : vector<1x288x128xf32> to vector<1x288x128xbf16>
    %c0_51 = arith.constant 0 : index
    %c0_52 = arith.constant 0 : index
    %c0_53 = arith.constant 0 : index
    %62 = vector.load %arg5[%c0_51, %c0_52, %c0_53] : memref<1x288x128xbf16, #tpu.memory_space<vmem>>, vector<1x288x128xbf16>
    tpu.vector_store %arg5[%c0_51, %c0_52, %c0_53], %61 {strides = array<i32>} : memref<1x288x128xbf16, #tpu.memory_space<vmem>>, vector<1x288x128xbf16>,
    return
  }
  func.func @transform_0(%arg0: i32, %arg1: i32) -> (i32, i32, i32) {
    %c0_i32 = arith.constant 0 : i32
    %c0_i32_0 = arith.constant 0 : i32
    %c0_i32_1 = arith.constant 0 : i32
    return %arg0, %c0_i32, %c0_i32_0 : i32, i32, i32
  }
  func.func @transform_1(%arg0: i32, %arg1: i32) -> (i32, i32, i32) {
    %c0_i32 = arith.constant 0 : i32
    %c0_i32_0 = arith.constant 0 : i32
    %c0_i32_1 = arith.constant 0 : i32
    %c0_i32_2 = arith.constant 0 : i32
    return %c0_i32, %c0_i32_0, %c0_i32_1 : i32, i32, i32
  }
  func.func @transform_2(%arg0: i32, %arg1: i32) -> (i32, i32) {
    %c0_i32 = arith.constant 0 : i32
    %c0_i32_0 = arith.constant 0 : i32
    %c0_i32_1 = arith.constant 0 : i32
    return %c0_i32, %c0_i32_0 : i32, i32
  }
  func.func @transform_3(%arg0: i32, %arg1: i32) -> (i32, i32, i32) {
    %c0_i32 = arith.constant 0 : i32
    %c0_i32_0 = arith.constant 0 : i32
    return %arg0, %arg1, %c0_i32 : i32, i32, i32
  }
}

module attributes {stable_mosaic.version = 11 : i64} {
  func.func @_lpips_layer_kernel(%arg0: i32, %arg1: memref<512x128xbf16, #tpu.memory_space<vmem>>, %arg2: memref<512x128xbf16, #tpu.memory_space<vmem>>, %arg3: memref<1x128xf32, #tpu.memory_space<vmem>>, %arg4: memref<1x1xf32, #tpu.memory_space<vmem>>, %arg5: memref<1x1xf32, #tpu.memory_space<vmem>>) attributes {dimension_semantics = [#tpu.dimension_semantics<arbitrary>], iteration_bounds = array<i64: 1>, scalar_prefetch = 0 : i64, scratch_operands = 1 : i64, tpu.core_type = #tpu.core_type<tc>, window_params = [{transform_indices = @transform_0, window_bounds = array<i64: 512, 128>}, {transform_indices = @transform_1, window_bounds = array<i64: 512, 128>}, {pipeline_mode = #tpu.pipeline_mode<synchronous>, transform_indices = @transform_2, window_bounds = array<i64: 1, 128>}, {pipeline_mode = #tpu.pipeline_mode<synchronous>, transform_indices = @transform_3, window_bounds = array<i64: 1, 1>}]} {
    %c0_i32 = arith.constant 0 : i32
    %0 = arith.cmpi eq, %arg0, %c0_i32 : i32
    %1 = arith.extui %0 : i1 to i32
    %c0_i32_0 = arith.constant 0 : i32
    %2 = arith.cmpi ne, %1, %c0_i32_0 : i32
    scf.if %2 {
      %cst_16 = arith.constant 0.000000e+00 : f32
      %41 = vector.broadcast %cst_16 : f32 to vector<1x1xf32>
      %c0_17 = arith.constant 0 : index
      %c0_18 = arith.constant 0 : index
      %42 = vector.load %arg5[%c0_17, %c0_18] : memref<1x1xf32, #tpu.memory_space<vmem>>, vector<1x1xf32>
      tpu.vector_store %arg5[%c0_17, %c0_18], %41 {strides = array<i32>} : memref<1x1xf32, #tpu.memory_space<vmem>>, vector<1x1xf32>,
    } else {
    }
    %c0 = arith.constant 0 : index
    %c0_1 = arith.constant 0 : index
    %3 = vector.load %arg1[%c0, %c0_1] : memref<512x128xbf16, #tpu.memory_space<vmem>>, vector<512x128xbf16>
    %4 = arith.extf %3 : vector<512x128xbf16> to vector<512x128xf32>
    %c0_2 = arith.constant 0 : index
    %c0_3 = arith.constant 0 : index
    %5 = vector.load %arg2[%c0_2, %c0_3] : memref<512x128xbf16, #tpu.memory_space<vmem>>, vector<512x128xbf16>
    %6 = arith.extf %5 : vector<512x128xbf16> to vector<512x128xf32>
    %7 = arith.mulf %4, %4 : vector<512x128xf32>
    %cst = arith.constant dense<0.000000e+00> : vector<512xf32>
    %8 = vector.multi_reduction <add>, %7, %cst [1] : vector<512x128xf32> to vector<512xf32>
    %9 = vector.shape_cast %8 : vector<512xf32> to vector<512x1xf32>
    %10 = math.sqrt %9 : vector<512x1xf32>
    %cst_4 = arith.constant 1.000000e-10 : f32
    %11 = vector.broadcast %cst_4 : f32 to vector<512x1xf32>
    %12 = arith.addf %10, %11 : vector<512x1xf32>
    %13 = tpu.reciprocal %12 {approx = true} : vector<512x1xf32> -> vector<512x1xf32>
    %14 = arith.mulf %6, %6 : vector<512x128xf32>
    %cst_5 = arith.constant dense<0.000000e+00> : vector<512xf32>
    %15 = vector.multi_reduction <add>, %14, %cst_5 [1] : vector<512x128xf32> to vector<512xf32>
    %16 = vector.shape_cast %15 : vector<512xf32> to vector<512x1xf32>
    %17 = math.sqrt %16 : vector<512x1xf32>
    %cst_6 = arith.constant 1.000000e-10 : f32
    %18 = vector.broadcast %cst_6 : f32 to vector<512x1xf32>
    %19 = arith.addf %17, %18 : vector<512x1xf32>
    %20 = tpu.reciprocal %19 {approx = true} : vector<512x1xf32> -> vector<512x1xf32>
    %21 = vector.broadcast %13 : vector<512x1xf32> to vector<512x128xf32>
    %22 = arith.mulf %4, %21 : vector<512x128xf32>
    %23 = vector.broadcast %20 : vector<512x1xf32> to vector<512x128xf32>
    %24 = arith.mulf %6, %23 : vector<512x128xf32>
    %25 = arith.subf %22, %24 : vector<512x128xf32>
    %26 = arith.mulf %25, %25 : vector<512x128xf32>
    %c0_7 = arith.constant 0 : index
    %c0_8 = arith.constant 0 : index
    %27 = vector.load %arg5[%c0_7, %c0_8] : memref<1x1xf32, #tpu.memory_space<vmem>>, vector<1x1xf32>
    %c0_9 = arith.constant 0 : index
    %c0_10 = arith.constant 0 : index
    %28 = vector.load %arg3[%c0_9, %c0_10] : memref<1x128xf32, #tpu.memory_space<vmem>>, vector<1x128xf32>
    %29 = vector.broadcast %28 : vector<1x128xf32> to vector<512x128xf32>
    %30 = arith.mulf %26, %29 : vector<512x128xf32>
    %31 = vector.shape_cast %30 : vector<512x128xf32> to vector<1x512x128xf32>
    %cst_11 = arith.constant dense<0.000000e+00> : vector<1xf32>
    %32 = vector.multi_reduction <add>, %31, %cst_11 [1, 2] : vector<1x512x128xf32> to vector<1xf32>
    %33 = vector.shape_cast %32 : vector<1xf32> to vector<1x1x1xf32>
    %34 = vector.extract %33[0, 0, 0] : f32 from vector<1x1x1xf32>
    %35 = vector.broadcast %34 : f32 to vector<1x1xf32>
    %36 = arith.addf %27, %35 : vector<1x1xf32>
    %c0_12 = arith.constant 0 : index
    %c0_13 = arith.constant 0 : index
    %37 = vector.load %arg5[%c0_12, %c0_13] : memref<1x1xf32, #tpu.memory_space<vmem>>, vector<1x1xf32>
    tpu.vector_store %arg5[%c0_12, %c0_13], %36 {strides = array<i32>} : memref<1x1xf32, #tpu.memory_space<vmem>>, vector<1x1xf32>,
    %c0_i32_14 = arith.constant 0 : i32
    %38 = arith.cmpi eq, %arg0, %c0_i32_14 : i32
    %39 = arith.extui %38 : i1 to i32
    %c0_i32_15 = arith.constant 0 : i32
    %40 = arith.cmpi ne, %39, %c0_i32_15 : i32
    scf.if %40 {
      %c0_16 = arith.constant 0 : index
      %c0_17 = arith.constant 0 : index
      %41 = vector.load %arg5[%c0_16, %c0_17] : memref<1x1xf32, #tpu.memory_space<vmem>>, vector<1x1xf32>
      %cst_18 = arith.constant 0.001953125 : f32
      %42 = vector.broadcast %cst_18 : f32 to vector<1x1xf32>
      %43 = arith.mulf %41, %42 : vector<1x1xf32>
      %c0_19 = arith.constant 0 : index
      %c0_20 = arith.constant 0 : index
      %44 = vector.load %arg4[%c0_19, %c0_20] : memref<1x1xf32, #tpu.memory_space<vmem>>, vector<1x1xf32>
      tpu.vector_store %arg4[%c0_19, %c0_20], %43 {strides = array<i32>} : memref<1x1xf32, #tpu.memory_space<vmem>>, vector<1x1xf32>,
    } else {
    }
    return
  }
  func.func @transform_0(%arg0: i32) -> (i32, i32) {
    %c0_i32 = arith.constant 0 : i32
    %c0_i32_0 = arith.constant 0 : i32
    return %arg0, %c0_i32 : i32, i32
  }
  func.func @transform_1(%arg0: i32) -> (i32, i32) {
    %c0_i32 = arith.constant 0 : i32
    %c0_i32_0 = arith.constant 0 : i32
    return %arg0, %c0_i32 : i32, i32
  }
  func.func @transform_2(%arg0: i32) -> (i32, i32) {
    %c0_i32 = arith.constant 0 : i32
    %c0_i32_0 = arith.constant 0 : i32
    %c0_i32_1 = arith.constant 0 : i32
    return %c0_i32, %c0_i32_0 : i32, i32
  }
  func.func @transform_3(%arg0: i32) -> (i32, i32) {
    %c0_i32 = arith.constant 0 : i32
    %c0_i32_0 = arith.constant 0 : i32
    %c0_i32_1 = arith.constant 0 : i32
    return %c0_i32, %c0_i32_0 : i32, i32
  }
}

module attributes {stable_mosaic.version = 11 : i64} {
  func.func @_conv3x3_relu_kernel(%arg0: i32, %arg1: i32, %arg2: memref<1x333x128xbf16, #tpu.memory_space<vmem>>, %arg3: memref<9x128x128xbf16, #tpu.memory_space<vmem>>, %arg4: memref<1x128xf32, #tpu.memory_space<vmem>>, %arg5: memref<1x72x128xbf16, #tpu.memory_space<vmem>>) attributes {dimension_semantics = [#tpu.dimension_semantics<parallel>, #tpu.dimension_semantics<parallel>], iteration_bounds = array<i64: 4, 1>, scalar_prefetch = 0 : i64, scratch_operands = 0 : i64, tpu.core_type = #tpu.core_type<tc>, window_params = [{transform_indices = @transform_0, window_bounds = array<i64: 1, 333, 128>}, {pipeline_mode = #tpu.pipeline_mode<synchronous>, transform_indices = @transform_1, window_bounds = array<i64: 9, 128, 128>}, {pipeline_mode = #tpu.pipeline_mode<synchronous>, transform_indices = @transform_2, window_bounds = array<i64: 1, 128>}, {transform_indices = @transform_3, window_bounds = array<i64: 1, 72, 128>}]} {
    %cst = arith.constant 0.000000e+00 : f32
    %0 = vector.broadcast %cst : f32 to vector<72x128xf32>
    %c0 = arith.constant 0 : index
    %c0_0 = arith.constant 0 : index
    %c0_1 = arith.constant 0 : index
    %1 = vector.load %arg2[%c0, %c0_0, %c0_1] : memref<1x333x128xbf16, #tpu.memory_space<vmem>>, vector<1x72x128xbf16>
    %2 = vector.shape_cast %1 : vector<1x72x128xbf16> to vector<72x128xbf16>
    %c0_2 = arith.constant 0 : index
    %c0_3 = arith.constant 0 : index
    %c0_4 = arith.constant 0 : index
    %3 = vector.load %arg3[%c0_2, %c0_3, %c0_4] : memref<9x128x128xbf16, #tpu.memory_space<vmem>>, vector<1x128x128xbf16>
    %4 = vector.shape_cast %3 : vector<1x128x128xbf16> to vector<128x128xbf16>
    %cst_5 = arith.constant dense<0.000000e+00> : vector<72x128xf32>
    %5 = tpu.matmul %2, %4, %cst_5 {dimension_numbers = #tpu.dot_dimension_numbers<[1], [0], [0], [1], [0, 0, 1, 1], [], []>} : vector<72x128xbf16>, vector<128x128xbf16>, vector<72x128xf32> -> vector<72x128xf32>
    %6 = arith.addf %0, %5 : vector<72x128xf32>
    %c0_6 = arith.constant 0 : index
    %c81 = arith.constant 81 : index
    %c0_7 = arith.constant 0 : index
    %7 = vector.load %arg2[%c0_6, %c81, %c0_7] : memref<1x333x128xbf16, #tpu.memory_space<vmem>>, vector<1x72x128xbf16>
    %8 = vector.shape_cast %7 : vector<1x72x128xbf16> to vector<72x128xbf16>
    %c1 = arith.constant 1 : index
    %c0_8 = arith.constant 0 : index
    %c0_9 = arith.constant 0 : index
    %9 = vector.load %arg3[%c1, %c0_8, %c0_9] : memref<9x128x128xbf16, #tpu.memory_space<vmem>>, vector<1x128x128xbf16>
    %10 = vector.shape_cast %9 : vector<1x128x128xbf16> to vector<128x128xbf16>
    %cst_10 = arith.constant dense<0.000000e+00> : vector<72x128xf32>
    %11 = tpu.matmul %8, %10, %cst_10 {dimension_numbers = #tpu.dot_dimension_numbers<[1], [0], [0], [1], [0, 0, 1, 1], [], []>} : vector<72x128xbf16>, vector<128x128xbf16>, vector<72x128xf32> -> vector<72x128xf32>
    %12 = arith.addf %6, %11 : vector<72x128xf32>
    %c0_11 = arith.constant 0 : index
    %c1_12 = arith.constant 1 : index
    %c0_13 = arith.constant 0 : index
    %13 = vector.load %arg2[%c0_11, %c1_12, %c0_13] : memref<1x333x128xbf16, #tpu.memory_space<vmem>>, vector<1x72x128xbf16>
    %14 = vector.shape_cast %13 : vector<1x72x128xbf16> to vector<72x128xbf16>
    %c2 = arith.constant 2 : index
    %c0_14 = arith.constant 0 : index
    %c0_15 = arith.constant 0 : index
    %15 = vector.load %arg3[%c2, %c0_14, %c0_15] : memref<9x128x128xbf16, #tpu.memory_space<vmem>>, vector<1x128x128xbf16>
    %16 = vector.shape_cast %15 : vector<1x128x128xbf16> to vector<128x128xbf16>
    %cst_16 = arith.constant dense<0.000000e+00> : vector<72x128xf32>
    %17 = tpu.matmul %14, %16, %cst_16 {dimension_numbers = #tpu.dot_dimension_numbers<[1], [0], [0], [1], [0, 0, 1, 1], [], []>} : vector<72x128xbf16>, vector<128x128xbf16>, vector<72x128xf32> -> vector<72x128xf32>
    %18 = arith.addf %12, %17 : vector<72x128xf32>
    %c0_17 = arith.constant 0 : index
    %c162 = arith.constant 162 : index
    %c0_18 = arith.constant 0 : index
    %19 = vector.load %arg2[%c0_17, %c162, %c0_18] : memref<1x333x128xbf16, #tpu.memory_space<vmem>>, vector<1x72x128xbf16>
    %20 = vector.shape_cast %19 : vector<1x72x128xbf16> to vector<72x128xbf16>
    %c3 = arith.constant 3 : index
    %c0_19 = arith.constant 0 : index
    %c0_20 = arith.constant 0 : index
    %21 = vector.load %arg3[%c3, %c0_19, %c0_20] : memref<9x128x128xbf16, #tpu.memory_space<vmem>>, vector<1x128x128xbf16>
    %22 = vector.shape_cast %21 : vector<1x128x128xbf16> to vector<128x128xbf16>
    %cst_21 = arith.constant dense<0.000000e+00> : vector<72x128xf32>
    %23 = tpu.matmul %20, %22, %cst_21 {dimension_numbers = #tpu.dot_dimension_numbers<[1], [0], [0], [1], [0, 0, 1, 1], [], []>} : vector<72x128xbf16>, vector<128x128xbf16>, vector<72x128xf32> -> vector<72x128xf32>
    %24 = arith.addf %18, %23 : vector<72x128xf32>
    %c0_22 = arith.constant 0 : index
    %c243 = arith.constant 243 : index
    %c0_23 = arith.constant 0 : index
    %25 = vector.load %arg2[%c0_22, %c243, %c0_23] : memref<1x333x128xbf16, #tpu.memory_space<vmem>>, vector<1x72x128xbf16>
    %26 = vector.shape_cast %25 : vector<1x72x128xbf16> to vector<72x128xbf16>
    %c4 = arith.constant 4 : index
    %c0_24 = arith.constant 0 : index
    %c0_25 = arith.constant 0 : index
    %27 = vector.load %arg3[%c4, %c0_24, %c0_25] : memref<9x128x128xbf16, #tpu.memory_space<vmem>>, vector<1x128x128xbf16>
    %28 = vector.shape_cast %27 : vector<1x128x128xbf16> to vector<128x128xbf16>
    %cst_26 = arith.constant dense<0.000000e+00> : vector<72x128xf32>
    %29 = tpu.matmul %26, %28, %cst_26 {dimension_numbers = #tpu.dot_dimension_numbers<[1], [0], [0], [1], [0, 0, 1, 1], [], []>} : vector<72x128xbf16>, vector<128x128xbf16>, vector<72x128xf32> -> vector<72x128xf32>
    %30 = arith.addf %24, %29 : vector<72x128xf32>
    %c0_27 = arith.constant 0 : index
    %c163 = arith.constant 163 : index
    %c0_28 = arith.constant 0 : index
    %31 = vector.load %arg2[%c0_27, %c163, %c0_28] : memref<1x333x128xbf16, #tpu.memory_space<vmem>>, vector<1x72x128xbf16>
    %32 = vector.shape_cast %31 : vector<1x72x128xbf16> to vector<72x128xbf16>
    %c5 = arith.constant 5 : index
    %c0_29 = arith.constant 0 : index
    %c0_30 = arith.constant 0 : index
    %33 = vector.load %arg3[%c5, %c0_29, %c0_30] : memref<9x128x128xbf16, #tpu.memory_space<vmem>>, vector<1x128x128xbf16>
    %34 = vector.shape_cast %33 : vector<1x128x128xbf16> to vector<128x128xbf16>
    %cst_31 = arith.constant dense<0.000000e+00> : vector<72x128xf32>
    %35 = tpu.matmul %32, %34, %cst_31 {dimension_numbers = #tpu.dot_dimension_numbers<[1], [0], [0], [1], [0, 0, 1, 1], [], []>} : vector<72x128xbf16>, vector<128x128xbf16>, vector<72x128xf32> -> vector<72x128xf32>
    %36 = arith.addf %30, %35 : vector<72x128xf32>
    %c0_32 = arith.constant 0 : index
    %c9 = arith.constant 9 : index
    %c0_33 = arith.constant 0 : index
    %37 = vector.load %arg2[%c0_32, %c9, %c0_33] : memref<1x333x128xbf16, #tpu.memory_space<vmem>>, vector<1x72x128xbf16>
    %38 = vector.shape_cast %37 : vector<1x72x128xbf16> to vector<72x128xbf16>
    %c6 = arith.constant 6 : index
    %c0_34 = arith.constant 0 : index
    %c0_35 = arith.constant 0 : index
    %39 = vector.load %arg3[%c6, %c0_34, %c0_35] : memref<9x128x128xbf16, #tpu.memory_space<vmem>>, vector<1x128x128xbf16>
    %40 = vector.shape_cast %39 : vector<1x128x128xbf16> to vector<128x128xbf16>
    %cst_36 = arith.constant dense<0.000000e+00> : vector<72x128xf32>
    %41 = tpu.matmul %38, %40, %cst_36 {dimension_numbers = #tpu.dot_dimension_numbers<[1], [0], [0], [1], [0, 0, 1, 1], [], []>} : vector<72x128xbf16>, vector<128x128xbf16>, vector<72x128xf32> -> vector<72x128xf32>
    %42 = arith.addf %36, %41 : vector<72x128xf32>
    %c0_37 = arith.constant 0 : index
    %c90 = arith.constant 90 : index
    %c0_38 = arith.constant 0 : index
    %43 = vector.load %arg2[%c0_37, %c90, %c0_38] : memref<1x333x128xbf16, #tpu.memory_space<vmem>>, vector<1x72x128xbf16>
    %44 = vector.shape_cast %43 : vector<1x72x128xbf16> to vector<72x128xbf16>
    %c7 = arith.constant 7 : index
    %c0_39 = arith.constant 0 : index
    %c0_40 = arith.constant 0 : index
    %45 = vector.load %arg3[%c7, %c0_39, %c0_40] : memref<9x128x128xbf16, #tpu.memory_space<vmem>>, vector<1x128x128xbf16>
    %46 = vector.shape_cast %45 : vector<1x128x128xbf16> to vector<128x128xbf16>
    %cst_41 = arith.constant dense<0.000000e+00> : vector<72x128xf32>
    %47 = tpu.matmul %44, %46, %cst_41 {dimension_numbers = #tpu.dot_dimension_numbers<[1], [0], [0], [1], [0, 0, 1, 1], [], []>} : vector<72x128xbf16>, vector<128x128xbf16>, vector<72x128xf32> -> vector<72x128xf32>
    %48 = arith.addf %42, %47 : vector<72x128xf32>
    %c0_42 = arith.constant 0 : index
    %c10 = arith.constant 10 : index
    %c0_43 = arith.constant 0 : index
    %49 = vector.load %arg2[%c0_42, %c10, %c0_43] : memref<1x333x128xbf16, #tpu.memory_space<vmem>>, vector<1x72x128xbf16>
    %50 = vector.shape_cast %49 : vector<1x72x128xbf16> to vector<72x128xbf16>
    %c8 = arith.constant 8 : index
    %c0_44 = arith.constant 0 : index
    %c0_45 = arith.constant 0 : index
    %51 = vector.load %arg3[%c8, %c0_44, %c0_45] : memref<9x128x128xbf16, #tpu.memory_space<vmem>>, vector<1x128x128xbf16>
    %52 = vector.shape_cast %51 : vector<1x128x128xbf16> to vector<128x128xbf16>
    %cst_46 = arith.constant dense<0.000000e+00> : vector<72x128xf32>
    %53 = tpu.matmul %50, %52, %cst_46 {dimension_numbers = #tpu.dot_dimension_numbers<[1], [0], [0], [1], [0, 0, 1, 1], [], []>} : vector<72x128xbf16>, vector<128x128xbf16>, vector<72x128xf32> -> vector<72x128xf32>
    %54 = arith.addf %48, %53 : vector<72x128xf32>
    %c0_47 = arith.constant 0 : index
    %c0_48 = arith.constant 0 : index
    %55 = vector.load %arg4[%c0_47, %c0_48] : memref<1x128xf32, #tpu.memory_space<vmem>>, vector<1x128xf32>
    %56 = vector.broadcast %55 : vector<1x128xf32> to vector<72x128xf32>
    %57 = arith.addf %54, %56 : vector<72x128xf32>
    %cst_49 = arith.constant 0.000000e+00 : f32
    %58 = vector.broadcast %cst_49 : f32 to vector<72x128xf32>
    %59 = arith.maximumf %57, %58 : vector<72x128xf32>
    %60 = vector.shape_cast %59 : vector<72x128xf32> to vector<1x72x128xf32>
    %61 = arith.truncf %60 : vector<1x72x128xf32> to vector<1x72x128xbf16>
    %c0_50 = arith.constant 0 : index
    %c0_51 = arith.constant 0 : index
    %c0_52 = arith.constant 0 : index
    %62 = vector.load %arg5[%c0_50, %c0_51, %c0_52] : memref<1x72x128xbf16, #tpu.memory_space<vmem>>, vector<1x72x128xbf16>
    tpu.vector_store %arg5[%c0_50, %c0_51, %c0_52], %61 {strides = array<i32>} : memref<1x72x128xbf16, #tpu.memory_space<vmem>>, vector<1x72x128xbf16>,
    return
  }
  func.func @transform_0(%arg0: i32, %arg1: i32) -> (i32, i32, i32) {
    %c0_i32 = arith.constant 0 : i32
    %c0_i32_0 = arith.constant 0 : i32
    %c0_i32_1 = arith.constant 0 : i32
    return %arg0, %c0_i32, %c0_i32_0 : i32, i32, i32
  }
  func.func @transform_1(%arg0: i32, %arg1: i32) -> (i32, i32, i32) {
    %c0_i32 = arith.constant 0 : i32
    %c0_i32_0 = arith.constant 0 : i32
    %c0_i32_1 = arith.constant 0 : i32
    %c0_i32_2 = arith.constant 0 : i32
    return %c0_i32, %c0_i32_0, %c0_i32_1 : i32, i32, i32
  }
  func.func @transform_2(%arg0: i32, %arg1: i32) -> (i32, i32) {
    %c0_i32 = arith.constant 0 : i32
    %c0_i32_0 = arith.constant 0 : i32
    %c0_i32_1 = arith.constant 0 : i32
    return %c0_i32, %c0_i32_0 : i32, i32
  }
  func.func @transform_3(%arg0: i32, %arg1: i32) -> (i32, i32, i32) {
    %c0_i32 = arith.constant 0 : i32
    %c0_i32_0 = arith.constant 0 : i32
    return %arg0, %arg1, %c0_i32 : i32, i32, i32
  }
}

module attributes {stable_mosaic.version = 11 : i64} {
  func.func @_lpips_layer_kernel(%arg0: i32, %arg1: memref<128x128xbf16, #tpu.memory_space<vmem>>, %arg2: memref<128x128xbf16, #tpu.memory_space<vmem>>, %arg3: memref<1x128xf32, #tpu.memory_space<vmem>>, %arg4: memref<1x1xf32, #tpu.memory_space<vmem>>, %arg5: memref<1x1xf32, #tpu.memory_space<vmem>>) attributes {dimension_semantics = [#tpu.dimension_semantics<arbitrary>], iteration_bounds = array<i64: 1>, scalar_prefetch = 0 : i64, scratch_operands = 1 : i64, tpu.core_type = #tpu.core_type<tc>, window_params = [{transform_indices = @transform_0, window_bounds = array<i64: 128, 128>}, {transform_indices = @transform_1, window_bounds = array<i64: 128, 128>}, {pipeline_mode = #tpu.pipeline_mode<synchronous>, transform_indices = @transform_2, window_bounds = array<i64: 1, 128>}, {pipeline_mode = #tpu.pipeline_mode<synchronous>, transform_indices = @transform_3, window_bounds = array<i64: 1, 1>}]} {
    %c0_i32 = arith.constant 0 : i32
    %0 = arith.cmpi eq, %arg0, %c0_i32 : i32
    %1 = arith.extui %0 : i1 to i32
    %c0_i32_0 = arith.constant 0 : i32
    %2 = arith.cmpi ne, %1, %c0_i32_0 : i32
    scf.if %2 {
      %cst_16 = arith.constant 0.000000e+00 : f32
      %41 = vector.broadcast %cst_16 : f32 to vector<1x1xf32>
      %c0_17 = arith.constant 0 : index
      %c0_18 = arith.constant 0 : index
      %42 = vector.load %arg5[%c0_17, %c0_18] : memref<1x1xf32, #tpu.memory_space<vmem>>, vector<1x1xf32>
      tpu.vector_store %arg5[%c0_17, %c0_18], %41 {strides = array<i32>} : memref<1x1xf32, #tpu.memory_space<vmem>>, vector<1x1xf32>,
    } else {
    }
    %c0 = arith.constant 0 : index
    %c0_1 = arith.constant 0 : index
    %3 = vector.load %arg1[%c0, %c0_1] : memref<128x128xbf16, #tpu.memory_space<vmem>>, vector<128x128xbf16>
    %4 = arith.extf %3 : vector<128x128xbf16> to vector<128x128xf32>
    %c0_2 = arith.constant 0 : index
    %c0_3 = arith.constant 0 : index
    %5 = vector.load %arg2[%c0_2, %c0_3] : memref<128x128xbf16, #tpu.memory_space<vmem>>, vector<128x128xbf16>
    %6 = arith.extf %5 : vector<128x128xbf16> to vector<128x128xf32>
    %7 = arith.mulf %4, %4 : vector<128x128xf32>
    %cst = arith.constant dense<0.000000e+00> : vector<128xf32>
    %8 = vector.multi_reduction <add>, %7, %cst [1] : vector<128x128xf32> to vector<128xf32>
    %9 = vector.shape_cast %8 : vector<128xf32> to vector<128x1xf32>
    %10 = math.sqrt %9 : vector<128x1xf32>
    %cst_4 = arith.constant 1.000000e-10 : f32
    %11 = vector.broadcast %cst_4 : f32 to vector<128x1xf32>
    %12 = arith.addf %10, %11 : vector<128x1xf32>
    %13 = tpu.reciprocal %12 {approx = true} : vector<128x1xf32> -> vector<128x1xf32>
    %14 = arith.mulf %6, %6 : vector<128x128xf32>
    %cst_5 = arith.constant dense<0.000000e+00> : vector<128xf32>
    %15 = vector.multi_reduction <add>, %14, %cst_5 [1] : vector<128x128xf32> to vector<128xf32>
    %16 = vector.shape_cast %15 : vector<128xf32> to vector<128x1xf32>
    %17 = math.sqrt %16 : vector<128x1xf32>
    %cst_6 = arith.constant 1.000000e-10 : f32
    %18 = vector.broadcast %cst_6 : f32 to vector<128x1xf32>
    %19 = arith.addf %17, %18 : vector<128x1xf32>
    %20 = tpu.reciprocal %19 {approx = true} : vector<128x1xf32> -> vector<128x1xf32>
    %21 = vector.broadcast %13 : vector<128x1xf32> to vector<128x128xf32>
    %22 = arith.mulf %4, %21 : vector<128x128xf32>
    %23 = vector.broadcast %20 : vector<128x1xf32> to vector<128x128xf32>
    %24 = arith.mulf %6, %23 : vector<128x128xf32>
    %25 = arith.subf %22, %24 : vector<128x128xf32>
    %26 = arith.mulf %25, %25 : vector<128x128xf32>
    %c0_7 = arith.constant 0 : index
    %c0_8 = arith.constant 0 : index
    %27 = vector.load %arg5[%c0_7, %c0_8] : memref<1x1xf32, #tpu.memory_space<vmem>>, vector<1x1xf32>
    %c0_9 = arith.constant 0 : index
    %c0_10 = arith.constant 0 : index
    %28 = vector.load %arg3[%c0_9, %c0_10] : memref<1x128xf32, #tpu.memory_space<vmem>>, vector<1x128xf32>
    %29 = vector.broadcast %28 : vector<1x128xf32> to vector<128x128xf32>
    %30 = arith.mulf %26, %29 : vector<128x128xf32>
    %31 = vector.shape_cast %30 : vector<128x128xf32> to vector<1x128x128xf32>
    %cst_11 = arith.constant dense<0.000000e+00> : vector<1xf32>
    %32 = vector.multi_reduction <add>, %31, %cst_11 [1, 2] : vector<1x128x128xf32> to vector<1xf32>
    %33 = vector.shape_cast %32 : vector<1xf32> to vector<1x1x1xf32>
    %34 = vector.extract %33[0, 0, 0] : f32 from vector<1x1x1xf32>
    %35 = vector.broadcast %34 : f32 to vector<1x1xf32>
    %36 = arith.addf %27, %35 : vector<1x1xf32>
    %c0_12 = arith.constant 0 : index
    %c0_13 = arith.constant 0 : index
    %37 = vector.load %arg5[%c0_12, %c0_13] : memref<1x1xf32, #tpu.memory_space<vmem>>, vector<1x1xf32>
    tpu.vector_store %arg5[%c0_12, %c0_13], %36 {strides = array<i32>} : memref<1x1xf32, #tpu.memory_space<vmem>>, vector<1x1xf32>,
    %c0_i32_14 = arith.constant 0 : i32
    %38 = arith.cmpi eq, %arg0, %c0_i32_14 : i32
    %39 = arith.extui %38 : i1 to i32
    %c0_i32_15 = arith.constant 0 : i32
    %40 = arith.cmpi ne, %39, %c0_i32_15 : i32
    scf.if %40 {
      %c0_16 = arith.constant 0 : index
      %c0_17 = arith.constant 0 : index
      %41 = vector.load %arg5[%c0_16, %c0_17] : memref<1x1xf32, #tpu.memory_space<vmem>>, vector<1x1xf32>
      %cst_18 = arith.constant 7.812500e-03 : f32
      %42 = vector.broadcast %cst_18 : f32 to vector<1x1xf32>
      %43 = arith.mulf %41, %42 : vector<1x1xf32>
      %c0_19 = arith.constant 0 : index
      %c0_20 = arith.constant 0 : index
      %44 = vector.load %arg4[%c0_19, %c0_20] : memref<1x1xf32, #tpu.memory_space<vmem>>, vector<1x1xf32>
      tpu.vector_store %arg4[%c0_19, %c0_20], %43 {strides = array<i32>} : memref<1x1xf32, #tpu.memory_space<vmem>>, vector<1x1xf32>,
    } else {
    }
    return
  }
  func.func @transform_0(%arg0: i32) -> (i32, i32) {
    %c0_i32 = arith.constant 0 : i32
    %c0_i32_0 = arith.constant 0 : i32
    return %arg0, %c0_i32 : i32, i32
  }
  func.func @transform_1(%arg0: i32) -> (i32, i32) {
    %c0_i32 = arith.constant 0 : i32
    %c0_i32_0 = arith.constant 0 : i32
    return %arg0, %c0_i32 : i32, i32
  }
  func.func @transform_2(%arg0: i32) -> (i32, i32) {
    %c0_i32 = arith.constant 0 : i32
    %c0_i32_0 = arith.constant 0 : i32
    %c0_i32_1 = arith.constant 0 : i32
    return %c0_i32, %c0_i32_0 : i32, i32
  }
  func.func @transform_3(%arg0: i32) -> (i32, i32) {
    %c0_i32 = arith.constant 0 : i32
    %c0_i32_0 = arith.constant 0 : i32
    %c0_i32_1 = arith.constant 0 : i32
    return %c0_i32, %c0_i32_0 : i32, i32
  }
}

module attributes {stable_mosaic.version = 11 : i64} {
  func.func @_conv3x3_relu_kernel(%arg0: i32, %arg1: i32, %arg2: memref<1x105x128xbf16, #tpu.memory_space<vmem>>, %arg3: memref<9x128x128xbf16, #tpu.memory_space<vmem>>, %arg4: memref<1x128xf32, #tpu.memory_space<vmem>>, %arg5: memref<1x20x128xbf16, #tpu.memory_space<vmem>>) attributes {dimension_semantics = [#tpu.dimension_semantics<parallel>, #tpu.dimension_semantics<parallel>], iteration_bounds = array<i64: 4, 1>, scalar_prefetch = 0 : i64, scratch_operands = 0 : i64, tpu.core_type = #tpu.core_type<tc>, window_params = [{transform_indices = @transform_0, window_bounds = array<i64: 1, 105, 128>}, {pipeline_mode = #tpu.pipeline_mode<synchronous>, transform_indices = @transform_1, window_bounds = array<i64: 9, 128, 128>}, {pipeline_mode = #tpu.pipeline_mode<synchronous>, transform_indices = @transform_2, window_bounds = array<i64: 1, 128>}, {transform_indices = @transform_3, window_bounds = array<i64: 1, 20, 128>}]} {
    %cst = arith.constant 0.000000e+00 : f32
    %0 = vector.broadcast %cst : f32 to vector<20x128xf32>
    %c0 = arith.constant 0 : index
    %c0_0 = arith.constant 0 : index
    %c0_1 = arith.constant 0 : index
    %1 = vector.load %arg2[%c0, %c0_0, %c0_1] : memref<1x105x128xbf16, #tpu.memory_space<vmem>>, vector<1x20x128xbf16>
    %2 = vector.shape_cast %1 : vector<1x20x128xbf16> to vector<20x128xbf16>
    %c0_2 = arith.constant 0 : index
    %c0_3 = arith.constant 0 : index
    %c0_4 = arith.constant 0 : index
    %3 = vector.load %arg3[%c0_2, %c0_3, %c0_4] : memref<9x128x128xbf16, #tpu.memory_space<vmem>>, vector<1x128x128xbf16>
    %4 = vector.shape_cast %3 : vector<1x128x128xbf16> to vector<128x128xbf16>
    %cst_5 = arith.constant dense<0.000000e+00> : vector<20x128xf32>
    %5 = tpu.matmul %2, %4, %cst_5 {dimension_numbers = #tpu.dot_dimension_numbers<[1], [0], [0], [1], [0, 0, 1, 1], [], []>} : vector<20x128xbf16>, vector<128x128xbf16>, vector<20x128xf32> -> vector<20x128xf32>
    %6 = arith.addf %0, %5 : vector<20x128xf32>
    %c0_6 = arith.constant 0 : index
    %c25 = arith.constant 25 : index
    %c0_7 = arith.constant 0 : index
    %7 = vector.load %arg2[%c0_6, %c25, %c0_7] : memref<1x105x128xbf16, #tpu.memory_space<vmem>>, vector<1x20x128xbf16>
    %8 = vector.shape_cast %7 : vector<1x20x128xbf16> to vector<20x128xbf16>
    %c1 = arith.constant 1 : index
    %c0_8 = arith.constant 0 : index
    %c0_9 = arith.constant 0 : index
    %9 = vector.load %arg3[%c1, %c0_8, %c0_9] : memref<9x128x128xbf16, #tpu.memory_space<vmem>>, vector<1x128x128xbf16>
    %10 = vector.shape_cast %9 : vector<1x128x128xbf16> to vector<128x128xbf16>
    %cst_10 = arith.constant dense<0.000000e+00> : vector<20x128xf32>
    %11 = tpu.matmul %8, %10, %cst_10 {dimension_numbers = #tpu.dot_dimension_numbers<[1], [0], [0], [1], [0, 0, 1, 1], [], []>} : vector<20x128xbf16>, vector<128x128xbf16>, vector<20x128xf32> -> vector<20x128xf32>
    %12 = arith.addf %6, %11 : vector<20x128xf32>
    %c0_11 = arith.constant 0 : index
    %c1_12 = arith.constant 1 : index
    %c0_13 = arith.constant 0 : index
    %13 = vector.load %arg2[%c0_11, %c1_12, %c0_13] : memref<1x105x128xbf16, #tpu.memory_space<vmem>>, vector<1x20x128xbf16>
    %14 = vector.shape_cast %13 : vector<1x20x128xbf16> to vector<20x128xbf16>
    %c2 = arith.constant 2 : index
    %c0_14 = arith.constant 0 : index
    %c0_15 = arith.constant 0 : index
    %15 = vector.load %arg3[%c2, %c0_14, %c0_15] : memref<9x128x128xbf16, #tpu.memory_space<vmem>>, vector<1x128x128xbf16>
    %16 = vector.shape_cast %15 : vector<1x128x128xbf16> to vector<128x128xbf16>
    %cst_16 = arith.constant dense<0.000000e+00> : vector<20x128xf32>
    %17 = tpu.matmul %14, %16, %cst_16 {dimension_numbers = #tpu.dot_dimension_numbers<[1], [0], [0], [1], [0, 0, 1, 1], [], []>} : vector<20x128xbf16>, vector<128x128xbf16>, vector<20x128xf32> -> vector<20x128xf32>
    %18 = arith.addf %12, %17 : vector<20x128xf32>
    %c0_17 = arith.constant 0 : index
    %c50 = arith.constant 50 : index
    %c0_18 = arith.constant 0 : index
    %19 = vector.load %arg2[%c0_17, %c50, %c0_18] : memref<1x105x128xbf16, #tpu.memory_space<vmem>>, vector<1x20x128xbf16>
    %20 = vector.shape_cast %19 : vector<1x20x128xbf16> to vector<20x128xbf16>
    %c3 = arith.constant 3 : index
    %c0_19 = arith.constant 0 : index
    %c0_20 = arith.constant 0 : index
    %21 = vector.load %arg3[%c3, %c0_19, %c0_20] : memref<9x128x128xbf16, #tpu.memory_space<vmem>>, vector<1x128x128xbf16>
    %22 = vector.shape_cast %21 : vector<1x128x128xbf16> to vector<128x128xbf16>
    %cst_21 = arith.constant dense<0.000000e+00> : vector<20x128xf32>
    %23 = tpu.matmul %20, %22, %cst_21 {dimension_numbers = #tpu.dot_dimension_numbers<[1], [0], [0], [1], [0, 0, 1, 1], [], []>} : vector<20x128xbf16>, vector<128x128xbf16>, vector<20x128xf32> -> vector<20x128xf32>
    %24 = arith.addf %18, %23 : vector<20x128xf32>
    %c0_22 = arith.constant 0 : index
    %c75 = arith.constant 75 : index
    %c0_23 = arith.constant 0 : index
    %25 = vector.load %arg2[%c0_22, %c75, %c0_23] : memref<1x105x128xbf16, #tpu.memory_space<vmem>>, vector<1x20x128xbf16>
    %26 = vector.shape_cast %25 : vector<1x20x128xbf16> to vector<20x128xbf16>
    %c4 = arith.constant 4 : index
    %c0_24 = arith.constant 0 : index
    %c0_25 = arith.constant 0 : index
    %27 = vector.load %arg3[%c4, %c0_24, %c0_25] : memref<9x128x128xbf16, #tpu.memory_space<vmem>>, vector<1x128x128xbf16>
    %28 = vector.shape_cast %27 : vector<1x128x128xbf16> to vector<128x128xbf16>
    %cst_26 = arith.constant dense<0.000000e+00> : vector<20x128xf32>
    %29 = tpu.matmul %26, %28, %cst_26 {dimension_numbers = #tpu.dot_dimension_numbers<[1], [0], [0], [1], [0, 0, 1, 1], [], []>} : vector<20x128xbf16>, vector<128x128xbf16>, vector<20x128xf32> -> vector<20x128xf32>
    %30 = arith.addf %24, %29 : vector<20x128xf32>
    %c0_27 = arith.constant 0 : index
    %c51 = arith.constant 51 : index
    %c0_28 = arith.constant 0 : index
    %31 = vector.load %arg2[%c0_27, %c51, %c0_28] : memref<1x105x128xbf16, #tpu.memory_space<vmem>>, vector<1x20x128xbf16>
    %32 = vector.shape_cast %31 : vector<1x20x128xbf16> to vector<20x128xbf16>
    %c5 = arith.constant 5 : index
    %c0_29 = arith.constant 0 : index
    %c0_30 = arith.constant 0 : index
    %33 = vector.load %arg3[%c5, %c0_29, %c0_30] : memref<9x128x128xbf16, #tpu.memory_space<vmem>>, vector<1x128x128xbf16>
    %34 = vector.shape_cast %33 : vector<1x128x128xbf16> to vector<128x128xbf16>
    %cst_31 = arith.constant dense<0.000000e+00> : vector<20x128xf32>
    %35 = tpu.matmul %32, %34, %cst_31 {dimension_numbers = #tpu.dot_dimension_numbers<[1], [0], [0], [1], [0, 0, 1, 1], [], []>} : vector<20x128xbf16>, vector<128x128xbf16>, vector<20x128xf32> -> vector<20x128xf32>
    %36 = arith.addf %30, %35 : vector<20x128xf32>
    %c0_32 = arith.constant 0 : index
    %c5_33 = arith.constant 5 : index
    %c0_34 = arith.constant 0 : index
    %37 = vector.load %arg2[%c0_32, %c5_33, %c0_34] : memref<1x105x128xbf16, #tpu.memory_space<vmem>>, vector<1x20x128xbf16>
    %38 = vector.shape_cast %37 : vector<1x20x128xbf16> to vector<20x128xbf16>
    %c6 = arith.constant 6 : index
    %c0_35 = arith.constant 0 : index
    %c0_36 = arith.constant 0 : index
    %39 = vector.load %arg3[%c6, %c0_35, %c0_36] : memref<9x128x128xbf16, #tpu.memory_space<vmem>>, vector<1x128x128xbf16>
    %40 = vector.shape_cast %39 : vector<1x128x128xbf16> to vector<128x128xbf16>
    %cst_37 = arith.constant dense<0.000000e+00> : vector<20x128xf32>
    %41 = tpu.matmul %38, %40, %cst_37 {dimension_numbers = #tpu.dot_dimension_numbers<[1], [0], [0], [1], [0, 0, 1, 1], [], []>} : vector<20x128xbf16>, vector<128x128xbf16>, vector<20x128xf32> -> vector<20x128xf32>
    %42 = arith.addf %36, %41 : vector<20x128xf32>
    %c0_38 = arith.constant 0 : index
    %c30 = arith.constant 30 : index
    %c0_39 = arith.constant 0 : index
    %43 = vector.load %arg2[%c0_38, %c30, %c0_39] : memref<1x105x128xbf16, #tpu.memory_space<vmem>>, vector<1x20x128xbf16>
    %44 = vector.shape_cast %43 : vector<1x20x128xbf16> to vector<20x128xbf16>
    %c7 = arith.constant 7 : index
    %c0_40 = arith.constant 0 : index
    %c0_41 = arith.constant 0 : index
    %45 = vector.load %arg3[%c7, %c0_40, %c0_41] : memref<9x128x128xbf16, #tpu.memory_space<vmem>>, vector<1x128x128xbf16>
    %46 = vector.shape_cast %45 : vector<1x128x128xbf16> to vector<128x128xbf16>
    %cst_42 = arith.constant dense<0.000000e+00> : vector<20x128xf32>
    %47 = tpu.matmul %44, %46, %cst_42 {dimension_numbers = #tpu.dot_dimension_numbers<[1], [0], [0], [1], [0, 0, 1, 1], [], []>} : vector<20x128xbf16>, vector<128x128xbf16>, vector<20x128xf32> -> vector<20x128xf32>
    %48 = arith.addf %42, %47 : vector<20x128xf32>
    %c0_43 = arith.constant 0 : index
    %c6_44 = arith.constant 6 : index
    %c0_45 = arith.constant 0 : index
    %49 = vector.load %arg2[%c0_43, %c6_44, %c0_45] : memref<1x105x128xbf16, #tpu.memory_space<vmem>>, vector<1x20x128xbf16>
    %50 = vector.shape_cast %49 : vector<1x20x128xbf16> to vector<20x128xbf16>
    %c8 = arith.constant 8 : index
    %c0_46 = arith.constant 0 : index
    %c0_47 = arith.constant 0 : index
    %51 = vector.load %arg3[%c8, %c0_46, %c0_47] : memref<9x128x128xbf16, #tpu.memory_space<vmem>>, vector<1x128x128xbf16>
    %52 = vector.shape_cast %51 : vector<1x128x128xbf16> to vector<128x128xbf16>
    %cst_48 = arith.constant dense<0.000000e+00> : vector<20x128xf32>
    %53 = tpu.matmul %50, %52, %cst_48 {dimension_numbers = #tpu.dot_dimension_numbers<[1], [0], [0], [1], [0, 0, 1, 1], [], []>} : vector<20x128xbf16>, vector<128x128xbf16>, vector<20x128xf32> -> vector<20x128xf32>
    %54 = arith.addf %48, %53 : vector<20x128xf32>
    %c0_49 = arith.constant 0 : index
    %c0_50 = arith.constant 0 : index
    %55 = vector.load %arg4[%c0_49, %c0_50] : memref<1x128xf32, #tpu.memory_space<vmem>>, vector<1x128xf32>
    %56 = vector.broadcast %55 : vector<1x128xf32> to vector<20x128xf32>
    %57 = arith.addf %54, %56 : vector<20x128xf32>
    %cst_51 = arith.constant 0.000000e+00 : f32
    %58 = vector.broadcast %cst_51 : f32 to vector<20x128xf32>
    %59 = arith.maximumf %57, %58 : vector<20x128xf32>
    %60 = vector.shape_cast %59 : vector<20x128xf32> to vector<1x20x128xf32>
    %61 = arith.truncf %60 : vector<1x20x128xf32> to vector<1x20x128xbf16>
    %c0_52 = arith.constant 0 : index
    %c0_53 = arith.constant 0 : index
    %c0_54 = arith.constant 0 : index
    %62 = vector.load %arg5[%c0_52, %c0_53, %c0_54] : memref<1x20x128xbf16, #tpu.memory_space<vmem>>, vector<1x20x128xbf16>
    tpu.vector_store %arg5[%c0_52, %c0_53, %c0_54], %61 {strides = array<i32>} : memref<1x20x128xbf16, #tpu.memory_space<vmem>>, vector<1x20x128xbf16>,
    return
  }
  func.func @transform_0(%arg0: i32, %arg1: i32) -> (i32, i32, i32) {
    %c0_i32 = arith.constant 0 : i32
    %c0_i32_0 = arith.constant 0 : i32
    %c0_i32_1 = arith.constant 0 : i32
    return %arg0, %c0_i32, %c0_i32_0 : i32, i32, i32
  }
  func.func @transform_1(%arg0: i32, %arg1: i32) -> (i32, i32, i32) {
    %c0_i32 = arith.constant 0 : i32
    %c0_i32_0 = arith.constant 0 : i32
    %c0_i32_1 = arith.constant 0 : i32
    %c0_i32_2 = arith.constant 0 : i32
    return %c0_i32, %c0_i32_0, %c0_i32_1 : i32, i32, i32
  }
  func.func @transform_2(%arg0: i32, %arg1: i32) -> (i32, i32) {
    %c0_i32 = arith.constant 0 : i32
    %c0_i32_0 = arith.constant 0 : i32
    %c0_i32_1 = arith.constant 0 : i32
    return %c0_i32, %c0_i32_0 : i32, i32
  }
  func.func @transform_3(%arg0: i32, %arg1: i32) -> (i32, i32, i32) {
    %c0_i32 = arith.constant 0 : i32
    %c0_i32_0 = arith.constant 0 : i32
    return %arg0, %arg1, %c0_i32 : i32, i32, i32
  }
}

module attributes {stable_mosaic.version = 11 : i64} {
  func.func @_lpips_layer_kernel(%arg0: i32, %arg1: memref<32x128xbf16, #tpu.memory_space<vmem>>, %arg2: memref<32x128xbf16, #tpu.memory_space<vmem>>, %arg3: memref<1x128xf32, #tpu.memory_space<vmem>>, %arg4: memref<1x1xf32, #tpu.memory_space<vmem>>, %arg5: memref<1x1xf32, #tpu.memory_space<vmem>>) attributes {dimension_semantics = [#tpu.dimension_semantics<arbitrary>], iteration_bounds = array<i64: 1>, scalar_prefetch = 0 : i64, scratch_operands = 1 : i64, tpu.core_type = #tpu.core_type<tc>, window_params = [{transform_indices = @transform_0, window_bounds = array<i64: 32, 128>}, {transform_indices = @transform_1, window_bounds = array<i64: 32, 128>}, {pipeline_mode = #tpu.pipeline_mode<synchronous>, transform_indices = @transform_2, window_bounds = array<i64: 1, 128>}, {pipeline_mode = #tpu.pipeline_mode<synchronous>, transform_indices = @transform_3, window_bounds = array<i64: 1, 1>}]} {
    %c0_i32 = arith.constant 0 : i32
    %0 = arith.cmpi eq, %arg0, %c0_i32 : i32
    %1 = arith.extui %0 : i1 to i32
    %c0_i32_0 = arith.constant 0 : i32
    %2 = arith.cmpi ne, %1, %c0_i32_0 : i32
    scf.if %2 {
      %cst_16 = arith.constant 0.000000e+00 : f32
      %41 = vector.broadcast %cst_16 : f32 to vector<1x1xf32>
      %c0_17 = arith.constant 0 : index
      %c0_18 = arith.constant 0 : index
      %42 = vector.load %arg5[%c0_17, %c0_18] : memref<1x1xf32, #tpu.memory_space<vmem>>, vector<1x1xf32>
      tpu.vector_store %arg5[%c0_17, %c0_18], %41 {strides = array<i32>} : memref<1x1xf32, #tpu.memory_space<vmem>>, vector<1x1xf32>,
    } else {
    }
    %c0 = arith.constant 0 : index
    %c0_1 = arith.constant 0 : index
    %3 = vector.load %arg1[%c0, %c0_1] : memref<32x128xbf16, #tpu.memory_space<vmem>>, vector<32x128xbf16>
    %4 = arith.extf %3 : vector<32x128xbf16> to vector<32x128xf32>
    %c0_2 = arith.constant 0 : index
    %c0_3 = arith.constant 0 : index
    %5 = vector.load %arg2[%c0_2, %c0_3] : memref<32x128xbf16, #tpu.memory_space<vmem>>, vector<32x128xbf16>
    %6 = arith.extf %5 : vector<32x128xbf16> to vector<32x128xf32>
    %7 = arith.mulf %4, %4 : vector<32x128xf32>
    %cst = arith.constant dense<0.000000e+00> : vector<32xf32>
    %8 = vector.multi_reduction <add>, %7, %cst [1] : vector<32x128xf32> to vector<32xf32>
    %9 = vector.shape_cast %8 : vector<32xf32> to vector<32x1xf32>
    %10 = math.sqrt %9 : vector<32x1xf32>
    %cst_4 = arith.constant 1.000000e-10 : f32
    %11 = vector.broadcast %cst_4 : f32 to vector<32x1xf32>
    %12 = arith.addf %10, %11 : vector<32x1xf32>
    %13 = tpu.reciprocal %12 {approx = true} : vector<32x1xf32> -> vector<32x1xf32>
    %14 = arith.mulf %6, %6 : vector<32x128xf32>
    %cst_5 = arith.constant dense<0.000000e+00> : vector<32xf32>
    %15 = vector.multi_reduction <add>, %14, %cst_5 [1] : vector<32x128xf32> to vector<32xf32>
    %16 = vector.shape_cast %15 : vector<32xf32> to vector<32x1xf32>
    %17 = math.sqrt %16 : vector<32x1xf32>
    %cst_6 = arith.constant 1.000000e-10 : f32
    %18 = vector.broadcast %cst_6 : f32 to vector<32x1xf32>
    %19 = arith.addf %17, %18 : vector<32x1xf32>
    %20 = tpu.reciprocal %19 {approx = true} : vector<32x1xf32> -> vector<32x1xf32>
    %21 = vector.broadcast %13 : vector<32x1xf32> to vector<32x128xf32>
    %22 = arith.mulf %4, %21 : vector<32x128xf32>
    %23 = vector.broadcast %20 : vector<32x1xf32> to vector<32x128xf32>
    %24 = arith.mulf %6, %23 : vector<32x128xf32>
    %25 = arith.subf %22, %24 : vector<32x128xf32>
    %26 = arith.mulf %25, %25 : vector<32x128xf32>
    %c0_7 = arith.constant 0 : index
    %c0_8 = arith.constant 0 : index
    %27 = vector.load %arg5[%c0_7, %c0_8] : memref<1x1xf32, #tpu.memory_space<vmem>>, vector<1x1xf32>
    %c0_9 = arith.constant 0 : index
    %c0_10 = arith.constant 0 : index
    %28 = vector.load %arg3[%c0_9, %c0_10] : memref<1x128xf32, #tpu.memory_space<vmem>>, vector<1x128xf32>
    %29 = vector.broadcast %28 : vector<1x128xf32> to vector<32x128xf32>
    %30 = arith.mulf %26, %29 : vector<32x128xf32>
    %31 = vector.shape_cast %30 : vector<32x128xf32> to vector<1x32x128xf32>
    %cst_11 = arith.constant dense<0.000000e+00> : vector<1xf32>
    %32 = vector.multi_reduction <add>, %31, %cst_11 [1, 2] : vector<1x32x128xf32> to vector<1xf32>
    %33 = vector.shape_cast %32 : vector<1xf32> to vector<1x1x1xf32>
    %34 = vector.extract %33[0, 0, 0] : f32 from vector<1x1x1xf32>
    %35 = vector.broadcast %34 : f32 to vector<1x1xf32>
    %36 = arith.addf %27, %35 : vector<1x1xf32>
    %c0_12 = arith.constant 0 : index
    %c0_13 = arith.constant 0 : index
    %37 = vector.load %arg5[%c0_12, %c0_13] : memref<1x1xf32, #tpu.memory_space<vmem>>, vector<1x1xf32>
    tpu.vector_store %arg5[%c0_12, %c0_13], %36 {strides = array<i32>} : memref<1x1xf32, #tpu.memory_space<vmem>>, vector<1x1xf32>,
    %c0_i32_14 = arith.constant 0 : i32
    %38 = arith.cmpi eq, %arg0, %c0_i32_14 : i32
    %39 = arith.extui %38 : i1 to i32
    %c0_i32_15 = arith.constant 0 : i32
    %40 = arith.cmpi ne, %39, %c0_i32_15 : i32
    scf.if %40 {
      %c0_16 = arith.constant 0 : index
      %c0_17 = arith.constant 0 : index
      %41 = vector.load %arg5[%c0_16, %c0_17] : memref<1x1xf32, #tpu.memory_space<vmem>>, vector<1x1xf32>
      %cst_18 = arith.constant 3.125000e-02 : f32
      %42 = vector.broadcast %cst_18 : f32 to vector<1x1xf32>
      %43 = arith.mulf %41, %42 : vector<1x1xf32>
      %c0_19 = arith.constant 0 : index
      %c0_20 = arith.constant 0 : index
      %44 = vector.load %arg4[%c0_19, %c0_20] : memref<1x1xf32, #tpu.memory_space<vmem>>, vector<1x1xf32>
      tpu.vector_store %arg4[%c0_19, %c0_20], %43 {strides = array<i32>} : memref<1x1xf32, #tpu.memory_space<vmem>>, vector<1x1xf32>,
    } else {
    }
    return
  }
  func.func @transform_0(%arg0: i32) -> (i32, i32) {
    %c0_i32 = arith.constant 0 : i32
    %c0_i32_0 = arith.constant 0 : i32
    return %arg0, %c0_i32 : i32, i32
  }
  func.func @transform_1(%arg0: i32) -> (i32, i32) {
    %c0_i32 = arith.constant 0 : i32
    %c0_i32_0 = arith.constant 0 : i32
    return %arg0, %c0_i32 : i32, i32
  }
  func.func @transform_2(%arg0: i32) -> (i32, i32) {
    %c0_i32 = arith.constant 0 : i32
    %c0_i32_0 = arith.constant 0 : i32
    %c0_i32_1 = arith.constant 0 : i32
    return %c0_i32, %c0_i32_0 : i32, i32
  }
  func.func @transform_3(%arg0: i32) -> (i32, i32) {
    %c0_i32 = arith.constant 0 : i32
    %c0_i32_0 = arith.constant 0 : i32
    %c0_i32_1 = arith.constant 0 : i32
    return %c0_i32, %c0_i32_0 : i32, i32
  }
}

</mosaic_0001>

<bundles_post_ra>
// kernel: perceptual_loss.7
= control target key start
LH: loop header
LB: loop body
LE: loop exit
PB: predicated region body
PF: predicated region fallthrough
CT: control target
= control target key end

     0   :  { %s6650_s0 = inlined_call_operand.vmem [shape: bf16[512,128], index: 0, kind: input, shape index: {}]   ;;  %s6651_s1 = inlined_call_operand.vmem [shape: bf16[512,128], index: 1, kind: input, shape index: {}]   ;;  %s6652_s2 = inlined_call_operand.vmem [shape: f32[1,128], index: 2, kind: input, shape index: {}]   ;;  %s6653_s3 = inlined_call_operand.hbm [shape: f32[1,1], index: 3, kind: output, shape index: {}]  }
   0x1   :  { %v3133_v0 = vld [vmem:[%s6650_s0 + $0x10] sm:$0xff]   ;;  %v3132_v1 = vld [vmem:[%s6650_s0 + $0x8] sm:$0xff]   ;;  %v2877_v2 = vld [vmem:[%s6650_s0] sm:$0xff]  }
   0x2   :  { %v3772_v3 = vunpack.c.l.bf16 %v3133_v0  ;;  %v3774_v4 = vunpack.c.l.bf16 %v3132_v1  ;;  %v3776_v5 = vunpack.c.l.bf16 %v2877_v2 }
   0x4   :  { %v281_v6 = vmul.f32 %v3772_v3, %v3772_v3  ;;  %v279_v7 = vmul.f32 %v3774_v4, %v3774_v4  ;;  %v277_v8 = vmul.f32 %v3776_v5, %v3776_v5 }
   0x5   :  { %8 = vsyncpa [#allocation4], 0  ;;  %v3784_v9 = vunpack.c.h.bf16 %v3133_v0  ;;  %v3786_v10 = vunpack.c.h.bf16 %v3132_v1  ;;  %v3788_v11 = vunpack.c.h.bf16 %v2877_v2  ;;  %v3135_v15 = vld [vmem:[%s6650_s0 + $0x20] sm:$0xff]   ;;  %v3134_v16 = vld [vmem:[%s6650_s0 + $0x18] sm:$0xff]   ;;  %s3742_s13 = smov [#allocation3]   ;;  %s2867_s17 = sshll.u32 %s6653_s3, 4  ;;  %s2868_s17 = int_to_ptr.hbm [resolvable:$true] %s2867_s17 }
   0x6   :  { %349 = vadd.xlane.f32.xlu2 %v281_v6  ;;  %345 = vadd.xlane.f32.xlu1 %v279_v7  ;;  %v3802_v17 = vunpack.c.l.bf16 %v3135_v15  ;;  %v3804_v18 = vunpack.c.h.bf16 %v3134_v16  ;;  %v3806_v19 = vunpack.c.l.bf16 %v3134_v16  ;;  %v3136_v23 = vld [vmem:[%s6650_s0 + $0x28] sm:$0xff]   ;;  %v3821_v26 = vunpack.c.h.bf16 %v3135_v15  ;;  %v3138_v30 = vld [vmem:[%s6650_s0 + $0x38] sm:$0xff]   ;;  %v3137_v31 = vld [vmem:[%s6650_s0 + $0x30] sm:$0xff]   ;;  %s2865_s14 = sshll.u32 %s3742_s13, 4  ;;  %s2866_s14 = int_to_ptr.vmem [resolvable:$true] %s2865_s14 }
   0x7   :  { %341 = vadd.xlane.f32.xlu0 %v277_v8  ;;  %v282_v12 = vmul.f32 %v3784_v9, %v3784_v9  ;;  %v280_v13 = vmul.f32 %v3786_v10, %v3786_v10  ;;  %v278_v14 = vmul.f32 %v3788_v11, %v3788_v11  ;;  %v3817_v24 = vunpack.c.h.bf16 %v3136_v23  ;;  %v3139_v38 = vld [vmem:[%s6650_s0 + $0x40] sm:$0xff]   ;;  %v3141_v45 = vld [vmem:[%s6650_s0 + $0x50] sm:$0xff]   ;;  %v3140_v46 = vld [vmem:[%s6650_s0 + $0x48] sm:$0xff]  }
   0x8   :  { %v285_v20 = vmul.f32 %v3802_v17, %v3802_v17  ;;  %v284_v21 = vmul.f32 %v3804_v18, %v3804_v18  ;;  %v283_v22 = vmul.f32 %v3806_v19, %v3806_v19  ;;  %v3819_v25 = vunpack.c.l.bf16 %v3136_v23  ;;  %v3005_v53 = vld [vmem:[%s6651_s1] sm:$0xff]   ;;  %v3886_v54 = vld [vmem:[%s6650_s0 + $0x58] sm:$0xff]   ;;  %v3163_v61 = vld [vmem:[%s6651_s1 + $0x8] sm:$0xff]  }
   0x9   :  { %v288_v27 = vmul.f32 %v3817_v24, %v3817_v24  ;;  %v286_v29 = vmul.f32 %v3821_v26, %v3821_v26  ;;  %v3835_v32 = vunpack.c.l.bf16 %v3138_v30  ;;  %v3837_v33 = vunpack.c.h.bf16 %v3137_v31  ;;  %v3165_v7 = vld [vmem:[%s6651_s1 + $0x18] sm:$0xff]   ;;  %v3164_v8 = vld [vmem:[%s6651_s1 + $0x10] sm:$0xff]  }
   0xa   :  { %v287_v28 = vmul.f32 %v3819_v25, %v3819_v25  ;;  %v3839_v34 = vunpack.c.l.bf16 %v3137_v31  ;;  %v3850_v39 = vunpack.c.h.bf16 %v3139_v38  ;;  %v3852_v40 = vunpack.c.l.bf16 %v3139_v38  ;;  %v3168_v31 = vld [vmem:[%s6651_s1 + $0x30] sm:$0xff]  }
   0xb   :  { %v291_v35 = vmul.f32 %v3835_v32, %v3835_v32  ;;  %v290_v36 = vmul.f32 %v3837_v33, %v3837_v33  ;;  %v3854_v41 = vunpack.c.h.bf16 %v3138_v30  ;;  %v3868_v47 = vunpack.c.l.bf16 %v3141_v45 }
   0xc   :  { %v289_v37 = vmul.f32 %v3839_v34, %v3839_v34  ;;  %v294_v42 = vmul.f32 %v3850_v39, %v3850_v39  ;;  %v293_v43 = vmul.f32 %v3852_v40, %v3852_v40  ;;  %v3870_v48 = vunpack.c.h.bf16 %v3140_v46 }
   0xd   :  { %v292_v44 = vmul.f32 %v3854_v41, %v3854_v41  ;;  %6714 = vst [vmem:[#allocation6_spill] sm:$0xff] %v3868_v47  ;;  %v3872_v49 = vunpack.c.l.bf16 %v3140_v46  ;;  %v297_v50 = vmul.f32 %v3868_v47, %v3868_v47  ;;  %v3888_v55 = vunpack.c.l.bf16 %v3005_v53 }
   0xe   :  { %351 = vadd.xlane.f32.xlu2 %v282_v12  ;;  %347 = vadd.xlane.f32.xlu1 %v280_v13  ;;  %6715 = vst [vmem:[#allocation7_spill] sm:$0xff] %v3870_v48  ;;  %v296_v51 = vmul.f32 %v3870_v48, %v3870_v48  ;;  %v3891_v56 = vunpack.c.l.bf16 %v3886_v54  ;;  %v3893_v57 = vunpack.c.h.bf16 %v3141_v45  ;;  %v3904_v62 = vunpack.c.h.bf16 %v3163_v61  ;;  %v3169_v45 = vld [vmem:[%s6651_s1 + $0x38] sm:$0xff]   ;;  %v4075_v48 = vld [vmem:[%s6650_s0 + $0x68] sm:$0xff]  }
   0xf   :  { %343 = vadd.xlane.f32.xlu0 %v278_v14  ;;  %v295_v52 = vmul.f32 %v3872_v49, %v3872_v49  ;;  %v1365_v58 = vmul.f32 %v3888_v55, %v3888_v55  ;;  %v3906_v63 = vunpack.c.l.bf16 %v3163_v61  ;;  %v3908_v0 = vunpack.c.h.bf16 %v3005_v53 }
  0x10   :  { %6716 = vst [vmem:[#allocation8_spill] sm:$0xff] %v3891_v56  ;;  %v299_v59 = vmul.f32 %v3891_v56, %v3891_v56  ;;  %v298_v60 = vmul.f32 %v3893_v57, %v3893_v57  ;;  %v1368_v1 = vmul.f32 %v3904_v62, %v3904_v62  ;;  %v3922_v12 = vunpack.c.l.bf16 %v3165_v7 }
  0x11   :  { %6717 = vst [vmem:[#allocation9_spill] sm:$0xff] %v3893_v57  ;;  %v1367_v2 = vmul.f32 %v3906_v63, %v3906_v63  ;;  %v1366_v6 = vmul.f32 %v3908_v0, %v3908_v0  ;;  %v3924_v13 = vunpack.c.h.bf16 %v3164_v8  ;;  %v3926_v14 = vunpack.c.l.bf16 %v3164_v8 }
  0x12   :  { %v1371_v15 = vmul.f32 %v3922_v12, %v3922_v12  ;;  %v3970_v46 = vunpack.c.h.bf16 %v3169_v45 }
  0x13   :  { %v1370_v16 = vmul.f32 %v3924_v13, %v3924_v13 }
  0x14   :  { %6723 = vst [vmem:[#allocation15_spill] sm:$0xff] %v3970_v46 }
  0x16   :  { %357 = vadd.xlane.f32.xlu2 %v285_v20  ;;  %355 = vadd.xlane.f32.xlu1 %v284_v21  ;;  %v1369_v20 = vmul.f32 %v3926_v14, %v3926_v14  ;;  %v3166_v21 = vld [vmem:[%s6651_s1 + $0x20] sm:$0xff]  }
  0x17   :  { %353 = vadd.xlane.f32.xlu0 %v283_v22  ;;  %v3937_v22 = vunpack.c.h.bf16 %v3166_v21  ;;  %v3939_v23 = vunpack.c.l.bf16 %v3166_v21 }
  0x19   :  { %6718 = vst [vmem:[#allocation10_spill] sm:$0xff] %v3939_v23 }
  0x1e   :  { %363 = vadd.xlane.f32.xlu2 %v288_v27  ;;  %361 = vadd.xlane.f32.xlu1 %v287_v28  ;;  %v3941_v27 = vunpack.c.h.bf16 %v3165_v7  ;;  %v1374_v28 = vmul.f32 %v3937_v22, %v3937_v22 }
  0x1f   :  { %359 = vadd.xlane.f32.xlu0 %v286_v29  ;;  %v1373_v29 = vmul.f32 %v3939_v23, %v3939_v23 }
  0x20   :  { %6719 = vst [vmem:[#allocation11_spill] sm:$0xff] %v3941_v27  ;;  %v1372_v30 = vmul.f32 %v3941_v27, %v3941_v27 }
  0x26   :  { %369 = vadd.xlane.f32.xlu2 %v291_v35  ;;  %367 = vadd.xlane.f32.xlu1 %v290_v36  ;;  %v3167_v35 = vld [vmem:[%s6651_s1 + $0x28] sm:$0xff]   ;;  %v3955_v36 = vunpack.c.l.bf16 %v3168_v31 }
  0x27   :  { %365 = vadd.xlane.f32.xlu0 %v289_v37  ;;  %v3957_v37 = vunpack.c.h.bf16 %v3167_v35  ;;  %v3959_v38 = vunpack.c.l.bf16 %v3167_v35 }
  0x28   :  { %6720 = vst [vmem:[#allocation12_spill] sm:$0xff] %v3955_v36 }
  0x29   :  { %6721 = vst [vmem:[#allocation13_spill] sm:$0xff] %v3957_v37 }
  0x2a   :  { %6722 = vst [vmem:[#allocation14_spill] sm:$0xff] %v3959_v38 }
  0x2e   :  { %375 = vadd.xlane.f32.xlu2 %v294_v42  ;;  %373 = vadd.xlane.f32.xlu1 %v293_v43  ;;  %v1377_v42 = vmul.f32 %v3955_v36, %v3955_v36  ;;  %v1376_v43 = vmul.f32 %v3957_v37, %v3957_v37 }
  0x2f   :  { %371 = vadd.xlane.f32.xlu0 %v292_v44  ;;  %v1375_v44 = vmul.f32 %v3959_v38, %v3959_v38 }
  0x36   :  { %381 = vadd.xlane.f32.xlu2 %v297_v50  ;;  %379 = vadd.xlane.f32.xlu1 %v296_v51  ;;  %v3972_v50 = vunpack.c.l.bf16 %v3169_v45  ;;  %v3974_v51 = vunpack.c.h.bf16 %v3168_v31  ;;  %v3173_v31 = vld [vmem:[%s6651_s1 + $0x58] sm:$0xff]  }
  0x37   :  { %377 = vadd.xlane.f32.xlu0 %v295_v52  ;;  %v1380_v52 = vmul.f32 %v3970_v46, %v3970_v46  ;;  %v4018_v35 = vunpack.c.h.bf16 %v3173_v31 }
  0x38   :  { %6724 = vst [vmem:[#allocation16_spill] sm:$0xff] %v3972_v50  ;;  %v1379_v53 = vmul.f32 %v3972_v50, %v3972_v50 }
  0x39   :  { %6725 = vst [vmem:[#allocation17_spill] sm:$0xff] %v3974_v51 }
  0x3a   :  { %6732 = vst [vmem:[#allocation24_spill] sm:$0xff] %v4018_v35 }
  0x3e   :  { %1429 = vadd.xlane.f32.xlu2 %v1365_v58  ;;  %385 = vadd.xlane.f32.xlu1 %v299_v59  ;;  %v1378_v58 = vmul.f32 %v3974_v51, %v3974_v51  ;;  %v3171_v59 = vld [vmem:[%s6651_s1 + $0x48] sm:$0xff]  }
  0x3f   :  { %383 = vadd.xlane.f32.xlu0 %v298_v60  ;;  %v3170_v60 = vld [vmem:[%s6651_s1 + $0x40] sm:$0xff]   ;;  %v3988_v61 = vunpack.c.l.bf16 %v3171_v59  ;;  %v4007_v21 = vunpack.c.h.bf16 %v3171_v59 }
  0x40   :  { %v3143_v59 = vld [vmem:[%s6650_s0 + $0x60] sm:$0xff]  }
  0x41   :  { %6726 = vst [vmem:[#allocation18_spill] sm:$0xff] %v3988_v61 }
  0x42   :  { %6731 = vst [vmem:[#allocation23_spill] sm:$0xff] %v4007_v21 }
  0x46   :  { %1435 = vadd.xlane.f32.xlu2 %v1368_v1  ;;  %1433 = vadd.xlane.f32.xlu1 %v1367_v2  ;;  %v3990_v1 = vunpack.c.h.bf16 %v3170_v60  ;;  %v3992_v2 = vunpack.c.l.bf16 %v3170_v60  ;;  %v3174_v60 = vld [vmem:[%s6651_s1 + $0x60] sm:$0xff]  }
  0x47   :  { %1431 = vadd.xlane.f32.xlu0 %v1366_v6  ;;  %v1383_v6 = vmul.f32 %v3988_v61, %v3988_v61 }
  0x48   :  { %6727 = vst [vmem:[#allocation19_spill] sm:$0xff] %v3990_v1  ;;  %v1382_v7 = vmul.f32 %v3990_v1, %v3990_v1  ;;  %v1381_v8 = vmul.f32 %v3992_v2, %v3992_v2  ;;  %v4083_v1 = vunpack.c.h.bf16 %v3174_v60 }
  0x49   :  { %6728 = vst [vmem:[#allocation20_spill] sm:$0xff] %v3992_v2 }
  0x4a   :  { %6740 = vst [vmem:[#allocation32_spill] sm:$0xff] %v4083_v1  ;;  %v1390_v50 = vmul.f32 %v4083_v1, %v4083_v1 }
  0x4e   :  { %1441 = vadd.xlane.f32.xlu2 %v1371_v15  ;;  %1439 = vadd.xlane.f32.xlu1 %v1370_v16  ;;  %v3172_v15 = vld [vmem:[%s6651_s1 + $0x50] sm:$0xff]  }
  0x4f   :  { %1437 = vadd.xlane.f32.xlu0 %v1369_v20  ;;  %v4003_v16 = vunpack.c.h.bf16 %v3172_v15  ;;  %v4005_v20 = vunpack.c.l.bf16 %v3172_v15 }
  0x51   :  { %6729 = vst [vmem:[#allocation21_spill] sm:$0xff] %v4003_v16 }
  0x52   :  { %6730 = vst [vmem:[#allocation22_spill] sm:$0xff] %v4005_v20 }
  0x56   :  { %1447 = vadd.xlane.f32.xlu2 %v1374_v28  ;;  %1445 = vadd.xlane.f32.xlu1 %v1373_v29  ;;  %v1386_v28 = vmul.f32 %v4003_v16, %v4003_v16  ;;  %v1385_v29 = vmul.f32 %v4005_v20, %v4005_v20  ;;  %v4081_v16 = vunpack.c.l.bf16 %v4075_v48 }
  0x57   :  { %1443 = vadd.xlane.f32.xlu0 %v1372_v30  ;;  %v1384_v30 = vmul.f32 %v4007_v21, %v4007_v21 }
  0x58   :  { %6739 = vst [vmem:[#allocation31_spill] sm:$0xff] %v4081_v16 }
  0x5e   :  { %1453 = vadd.xlane.f32.xlu2 %v1377_v42  ;;  %1451 = vadd.xlane.f32.xlu1 %v1376_v43  ;;  %v4021_v42 = vunpack.c.h.bf16 %v3886_v54  ;;  %v4023_v43 = vunpack.c.l.bf16 %v3173_v31 }
  0x5f   :  { %1449 = vadd.xlane.f32.xlu0 %v1375_v44 }
  0x60   :  { %6733 = vst [vmem:[#allocation25_spill] sm:$0xff] %v4021_v42  ;;  %v1387_v54 = vmul.f32 %v4023_v43, %v4023_v43 }
  0x61   :  { %6734 = vst [vmem:[#allocation26_spill] sm:$0xff] %v4023_v43 }
  0x66   :  { %1459 = vadd.xlane.f32.xlu2 %v1380_v52  ;;  %1457 = vadd.xlane.f32.xlu1 %v1379_v53  ;;  %v1388_v53 = vmul.f32 %v4018_v35, %v4018_v35 }
  0x67   :  { %1455 = vadd.xlane.f32.xlu0 %v1378_v58  ;;  %v300_v58 = vmul.f32 %v4021_v42, %v4021_v42 }
  0x6e   :  { %1465 = vadd.xlane.f32.xlu2 %v1383_v6  ;;  %1463 = vadd.xlane.f32.xlu1 %v1382_v7  ;;  %v4046_v6 = vunpack.c.h.bf16 %v3143_v59  ;;  %v4048_v7 = vunpack.c.l.bf16 %v3174_v60 }
  0x6f   :  { %1461 = vadd.xlane.f32.xlu0 %v1381_v8  ;;  %v4050_v8 = vunpack.c.l.bf16 %v3143_v59  ;;  %v3175_v59 = vld [vmem:[%s6651_s1 + $0x68] sm:$0xff]  }
  0x70   :  { %6735 = vst [vmem:[#allocation27_spill] sm:$0xff] %v4046_v6  ;;  %v4078_v47 = vunpack.c.l.bf16 %v3175_v59 }
  0x71   :  { %6736 = vst [vmem:[#allocation28_spill] sm:$0xff] %v4048_v7  ;;  %v301_v56 = vmul.f32 %v4050_v8, %v4050_v8 }
  0x72   :  { %6737 = vst [vmem:[#allocation29_spill] sm:$0xff] %v4050_v8 }
  0x73   :  { %6738 = vst [vmem:[#allocation30_spill] sm:$0xff] %v4078_v47 }
  0x76   :  { %1471 = vadd.xlane.f32.xlu2 %v1386_v28  ;;  %1469 = vadd.xlane.f32.xlu1 %v1385_v29 }
  0x77   :  { %1467 = vadd.xlane.f32.xlu0 %v1384_v30 }
  0x79   :  { %v4025_v44 = vpop.xlane.xlu2 %349  ;;  %v4027_v45 = vpop.xlane.xlu1 %345 }
  0x7a   :  { %3199 = vrsqrt.f32 %v4025_v44  ;;  %v4030_v52 = vpop.xlane.xlu0 %341  ;;  %vm524_vm0 = vcmp.eq.f32.partialorder %v4025_v44, inf  ;;  %vm526_vm1 = vcmp.eq.f32.partialorder %v4025_v44, 0.0  ;;  %vm500_vm2 = vcmp.eq.f32.partialorder %v4027_v45, inf }
  0x7b   :  { %3201 = vrsqrt.f32 %v4027_v45  ;;  %vm502_vm3 = vcmp.eq.f32.partialorder %v4027_v45, 0.0  ;;  %vm476_vm4 = vcmp.eq.f32.partialorder %v4030_v52, inf  ;;  %vm478_vm5 = vcmp.eq.f32.partialorder %v4030_v52, 0.0 }
  0x7c   :  { %3203 = vrsqrt.f32 %v4030_v52 }
  0x7e   :  { %1475 = vadd.xlane.f32.xlu2 %v1388_v53  ;;  %387 = vadd.xlane.f32.xlu1 %v300_v58  ;;  %v302_v58 = vmul.f32 %v4046_v6, %v4046_v6 }
  0x7f   :  { %1473 = vadd.xlane.f32.xlu0 %v1387_v54  ;;  %v1389_v54 = vmul.f32 %v4048_v7, %v4048_v7 }
  0x80   :  { %v3200_v15 = vpop.eup %3199 }
  0x81   :  { %v3202_v28 = vpop.eup %3201  ;;  %v518_v29 = vmul.f32 %v3200_v15, %v4025_v44  ;;  %v4053_v30 = vpop.xlane.xlu2 %351 }
  0x82   :  { %v4055_v31 = vpop.xlane.xlu1 %347  ;;  %v3204_v43 = vpop.eup %3203  ;;  %v494_v42 = vmul.f32 %v3202_v28, %v4027_v45  ;;  %3205 = vrsqrt.f32 %v4053_v30  ;;  %vm536_vm6 = vcmp.eq.f32.partialorder %v4053_v30, inf  ;;  %vm538_vm8 = vcmp.eq.f32.partialorder %v4053_v30, 0.0 }
  0x83   :  { %v4059_v53 = vpop.xlane.xlu0 %343  ;;  %v519_v35 = vmul.f32 %v3200_v15, %v518_v29  ;;  %v470_v21 = vmul.f32 %v3204_v43, %v4030_v52  ;;  %3207 = vrsqrt.f32 %v4055_v31  ;;  %vm512_vm7 = vcmp.eq.f32.partialorder %v4055_v31, inf }
  0x84   :  { %v495_v6 = vmul.f32 %v3202_v28, %v494_v42  ;;  %3209 = vrsqrt.f32 %v4059_v53  ;;  %vm514_vm9 = vcmp.eq.f32.partialorder %v4055_v31, 0.0  ;;  %vm488_vm10 = vcmp.eq.f32.partialorder %v4059_v53, inf }
  0x85   :  { %v520_v20 = vmul.f32 0.5, %v519_v35  ;;  %v471_v7 = vmul.f32 %v3204_v43, %v470_v21  ;;  %vm490_vm11 = vcmp.eq.f32.partialorder %v4059_v53, 0.0 }
  0x86   :  { %v496_v29 = vmul.f32 0.5, %v495_v6  ;;  %391 = vadd.xlane.f32.xlu2 %v302_v58  ;;  %1477 = vadd.xlane.f32.xlu1 %v1389_v54  ;;  %v527_v54 = vand.u32 2147483648, %v4025_v44 }
  0x87   :  { %v521_v2 = vsub.f32 1.5, %v520_v20  ;;  %v472_v8 = vmul.f32 0.5, %v471_v7  ;;  %389 = vadd.xlane.f32.xlu0 %v301_v56  ;;  %v1391_v20 = vmul.f32 %v4078_v47, %v4078_v47 }
  0x88   :  { %v3206_v61 = vpop.eup %3205  ;;  %v497_v35 = vsub.f32 1.5, %v496_v29 }
  0x89   :  { %v3208_v21 = vpop.eup %3207  ;;  %v522_v42 = vmul.f32 %v3200_v15, %v521_v2  ;;  %v473_v51 = vsub.f32 1.5, %v472_v8  ;;  %v530_v6 = vmul.f32 %v3206_v61, %v4053_v30  ;;  %v4088_v58 = vpop.xlane.xlu2 %357  ;;  %v303_v2 = vmul.f32 %v4081_v16, %v4081_v16 }
  0x8a   :  { %v498_v7 = vmul.f32 %v3202_v28, %v497_v35  ;;  %v506_v56 = vmul.f32 %v3208_v21, %v4055_v31  ;;  %3211 = vrsqrt.f32 %v4088_v58  ;;  %v4094_v60 = vpop.xlane.xlu1 %355  ;;  %v3210_v15 = vpop.eup %3209  ;;  %v4105_v28 = vld [vmem:[%s6650_s0 + $0x70] sm:$0xff]   ;;  %vm572_vm12 = vcmp.eq.f32.partialorder %v4088_v58, inf }
  0x8b   :  { %v523_v8 = vmul.f32 %v522_v42, %v4025_v44  ;;  %v531_v29 = vmul.f32 %v3206_v61, %v530_v6  ;;  %v474_v47 = vmul.f32 %v3204_v43, %v473_v51  ;;  %v482_v16 = vmul.f32 %v3210_v15, %v4059_v53 }
  0x8c   :  { %v499_v35 = vmul.f32 %v498_v7, %v4027_v45  ;;  %v507_v46 = vmul.f32 %v3208_v21, %v506_v56  ;;  %3213 = vrsqrt.f32 %v4094_v60  ;;  %v503_v6 = vand.u32 2147483648, %v4027_v45 }
  0x8d   :  { %v532_v42 = vmul.f32 0.5, %v531_v29  ;;  %v483_v38 = vmul.f32 %v3210_v15, %v482_v16  ;;  %v4114_v37 = vunpack.c.l.bf16 %v4105_v28  ;;  %v525_v51 = vsel %vm524_vm0, %v4025_v44, %v523_v8  ;;  %v4126_v29 = vpop.xlane.xlu0 %353 }
  0x8e   :  { %v508_v1 = vmul.f32 0.5, %v507_v46  ;;  %1481 = vadd.xlane.f32.xlu2 %v1391_v20  ;;  %393 = vadd.xlane.f32.xlu1 %v303_v2  ;;  %v4120_v7 = vunpack.c.h.bf16 %v3175_v59  ;;  %v501_v46 = vsel %vm500_vm2, %v4027_v45, %v499_v35  ;;  %v475_v16 = vmul.f32 %v474_v47, %v4030_v52 }
  0x8f   :  { %6741 = vst [vmem:[#allocation33_spill] sm:$0xff] %v4114_v37  ;;  %v533_v43 = vsub.f32 1.5, %v532_v42  ;;  %1479 = vadd.xlane.f32.xlu0 %v1390_v50  ;;  %v484_v2 = vmul.f32 0.5, %v483_v38  ;;  %v479_v8 = vand.u32 2147483648, %v4030_v52  ;;  %v528_v59 = vsel %vm526_vm1, %v527_v54, %v525_v51 }
  0x90   :  { %6742 = vst [vmem:[#allocation34_spill] sm:$0xff] %v4120_v7  ;;  %v3212_v56 = vpop.eup %3211  ;;  %v509_v20 = vsub.f32 1.5, %v508_v1  ;;  %v305_v35 = vmul.f32 %v4114_v37, %v4114_v37  ;;  %v504_v38 = vsel %vm502_vm3, %v503_v6, %v501_v46  ;;  %v477_v44 = vsel %vm476_vm4, %v4030_v52, %v475_v16 }
  0x91   :  { %v534_v57 = vmul.f32 %v3206_v61, %v533_v43  ;;  %v566_v50 = vmul.f32 %v3212_v56, %v4088_v58  ;;  %v485_v36 = vsub.f32 1.5, %v484_v2  ;;  %v1392_v61 = vmul.f32 %v4120_v7, %v4120_v7 }
  0x92   :  { %v510_v42 = vmul.f32 %v3208_v21, %v509_v20  ;;  %v3214_v47 = vpop.eup %3213  ;;  %v1241_v43 = vadd.f32 1e-10, %v528_v59  ;;  %3215 = vrsqrt.f32 %v4126_v29  ;;  %v4149_v20 = vpop.xlane.xlu2 %363  ;;  %vm574_vm13 = vcmp.eq.f32.partialorder %v4088_v58, 0.0 }
  0x93   :  { %v535_v1 = vmul.f32 %v534_v57, %v4053_v30  ;;  %v567_v27 = vmul.f32 %v3212_v56, %v566_v50  ;;  %v486_v54 = vmul.f32 %v3210_v15, %v485_v36  ;;  %v554_v51 = vmul.f32 %v3214_v47, %v4094_v60 }
  0x94   :  { %v511_v21 = vmul.f32 %v510_v42, %v4055_v31  ;;  %v1239_v57 = vadd.f32 1e-10, %v504_v38  ;;  %v480_v36 = vsel %vm478_vm5, %v479_v8, %v477_v44  ;;  %v539_v15 = vand.u32 2147483648, %v4053_v30  ;;  %v4158_v42 = vpop.xlane.xlu1 %361 }
  0x95   :  { %v568_v45 = vmul.f32 0.5, %v567_v27  ;;  %v537_v6 = vsel %vm536_vm6, %v4053_v30, %v535_v1  ;;  %v555_v46 = vmul.f32 %v3214_v47, %v554_v51  ;;  %v515_v27 = vand.u32 2147483648, %v4055_v31  ;;  %v4161_v38 = vpop.xlane.xlu0 %359 }
  0x96   :  { %397 = vadd.xlane.f32.xlu2 %v305_v35  ;;  %v513_v16 = vsel %vm512_vm7, %v4055_v31, %v511_v21  ;;  %1483 = vadd.xlane.f32.xlu1 %v1392_v61  ;;  %v487_v50 = vmul.f32 %v486_v54, %v4059_v53  ;;  %3217 = vrcp.f32 %v1241_v43  ;;  %v540_v35 = vsel %vm538_vm8, %v539_v15, %v537_v6 }
  0x97   :  { %v569_v2 = vsub.f32 1.5, %v568_v45  ;;  %v556_v59 = vmul.f32 0.5, %v555_v46  ;;  %3219 = vrcp.f32 %v1239_v57  ;;  %v1237_v52 = vadd.f32 1e-10, %v480_v36 }
  0x98   :  { %v516_v8 = vsel %vm514_vm9, %v515_v27, %v513_v16  ;;  %v3216_v1 = vpop.eup %3215  ;;  %3221 = vrsqrt.f32 %v4149_v20  ;;  %v1242_v61 = vadd.f32 1e-10, %v540_v35  ;;  %v489_v44 = vsel %vm488_vm10, %v4059_v53, %v487_v50 }
  0x99   :  { %v570_v30 = vmul.f32 %v3212_v56, %v569_v2  ;;  %v557_v21 = vsub.f32 1.5, %v556_v59  ;;  %v542_v54 = vmul.f32 %v3216_v1, %v4126_v29  ;;  %v1240_v51 = vadd.f32 1e-10, %v516_v8 }
  0x9a   :  { %v491_v31 = vand.u32 2147483648, %v4059_v53  ;;  %3223 = vrsqrt.f32 %v4158_v42  ;;  %v4171_v45 = vunpack.c.h.bf16 %v4075_v48  ;;  %v4176_v16 = vpop.xlane.xlu2 %369  ;;  %v575_v48 = vand.u32 2147483648, %v4088_v58 }
  0x9b   :  { %3225 = vrcp.f32 %v1237_v52  ;;  %v543_v43 = vmul.f32 %v3216_v1, %v542_v54  ;;  %v571_v6 = vmul.f32 %v570_v30, %v4088_v58  ;;  %v558_v36 = vmul.f32 %v3214_v47, %v557_v21 }
  0x9c   :  { %6743 = vst [vmem:[#allocation35_spill] sm:$0xff] %v4171_v45  ;;  %v3218_v56 = vpop.eup %3217  ;;  %v492_v57 = vsel %vm490_vm11, %v491_v31, %v489_v44  ;;  %3227 = vrsqrt.f32 %v4161_v38  ;;  %vm560_vm14 = vcmp.eq.f32.partialorder %v4094_v60, inf  ;;  %v304_v59 = vmul.f32 %v4171_v45, %v4171_v45  ;;  %v4184_v35 = vpop.xlane.xlu1 %367 }
  0x9d   :  { %v3220_v46 = vpop.eup %3219  ;;  %3229 = vrcp.f32 %v1242_v61  ;;  %v544_v15 = vmul.f32 0.5, %v543_v43  ;;  %v1238_v53 = vadd.f32 1e-10, %v492_v57  ;;  %v573_v52 = vsel %vm572_vm12, %v4088_v58, %v571_v6 }
  0x9e   :  { %v3222_v2 = vpop.eup %3221  ;;  %3231 = vrcp.f32 %v1240_v51  ;;  %vm562_vm15 = vcmp.eq.f32.partialorder %v4094_v60, 0.0  ;;  %v563_v8 = vand.u32 2147483648, %v4094_v60  ;;  %v559_v61 = vmul.f32 %v558_v36, %v4094_v60  ;;  %395 = vadd.xlane.f32.xlu0 %v304_v59  ;;  %v4192_v51 = vpop.xlane.xlu0 %365 }
  0x9f   :  { %v545_v27 = vsub.f32 1.5, %v544_v15  ;;  %v602_v50 = vmul.f32 %v3222_v2, %v4149_v20  ;;  %3233 = vrsqrt.f32 %v4176_v16  ;;  %v4195_v43 = vmul.f32 %v3218_v56, %v3772_v3 }
  0xa0   :  { %v3224_v47 = vpop.eup %3223  ;;  %v4198_v57 = vmul.f32 %v3220_v46, %v3774_v4  ;;  %vm548_vm0 = vcmp.eq.f32.partialorder %v4126_v29, inf  ;;  %3235 = vrsqrt.f32 %v4184_v35  ;;  %v576_v56 = vsel %vm574_vm13, %v575_v48, %v573_v52 }
  0xa1   :  { %v3226_v30 = vpop.eup %3225  ;;  %v546_v44 = vmul.f32 %v3216_v1, %v545_v27  ;;  %v603_v21 = vmul.f32 %v3222_v2, %v602_v50  ;;  %v590_v54 = vmul.f32 %v3224_v47, %v4158_v42  ;;  %3237 = vrcp.f32 %v1238_v53  ;;  %v3176_v27 = vld [vmem:[%s6651_s1 + $0x70] sm:$0xff]  }
  0xa2   :  { %v3228_v31 = vpop.eup %3227  ;;  %v4211_v4 = vmul.f32 %v3226_v30, %v3776_v5  ;;  %vm550_vm1 = vcmp.eq.f32.partialorder %v4126_v29, 0.0  ;;  %v551_v46 = vand.u32 2147483648, %v4126_v29  ;;  %3239 = vrsqrt.f32 %v4192_v51 }
  0xa3   :  { %v4202_v6 = vpop.eup %3229  ;;  %v604_v1 = vmul.f32 0.5, %v603_v21  ;;  %v591_v36 = vmul.f32 %v3224_v47, %v590_v54  ;;  %v578_v15 = vmul.f32 %v3228_v31, %v4161_v38  ;;  %v561_v53 = vsel %vm560_vm14, %v4094_v60, %v559_v61 }
  0xa4   :  { %v4208_v3 = vpop.eup %3231  ;;  %v547_v50 = vmul.f32 %v546_v44, %v4126_v29  ;;  %vm608_vm2 = vcmp.eq.f32.partialorder %v4149_v20, inf  ;;  %v611_v58 = vand.u32 2147483648, %v4149_v20  ;;  %vm596_vm3 = vcmp.eq.f32.partialorder %v4158_v42, inf }
  0xa5   :  { %v605_v59 = vsub.f32 1.5, %v604_v1  ;;  %v592_v5 = vmul.f32 0.5, %v591_v36  ;;  %v3234_v30 = vpop.eup %3233  ;;  %v579_v48 = vmul.f32 %v3228_v31, %v578_v15  ;;  %v4225_v52 = vunpack.c.h.bf16 %v3176_v27 }
  0xa6   :  { %v1245_v21 = vadd.f32 1e-10, %v576_v56  ;;  %v638_v45 = vmul.f32 %v3234_v30, %v4176_v16  ;;  %v3236_v61 = vpop.eup %3235  ;;  %v564_v44 = vsel %vm562_vm15, %v563_v8, %v561_v53  ;;  %vm610_vm4 = vcmp.eq.f32.partialorder %v4149_v20, 0.0 }
  0xa7   :  { %6744 = vst [vmem:[#allocation36_spill] sm:$0xff] %v4225_v52  ;;  %v606_v54 = vmul.f32 %v3222_v2, %v605_v59  ;;  %v593_v37 = vsub.f32 1.5, %v592_v5  ;;  %v580_v1 = vmul.f32 0.5, %v579_v48  ;;  %v1394_v36 = vmul.f32 %v4225_v52, %v4225_v52  ;;  %v3238_v15 = vpop.eup %3237 }
  0xa8   :  { %v4234_v7 = vunpack.c.h.bf16 %v4105_v28  ;;  %v549_v2 = vsel %vm548_vm0, %v4126_v29, %v547_v50  ;;  %vm598_vm5 = vcmp.eq.f32.partialorder %v4158_v42, 0.0  ;;  %v639_v60 = vmul.f32 %v3234_v30, %v638_v45  ;;  %v3240_v8 = vpop.eup %3239 }
  0xa9   :  { %v607_v56 = vmul.f32 %v606_v54, %v4149_v20  ;;  %v594_v59 = vmul.f32 %v3224_v47, %v593_v37  ;;  %v581_v53 = vsub.f32 1.5, %v580_v1  ;;  %v626_v5 = vmul.f32 %v3236_v61, %v4184_v35  ;;  %1487 = vadd.xlane.f32.xlu2 %v1394_v36  ;;  %v4248_v37 = vpop.xlane.xlu2 %375 }
  0xaa   :  { %6745 = vst [vmem:[#allocation37_spill] sm:$0xff] %v4234_v7  ;;  %v306_v28 = vmul.f32 %v4234_v7, %v4234_v7  ;;  %v4244_v48 = vunpack.c.l.bf16 %v3176_v27  ;;  %v1244_v52 = vadd.f32 1e-10, %v564_v44  ;;  %v640_v50 = vmul.f32 0.5, %v639_v60 }
  0xab   :  { %v595_v23 = vmul.f32 %v594_v59, %v4158_v42  ;;  %v614_v54 = vmul.f32 %v3240_v8, %v4192_v51  ;;  %3241 = vrcp.f32 %v1245_v21  ;;  %v599_v45 = vand.u32 2147483648, %v4158_v42 }
  0xac   :  { %v627_v47 = vmul.f32 %v3236_v61, %v626_v5  ;;  %399 = vadd.xlane.f32.xlu1 %v306_v28  ;;  %v1393_v1 = vmul.f32 %v4244_v48, %v4244_v48  ;;  %v552_v27 = vsel %vm550_vm1, %v551_v46, %v549_v2  ;;  %v582_v36 = vmul.f32 %v3228_v31, %v581_v53  ;;  %v4268_v53 = vpop.xlane.xlu1 %373 }
  0xad   :  { %v641_v44 = vsub.f32 1.5, %v640_v50  ;;  %v615_v7 = vmul.f32 %v3240_v8, %v614_v54  ;;  %v609_v59 = vsel %vm608_vm2, %v4149_v20, %v607_v56  ;;  %vm584_vm6 = vcmp.eq.f32.partialorder %v4161_v38, inf }
  0xae   :  { %v628_v21 = vmul.f32 0.5, %v627_v47  ;;  %1485 = vadd.xlane.f32.xlu0 %v1393_v1  ;;  %3243 = vrsqrt.f32 %v4248_v37  ;;  %v597_v60 = vsel %vm596_vm3, %v4158_v42, %v595_v23  ;;  %v4265_v31 = vmul.f32 %v4202_v6, %v3784_v9  ;;  %v3146_v1 = vld [vmem:[%s6650_s0 + $0x78] sm:$0xff]  }
  0xaf   :  { %3245 = vrcp.f32 %v1244_v52  ;;  %v642_v29 = vmul.f32 %v3234_v30, %v641_v44  ;;  %v616_v46 = vmul.f32 0.5, %v615_v7  ;;  %v1243_v2 = vadd.f32 1e-10, %v552_v27 }
  0xb0   :  { %vm586_vm7 = vcmp.eq.f32.partialorder %v4161_v38, 0.0  ;;  %v629_v56 = vsub.f32 1.5, %v628_v21  ;;  %v4272_v5 = vmul.f32 %v4208_v3, %v3786_v10  ;;  %v612_v52 = vsel %vm610_vm4, %v611_v58, %v609_v59  ;;  %v4287_v3 = vpop.xlane.xlu0 %371  ;;  %v4313_v59 = vld [vmem:[%s6651_s1 + $0x78] sm:$0xff]  }
  0xb1   :  { %v583_v23 = vmul.f32 %v582_v36, %v4161_v38  ;;  %v617_v7 = vsub.f32 1.5, %v616_v46  ;;  %v3242_v30 = vpop.eup %3241  ;;  %v4278_v9 = vmul.f32 %v3238_v15, %v3788_v11  ;;  %v600_v6 = vsel %vm598_vm5, %v599_v45, %v597_v60  ;;  %v4315_v21 = vpop.xlane.xlu2 %381 }
  0xb2   :  { %v587_v28 = vand.u32 2147483648, %v4161_v38  ;;  %vm644_vm8 = vcmp.eq.f32.partialorder %v4176_v16, inf  ;;  %v643_v10 = vmul.f32 %v642_v29, %v4176_v16  ;;  %vm646_vm9 = vcmp.eq.f32.partialorder %v4176_v16, 0.0 }
  0xb3   :  { %v630_v20 = vmul.f32 %v3236_v61, %v629_v56  ;;  %3247 = vrsqrt.f32 %v4268_v53  ;;  %v1248_v11 = vadd.f32 1e-10, %v612_v52  ;;  %v647_v15 = vand.u32 2147483648, %v4176_v16 }
  0xb4   :  { %v3244_v58 = vpop.eup %3243  ;;  %3249 = vrcp.f32 %v1243_v2  ;;  %vm632_vm10 = vcmp.eq.f32.partialorder %v4184_v35, inf  ;;  %v1247_v50 = vadd.f32 1e-10, %v600_v6  ;;  %v585_v54 = vsel %vm584_vm6, %v4161_v38, %v583_v23 }
  0xb5   :  { %v3246_v42 = vpop.eup %3245  ;;  %v618_v45 = vmul.f32 %v3240_v8, %v617_v7  ;;  %v674_v61 = vmul.f32 %v3244_v58, %v4248_v37  ;;  %vm634_vm11 = vcmp.eq.f32.partialorder %v4184_v35, 0.0  ;;  %v635_v47 = vand.u32 2147483648, %v4184_v35 }
  0xb6   :  { %vm620_vm12 = vcmp.eq.f32.partialorder %v4192_v51, inf  ;;  %3251 = vrsqrt.f32 %v4287_v3  ;;  %v4303_v27 = vmul.f32 %v3242_v30, %v3802_v17  ;;  %v645_v8 = vsel %vm644_vm8, %v4176_v16, %v643_v10 }
  0xb7   :  { %v631_v36 = vmul.f32 %v630_v20, %v4184_v35  ;;  %vm622_vm13 = vcmp.eq.f32.partialorder %v4192_v51, 0.0  ;;  %v675_v44 = vmul.f32 %v3244_v58, %v674_v61  ;;  %v4318_v60 = vmul.f32 %v3246_v42, %v3804_v18 }
  0xb8   :  { %3253 = vrcp.f32 %v1248_v11  ;;  %v588_v17 = vsel %vm586_vm7, %v587_v28, %v585_v54  ;;  %v623_v29 = vand.u32 2147483648, %v4192_v51  ;;  %v619_v2 = vmul.f32 %v618_v45, %v4192_v51  ;;  %v4339_v11 = vpop.xlane.xlu1 %379 }
  0xb9   :  { %v3248_v46 = vpop.eup %3247  ;;  %3255 = vrcp.f32 %v1247_v50  ;;  %v676_v56 = vmul.f32 0.5, %v675_v44  ;;  %v4324_v52 = vunpack.c.h.bf16 %v3146_v1  ;;  %v648_v7 = vsel %vm646_vm9, %v647_v15, %v645_v8  ;;  %v4353_v8 = vpop.xlane.xlu0 %377 }
  0xba   :  { %v3250_v23 = vpop.eup %3249  ;;  %v662_v18 = vmul.f32 %v3248_v46, %v4268_v53  ;;  %v4330_v30 = vunpack.c.l.bf16 %v4313_v59  ;;  %v4332_v38 = vunpack.c.l.bf16 %v3146_v1  ;;  %v1246_v6 = vadd.f32 1e-10, %v588_v17 }
  0xbb   :  { %6746 = vst [vmem:[#allocation38_spill] sm:$0xff] %v4324_v52  ;;  %v633_v28 = vsel %vm632_vm10, %v4184_v35, %v631_v36  ;;  %v677_v10 = vsub.f32 1.5, %v676_v56  ;;  %v308_v20 = vmul.f32 %v4324_v52, %v4324_v52  ;;  %3257 = vrsqrt.f32 %v4315_v21  ;;  %v4369_v35 = vld [vmem:[%s6651_s1 + $0x80] sm:$0xff]  }
  0xbc   :  { %v3252_v16 = vpop.eup %3251  ;;  %v663_v15 = vmul.f32 %v3248_v46, %v662_v18  ;;  %v1395_v42 = vmul.f32 %v4330_v30, %v4330_v30  ;;  %v307_v50 = vmul.f32 %v4332_v38, %v4332_v38  ;;  %v4347_v54 = vmul.f32 %v3250_v23, %v3806_v19 }
  0xbd   :  { %v1251_v45 = vadd.f32 1e-10, %v648_v7  ;;  %v621_v61 = vsel %vm620_vm12, %v4192_v51, %v619_v2  ;;  %v650_v1 = vmul.f32 %v3252_v16, %v4287_v3  ;;  %403 = vadd.xlane.f32.xlu2 %v308_v20  ;;  %v678_v44 = vmul.f32 %v3244_v58, %v677_v10 }
  0xbe   :  { %v3254_v36 = vpop.eup %3253  ;;  %vm680_vm14 = vcmp.eq.f32.partialorder %v4248_v37, inf  ;;  %v664_v17 = vmul.f32 0.5, %v663_v15  ;;  %1489 = vadd.xlane.f32.xlu1 %v1395_v42  ;;  %401 = vadd.xlane.f32.xlu0 %v307_v50  ;;  %3259 = vrsqrt.f32 %v4339_v11  ;;  %v636_v56 = vsel %vm634_vm11, %v635_v47, %v633_v28 }
  0xbf   :  { %v3256_v19 = vpop.eup %3255  ;;  %3261 = vrcp.f32 %v1246_v6  ;;  %v683_v2 = vand.u32 2147483648, %v4248_v37  ;;  %v651_v23 = vmul.f32 %v3252_v16, %v650_v1  ;;  %v624_v7 = vsel %vm622_vm13, %v623_v29, %v621_v61  ;;  %v4378_v29 = vld [vmem:[%s6650_s0 + $0x80] sm:$0xff]   ;;  %v4380_v6 = vpop.xlane.xlu2 %1429 }
  0xc0   :  { %vm682_vm15 = vcmp.eq.f32.partialorder %v4248_v37, 0.0  ;;  %v665_v58 = vsub.f32 1.5, %v664_v17  ;;  %vm668_vm0 = vcmp.eq.f32.partialorder %v4268_v53, inf  ;;  %3263 = vrsqrt.f32 %v4353_v8 }
  0xc1   :  { %v4372_v47 = vmul.f32 %v3254_v36, %v3817_v24  ;;  %3265 = vrcp.f32 %v1251_v45  ;;  %v652_v51 = vmul.f32 0.5, %v651_v23  ;;  %vm656_vm1 = vcmp.eq.f32.partialorder %v4287_v3, inf  ;;  %v3258_v28 = vpop.eup %3257 }
  0xc2   :  { %v4383_v10 = vmul.f32 %v3256_v19, %v3819_v25  ;;  %v1250_v20 = vadd.f32 1e-10, %v636_v56  ;;  %v679_v15 = vmul.f32 %v678_v44, %v4248_v37  ;;  %v666_v24 = vmul.f32 %v3248_v46, %v665_v58 }
  0xc3   :  { %v1249_v42 = vadd.f32 1e-10, %v624_v7  ;;  %vm670_vm2 = vcmp.eq.f32.partialorder %v4268_v53, 0.0  ;;  %v653_v50 = vsub.f32 1.5, %v652_v51  ;;  %v710_v45 = vmul.f32 %v3258_v28, %v4315_v21 }
  0xc4   :  { %v4389_v61 = vunpack.c.l.bf16 %v4369_v35  ;;  %v3260_v1 = vpop.eup %3259  ;;  %vm658_vm3 = vcmp.eq.f32.partialorder %v4287_v3, 0.0  ;;  %v659_v36 = vand.u32 2147483648, %v4287_v3  ;;  %v4394_v25 = vunpack.c.l.bf16 %v4378_v29 }
  0xc5   :  { %v4397_v44 = vunpack.c.h.bf16 %v4313_v59  ;;  %3267 = vrsqrt.f32 %v4380_v6  ;;  %v3262_v46 = vpop.eup %3261  ;;  %v667_v17 = vmul.f32 %v666_v24, %v4268_v53  ;;  %v654_v19 = vmul.f32 %v3252_v16, %v653_v50 }
  0xc6   :  { %6747 = vst [vmem:[#allocation39_spill] sm:$0xff] %v4394_v25  ;;  %v711_v56 = vmul.f32 %v3258_v28, %v710_v45  ;;  %v698_v23 = vmul.f32 %v3260_v1, %v4339_v11  ;;  %v3264_v7 = vpop.eup %3263  ;;  %v681_v58 = vsel %vm680_vm14, %v4248_v37, %v679_v15  ;;  %v1397_v51 = vmul.f32 %v4389_v61, %v4389_v61 }
  0xc7   :  { %v309_v59 = vmul.f32 %v4394_v25, %v4394_v25  ;;  %v1396_v18 = vmul.f32 %v4397_v44, %v4397_v44  ;;  %v3266_v52 = vpop.eup %3265  ;;  %3269 = vrcp.f32 %v1250_v20  ;;  %v655_v16 = vmul.f32 %v654_v19, %v4287_v3 }
  0xc8   :  { %v712_v24 = vmul.f32 0.5, %v711_v56  ;;  %v699_v50 = vmul.f32 %v3260_v1, %v698_v23  ;;  %v4413_v45 = vmul.f32 %v3262_v46, %v3821_v26  ;;  %3271 = vrcp.f32 %v1249_v42  ;;  %1493 = vadd.xlane.f32.xlu2 %v1397_v51  ;;  %v4422_v23 = vpop.xlane.xlu1 %385 }
  0xc9   :  { %vm716_vm4 = vcmp.eq.f32.partialorder %v4315_v21, inf  ;;  %v686_v15 = vmul.f32 %v3264_v7, %v4353_v8  ;;  %405 = vadd.xlane.f32.xlu1 %v309_v59  ;;  %v684_v25 = vsel %vm682_vm15, %v683_v2, %v681_v58  ;;  %v669_v20 = vsel %vm668_vm0, %v4268_v53, %v667_v17  ;;  %1491 = vadd.xlane.f32.xlu0 %v1396_v18  ;;  %v4433_v18 = vpop.xlane.xlu0 %383 }
  0xca   :  { %v713_v19 = vsub.f32 1.5, %v712_v24  ;;  %v700_v56 = vmul.f32 0.5, %v699_v50  ;;  %v4425_v42 = vmul.f32 %v3266_v52, %v3835_v32  ;;  %v657_v46 = vsel %vm656_vm1, %v4287_v3, %v655_v16 }
  0xcb   :  { %v3268_v26 = vpop.eup %3267  ;;  %vm718_vm5 = vcmp.eq.f32.partialorder %v4315_v21, 0.0  ;;  %v687_v37 = vmul.f32 %v3264_v7, %v686_v15  ;;  %v719_v58 = vand.u32 2147483648, %v4315_v21  ;;  %v1254_v59 = vadd.f32 1e-10, %v684_v25  ;;  %v4446_v25 = vld [vmem:[%s6650_s0 + $0x88] sm:$0xff]  }
  0xcc   :  { %v714_v2 = vmul.f32 %v3258_v28, %v713_v19  ;;  %v701_v17 = vsub.f32 1.5, %v700_v56  ;;  %v1558_v51 = vmul.f32 %v3268_v26, %v4380_v6  ;;  %v6748_v24 = vand.u32 2147483648, %v4268_v53 }
  0xcd   :  { %v688_v52 = vmul.f32 0.5, %v687_v37  ;;  %3273 = vrsqrt.f32 %v4422_v23  ;;  %v3270_v16 = vpop.eup %3269  ;;  %v660_v28 = vsel %vm658_vm3, %v659_v36, %v657_v46  ;;  %vm704_vm6 = vcmp.eq.f32.partialorder %v4339_v11, inf }
  0xce   :  { %v672_v32 = vsel %vm670_vm2, %v6748_v24, %v669_v20  ;;  %v715_v50 = vmul.f32 %v714_v2, %v4315_v21  ;;  %v702_v15 = vmul.f32 %v3260_v1, %v701_v17  ;;  %v1559_v19 = vmul.f32 %v3268_v26, %v1558_v51  ;;  %v3272_v56 = vpop.eup %3271 }
  0xcf   :  { %v707_v53 = vand.u32 2147483648, %v4339_v11  ;;  %v689_v20 = vsub.f32 1.5, %v688_v52  ;;  %3275 = vrsqrt.f32 %v4433_v18  ;;  %v1253_v37 = vadd.f32 1e-10, %v672_v32  ;;  %v4464_v32 = vpop.xlane.xlu2 %1435 }
  0xd0   :  { %v717_v3 = vsel %vm716_vm4, %v4315_v21, %v715_v50  ;;  %vm706_vm7 = vcmp.eq.f32.partialorder %v4339_v11, 0.0  ;;  %vm692_vm8 = vcmp.eq.f32.partialorder %v4353_v8, inf  ;;  %v1560_v1 = vmul.f32 0.5, %v1559_v19 }
  0xd1   :  { %v4457_v36 = vmul.f32 %v3270_v16, %v3837_v33  ;;  %v1252_v46 = vadd.f32 1e-10, %v660_v28  ;;  %v690_v2 = vmul.f32 %v3264_v7, %v689_v20  ;;  %v4460_v17 = vunpack.c.l.bf16 %v4446_v25 }
  0xd2   :  { %3277 = vrcp.f32 %v1254_v59  ;;  %v703_v51 = vmul.f32 %v702_v15, %v4339_v11  ;;  %vm694_vm9 = vcmp.eq.f32.partialorder %v4353_v8, 0.0  ;;  %v1561_v24 = vsub.f32 1.5, %v1560_v1 }
  0xd3   :  { %6749 = vst [vmem:[#allocation40_spill] sm:$0xff] %v4460_v17  ;;  %v3274_v52 = vpop.eup %3273  ;;  %v720_v50 = vsel %vm718_vm5, %v719_v58, %v717_v3  ;;  %v691_v33 = vmul.f32 %v690_v2, %v4353_v8  ;;  %v311_v7 = vmul.f32 %v4460_v17, %v4460_v17  ;;  %v4472_v16 = vunpack.c.h.bf16 %v4369_v35 }
  0xd4   :  { %3279 = vrcp.f32 %v1253_v37  ;;  %v1562_v59 = vmul.f32 %v3268_v26, %v1561_v24  ;;  %vm1564_vm10 = vcmp.eq.f32.partialorder %v4380_v6, inf  ;;  %v734_v28 = vmul.f32 %v3274_v52, %v4422_v23 }
  0xd5   :  { %6750 = vst [vmem:[#allocation41_spill] sm:$0xff] %v4472_v16  ;;  %v3276_v15 = vpop.eup %3275  ;;  %3281 = vrcp.f32 %v1252_v46  ;;  %v1567_v19 = vand.u32 2147483648, %v4380_v6  ;;  %409 = vadd.xlane.f32.xlu2 %v311_v7  ;;  %v1398_v21 = vmul.f32 %v4472_v16, %v4472_v16  ;;  %v4480_v58 = vunpack.c.h.bf16 %v4378_v29  ;;  %v4493_v29 = vpop.xlane.xlu1 %1433 }
  0xd6   :  { %v1257_v20 = vadd.f32 1e-10, %v720_v50  ;;  %v705_v35 = vsel %vm704_vm6, %v4339_v11, %v703_v51  ;;  %v1563_v26 = vmul.f32 %v1562_v59, %v4380_v6  ;;  %v735_v37 = vmul.f32 %v3274_v52, %v734_v28 }
  0xd7   :  { %6751 = vst [vmem:[#allocation42_spill] sm:$0xff] %v4480_v58  ;;  %v693_v3 = vsel %vm692_vm8, %v4353_v8, %v691_v33  ;;  %v722_v1 = vmul.f32 %v3276_v15, %v4433_v18  ;;  %1495 = vadd.xlane.f32.xlu1 %v1398_v21  ;;  %v310_v46 = vmul.f32 %v4480_v58, %v4480_v58  ;;  %3283 = vrsqrt.f32 %v4464_v32 }
  0xd8   :  { %v3278_v2 = vpop.eup %3277  ;;  %v695_v51 = vand.u32 2147483648, %v4353_v8  ;;  %v1565_v24 = vsel %vm1564_vm10, %v4380_v6, %v1563_v26  ;;  %vm1566_vm11 = vcmp.eq.f32.partialorder %v4380_v6, 0.0  ;;  %v736_v50 = vmul.f32 0.5, %v735_v37  ;;  %v4508_v26 = vpop.xlane.xlu0 %1431 }
  0xd9   :  { %v4501_v33 = vmul.f32 %v3272_v56, %v3839_v34  ;;  %v708_v7 = vsel %vm706_vm7, %v707_v53, %v705_v35  ;;  %v1568_v59 = vsel %vm1566_vm11, %v1567_v19, %v1565_v24  ;;  %v723_v28 = vmul.f32 %v3276_v15, %v722_v1  ;;  %407 = vadd.xlane.f32.xlu0 %v310_v46  ;;  %v3179_v56 = vld [vmem:[%s6651_s1 + $0x88] sm:$0xff]   ;;  %v4519_v19 = vpop.xlane.xlu2 %1441 }
  0xda   :  { %v3280_v21 = vpop.eup %3279  ;;  %v696_v17 = vsel %vm694_vm9, %v695_v51, %v693_v3  ;;  %v2325_v58 = vadd.f32 1e-10, %v1568_v59  ;;  %v737_v16 = vsub.f32 1.5, %v736_v50  ;;  %3285 = vrsqrt.f32 %v4493_v29 }
  0xdb   :  { %v3282_v6 = vpop.eup %3281  ;;  %v4511_v34 = vmul.f32 %v3278_v2, %v3850_v39  ;;  %3287 = vrcp.f32 %v1257_v20  ;;  %vm740_vm12 = vcmp.eq.f32.partialorder %v4422_v23, inf  ;;  %v724_v11 = vmul.f32 0.5, %v723_v28 }
  0xdc   :  { %3289 = vrcp.f32 %v2325_v58  ;;  %v738_v8 = vmul.f32 %v3274_v52, %v737_v16  ;;  %vm742_vm13 = vcmp.eq.f32.partialorder %v4422_v23, 0.0  ;;  %v743_v53 = vand.u32 2147483648, %v4422_v23 }
  0xdd   :  { %v3284_v35 = vpop.eup %3283  ;;  %v1256_v37 = vadd.f32 1e-10, %v708_v7  ;;  %v1255_v39 = vadd.f32 1e-10, %v696_v17  ;;  %v725_v3 = vsub.f32 1.5, %v724_v11  ;;  %3291 = vrsqrt.f32 %v4508_v26 }
  0xde   :  { %v739_v20 = vmul.f32 %v738_v8, %v4422_v23  ;;  %v1594_v1 = vmul.f32 %v3284_v35, %v4464_v32  ;;  %v4524_v46 = vunpack.c.h.bf16 %v3179_v56  ;;  %v4527_v52 = vunpack.c.h.bf16 %v4446_v25 }
  0xdf   :  { %v4530_v16 = vmul.f32 %v3280_v21, %v3852_v40  ;;  %vm728_vm14 = vcmp.eq.f32.partialorder %v4433_v18, inf  ;;  %v4534_v17 = vunpack.c.l.bf16 %v3179_v56  ;;  %3293 = vrsqrt.f32 %v4519_v19 }
  0xe0   :  { %6752 = vst [vmem:[#allocation43_spill] sm:$0xff] %v4524_v46  ;;  %v3286_v2 = vpop.eup %3285  ;;  %v4538_v51 = vmul.f32 %v3282_v6, %v3854_v41  ;;  %v726_v24 = vmul.f32 %v3276_v15, %v725_v3  ;;  %v1595_v50 = vmul.f32 %v3284_v35, %v1594_v1  ;;  %v1400_v25 = vmul.f32 %v4524_v46, %v4524_v46  ;;  %v4554_v6 = vpop.xlane.xlu1 %1439 }
  0xe1   :  { %6753 = vst [vmem:[#allocation44_spill] sm:$0xff] %v4527_v52  ;;  %v4542_v7 = vpop.eup %3287  ;;  %3295 = vrcp.f32 %v1255_v39  ;;  %v741_v40 = vsel %vm740_vm12, %v4422_v23, %v739_v20  ;;  %v1582_v59 = vmul.f32 %v3286_v2, %v4493_v29  ;;  %v312_v28 = vmul.f32 %v4527_v52, %v4527_v52 }
  0xe2   :  { %6754 = vst [vmem:[#allocation45_spill] sm:$0xff] %v4534_v17  ;;  %v3290_v21 = vpop.eup %3289  ;;  %3297 = vrcp.f32 %v1256_v37  ;;  %vm730_vm15 = vcmp.eq.f32.partialorder %v4433_v18, 0.0  ;;  %v1596_v41 = vmul.f32 0.5, %v1595_v50  ;;  %vm1600_vm0 = vcmp.eq.f32.partialorder %v4464_v32, inf  ;;  %1499 = vadd.xlane.f32.xlu2 %v1400_v25 }
  0xe3   :  { %v1399_v15 = vmul.f32 %v4534_v17, %v4534_v17  ;;  %v3292_v11 = vpop.eup %3291  ;;  %v2517_v56 = vmul.f32 %v3290_v21, %v3888_v55  ;;  %vm1602_vm1 = vcmp.eq.f32.partialorder %v4464_v32, 0.0  ;;  %v1603_v8 = vand.u32 2147483648, %v4464_v32  ;;  %411 = vadd.xlane.f32.xlu1 %v312_v28 }
  0xe4   :  { %v1583_v39 = vmul.f32 %v3286_v2, %v1582_v59  ;;  %v744_v37 = vsel %vm742_vm13, %v743_v53, %v741_v40  ;;  %v727_v3 = vmul.f32 %v726_v24, %v4433_v18  ;;  %v1597_v20 = vsub.f32 1.5, %v1596_v41  ;;  %v4570_v24 = vpop.xlane.xlu0 %1437 }
  0xe5   :  { %v1570_v1 = vmul.f32 %v3292_v11, %v4508_v26  ;;  %1497 = vadd.xlane.f32.xlu0 %v1399_v15  ;;  %v3294_v50 = vpop.eup %3293  ;;  %v4564_v25 = vsub.f32 %v4211_v4, %v2517_v56  ;;  %vm1588_vm2 = vcmp.eq.f32.partialorder %v4493_v29, inf  ;;  %3299 = vrsqrt.f32 %v4554_v6 }
  0xe6   :  { %v1584_v55 = vmul.f32 0.5, %v1583_v39  ;;  %v1598_v59 = vmul.f32 %v3284_v35, %v1597_v20  ;;  %vm1590_vm3 = vcmp.eq.f32.partialorder %v4493_v29, 0.0  ;;  %v1630_v53 = vmul.f32 %v3294_v50, %v4519_v19 }
  0xe7   :  { %v1571_v23 = vmul.f32 %v3292_v11, %v1570_v1  ;;  %v3296_v40 = vpop.eup %3295  ;;  %v1259_v28 = vadd.f32 1e-10, %v744_v37  ;;  %v1591_v41 = vand.u32 2147483648, %v4493_v29  ;;  %vm1576_vm4 = vcmp.eq.f32.partialorder %v4508_v26, inf }
  0xe8   :  { %v1585_v21 = vsub.f32 1.5, %v1584_v55  ;;  %v4574_v4 = vpop.eup %3297  ;;  %v729_v35 = vsel %vm728_vm14, %v4433_v18, %v727_v3  ;;  %v1599_v15 = vmul.f32 %v1598_v59, %v4464_v32  ;;  %v1631_v39 = vmul.f32 %v3294_v50, %v1630_v53  ;;  %v4596_v59 = vld [vmem:[%s6651_s1 + $0x90] sm:$0xff]  }
  0xe9   :  { %v1572_v56 = vmul.f32 0.5, %v1571_v23  ;;  %vm1578_vm5 = vcmp.eq.f32.partialorder %v4508_v26, 0.0  ;;  %v1579_v37 = vand.u32 2147483648, %v4508_v26  ;;  %3301 = vrsqrt.f32 %v4570_v24 }
  0xea   :  { %v1586_v20 = vmul.f32 %v3286_v2, %v1585_v21  ;;  %v4584_v1 = vmul.f32 %v3296_v40, %v3872_v49  ;;  %v1601_v55 = vsel %vm1600_vm0, %v4464_v32, %v1599_v15  ;;  %v1632_v3 = vmul.f32 0.5, %v1631_v39  ;;  %v3149_v2 = vld [vmem:[%s6650_s0 + $0x90] sm:$0xff]  }
  0xeb   :  { %v1573_v58 = vsub.f32 1.5, %v1572_v56  ;;  %vm1636_vm6 = vcmp.eq.f32.partialorder %v4519_v19, inf  ;;  %v3300_v23 = vpop.eup %3299  ;;  %3303 = vrcp.f32 %v1259_v28  ;;  %v6755_v49 = vand.u32 2147483648, %v4433_v18 }
  0xec   :  { %v1604_v40 = vsel %vm1602_vm1, %v1603_v8, %v1601_v55  ;;  %v1587_v21 = vmul.f32 %v1586_v20, %v4493_v29  ;;  %v1633_v39 = vsub.f32 1.5, %v1632_v3  ;;  %v1618_v17 = vmul.f32 %v3300_v23, %v4554_v6 }
  0xed   :  { %v732_v53 = vsel %vm730_vm15, %v6755_v49, %v729_v35  ;;  %v2328_v15 = vadd.f32 1e-10, %v1604_v40  ;;  %v1574_v56 = vmul.f32 %v3292_v11, %v1573_v58  ;;  %v4609_v28 = vunpack.c.h.bf16 %v3149_v2  ;;  %v4621_v49 = vpop.xlane.xlu2 %1447 }
  0xee   :  { %v1589_v52 = vsel %vm1588_vm2, %v4493_v29, %v1587_v21  ;;  %v4612_v46 = vunpack.c.l.bf16 %v4596_v59  ;;  %v4614_v18 = vunpack.c.l.bf16 %v3149_v2  ;;  %v1258_v32 = vadd.f32 1e-10, %v732_v53 }
  0xef   :  { %6756 = vst [vmem:[#allocation46_spill] sm:$0xff] %v4609_v28  ;;  %3305 = vrcp.f32 %v2328_v15  ;;  %v1592_v8 = vsel %vm1590_vm3, %v1591_v41, %v1589_v52  ;;  %v1575_v58 = vmul.f32 %v1574_v56, %v4508_v26  ;;  %v3302_v11 = vpop.eup %3301  ;;  %v1634_v20 = vmul.f32 %v3294_v50, %v1633_v39  ;;  %v4638_v39 = vpop.xlane.xlu1 %1445 }
  0xf0   :  { %6757 = vst [vmem:[#allocation47_spill] sm:$0xff] %v4614_v18  ;;  %v2327_v35 = vadd.f32 1e-10, %v1592_v8  ;;  %v1619_v55 = vmul.f32 %v3300_v23, %v1618_v17  ;;  %v314_v3 = vmul.f32 %v4609_v28, %v4609_v28  ;;  %v1606_v53 = vmul.f32 %v3302_v11, %v4570_v24  ;;  %v4644_v8 = vpop.xlane.xlu0 %1443 }
  0xf1   :  { %v1577_v2 = vsel %vm1576_vm4, %v4508_v26, %v1575_v58  ;;  %v1401_v29 = vmul.f32 %v4612_v46, %v4612_v46  ;;  %v313_v52 = vmul.f32 %v4614_v18, %v4614_v18  ;;  %v4631_v41 = vpop.eup %3303  ;;  %v1635_v50 = vmul.f32 %v1634_v20, %v4519_v19 }
  0xf2   :  { %3307 = vrcp.f32 %v2327_v35  ;;  %v1580_v17 = vsel %vm1578_vm5, %v1579_v37, %v1577_v2  ;;  %v1620_v40 = vmul.f32 0.5, %v1619_v55  ;;  %415 = vadd.xlane.f32.xlu2 %v314_v3  ;;  %v1639_v15 = vand.u32 2147483648, %v4519_v19  ;;  %v4649_v35 = vld [vmem:[%s6652_s2] ss:$0 sm:$0xff] }
  0xf3   :  { %v2326_v21 = vadd.f32 1e-10, %v1580_v17  ;;  %v1607_v56 = vmul.f32 %v3302_v11, %v1606_v53  ;;  %1501 = vadd.xlane.f32.xlu1 %v1401_v29  ;;  %413 = vadd.xlane.f32.xlu0 %v313_v52  ;;  %3309 = vrsqrt.f32 %v4621_v49  ;;  %v1637_v26 = vsel %vm1636_vm6, %v4519_v19, %v1635_v50 }
  0xf4   :  { %3311 = vrcp.f32 %v1258_v32  ;;  %vm1638_vm7 = vcmp.eq.f32.partialorder %v4519_v19, 0.0  ;;  %v1621_v37 = vsub.f32 1.5, %v1620_v40  ;;  %v2645_v20 = vmul.f32 %v4564_v25, %v4564_v25  ;;  %v4661_v25 = vld [vmem:[%s6651_s1 + $0x98] sm:$0xff]  }
  0xf5   :  { %v3306_v58 = vpop.eup %3305  ;;  %3313 = vrcp.f32 %v2326_v21  ;;  %v1640_v32 = vsel %vm1638_vm7, %v1639_v15, %v1637_v26  ;;  %v1608_v55 = vmul.f32 0.5, %v1607_v56  ;;  %vm1624_vm8 = vcmp.eq.f32.partialorder %v4554_v6, inf  ;;  %v4672_v15 = vld [vmem:[%s6650_s0 + $0x98] sm:$0xff]  }
  0xf6   :  { %v2520_v3 = vmul.f32 %v3306_v58, %v3904_v62  ;;  %v2331_v2 = vadd.f32 1e-10, %v1640_v32  ;;  %v1622_v53 = vmul.f32 %v3300_v23, %v1621_v37  ;;  %3315 = vrsqrt.f32 %v4638_v39 }
  0xf7   :  { %vm1626_vm9 = vcmp.eq.f32.partialorder %v4554_v6, 0.0  ;;  %v1609_v19 = vsub.f32 1.5, %v1608_v55  ;;  %3317 = vrsqrt.f32 %v4644_v8  ;;  %v1627_v23 = vand.u32 2147483648, %v4554_v6 }
  0xf8   :  { %v3308_v29 = vpop.eup %3307  ;;  %v2584_v52 = vsub.f32 %v4272_v5, %v2520_v3  ;;  %3319 = vrcp.f32 %v2331_v2  ;;  %v1623_v62 = vmul.f32 %v1622_v53, %v4554_v6  ;;  %v2714_v50 = vmul.f32 %v4649_v35, %v2645_v20 }
  0xf9   :  { %v3310_v17 = vpop.eup %3309  ;;  %v2519_v40 = vmul.f32 %v3308_v29, %v3906_v63  ;;  %v1610_v21 = vmul.f32 %v3302_v11, %v1609_v19  ;;  %vm1612_vm10 = vcmp.eq.f32.partialorder %v4570_v24, inf  ;;  %vm1614_vm11 = vcmp.eq.f32.partialorder %v4570_v24, 0.0 }
  0xfa   :  { %v4674_v56 = vpop.eup %3311  ;;  %v1625_v5 = vsel %vm1624_vm8, %v4554_v6, %v1623_v62  ;;  %v1666_v26 = vmul.f32 %v3310_v17, %v4621_v49  ;;  %v4682_v63 = vunpack.c.l.bf16 %v4661_v25  ;;  %v1615_v32 = vand.u32 2147483648, %v4570_v24 }
  0xfb   :  { %v3314_v11 = vpop.eup %3313  ;;  %v2583_v37 = vsub.f32 %v4198_v57, %v2519_v40  ;;  %v1628_v58 = vsel %vm1626_vm9, %v1627_v23, %v1625_v5  ;;  %v1611_v20 = vmul.f32 %v1610_v21, %v4570_v24  ;;  %v4691_v19 = vunpack.c.l.bf16 %v4672_v15 }
  0xfc   :  { %6758 = vst [vmem:[#allocation48_spill] sm:$0xff] %v4682_v63  ;;  %v3316_v55 = vpop.eup %3315  ;;  %v2518_v3 = vmul.f32 %v3314_v11, %v3908_v0  ;;  %v2330_v2 = vadd.f32 1e-10, %v1628_v58  ;;  %v1667_v53 = vmul.f32 %v3310_v17, %v1666_v26  ;;  %v2648_v62 = vmul.f32 %v2584_v52, %v2584_v52 }
  0xfd   :  { %v3318_v29 = vpop.eup %3317  ;;  %v1613_v57 = vsel %vm1612_vm10, %v4570_v24, %v1611_v20  ;;  %vm1672_vm12 = vcmp.eq.f32.partialorder %v4621_v49, inf  ;;  %v1654_v6 = vmul.f32 %v3316_v55, %v4638_v39  ;;  %v1403_v23 = vmul.f32 %v4682_v63, %v4682_v63  ;;  %v4705_v20 = vpop.xlane.xlu2 %1453 }
  0xfe   :  { %v3320_v40 = vpop.eup %3319  ;;  %v2582_v0 = vsub.f32 %v4278_v9, %v2518_v3  ;;  %3321 = vrcp.f32 %v2330_v2  ;;  %v1616_v21 = vsel %vm1614_vm11, %v1615_v32, %v1613_v57  ;;  %v1668_v5 = vmul.f32 0.5, %v1667_v53 }
  0xff   :  { %vm1674_vm13 = vcmp.eq.f32.partialorder %v4621_v49, 0.0  ;;  %v2647_v52 = vmul.f32 %v2583_v37, %v2583_v37  ;;  %v2523_v26 = vmul.f32 %v3320_v40, %v3922_v12  ;;  %v2329_v11 = vadd.f32 1e-10, %v1616_v21  ;;  %1505 = vadd.xlane.f32.xlu2 %v1403_v23 }
 0x100   :  { %v1655_v58 = vmul.f32 %v3316_v55, %v1654_v6  ;;  %v2646_v28 = vmul.f32 %v2582_v0, %v2582_v0  ;;  %v1669_v63 = vsub.f32 1.5, %v1668_v5  ;;  %v1642_v18 = vmul.f32 %v3318_v29, %v4644_v8  ;;  %v4720_v6 = vpop.xlane.xlu1 %1451 }
 0x101   :  { %v315_v9 = vmul.f32 %v4691_v19, %v4691_v19  ;;  %v2587_v24 = vsub.f32 %v4347_v54, %v2523_v26  ;;  %3323 = vrcp.f32 %v2329_v11  ;;  %v4712_v37 = vunpack.c.h.bf16 %v4596_v59 }
 0x102   :  { %v1656_v32 = vmul.f32 0.5, %v1655_v58  ;;  %v2715_v12 = vmul.f32 %v4649_v35, %v2646_v28  ;;  %v1670_v3 = vmul.f32 %v3310_v17, %v1669_v63  ;;  %v1643_v2 = vmul.f32 %v3318_v29, %v1642_v18 }
 0x103   :  { %417 = vadd.xlane.f32.xlu1 %v315_v9  ;;  %3325 = vrsqrt.f32 %v4705_v20  ;;  %v1675_v53 = vand.u32 2147483648, %v4621_v49  ;;  %vm1660_vm14 = vcmp.eq.f32.partialorder %v4638_v39, inf  ;;  %v1402_v54 = vmul.f32 %v4712_v37, %v4712_v37 }
 0x104   :  { %v1657_v57 = vsub.f32 1.5, %v1656_v32  ;;  %v3322_v23 = vpop.eup %3321  ;;  %v2716_v59 = vmul.f32 %v4649_v35, %v2647_v52  ;;  %v2778_v40 = vadd.f32 %v2715_v12, %v2714_v50  ;;  %v1671_v28 = vmul.f32 %v1670_v3, %v4621_v49 }
 0x105   :  { %v1644_v18 = vmul.f32 0.5, %v1643_v2  ;;  %v2717_v17 = vmul.f32 %v4649_v35, %v2648_v62  ;;  %v2522_v63 = vmul.f32 %v3322_v23, %v3924_v13  ;;  %vm1662_vm15 = vcmp.eq.f32.partialorder %v4638_v39, 0.0  ;;  %1503 = vadd.xlane.f32.xlu0 %v1402_v54 }
 0x106   :  { %v1658_v0 = vmul.f32 %v3316_v55, %v1657_v57  ;;  %v2779_v21 = vadd.f32 %v2778_v40, %v2716_v59  ;;  %v1673_v5 = vsel %vm1672_vm12, %v4621_v49, %v1671_v28  ;;  %3327 = vrsqrt.f32 %v4720_v6  ;;  %v4742_v49 = vpop.xlane.xlu0 %1449 }
 0x107   :  { %v1645_v26 = vsub.f32 1.5, %v1644_v18  ;;  %v3324_v50 = vpop.eup %3323  ;;  %v2586_v52 = vsub.f32 %v4265_v31, %v2522_v63  ;;  %v1676_v62 = vsel %vm1674_vm13, %v1675_v53, %v1673_v5  ;;  %v1663_v55 = vand.u32 2147483648, %v4638_v39 }
 0x108   :  { %v1659_v13 = vmul.f32 %v1658_v0, %v4638_v39  ;;  %v2780_v58 = vadd.f32 %v2779_v21, %v2717_v17  ;;  %v2521_v9 = vmul.f32 %v3324_v50, %v3926_v14  ;;  %v2334_v32 = vadd.f32 1e-10, %v1676_v62 }
 0x109   :  { %v3326_v11 = vpop.eup %3325  ;;  %v1646_v12 = vmul.f32 %v3318_v29, %v1645_v26  ;;  %v2651_v3 = vmul.f32 %v2587_v24, %v2587_v24  ;;  %vm1648_vm0 = vcmp.eq.f32.partialorder %v4644_v8, inf  ;;  %vm1650_vm1 = vcmp.eq.f32.partialorder %v4644_v8, 0.0 }
 0x10a   :  { %v1661_v2 = vsel %vm1660_vm14, %v4638_v39, %v1659_v13  ;;  %v1702_v31 = vmul.f32 %v3326_v11, %v4705_v20  ;;  %v2585_v53 = vsub.f32 %v4195_v43, %v2521_v9  ;;  %3329 = vrcp.f32 %v2334_v32  ;;  %v4755_v43 = vld [vmem:[%s6650_s0 + $0xa0] sm:$0xff]  }
 0x10b   :  { %v1664_v57 = vsel %vm1662_vm15, %v1663_v55, %v1661_v2  ;;  %v1647_v14 = vmul.f32 %v1646_v12, %v4644_v8  ;;  %v1651_v24 = vand.u32 2147483648, %v4644_v8  ;;  %v2650_v59 = vmul.f32 %v2586_v52, %v2586_v52  ;;  %v4767_v52 = vpop.xlane.xlu2 %1459 }
 0x10c   :  { %v2333_v29 = vadd.f32 1e-10, %v1664_v57  ;;  %v1703_v54 = vmul.f32 %v3326_v11, %v1702_v31  ;;  %v3328_v23 = vpop.eup %3327  ;;  %v2649_v40 = vmul.f32 %v2585_v53, %v2585_v53  ;;  %3331 = vrsqrt.f32 %v4742_v49 }
 0x10d   :  { %v1649_v28 = vsel %vm1648_vm0, %v4644_v8, %v1647_v14  ;;  %v1690_v17 = vmul.f32 %v3328_v23, %v4720_v6  ;;  %v2720_v63 = vmul.f32 %v4649_v35, %v2651_v3  ;;  %vm1708_vm2 = vcmp.eq.f32.partialorder %v4705_v20, inf }
 0x10e   :  { %3333 = vrcp.f32 %v2333_v29  ;;  %v1652_v39 = vsel %vm1650_vm1, %v1651_v24, %v1649_v28  ;;  %v1704_v18 = vmul.f32 0.5, %v1703_v54  ;;  %v2718_v0 = vmul.f32 %v4649_v35, %v2649_v40  ;;  %v4784_v29 = vpop.xlane.xlu1 %1457  ;;  %v6759_v24 = vld [vmem:[#allocation10_spill] sm:$0xff] }
 0x10f   :  { %v2332_v21 = vadd.f32 1e-10, %v1652_v39  ;;  %v1691_v5 = vmul.f32 %v3328_v23, %v1690_v17  ;;  %v4762_v26 = vunpack.c.l.bf16 %v4755_v43  ;;  %v4765_v50 = vunpack.c.h.bf16 %v4661_v25 }
 0x110   :  { %v1705_v8 = vsub.f32 1.5, %v1704_v18  ;;  %v3330_v62 = vpop.eup %3329  ;;  %v2719_v13 = vmul.f32 %v4649_v35, %v2650_v59  ;;  %v2781_v55 = vadd.f32 %v2780_v58, %v2718_v0  ;;  %v4771_v9 = vunpack.c.h.bf16 %v4672_v15 }
 0x111   :  { %3335 = vrcp.f32 %v2332_v21  ;;  %v2526_v32 = vmul.f32 %v3330_v62, %v3937_v22  ;;  %v1692_v3 = vmul.f32 0.5, %v1691_v5  ;;  %v317_v2 = vmul.f32 %v4762_v26, %v4762_v26 }
 0x112   :  { %v1706_v12 = vmul.f32 %v3326_v11, %v1705_v8  ;;  %v3332_v31 = vpop.eup %3331  ;;  %v2782_v25 = vadd.f32 %v2781_v55, %v2719_v13  ;;  %v1404_v53 = vmul.f32 %v4765_v50, %v4765_v50  ;;  %v316_v57 = vmul.f32 %v4771_v9, %v4771_v9 }
 0x113   :  { %3337 = vrsqrt.f32 %v4767_v52  ;;  %v2590_v15 = vsub.f32 %v4413_v45, %v2526_v32  ;;  %v1693_v11 = vsub.f32 1.5, %v1692_v3  ;;  %v1678_v14 = vmul.f32 %v3332_v31, %v4742_v49  ;;  %421 = vadd.xlane.f32.xlu2 %v317_v2  ;;  %v3182_v2 = vld [vmem:[%s6651_s1 + $0xa0] sm:$0xff]  }
 0x114   :  { %v3334_v58 = vpop.eup %3333  ;;  %v1707_v22 = vmul.f32 %v1706_v12, %v4705_v20  ;;  %v2783_v59 = vadd.f32 %v2782_v25, %v2720_v63  ;;  %vm1710_vm3 = vcmp.eq.f32.partialorder %v4705_v20, 0.0  ;;  %v1711_v40 = vand.u32 2147483648, %v4705_v20  ;;  %1507 = vadd.xlane.f32.xlu1 %v1404_v53  ;;  %419 = vadd.xlane.f32.xlu0 %v316_v57  ;;  %v6760_v63 = vld [vmem:[#allocation11_spill] sm:$0xff] }
 0x115   :  { %v2525_v54 = vmul.f32 %v3334_v58, %v6759_v24  ;;  %v1694_v28 = vmul.f32 %v3328_v23, %v1693_v11  ;;  %vm1696_vm4 = vcmp.eq.f32.partialorder %v4720_v6, inf  ;;  %v1679_v39 = vmul.f32 %v3332_v31, %v1678_v14 }
 0x116   :  { %v1709_v45 = vsel %vm1708_vm2, %v4705_v20, %v1707_v22  ;;  %vm1698_vm5 = vcmp.eq.f32.partialorder %v4720_v6, 0.0  ;;  %3339 = vrsqrt.f32 %v4784_v29  ;;  %v1699_v62 = vand.u32 2147483648, %v4720_v6  ;;  %v4799_v20 = vpop.xlane.xlu0 %1455 }
 0x117   :  { %v3336_v18 = vpop.eup %3335  ;;  %v2589_v17 = vsub.f32 %v4303_v27, %v2525_v54  ;;  %v1712_v0 = vsel %vm1710_vm3, %v1711_v40, %v1709_v45  ;;  %v1695_v5 = vmul.f32 %v1694_v28, %v4720_v6  ;;  %v2654_v13 = vmul.f32 %v2590_v15, %v2590_v15 }
 0x118   :  { %v2524_v21 = vmul.f32 %v3336_v18, %v6760_v63  ;;  %v2337_v8 = vadd.f32 1e-10, %v1712_v0  ;;  %v1680_v32 = vmul.f32 0.5, %v1679_v39  ;;  %vm1684_vm6 = vcmp.eq.f32.partialorder %v4742_v49, inf }
 0x119   :  { %v3338_v23 = vpop.eup %3337  ;;  %v2653_v55 = vmul.f32 %v2589_v17, %v2589_v17  ;;  %v1697_v12 = vsel %vm1696_vm4, %v4720_v6, %v1695_v5  ;;  %vm1686_vm7 = vcmp.eq.f32.partialorder %v4742_v49, 0.0  ;;  %v1687_v58 = vand.u32 2147483648, %v4742_v49  ;;  %v4819_v6 = vpop.xlane.xlu2 %1465 }
 0x11a   :  { %v2588_v27 = vsub.f32 %v4318_v60, %v2524_v21  ;;  %3341 = vrcp.f32 %v2337_v8  ;;  %v1738_v3 = vmul.f32 %v3338_v23, %v4767_v52  ;;  %v1700_v25 = vsel %vm1698_vm5, %v1699_v62, %v1697_v12  ;;  %v6761_v62 = vld [vmem:[#allocation12_spill] sm:$0xff] }
 0x11b   :  { %v1681_v53 = vsub.f32 1.5, %v1680_v32  ;;  %3343 = vrsqrt.f32 %v4799_v20  ;;  %v2336_v57 = vadd.f32 1e-10, %v1700_v25  ;;  %v2723_v11 = vmul.f32 %v4649_v35, %v2654_v13 }
 0x11c   :  { %v2652_v60 = vmul.f32 %v2588_v27, %v2588_v27  ;;  %v1739_v15 = vmul.f32 %v3338_v23, %v1738_v3  ;;  %v3340_v22 = vpop.eup %3339  ;;  %v2722_v14 = vmul.f32 %v4649_v35, %v2653_v55  ;;  %v4817_v54 = vunpack.c.h.bf16 %v3182_v2 }
 0x11d   :  { %v1682_v24 = vmul.f32 %v3332_v31, %v1681_v53  ;;  %3345 = vrcp.f32 %v2336_v57  ;;  %v1726_v28 = vmul.f32 %v3340_v22, %v4784_v29  ;;  %v4827_v17 = vunpack.c.h.bf16 %v4755_v43 }
 0x11e   :  { %v2721_v40 = vmul.f32 %v4649_v35, %v2652_v60  ;;  %v1740_v45 = vmul.f32 0.5, %v1739_v15  ;;  %v1406_v18 = vmul.f32 %v4817_v54, %v4817_v54  ;;  %v4829_v0 = vunpack.c.l.bf16 %v3182_v2  ;;  %v6762_v2 = vld [vmem:[#allocation9_spill] sm:$0xff]  ;;  %v4848_v15 = vpop.xlane.xlu1 %1463 }
 0x11f   :  { %v1683_v39 = vmul.f32 %v1682_v24, %v4742_v49  ;;  %v1727_v8 = vmul.f32 %v3340_v22, %v1726_v28  ;;  %3347 = vrsqrt.f32 %v4819_v6  ;;  %v318_v43 = vmul.f32 %v4827_v17, %v4827_v17 }
 0x120   :  { %v3342_v31 = vpop.eup %3341  ;;  %v2784_v63 = vadd.f32 %v2783_v59, %v2721_v40  ;;  %v1741_v21 = vsub.f32 1.5, %v1740_v45  ;;  %1511 = vadd.xlane.f32.xlu2 %v1406_v18  ;;  %v1405_v32 = vmul.f32 %v4829_v0, %v4829_v0  ;;  %v4844_v25 = vmul.f32 %v4674_v56, %v6762_v2  ;;  %v6764_v2 = vld [vmem:[#allocation14_spill] sm:$0xff] }
 0x121   :  { %v3344_v5 = vpop.eup %3343  ;;  %v2529_v13 = vmul.f32 %v3342_v31, %v6761_v62  ;;  %v1685_v55 = vsel %vm1684_vm6, %v4742_v49, %v1683_v39  ;;  %v1728_v3 = vmul.f32 0.5, %v1727_v8  ;;  %423 = vadd.xlane.f32.xlu1 %v318_v43  ;;  %vm1744_vm8 = vcmp.eq.f32.partialorder %v4767_v52, inf  ;;  %v4864_v62 = vpop.xlane.xlu0 %1461  ;;  %v3152_v43 = vld [vmem:[%s6650_s0 + $0xa8] sm:$0xff]  }
 0x122   :  { %v2785_v27 = vadd.f32 %v2784_v63, %v2722_v14  ;;  %v1688_v59 = vsel %vm1686_vm7, %v1687_v58, %v1685_v55  ;;  %v1742_v12 = vmul.f32 %v3338_v23, %v1741_v21  ;;  %v1714_v57 = vmul.f32 %v3344_v5, %v4799_v20  ;;  %1509 = vadd.xlane.f32.xlu0 %v1405_v32  ;;  %v6763_v58 = vld [vmem:[#allocation13_spill] sm:$0xff] }
 0x123   :  { %v2593_v53 = vsub.f32 %v4501_v33, %v2529_v13  ;;  %v2335_v60 = vadd.f32 1e-10, %v1688_v59  ;;  %v3346_v24 = vpop.eup %3345  ;;  %v1729_v23 = vsub.f32 1.5, %v1728_v3  ;;  %v1747_v33 = vand.u32 2147483648, %v4767_v52 }
 0x124   :  { %v4850_v14 = vadd.f32 %v2785_v27, %v2723_v11  ;;  %v1743_v49 = vmul.f32 %v1742_v12, %v4767_v52  ;;  %v2528_v56 = vmul.f32 %v3346_v24, %v6763_v58  ;;  %v1715_v40 = vmul.f32 %v3344_v5, %v1714_v57  ;;  %v4879_v12 = vld [vmem:[%s6651_s1 + $0xa8] sm:$0xff]  }
 0x125   :  { %3349 = vrcp.f32 %v2335_v60  ;;  %v3348_v45 = vpop.eup %3347  ;;  %vm1746_vm9 = vcmp.eq.f32.partialorder %v4767_v52, 0.0  ;;  %v1730_v39 = vmul.f32 %v3340_v22, %v1729_v23  ;;  %vm1732_vm10 = vcmp.eq.f32.partialorder %v4784_v29, inf }
 0x126   :  { %v1745_v28 = vsel %vm1744_vm8, %v4767_v52, %v1743_v49  ;;  %3351 = vrsqrt.f32 %v4848_v15  ;;  %v2592_v11 = vsub.f32 %v4372_v47, %v2528_v56  ;;  %v1716_v31 = vmul.f32 0.5, %v1715_v40 }
 0x127   :  { %v1748_v18 = vsel %vm1746_vm9, %v1747_v33, %v1745_v28  ;;  %v1731_v21 = vmul.f32 %v1730_v39, %v4784_v29  ;;  %vm1734_vm11 = vcmp.eq.f32.partialorder %v4784_v29, 0.0  ;;  %v1774_v8 = vmul.f32 %v3348_v45, %v4819_v6 }
 0x128   :  { %v2340_v63 = vadd.f32 1e-10, %v1748_v18  ;;  %v1735_v52 = vand.u32 2147483648, %v4784_v29  ;;  %v1717_v22 = vsub.f32 1.5, %v1716_v31  ;;  %vm1720_vm12 = vcmp.eq.f32.partialorder %v4799_v20, inf  ;;  %v4898_v18 = vpop.xlane.xlu2 %1471 }
 0x129   :  { %vm1722_vm13 = vcmp.eq.f32.partialorder %v4799_v20, 0.0  ;;  %v1733_v47 = vsel %vm1732_vm10, %v4784_v29, %v1731_v21  ;;  %v1723_v13 = vand.u32 2147483648, %v4799_v20  ;;  %v1775_v55 = vmul.f32 %v3348_v45, %v1774_v8 }
 0x12a   :  { %3353 = vrcp.f32 %v2340_v63  ;;  %v1736_v27 = vsel %vm1734_vm11, %v1735_v52, %v1733_v47  ;;  %v1718_v59 = vmul.f32 %v3344_v5, %v1717_v22  ;;  %vm1780_vm14 = vcmp.eq.f32.partialorder %v4819_v6, inf  ;;  %v6765_v22 = vld [vmem:[#allocation15_spill] sm:$0xff] }
 0x12b   :  { %v3350_v32 = vpop.eup %3349  ;;  %3355 = vrsqrt.f32 %v4864_v62  ;;  %v2657_v3 = vmul.f32 %v2593_v53, %v2593_v53  ;;  %v2339_v57 = vadd.f32 1e-10, %v1736_v27  ;;  %v1776_v24 = vmul.f32 0.5, %v1775_v55 }
 0x12c   :  { %v3352_v29 = vpop.eup %3351  ;;  %v2527_v60 = vmul.f32 %v3350_v32, %v6764_v2  ;;  %vm1782_vm15 = vcmp.eq.f32.partialorder %v4819_v6, 0.0  ;;  %v2656_v49 = vmul.f32 %v2592_v11, %v2592_v11  ;;  %v1719_v5 = vmul.f32 %v1718_v59, %v4799_v20 }
 0x12d   :  { %v1762_v23 = vmul.f32 %v3352_v29, %v4848_v15  ;;  %v4885_v58 = vunpack.c.h.bf16 %v3152_v43  ;;  %3357 = vrcp.f32 %v2339_v57  ;;  %v1777_v33 = vsub.f32 1.5, %v1776_v24 }
 0x12e   :  { %v2591_v56 = vsub.f32 %v4383_v10, %v2527_v60  ;;  %v4889_v40 = vunpack.c.l.bf16 %v4879_v12  ;;  %v1721_v53 = vsel %vm1720_vm12, %v4799_v20, %v1719_v5  ;;  %v4896_v11 = vunpack.c.l.bf16 %v3152_v43 }
 0x12f   :  { %v1763_v28 = vmul.f32 %v3352_v29, %v1762_v23  ;;  %v320_v39 = vmul.f32 %v4885_v58, %v4885_v58  ;;  %v1724_v10 = vsel %vm1722_vm13, %v1723_v13, %v1721_v53  ;;  %v1778_v21 = vmul.f32 %v3348_v45, %v1777_v33 }
 0x130   :  { %v3354_v31 = vpop.eup %3353  ;;  %v2655_v63 = vmul.f32 %v2591_v56, %v2591_v56  ;;  %v1407_v8 = vmul.f32 %v4889_v40, %v4889_v40  ;;  %v2338_v55 = vadd.f32 1e-10, %v1724_v10  ;;  %v319_v43 = vmul.f32 %v4896_v11, %v4896_v11  ;;  %v4918_v56 = vpop.xlane.xlu1 %1469 }
 0x131   :  { %v3356_v52 = vpop.eup %3355  ;;  %v2532_v47 = vmul.f32 %v3354_v31, %v6765_v22  ;;  %v1764_v32 = vmul.f32 0.5, %v1763_v28  ;;  %427 = vadd.xlane.f32.xlu2 %v320_v39  ;;  %v1779_v59 = vmul.f32 %v1778_v21, %v4819_v6  ;;  %3359 = vrsqrt.f32 %v4898_v18 }
 0x132   :  { %v2724_v27 = vmul.f32 %v4649_v35, %v2655_v63  ;;  %v1750_v20 = vmul.f32 %v3356_v52, %v4864_v62  ;;  %1513 = vadd.xlane.f32.xlu1 %v1407_v8  ;;  %3361 = vrcp.f32 %v2338_v55  ;;  %v1783_v13 = vand.u32 2147483648, %v4819_v6  ;;  %425 = vadd.xlane.f32.xlu0 %v319_v43 }
 0x133   :  { %v2596_v45 = vsub.f32 %v4538_v51, %v2532_v47  ;;  %v1765_v2 = vsub.f32 1.5, %v1764_v32  ;;  %v3358_v60 = vpop.eup %3357  ;;  %v2725_v57 = vmul.f32 %v4649_v35, %v2656_v49  ;;  %v1781_v5 = vsel %vm1780_vm14, %v4819_v6, %v1779_v59  ;;  %v6766_v51 = vld [vmem:[#allocation16_spill] sm:$0xff]  ;;  %v6767_v32 = vld [vmem:[#allocation17_spill] sm:$0xff] }
 0x134   :  { %v2787_v24 = vadd.f32 %v4850_v14, %v2724_v27  ;;  %v1751_v23 = vmul.f32 %v3356_v52, %v1750_v20  ;;  %v2726_v33 = vmul.f32 %v4649_v35, %v2657_v3  ;;  %v2531_v53 = vmul.f32 %v3358_v60, %v6766_v51  ;;  %v4940_v20 = vld [vmem:[%s6651_s1 + $0xb0] sm:$0xff]  }
 0x135   :  { %v1784_v28 = vsel %vm1782_vm15, %v1783_v13, %v1781_v5  ;;  %v1766_v39 = vmul.f32 %v3352_v29, %v1765_v2  ;;  %vm1768_vm0 = vcmp.eq.f32.partialorder %v4848_v15, inf  ;;  %vm1770_vm1 = vcmp.eq.f32.partialorder %v4848_v15, 0.0  ;;  %v4930_v29 = vpop.xlane.xlu0 %1467 }
 0x136   :  { %v2788_v31 = vadd.f32 %v2787_v24, %v2725_v57  ;;  %v2343_v63 = vadd.f32 1e-10, %v1784_v28  ;;  %v1752_v14 = vmul.f32 0.5, %v1751_v23  ;;  %v2595_v49 = vsub.f32 %v4425_v42, %v2531_v53 }
 0x137   :  { %v1767_v10 = vmul.f32 %v1766_v39, %v4848_v15  ;;  %3363 = vrsqrt.f32 %v4918_v56  ;;  %v3360_v3 = vpop.eup %3359  ;;  %v1771_v6 = vand.u32 2147483648, %v4848_v15  ;;  %vm1756_vm2 = vcmp.eq.f32.partialorder %v4864_v62, inf }
 0x138   :  { %v2789_v21 = vadd.f32 %v2788_v31, %v2726_v33  ;;  %3365 = vrcp.f32 %v2343_v63  ;;  %v1753_v8 = vsub.f32 1.5, %v1752_v14  ;;  %v3362_v22 = vpop.eup %3361  ;;  %v2659_v47 = vmul.f32 %v2595_v49, %v2595_v49  ;;  %v4964_v31 = vpop.xlane.xlu2 %1475  ;;  %v6768_v63 = vld [vmem:[#allocation18_spill] sm:$0xff] }
 0x139   :  { %v1769_v55 = vsel %vm1768_vm0, %v4848_v15, %v1767_v10  ;;  %v1810_v42 = vmul.f32 %v3360_v3, %v4898_v18  ;;  %v2530_v43 = vmul.f32 %v3362_v22, %v6767_v32  ;;  %vm1758_vm3 = vcmp.eq.f32.partialorder %v4864_v62, 0.0  ;;  %v4947_v15 = vld [vmem:[%s6650_s0 + $0xb0] sm:$0xff]  }
 0x13a   :  { %v1772_v27 = vsel %vm1770_vm1, %v1771_v6, %v1769_v55  ;;  %v1754_v59 = vmul.f32 %v3356_v52, %v1753_v8  ;;  %v1759_v2 = vand.u32 2147483648, %v4864_v62  ;;  %3367 = vrsqrt.f32 %v4930_v29 }
 0x13b   :  { %v2342_v13 = vadd.f32 1e-10, %v1772_v27  ;;  %v1811_v60 = vmul.f32 %v3360_v3, %v1810_v42  ;;  %v2660_v57 = vmul.f32 %v2596_v45, %v2596_v45  ;;  %v2594_v52 = vsub.f32 %v4457_v36, %v2530_v43 }
 0x13c   :  { %v1755_v24 = vmul.f32 %v1754_v59, %v4864_v62  ;;  %vm1816_vm4 = vcmp.eq.f32.partialorder %v4898_v18, inf  ;;  %v2728_v23 = vmul.f32 %v4649_v35, %v2659_v47  ;;  %vm1818_vm5 = vcmp.eq.f32.partialorder %v4898_v18, 0.0 }
 0x13d   :  { %v3364_v5 = vpop.eup %3363  ;;  %3369 = vrcp.f32 %v2342_v13  ;;  %v1812_v33 = vmul.f32 0.5, %v1811_v60  ;;  %v4955_v51 = vunpack.c.l.bf16 %v4940_v20  ;;  %v2658_v28 = vmul.f32 %v2594_v52, %v2594_v52 }
 0x13e   :  { %v3366_v53 = vpop.eup %3365  ;;  %v1757_v36 = vsel %vm1756_vm2, %v4864_v62, %v1755_v24  ;;  %v1798_v45 = vmul.f32 %v3364_v5, %v4918_v56  ;;  %v4962_v39 = vunpack.c.l.bf16 %v4947_v15  ;;  %v4976_v27 = vunpack.c.h.bf16 %v4879_v12  ;;  %v6769_v24 = vld [vmem:[#allocation19_spill] sm:$0xff] }
 0x13f   :  { %v2535_v14 = vmul.f32 %v3366_v53, %v6768_v63  ;;  %v1760_v49 = vsel %vm1758_vm3, %v1759_v2, %v1757_v36  ;;  %v1813_v10 = vsub.f32 1.5, %v1812_v33  ;;  %v1409_v6 = vmul.f32 %v4955_v51, %v4955_v51 }
 0x140   :  { %v2727_v8 = vmul.f32 %v4649_v35, %v2658_v28  ;;  %v2341_v22 = vadd.f32 1e-10, %v1760_v49  ;;  %v1799_v47 = vmul.f32 %v3364_v5, %v1798_v45  ;;  %v321_v55 = vmul.f32 %v4962_v39, %v4962_v39  ;;  %v3368_v42 = vpop.eup %3367  ;;  %v4986_v28 = vpop.xlane.xlu1 %387 }
 0x141   :  { %v2599_v32 = vsub.f32 %v4584_v1, %v2535_v14  ;;  %v1814_v43 = vmul.f32 %v3360_v3, %v1813_v10  ;;  %1517 = vadd.xlane.f32.xlu2 %v1409_v6  ;;  %3371 = vrsqrt.f32 %v4964_v31  ;;  %v1786_v13 = vmul.f32 %v3368_v42, %v4930_v29 }
 0x142   :  { %v2790_v62 = vadd.f32 %v2789_v21, %v2727_v8  ;;  %3373 = vrcp.f32 %v2341_v22  ;;  %v1800_v59 = vmul.f32 0.5, %v1799_v47  ;;  %429 = vadd.xlane.f32.xlu1 %v321_v55  ;;  %v2729_v60 = vmul.f32 %v4649_v35, %v2660_v57  ;;  %v4999_v8 = vpop.xlane.xlu0 %1473 }
 0x143   :  { %v3370_v2 = vpop.eup %3369  ;;  %v1815_v52 = vmul.f32 %v1814_v43, %v4898_v18  ;;  %v1819_v1 = vand.u32 2147483648, %v4898_v18  ;;  %v1408_v3 = vmul.f32 %v4976_v27, %v4976_v27  ;;  %v1787_v21 = vmul.f32 %v3368_v42, %v1786_v13 }
 0x144   :  { %v2791_v12 = vadd.f32 %v2790_v62, %v2728_v23  ;;  %v2534_v33 = vmul.f32 %v3370_v2, %v6769_v24  ;;  %v1801_v53 = vsub.f32 1.5, %v1800_v59  ;;  %vm1804_vm6 = vcmp.eq.f32.partialorder %v4918_v56, inf  ;;  %v6770_v62 = vld [vmem:[#allocation20_spill] sm:$0xff] }
 0x145   :  { %v1817_v36 = vsel %vm1816_vm4, %v4898_v18, %v1815_v52  ;;  %vm1806_vm7 = vcmp.eq.f32.partialorder %v4918_v56, 0.0  ;;  %v1807_v57 = vand.u32 2147483648, %v4918_v56  ;;  %1515 = vadd.xlane.f32.xlu0 %v1408_v3  ;;  %v1788_v6 = vmul.f32 0.5, %v1787_v21 }
 0x146   :  { %v2598_v45 = vsub.f32 %v4511_v34, %v2534_v33  ;;  %v2792_v23 = vadd.f32 %v2791_v12, %v2729_v60  ;;  %v1820_v63 = vsel %vm1818_vm5, %v1819_v1, %v1817_v36  ;;  %v1802_v14 = vmul.f32 %v3364_v5, %v1801_v53 }
 0x147   :  { %v3372_v49 = vpop.eup %3371  ;;  %v2346_v10 = vadd.f32 1e-10, %v1820_v63  ;;  %vm1792_vm8 = vcmp.eq.f32.partialorder %v4930_v29, inf  ;;  %3375 = vrsqrt.f32 %v4986_v28  ;;  %v2663_v47 = vmul.f32 %v2599_v32, %v2599_v32  ;;  %v5013_v32 = vld [vmem:[%s6650_s0 + $0xb8] sm:$0xff]  }
 0x148   :  { %v3374_v22 = vpop.eup %3373  ;;  %v2662_v55 = vmul.f32 %v2598_v45, %v2598_v45  ;;  %v1803_v43 = vmul.f32 %v1802_v14, %v4918_v56  ;;  %v1834_v34 = vmul.f32 %v3372_v49, %v4964_v31  ;;  %v1789_v5 = vsub.f32 1.5, %v1788_v6 }
 0x149   :  { %v2533_v18 = vmul.f32 %v3374_v22, %v6770_v62  ;;  %3377 = vrcp.f32 %v2346_v10  ;;  %vm1794_vm9 = vcmp.eq.f32.partialorder %v4930_v29, 0.0  ;;  %v1795_v13 = vand.u32 2147483648, %v4930_v29  ;;  %v5040_v22 = vpop.xlane.xlu2 %391 }
 0x14a   :  { %v1805_v59 = vsel %vm1804_vm6, %v4918_v56, %v1803_v43  ;;  %v1835_v2 = vmul.f32 %v3372_v49, %v1834_v34  ;;  %3379 = vrsqrt.f32 %v4999_v8  ;;  %v1790_v1 = vmul.f32 %v3368_v42, %v1789_v5 }
 0x14b   :  { %v2597_v60 = vsub.f32 %v4530_v16, %v2533_v18  ;;  %v1808_v52 = vsel %vm1806_vm7, %v1807_v57, %v1805_v59  ;;  %vm1840_vm10 = vcmp.eq.f32.partialorder %v4964_v31, inf  ;;  %v2732_v3 = vmul.f32 %v4649_v35, %v2663_v47 }
 0x14c   :  { %v2731_v12 = vmul.f32 %v4649_v35, %v2662_v55  ;;  %v2345_v24 = vadd.f32 1e-10, %v1808_v52  ;;  %v1836_v33 = vmul.f32 0.5, %v1835_v2  ;;  %v1791_v36 = vmul.f32 %v1790_v1, %v4930_v29  ;;  %v6771_v55 = vld [vmem:[#allocation21_spill] sm:$0xff]  ;;  %v6772_v1 = vld [vmem:[#allocation6_spill] sm:$0xff] }
 0x14d   :  { %v3376_v53 = vpop.eup %3375  ;;  %v2661_v21 = vmul.f32 %v2597_v60, %v2597_v60  ;;  %v5023_v45 = vunpack.c.l.bf16 %v5013_v32  ;;  %v5026_v16 = vunpack.c.h.bf16 %v4940_v20  ;;  %v5030_v57 = vunpack.c.h.bf16 %v4947_v15 }
 0x14e   :  { %3381 = vrcp.f32 %v2345_v24  ;;  %v1837_v56 = vsub.f32 1.5, %v1836_v33  ;;  %v746_v42 = vmul.f32 %v3376_v53, %v4986_v28  ;;  %v1793_v10 = vsel %vm1792_vm8, %v4930_v29, %v1791_v36  ;;  %v6773_v36 = vld [vmem:[#allocation22_spill] sm:$0xff] }
 0x14f   :  { %v3378_v63 = vpop.eup %3377  ;;  %v2730_v14 = vmul.f32 %v4649_v35, %v2661_v21  ;;  %v323_v6 = vmul.f32 %v5023_v45, %v5023_v45  ;;  %v1410_v20 = vmul.f32 %v5026_v16, %v5026_v16  ;;  %v1796_v15 = vsel %vm1794_vm9, %v1795_v13, %v1793_v10  ;;  %v5058_v21 = vpop.xlane.xlu1 %1477 }
 0x150   :  { %v3380_v47 = vpop.eup %3379  ;;  %v2538_v43 = vmul.f32 %v3378_v63, %v6771_v55  ;;  %v1838_v34 = vmul.f32 %v3372_v49, %v1837_v56  ;;  %v747_v35 = vmul.f32 %v3376_v53, %v746_v42  ;;  %v2344_v18 = vadd.f32 1e-10, %v1796_v15  ;;  %v6775_v55 = vld [vmem:[#allocation8_spill] sm:$0xff] }
 0x151   :  { %v2793_v62 = vadd.f32 %v2792_v23, %v2730_v14  ;;  %v1822_v5 = vmul.f32 %v3380_v47, %v4999_v8  ;;  %433 = vadd.xlane.f32.xlu2 %v323_v6  ;;  %1519 = vadd.xlane.f32.xlu1 %v1410_v20  ;;  %v322_v59 = vmul.f32 %v5030_v57, %v5030_v57  ;;  %3383 = vrsqrt.f32 %v5040_v22  ;;  %v6774_v14 = vld [vmem:[#allocation7_spill] sm:$0xff] }
 0x152   :  { %v2602_v2 = vsub.f32 %v4844_v25, %v2538_v43  ;;  %v1839_v60 = vmul.f32 %v1838_v34, %v4964_v31  ;;  %v748_v52 = vmul.f32 0.5, %v747_v35  ;;  %3385 = vrcp.f32 %v2344_v18  ;;  %v6776_v18 = vld [vmem:[#allocation23_spill] sm:$0xff] }
 0x153   :  { %v2794_v29 = vadd.f32 %v2793_v62, %v2731_v12  ;;  %v1843_v49 = vand.u32 2147483648, %v4964_v31  ;;  %v1823_v23 = vmul.f32 %v3380_v47, %v1822_v5  ;;  %431 = vadd.xlane.f32.xlu0 %v322_v59  ;;  %v2473_v24 = vmul.f32 %v4542_v7, %v6772_v1  ;;  %v5063_v7 = vpop.xlane.xlu0 %389  ;;  %v3185_v62 = vld [vmem:[%s6651_s1 + $0xb8] sm:$0xff]  }
 0x154   :  { %v3382_v13 = vpop.eup %3381  ;;  %v1841_v33 = vsel %vm1840_vm10, %v4964_v31, %v1839_v60  ;;  %vm1842_vm11 = vcmp.eq.f32.partialorder %v4964_v31, 0.0  ;;  %v749_v25 = vsub.f32 1.5, %v748_v52  ;;  %v2472_v10 = vmul.f32 %v4574_v4, %v6774_v14 }
 0x155   :  { %v2537_v12 = vmul.f32 %v3382_v13, %v6773_v36  ;;  %v2795_v56 = vadd.f32 %v2794_v29, %v2732_v3  ;;  %v1844_v42 = vsel %vm1842_vm11, %v1843_v49, %v1841_v33  ;;  %v1824_v63 = vmul.f32 0.5, %v1823_v23 }
 0x156   :  { %v2348_v6 = vadd.f32 1e-10, %v1844_v42  ;;  %v750_v20 = vmul.f32 %v3376_v53, %v749_v25  ;;  %v5067_v43 = vmul.f32 %v4631_v41, %v6775_v55  ;;  %3387 = vrsqrt.f32 %v5058_v21 }
 0x157   :  { %v2601_v31 = vsub.f32 %v2473_v24, %v2537_v12  ;;  %v1825_v15 = vsub.f32 1.5, %v1824_v63  ;;  %v3384_v34 = vpop.eup %3383  ;;  %vm752_vm12 = vcmp.eq.f32.partialorder %v4986_v28, inf  ;;  %vm754_vm13 = vcmp.eq.f32.partialorder %v4986_v28, 0.0 }
 0x158   :  { %v751_v3 = vmul.f32 %v750_v20, %v4986_v28  ;;  %v755_v4 = vand.u32 2147483648, %v4986_v28  ;;  %v3386_v53 = vpop.eup %3385  ;;  %vm1828_vm14 = vcmp.eq.f32.partialorder %v4999_v8, inf  ;;  %v770_v41 = vmul.f32 %v3384_v34, %v5040_v22 }
 0x159   :  { %v1826_v35 = vmul.f32 %v3380_v47, %v1825_v15  ;;  %3389 = vrsqrt.f32 %v5063_v7  ;;  %v2536_v5 = vmul.f32 %v3386_v53, %v6776_v18  ;;  %vm1830_vm15 = vcmp.eq.f32.partialorder %v4999_v8, 0.0  ;;  %v5105_v15 = vld [vmem:[%s6652_s2] ss:$0 sm:$0xff]  ;;  %v5111_v53 = vpop.xlane.xlu1 %393 }
 0x15a   :  { %3391 = vrcp.f32 %v2348_v6  ;;  %v753_v59 = vsel %vm752_vm12, %v4986_v28, %v751_v3  ;;  %v1831_v52 = vand.u32 2147483648, %v4999_v8  ;;  %v771_v29 = vmul.f32 %v3384_v34, %v770_v41 }
 0x15b   :  { %v756_v60 = vsel %vm754_vm13, %v755_v4, %v753_v59  ;;  %v1827_v47 = vmul.f32 %v1826_v35, %v4999_v8  ;;  %v2665_v49 = vmul.f32 %v2601_v31, %v2601_v31  ;;  %v2600_v23 = vsub.f32 %v2472_v10, %v2536_v5  ;;  %v5100_v31 = vpop.xlane.xlu2 %1481 }
 0x15c   :  { %v1260_v13 = vadd.f32 1e-10, %v756_v60  ;;  %v5085_v1 = vunpack.c.h.bf16 %v3185_v62  ;;  %v3388_v24 = vpop.eup %3387  ;;  %v772_v25 = vmul.f32 0.5, %v771_v29  ;;  %v5091_v28 = vunpack.c.h.bf16 %v5013_v32  ;;  %v6777_v60 = vld [vmem:[#allocation24_spill] sm:$0xff] }
 0x15d   :  { %v1829_v33 = vsel %vm1828_vm14, %v4999_v8, %v1827_v47  ;;  %v5093_v36 = vunpack.c.l.bf16 %v3185_v62  ;;  %v2664_v12 = vmul.f32 %v2600_v23, %v2600_v23  ;;  %v1846_v63 = vmul.f32 %v3388_v24, %v5058_v21 }
 0x15e   :  { %3393 = vrcp.f32 %v1260_v13  ;;  %v1832_v42 = vsel %vm1830_vm15, %v1831_v52, %v1829_v33  ;;  %v2666_v10 = vmul.f32 %v2602_v2, %v2602_v2  ;;  %v773_v20 = vsub.f32 1.5, %v772_v25  ;;  %v5122_v13 = vpop.xlane.xlu0 %1479  ;;  %v6778_v33 = vld [vmem:[#allocation25_spill] sm:$0xff] }
 0x15f   :  { %v3390_v14 = vpop.eup %3389  ;;  %v2347_v6 = vadd.f32 1e-10, %v1832_v42  ;;  %v1412_v55 = vmul.f32 %v5085_v1, %v5085_v1  ;;  %v2733_v8 = vmul.f32 %v5105_v15, %v2664_v12  ;;  %v1847_v3 = vmul.f32 %v3388_v24, %v1846_v63 }
 0x160   :  { %v3392_v32 = vpop.eup %3391  ;;  %v758_v4 = vmul.f32 %v3390_v14, %v5063_v7  ;;  %v324_v2 = vmul.f32 %v5091_v28, %v5091_v28  ;;  %v2734_v35 = vmul.f32 %v5105_v15, %v2665_v49  ;;  %v774_v41 = vmul.f32 %v3384_v34, %v773_v20 }
 0x161   :  { %3395 = vrcp.f32 %v2347_v6  ;;  %1523 = vadd.xlane.f32.xlu2 %v1412_v55  ;;  %v1411_v62 = vmul.f32 %v5093_v36, %v5093_v36  ;;  %v2796_v18 = vadd.f32 %v2795_v56, %v2733_v8  ;;  %v1848_v5 = vmul.f32 0.5, %v1847_v3  ;;  %v6779_v3 = vld [vmem:[#allocation26_spill] sm:$0xff] }
 0x162   :  { %v759_v59 = vmul.f32 %v3390_v14, %v758_v4  ;;  %435 = vadd.xlane.f32.xlu1 %v324_v2  ;;  %3397 = vrsqrt.f32 %v5100_v31  ;;  %v2540_v47 = vmul.f32 %v3392_v32, %v6777_v60  ;;  %v775_v52 = vmul.f32 %v774_v41, %v5040_v22 }
 0x163   :  { %vm776_vm0 = vcmp.eq.f32.partialorder %v5040_v22, inf  ;;  %1521 = vadd.xlane.f32.xlu0 %v1411_v62  ;;  %3399 = vrsqrt.f32 %v5111_v53  ;;  %v2735_v29 = vmul.f32 %v5105_v15, %v2666_v10  ;;  %v2797_v49 = vadd.f32 %v2796_v18, %v2734_v35 }
 0x164   :  { %v3394_v34 = vpop.eup %3393  ;;  %v1849_v23 = vsub.f32 1.5, %v1848_v5  ;;  %v760_v56 = vmul.f32 0.5, %v759_v59  ;;  %vm778_vm1 = vcmp.eq.f32.partialorder %v5040_v22, 0.0  ;;  %v779_v12 = vand.u32 2147483648, %v5040_v22 }
 0x165   :  { %v2476_v25 = vmul.f32 %v3394_v34, %v6778_v33  ;;  %vm1852_vm2 = vcmp.eq.f32.partialorder %v5058_v21, inf  ;;  %v2798_v42 = vadd.f32 %v2797_v49, %v2735_v29  ;;  %v777_v63 = vsel %vm776_vm0, %v5040_v22, %v775_v52  ;;  %v5152_v22 = vld [vmem:[%s6651_s1 + $0xc0] sm:$0xff]  }
 0x166   :  { %v1850_v6 = vmul.f32 %v3388_v24, %v1849_v23  ;;  %v761_v20 = vsub.f32 1.5, %v760_v56  ;;  %vm1854_vm3 = vcmp.eq.f32.partialorder %v5058_v21, 0.0  ;;  %v1855_v32 = vand.u32 2147483648, %v5058_v21  ;;  %v3155_v24 = vld [vmem:[%s6650_s0 + $0xc0] sm:$0xff]  }
 0x167   :  { %v3396_v55 = vpop.eup %3395  ;;  %v2604_v10 = vsub.f32 %v2476_v25, %v2540_v47  ;;  %3401 = vrsqrt.f32 %v5122_v13  ;;  %vm764_vm4 = vcmp.eq.f32.partialorder %v5063_v7, inf  ;;  %v780_v62 = vsel %vm778_vm1, %v779_v12, %v777_v63 }
 0x168   :  { %v3398_v8 = vpop.eup %3397  ;;  %v2539_v4 = vmul.f32 %v3396_v55, %v6779_v3  ;;  %v1851_v2 = vmul.f32 %v1850_v6, %v5058_v21  ;;  %v762_v35 = vmul.f32 %v3390_v14, %v761_v20  ;;  %vm766_vm5 = vcmp.eq.f32.partialorder %v5063_v7, 0.0 }
 0x169   :  { %v3400_v41 = vpop.eup %3399  ;;  %v767_v18 = vand.u32 2147483648, %v5063_v7  ;;  %v1870_v5 = vmul.f32 %v3398_v8, %v5100_v31  ;;  %v2668_v52 = vmul.f32 %v2604_v10, %v2604_v10  ;;  %v5156_v49 = vunpack.c.h.bf16 %v3155_v24 }
 0x16a   :  { %v2603_v59 = vsub.f32 %v5067_v43, %v2539_v4  ;;  %v1853_v14 = vsel %vm1852_vm2, %v5058_v21, %v1851_v2  ;;  %v763_v60 = vmul.f32 %v762_v35, %v5063_v7  ;;  %v782_v47 = vmul.f32 %v3400_v41, %v5111_v53 }
 0x16b   :  { %v1856_v34 = vsel %vm1854_vm3, %v1855_v32, %v1853_v14  ;;  %v1871_v29 = vmul.f32 %v3398_v8, %v1870_v5  ;;  %vm1876_vm6 = vcmp.eq.f32.partialorder %v5100_v31, inf  ;;  %vm1878_vm7 = vcmp.eq.f32.partialorder %v5100_v31, 0.0  ;;  %v5171_v32 = vpop.xlane.xlu2 %397 }
 0x16c   :  { %v2667_v43 = vmul.f32 %v2603_v59, %v2603_v59  ;;  %v2349_v23 = vadd.f32 1e-10, %v1856_v34  ;;  %v765_v56 = vsel %vm764_vm4, %v5063_v7, %v763_v60  ;;  %v783_v33 = vmul.f32 %v3400_v41, %v782_v47  ;;  %v5179_v59 = vpop.xlane.xlu1 %1483 }
 0x16d   :  { %v3402_v25 = vpop.eup %3401  ;;  %v768_v12 = vsel %vm766_vm5, %v767_v18, %v765_v56  ;;  %v1872_v63 = vmul.f32 0.5, %v1871_v29  ;;  %v326_v21 = vmul.f32 %v5156_v49, %v5156_v49  ;;  %v5168_v6 = vunpack.c.l.bf16 %v5152_v22 }
 0x16e   :  { %v2736_v20 = vmul.f32 %v5105_v15, %v2667_v43  ;;  %3403 = vrcp.f32 %v2349_v23  ;;  %v1261_v55 = vadd.f32 1e-10, %v768_v12  ;;  %v784_v10 = vmul.f32 0.5, %v783_v33 }
 0x16f   :  { %v1873_v3 = vsub.f32 1.5, %v1872_v63  ;;  %v1858_v7 = vmul.f32 %v3402_v25, %v5122_v13  ;;  %439 = vadd.xlane.f32.xlu2 %v326_v21  ;;  %v1413_v4 = vmul.f32 %v5168_v6, %v5168_v6  ;;  %v5176_v2 = vunpack.c.l.bf16 %v3155_v24  ;;  %v5204_v21 = vld [vmem:[%s6651_s1 + $0xc8] sm:$0xff]  }
 0x170   :  { %v2737_v35 = vmul.f32 %v5105_v15, %v2668_v52  ;;  %v2799_v18 = vadd.f32 %v2798_v42, %v2736_v20  ;;  %3405 = vrcp.f32 %v1261_v55  ;;  %v785_v5 = vsub.f32 1.5, %v784_v10  ;;  %v5187_v52 = vpop.xlane.xlu0 %395 }
 0x171   :  { %v1874_v14 = vmul.f32 %v3398_v8, %v1873_v3  ;;  %v1859_v60 = vmul.f32 %v3402_v25, %v1858_v7  ;;  %1525 = vadd.xlane.f32.xlu1 %v1413_v4  ;;  %v325_v47 = vmul.f32 %v5176_v2, %v5176_v2  ;;  %3407 = vrsqrt.f32 %v5171_v32  ;;  %v5215_v3 = vld [vmem:[%s6650_s0 + $0xc8] sm:$0xff]   ;;  %v6781_v4 = vld [vmem:[#allocation29_spill] sm:$0xff] }
 0x172   :  { %v1262_v34 = vadd.f32 1e-10, %v780_v62  ;;  %v5184_v29 = vadd.f32 %v2799_v18, %v2737_v35  ;;  %v1879_v24 = vand.u32 2147483648, %v5100_v31  ;;  %v786_v43 = vmul.f32 %v3400_v41, %v785_v5  ;;  %v6780_v41 = vld [vmem:[#allocation28_spill] sm:$0xff] }
 0x173   :  { %v1875_v42 = vmul.f32 %v1874_v14, %v5100_v31  ;;  %vm788_vm8 = vcmp.eq.f32.partialorder %v5111_v53, inf  ;;  %v1860_v8 = vmul.f32 0.5, %v1859_v60  ;;  %437 = vadd.xlane.f32.xlu0 %v325_v47  ;;  %3409 = vrsqrt.f32 %v5179_v59 }
 0x174   :  { %v3404_v23 = vpop.eup %3403  ;;  %v787_v56 = vmul.f32 %v786_v43, %v5111_v53  ;;  %vm790_vm9 = vcmp.eq.f32.partialorder %v5111_v53, 0.0  ;;  %v791_v62 = vand.u32 2147483648, %v5111_v53  ;;  %vm1864_vm10 = vcmp.eq.f32.partialorder %v5122_v13, inf }
 0x175   :  { %v2541_v33 = vmul.f32 %v3404_v23, %v6780_v41  ;;  %v1877_v12 = vsel %vm1876_vm6, %v5100_v31, %v1875_v42  ;;  %v1861_v63 = vsub.f32 1.5, %v1860_v8  ;;  %3411 = vrsqrt.f32 %v5187_v52 }
 0x176   :  { %v3406_v20 = vpop.eup %3405  ;;  %3413 = vrcp.f32 %v1262_v34  ;;  %v1880_v55 = vsel %vm1878_vm7, %v1879_v24, %v1877_v12  ;;  %v789_v10 = vsel %vm788_vm8, %v5111_v53, %v787_v56  ;;  %vm1866_vm11 = vcmp.eq.f32.partialorder %v5122_v13, 0.0  ;;  %v5232_v56 = vpop.xlane.xlu2 %1487 }
 0x177   :  { %v3408_v7 = vpop.eup %3407  ;;  %v2477_v35 = vmul.f32 %v3406_v20, %v6781_v4  ;;  %v2351_v18 = vadd.f32 1e-10, %v1880_v55  ;;  %v792_v5 = vsel %vm790_vm9, %v791_v62, %v789_v10  ;;  %v1862_v31 = vmul.f32 %v3402_v25, %v1861_v63 }
 0x178   :  { %v1263_v14 = vadd.f32 1e-10, %v792_v5  ;;  %v1867_v60 = vand.u32 2147483648, %v5122_v13  ;;  %v806_v47 = vmul.f32 %v3408_v7, %v5171_v32  ;;  %v5223_v34 = vunpack.c.l.bf16 %v5204_v21 }
 0x179   :  { %v3410_v24 = vpop.eup %3409  ;;  %v2605_v43 = vsub.f32 %v2477_v35, %v2541_v33  ;;  %3415 = vrcp.f32 %v2351_v18  ;;  %v1863_v42 = vmul.f32 %v1862_v31, %v5122_v13  ;;  %v5227_v8 = vunpack.c.l.bf16 %v5215_v3 }
 0x17a   :  { %6782 = vst [vmem:[#allocation10_spill] sm:$0xff] %v5223_v34  ;;  %3417 = vrcp.f32 %v1263_v14  ;;  %v807_v53 = vmul.f32 %v3408_v7, %v806_v47  ;;  %v1882_v25 = vmul.f32 %v3410_v24, %v5179_v59  ;;  %v1415_v23 = vmul.f32 %v5223_v34, %v5223_v34 }
 0x17b   :  { %6783 = vst [vmem:[#allocation11_spill] sm:$0xff] %v5227_v8  ;;  %v3412_v62 = vpop.eup %3411  ;;  %v2669_v41 = vmul.f32 %v2605_v43, %v2605_v43  ;;  %v1865_v33 = vsel %vm1864_vm10, %v5122_v13, %v1863_v42  ;;  %v327_v12 = vmul.f32 %v5227_v8, %v5227_v8  ;;  %v5240_v63 = vunpack.c.h.bf16 %v5152_v22  ;;  %v5249_v43 = vpop.xlane.xlu1 %399 }
 0x17c   :  { %v3414_v20 = vpop.eup %3413  ;;  %v1868_v55 = vsel %vm1866_vm11, %v1867_v60, %v1865_v33  ;;  %v808_v10 = vmul.f32 0.5, %v807_v53  ;;  %v1883_v4 = vmul.f32 %v3410_v24, %v1882_v25  ;;  %v794_v35 = vmul.f32 %v3412_v62, %v5187_v52  ;;  %1529 = vadd.xlane.f32.xlu2 %v1415_v23  ;;  %v6785_v53 = vld [vmem:[#allocation30_spill] sm:$0xff] }
 0x17d   :  { %6784 = vst [vmem:[#allocation12_spill] sm:$0xff] %v5240_v63  ;;  %v2738_v18 = vmul.f32 %v5105_v15, %v2669_v41  ;;  %v2350_v5 = vadd.f32 1e-10, %v1868_v55  ;;  %441 = vadd.xlane.f32.xlu1 %v327_v12  ;;  %v1414_v31 = vmul.f32 %v5240_v63, %v5240_v63  ;;  %3419 = vrsqrt.f32 %v5232_v56  ;;  %v5255_v12 = vpop.xlane.xlu0 %1485  ;;  %v6786_v55 = vld [vmem:[#allocation27_spill] sm:$0xff] }
 0x17e   :  { %v809_v22 = vsub.f32 1.5, %v808_v10  ;;  %v1884_v14 = vmul.f32 0.5, %v1883_v4  ;;  %v795_v47 = vmul.f32 %v3412_v62, %v794_v35  ;;  %v2478_v10 = vmul.f32 %v3414_v20, %v6786_v55  ;;  %v6787_v4 = vld [vmem:[#allocation31_spill] sm:$0xff] }
 0x17f   :  { %v3416_v13 = vpop.eup %3415  ;;  %v5252_v60 = vadd.f32 %v5184_v29, %v2738_v18  ;;  %3421 = vrcp.f32 %v2350_v5  ;;  %1527 = vadd.xlane.f32.xlu0 %v1414_v31  ;;  %vm812_vm12 = vcmp.eq.f32.partialorder %v5171_v32, inf  ;;  %v815_v29 = vand.u32 2147483648, %v5171_v32 }
 0x180   :  { %v3418_v42 = vpop.eup %3417  ;;  %v2543_v25 = vmul.f32 %v3416_v13, %v6785_v53  ;;  %v810_v23 = vmul.f32 %v3408_v7, %v809_v22  ;;  %v1885_v41 = vsub.f32 1.5, %v1884_v14  ;;  %v796_v33 = vmul.f32 0.5, %v795_v47  ;;  %v5266_v7 = vld [vmem:[%s6650_s0 + $0xd0] sm:$0xff]  }
 0x181   :  { %v2479_v35 = vmul.f32 %v3418_v42, %v6787_v4  ;;  %3423 = vrsqrt.f32 %v5249_v43  ;;  %vm1888_vm13 = vcmp.eq.f32.partialorder %v5179_v59, inf  ;;  %vm814_vm14 = vcmp.eq.f32.partialorder %v5171_v32, 0.0 }
 0x182   :  { %v1886_v18 = vmul.f32 %v3410_v24, %v1885_v41  ;;  %v797_v5 = vsub.f32 1.5, %v796_v33  ;;  %v811_v20 = vmul.f32 %v810_v23, %v5171_v32  ;;  %vm1890_vm15 = vcmp.eq.f32.partialorder %v5179_v59, 0.0  ;;  %v6788_v23 = vld [vmem:[#allocation32_spill] sm:$0xff] }
 0x183   :  { %v3420_v31 = vpop.eup %3419  ;;  %v2607_v22 = vsub.f32 %v2479_v35, %v2543_v25  ;;  %3425 = vrsqrt.f32 %v5255_v12  ;;  %v1891_v14 = vand.u32 2147483648, %v5179_v59  ;;  %vm800_vm0 = vcmp.eq.f32.partialorder %v5187_v52, inf }
 0x184   :  { %v1887_v24 = vmul.f32 %v1886_v18, %v5179_v59  ;;  %v798_v47 = vmul.f32 %v3412_v62, %v797_v5  ;;  %v1906_v13 = vmul.f32 %v3420_v31, %v5232_v56  ;;  %vm802_vm1 = vcmp.eq.f32.partialorder %v5187_v52, 0.0 }
 0x185   :  { %v3422_v42 = vpop.eup %3421  ;;  %v803_v53 = vand.u32 2147483648, %v5187_v52  ;;  %v5279_v25 = vunpack.c.l.bf16 %v5266_v7  ;;  %v1915_v55 = vand.u32 2147483648, %v5232_v56  ;;  %v813_v35 = vsel %vm812_vm12, %v5171_v32, %v811_v20 }
 0x186   :  { %v2542_v41 = vmul.f32 %v3422_v42, %v6788_v23  ;;  %v1889_v33 = vsel %vm1888_vm13, %v5179_v59, %v1887_v24  ;;  %v799_v62 = vmul.f32 %v798_v47, %v5187_v52  ;;  %v1907_v5 = vmul.f32 %v3420_v31, %v1906_v13 }
 0x187   :  { %v3424_v4 = vpop.eup %3423  ;;  %v1892_v18 = vsel %vm1890_vm15, %v1891_v14, %v1889_v33  ;;  %v329_v42 = vmul.f32 %v5279_v25, %v5279_v25  ;;  %v2671_v23 = vmul.f32 %v2607_v22, %v2607_v22  ;;  %vm1912_vm2 = vcmp.eq.f32.partialorder %v5232_v56, inf }
 0x188   :  { %v2606_v63 = vsub.f32 %v2478_v10, %v2542_v41  ;;  %v2352_v8 = vadd.f32 1e-10, %v1892_v18  ;;  %v801_v24 = vsel %vm800_vm0, %v5187_v52, %v799_v62  ;;  %v1908_v34 = vmul.f32 0.5, %v1907_v5  ;;  %v5306_v41 = vpop.xlane.xlu2 %403 }
 0x189   :  { %v3426_v47 = vpop.eup %3425  ;;  %v804_v20 = vsel %vm802_vm1, %v803_v53, %v801_v24  ;;  %vm1914_vm3 = vcmp.eq.f32.partialorder %v5232_v56, 0.0  ;;  %v818_v59 = vmul.f32 %v3424_v4, %v5249_v43  ;;  %445 = vadd.xlane.f32.xlu2 %v329_v42  ;;  %v5303_v22 = vunpack.c.h.bf16 %v5204_v21 }
 0x18a   :  { %v2670_v10 = vmul.f32 %v2606_v63, %v2606_v63  ;;  %3427 = vrcp.f32 %v2352_v8  ;;  %v1264_v14 = vadd.f32 1e-10, %v804_v20  ;;  %v1894_v13 = vmul.f32 %v3426_v47, %v5255_v12  ;;  %v5316_v63 = vpop.xlane.xlu1 %1489 }
 0x18b   :  { %v1909_v33 = vsub.f32 1.5, %v1908_v34  ;;  %v819_v62 = vmul.f32 %v3424_v4, %v818_v59  ;;  %v1416_v52 = vmul.f32 %v5303_v22, %v5303_v22  ;;  %v5311_v53 = vunpack.c.h.bf16 %v5215_v3 }
 0x18c   :  { %v2739_v18 = vmul.f32 %v5105_v15, %v2670_v10  ;;  %v816_v21 = vsel %vm814_vm14, %v815_v29, %v813_v35  ;;  %3429 = vrcp.f32 %v1264_v14  ;;  %v1895_v8 = vmul.f32 %v3426_v47, %v1894_v13 }
 0x18d   :  { %v1910_v5 = vmul.f32 %v3420_v31, %v1909_v33  ;;  %v820_v42 = vmul.f32 0.5, %v819_v62  ;;  %1531 = vadd.xlane.f32.xlu1 %v1416_v52  ;;  %v328_v34 = vmul.f32 %v5311_v53, %v5311_v53  ;;  %3431 = vrsqrt.f32 %v5306_v41  ;;  %v5327_v31 = vpop.xlane.xlu0 %401  ;;  %v3188_v52 = vld [vmem:[%s6651_s1 + $0xd0] sm:$0xff]  }
 0x18e   :  { %v2740_v3 = vmul.f32 %v5105_v15, %v2671_v23  ;;  %v2802_v24 = vadd.f32 %v5252_v60, %v2739_v18  ;;  %vm824_vm4 = vcmp.eq.f32.partialorder %v5249_v43, inf  ;;  %v1896_v32 = vmul.f32 0.5, %v1895_v8  ;;  %v6789_v60 = vld [vmem:[#allocation34_spill] sm:$0xff] }
 0x18f   :  { %v1911_v29 = vmul.f32 %v1910_v5, %v5232_v56  ;;  %v821_v35 = vsub.f32 1.5, %v820_v42  ;;  %vm826_vm5 = vcmp.eq.f32.partialorder %v5249_v43, 0.0  ;;  %443 = vadd.xlane.f32.xlu0 %v328_v34  ;;  %3433 = vrsqrt.f32 %v5316_v63  ;;  %v6790_v42 = vld [vmem:[#allocation35_spill] sm:$0xff] }
 0x190   :  { %v3428_v20 = vpop.eup %3427  ;;  %v1265_v59 = vadd.f32 1e-10, %v816_v21  ;;  %v2803_v10 = vadd.f32 %v2802_v24, %v2740_v3  ;;  %v827_v23 = vand.u32 2147483648, %v5249_v43  ;;  %v1897_v14 = vsub.f32 1.5, %v1896_v32 }
 0x191   :  { %v2544_v13 = vmul.f32 %v3428_v20, %v6789_v60  ;;  %v1913_v33 = vsel %vm1912_vm2, %v5232_v56, %v1911_v29  ;;  %v822_v62 = vmul.f32 %v3424_v4, %v821_v35  ;;  %vm1900_vm6 = vcmp.eq.f32.partialorder %v5255_v12, inf }
 0x192   :  { %v3430_v18 = vpop.eup %3429  ;;  %v1916_v21 = vsel %vm1914_vm3, %v1915_v55, %v1913_v33  ;;  %v1898_v8 = vmul.f32 %v3426_v47, %v1897_v14  ;;  %vm1902_vm7 = vcmp.eq.f32.partialorder %v5255_v12, 0.0  ;;  %3435 = vrsqrt.f32 %v5327_v31 }
 0x193   :  { %v3432_v5 = vpop.eup %3431  ;;  %v2480_v34 = vmul.f32 %v3430_v18, %v6790_v42  ;;  %v2354_v3 = vadd.f32 1e-10, %v1916_v21  ;;  %v823_v4 = vmul.f32 %v822_v62, %v5249_v43  ;;  %v1903_v24 = vand.u32 2147483648, %v5255_v12 }
 0x194   :  { %3437 = vrcp.f32 %v1265_v59  ;;  %v1899_v32 = vmul.f32 %v1898_v8, %v5255_v12  ;;  %v842_v29 = vmul.f32 %v3432_v5, %v5306_v41  ;;  %v5347_v56 = vunpack.c.h.bf16 %v3188_v52 }
 0x195   :  { %v3434_v55 = vpop.eup %3433  ;;  %v2608_v47 = vsub.f32 %v2480_v34, %v2544_v13  ;;  %3439 = vrcp.f32 %v2354_v3  ;;  %v825_v35 = vsel %vm824_vm4, %v5249_v43, %v823_v4  ;;  %v5353_v20 = vunpack.c.h.bf16 %v5266_v7  ;;  %v5367_v34 = vpop.xlane.xlu2 %1493 }
 0x196   :  { %6791 = vst [vmem:[#allocation9_spill] sm:$0xff] %v5347_v56  ;;  %v828_v14 = vsel %vm826_vm5, %v827_v23, %v825_v35  ;;  %v1901_v59 = vsel %vm1900_vm6, %v5255_v12, %v1899_v32  ;;  %v843_v60 = vmul.f32 %v3432_v5, %v842_v29  ;;  %v1918_v33 = vmul.f32 %v3434_v55, %v5316_v63 }
 0x197   :  { %6792 = vst [vmem:[#allocation13_spill] sm:$0xff] %v5353_v20  ;;  %v2672_v62 = vmul.f32 %v2608_v47, %v2608_v47  ;;  %v1266_v13 = vadd.f32 1e-10, %v828_v14  ;;  %v1904_v18 = vsel %vm1902_vm7, %v1903_v24, %v1901_v59  ;;  %v1418_v21 = vmul.f32 %v5347_v56, %v5347_v56  ;;  %v5373_v47 = vpop.xlane.xlu1 %405 }
 0x198   :  { %v3436_v7 = vpop.eup %3435  ;;  %v2353_v8 = vadd.f32 1e-10, %v1904_v18  ;;  %v844_v42 = vmul.f32 0.5, %v843_v60  ;;  %v1919_v43 = vmul.f32 %v3434_v55, %v1918_v33  ;;  %v330_v23 = vmul.f32 %v5353_v20, %v5353_v20 }
 0x199   :  { %v2741_v3 = vmul.f32 %v5105_v15, %v2672_v62  ;;  %3441 = vrcp.f32 %v1266_v13  ;;  %v830_v4 = vmul.f32 %v3436_v7, %v5327_v31  ;;  %1535 = vadd.xlane.f32.xlu2 %v1418_v21  ;;  %v5371_v12 = vunpack.c.l.bf16 %v3188_v52  ;;  %v5382_v62 = vpop.xlane.xlu0 %1491  ;;  %v6794_v13 = vld [vmem:[#allocation33_spill] sm:$0xff] }
 0x19a   :  { %v3438_v24 = vpop.eup %3437  ;;  %3443 = vrcp.f32 %v2353_v8  ;;  %v845_v32 = vsub.f32 1.5, %v844_v42  ;;  %v1920_v29 = vmul.f32 0.5, %v1919_v43  ;;  %447 = vadd.xlane.f32.xlu1 %v330_v23  ;;  %vm848_vm8 = vcmp.eq.f32.partialorder %v5306_v41, inf  ;;  %v6795_v8 = vld [vmem:[#allocation36_spill] sm:$0xff] }
 0x19b   :  { %6793 = vst [vmem:[#allocation14_spill] sm:$0xff] %v5371_v12  ;;  %v3440_v35 = vpop.eup %3439  ;;  %v5375_v14 = vadd.f32 %v2803_v10, %v2741_v3  ;;  %v831_v59 = vmul.f32 %v3436_v7, %v830_v4  ;;  %v1417_v60 = vmul.f32 %v5371_v12, %v5371_v12  ;;  %3445 = vrsqrt.f32 %v5367_v34  ;;  %v3158_v23 = vld [vmem:[%s6650_s0 + $0xd8] sm:$0xff]  }
 0x19c   :  { %v846_v33 = vmul.f32 %v3432_v5, %v845_v32  ;;  %vm850_vm9 = vcmp.eq.f32.partialorder %v5306_v41, 0.0  ;;  %v1921_v52 = vsub.f32 1.5, %v1920_v29  ;;  %v2481_v18 = vmul.f32 %v3438_v24, %v6794_v13  ;;  %v6796_v29 = vld [vmem:[#allocation37_spill] sm:$0xff] }
 0x19d   :  { %v851_v21 = vand.u32 2147483648, %v5306_v41  ;;  %v832_v10 = vmul.f32 0.5, %v831_v59  ;;  %1533 = vadd.xlane.f32.xlu0 %v1417_v60  ;;  %3447 = vrsqrt.f32 %v5373_v47  ;;  %v2546_v42 = vmul.f32 %v3440_v35, %v6795_v8 }
 0x19e   :  { %v847_v43 = vmul.f32 %v846_v33, %v5306_v41  ;;  %v1922_v5 = vmul.f32 %v3434_v55, %v1921_v52  ;;  %vm1924_vm10 = vcmp.eq.f32.partialorder %v5316_v63, inf  ;;  %vm1926_vm11 = vcmp.eq.f32.partialorder %v5316_v63, 0.0 }
 0x19f   :  { %v3442_v3 = vpop.eup %3441  ;;  %v1927_v4 = vand.u32 2147483648, %v5316_v63  ;;  %v833_v24 = vsub.f32 1.5, %v832_v10  ;;  %3449 = vrsqrt.f32 %v5382_v62  ;;  %vm836_vm12 = vcmp.eq.f32.partialorder %v5327_v31, inf }
 0x1a0   :  { %v3444_v32 = vpop.eup %3443  ;;  %v2482_v35 = vmul.f32 %v3442_v3, %v6796_v29  ;;  %v1923_v59 = vmul.f32 %v1922_v5, %v5316_v63  ;;  %vm838_vm13 = vcmp.eq.f32.partialorder %v5327_v31, 0.0  ;;  %v849_v33 = vsel %vm848_vm8, %v5306_v41, %v847_v43 }
 0x1a1   :  { %v3446_v55 = vpop.eup %3445  ;;  %v2545_v60 = vmul.f32 %v3444_v32, %v4244_v48  ;;  %v834_v52 = vmul.f32 %v3436_v7, %v833_v24  ;;  %v5404_v13 = vunpack.c.h.bf16 %v3158_v23  ;;  %v839_v5 = vand.u32 2147483648, %v5327_v31  ;;  %v5414_v48 = vld [vmem:[%s6651_s1 + $0xd8] sm:$0xff]  }
 0x1a2   :  { %v2610_v10 = vsub.f32 %v2482_v35, %v2546_v42  ;;  %v1925_v8 = vsel %vm1924_vm10, %v5316_v63, %v1923_v59  ;;  %v1942_v3 = vmul.f32 %v3446_v55, %v5367_v34  ;;  %v852_v35 = vsel %vm850_vm9, %v851_v21, %v849_v33 }
 0x1a3   :  { %v3448_v32 = vpop.eup %3447  ;;  %v2609_v29 = vsub.f32 %v2481_v18, %v2545_v60  ;;  %v1928_v7 = vsel %vm1926_vm11, %v1927_v4, %v1925_v8  ;;  %v835_v42 = vmul.f32 %v834_v52, %v5327_v31  ;;  %v332_v43 = vmul.f32 %v5404_v13, %v5404_v13  ;;  %v5431_v60 = vpop.xlane.xlu2 %409 }
 0x1a4   :  { %v2674_v24 = vmul.f32 %v2610_v10, %v2610_v10  ;;  %v2355_v59 = vadd.f32 1e-10, %v1928_v7  ;;  %v1943_v12 = vmul.f32 %v3446_v55, %v1942_v3  ;;  %vm1948_vm14 = vcmp.eq.f32.partialorder %v5367_v34, inf }
 0x1a5   :  { %v3450_v20 = vpop.eup %3449  ;;  %v2673_v56 = vmul.f32 %v2609_v29, %v2609_v29  ;;  %v837_v18 = vsel %vm836_vm12, %v5327_v31, %v835_v42  ;;  %v854_v63 = vmul.f32 %v3448_v32, %v5373_v47  ;;  %451 = vadd.xlane.f32.xlu2 %v332_v43  ;;  %v5429_v4 = vunpack.c.l.bf16 %v5414_v48 }
 0x1a6   :  { %v2743_v41 = vmul.f32 %v5105_v15, %v2674_v24  ;;  %3451 = vrcp.f32 %v2355_v59  ;;  %v840_v21 = vsel %vm838_vm13, %v839_v5, %v837_v18  ;;  %v1944_v33 = vmul.f32 0.5, %v1943_v12  ;;  %v5444_v12 = vpop.xlane.xlu1 %1495 }
 0x1a7   :  { %v2742_v52 = vmul.f32 %v5105_v15, %v2673_v56  ;;  %v1267_v10 = vadd.f32 1e-10, %v840_v21  ;;  %v855_v8 = vmul.f32 %v3448_v32, %v854_v63  ;;  %v1930_v3 = vmul.f32 %v3450_v20, %v5382_v62  ;;  %v5453_v63 = vpop.xlane.xlu0 %407 }
 0x1a8   :  { %v1945_v29 = vsub.f32 1.5, %v1944_v33  ;;  %v1419_v7 = vmul.f32 %v5429_v4, %v5429_v4  ;;  %v5440_v42 = vunpack.c.l.bf16 %v3158_v23  ;;  %3453 = vrsqrt.f32 %v5431_v60 }
 0x1a9   :  { %v2805_v43 = vadd.f32 %v5375_v14, %v2742_v52  ;;  %3455 = vrcp.f32 %v1267_v10  ;;  %v856_v31 = vmul.f32 0.5, %v855_v8  ;;  %v1931_v5 = vmul.f32 %v3450_v20, %v1930_v3 }
 0x1aa   :  { %v1946_v56 = vmul.f32 %v3446_v55, %v1945_v29  ;;  %vm1950_vm15 = vcmp.eq.f32.partialorder %v5367_v34, 0.0  ;;  %v1951_v24 = vand.u32 2147483648, %v5367_v34  ;;  %1537 = vadd.xlane.f32.xlu1 %v1419_v7  ;;  %v331_v59 = vmul.f32 %v5440_v42, %v5440_v42 }
 0x1ab   :  { %v5450_v23 = vadd.f32 %v2805_v43, %v2743_v41  ;;  %v857_v18 = vsub.f32 1.5, %v856_v31  ;;  %vm860_vm0 = vcmp.eq.f32.partialorder %v5373_v47, inf  ;;  %v1932_v14 = vmul.f32 0.5, %v1931_v5  ;;  %v5478_v5 = vld [vmem:[%s6650_s0 + $0xe0] sm:$0xff]  }
 0x1ac   :  { %v3452_v21 = vpop.eup %3451  ;;  %v1268_v33 = vadd.f32 1e-10, %v852_v35  ;;  %v1947_v55 = vmul.f32 %v1946_v56, %v5367_v34  ;;  %vm862_vm1 = vcmp.eq.f32.partialorder %v5373_v47, 0.0  ;;  %449 = vadd.xlane.f32.xlu0 %v331_v59  ;;  %3457 = vrsqrt.f32 %v5444_v12 }
 0x1ad   :  { %v858_v52 = vmul.f32 %v3448_v32, %v857_v18  ;;  %v863_v10 = vand.u32 2147483648, %v5373_v47  ;;  %v1933_v41 = vsub.f32 1.5, %v1932_v14  ;;  %vm1936_vm2 = vcmp.eq.f32.partialorder %v5382_v62, inf  ;;  %v5469_v32 = vld [vmem:[%s6651_s1 + $0xe0] sm:$0xff]  }
 0x1ae   :  { %v3454_v8 = vpop.eup %3453  ;;  %v2547_v3 = vmul.f32 %v3452_v21, %v4330_v30  ;;  %v1949_v35 = vsel %vm1948_vm14, %v5367_v34, %v1947_v55  ;;  %vm1938_vm3 = vcmp.eq.f32.partialorder %v5382_v62, 0.0  ;;  %3459 = vrsqrt.f32 %v5453_v63 }
 0x1af   :  { %v3456_v29 = vpop.eup %3455  ;;  %v1952_v7 = vsel %vm1950_vm15, %v1951_v24, %v1949_v35  ;;  %v859_v43 = vmul.f32 %v858_v52, %v5373_v47  ;;  %v1934_v30 = vmul.f32 %v3450_v20, %v1933_v41  ;;  %v878_v31 = vmul.f32 %v3454_v8, %v5431_v60 }
 0x1b0   :  { %3461 = vrcp.f32 %v1268_v33  ;;  %v2483_v56 = vmul.f32 %v3456_v29, %v4332_v38  ;;  %v2357_v59 = vadd.f32 1e-10, %v1952_v7  ;;  %v1939_v18 = vand.u32 2147483648, %v5382_v62  ;;  %v5498_v7 = vpop.xlane.xlu2 %1499 }
 0x1b1   :  { %v861_v34 = vsel %vm860_vm0, %v5373_v47, %v859_v43  ;;  %v1935_v24 = vmul.f32 %v1934_v30, %v5382_v62  ;;  %v879_v20 = vmul.f32 %v3454_v8, %v878_v31  ;;  %v5487_v14 = vunpack.c.l.bf16 %v5469_v32 }
 0x1b2   :  { %v3458_v21 = vpop.eup %3457  ;;  %v2611_v55 = vsub.f32 %v2483_v56, %v2547_v3  ;;  %3463 = vrcp.f32 %v2357_v59  ;;  %v864_v33 = vsel %vm862_vm1, %v863_v10, %v861_v34  ;;  %v5492_v38 = vunpack.c.l.bf16 %v5478_v5 }
 0x1b3   :  { %6797 = vst [vmem:[#allocation15_spill] sm:$0xff] %v5487_v14  ;;  %v1269_v52 = vadd.f32 1e-10, %v864_v33  ;;  %v1937_v41 = vsel %vm1936_vm2, %v5382_v62, %v1935_v24  ;;  %v880_v35 = vmul.f32 0.5, %v879_v20  ;;  %v1954_v29 = vmul.f32 %v3458_v21, %v5444_v12  ;;  %v5512_v33 = vpop.xlane.xlu1 %411 }
 0x1b4   :  { %v3460_v43 = vpop.eup %3459  ;;  %v2675_v30 = vmul.f32 %v2611_v55, %v2611_v55  ;;  %v1940_v3 = vsel %vm1938_vm3, %v1939_v18, %v1937_v41  ;;  %v1421_v47 = vmul.f32 %v5487_v14, %v5487_v14  ;;  %v333_v10 = vmul.f32 %v5492_v38, %v5492_v38 }
 0x1b5   :  { %3465 = vrcp.f32 %v1269_v52  ;;  %v2356_v31 = vadd.f32 1e-10, %v1940_v3  ;;  %v881_v56 = vsub.f32 1.5, %v880_v35  ;;  %v1955_v59 = vmul.f32 %v3458_v21, %v1954_v29 }
 0x1b6   :  { %v3462_v34 = vpop.eup %3461  ;;  %v2744_v24 = vmul.f32 %v5105_v15, %v2675_v30  ;;  %v866_v20 = vmul.f32 %v3460_v43, %v5453_v63  ;;  %1541 = vadd.xlane.f32.xlu2 %v1421_v47  ;;  %453 = vadd.xlane.f32.xlu1 %v333_v10  ;;  %v5509_v62 = vunpack.c.h.bf16 %v5414_v48  ;;  %3467 = vrsqrt.f32 %v5498_v7  ;;  %v5520_v30 = vpop.xlane.xlu0 %1497  ;;  %v6799_v48 = vld [vmem:[#allocation38_spill] sm:$0xff] }
 0x1b7   :  { %3469 = vrcp.f32 %v2356_v31  ;;  %v882_v18 = vmul.f32 %v3454_v8, %v881_v56  ;;  %v1956_v55 = vmul.f32 0.5, %v1955_v59  ;;  %vm884_vm4 = vcmp.eq.f32.partialorder %v5431_v60, inf }
 0x1b8   :  { %6798 = vst [vmem:[#allocation16_spill] sm:$0xff] %v5509_v62  ;;  %v3464_v52 = vpop.eup %3463  ;;  %v5515_v41 = vadd.f32 %v5450_v23, %v2744_v24  ;;  %v867_v35 = vmul.f32 %v3460_v43, %v866_v20  ;;  %v1420_v29 = vmul.f32 %v5509_v62, %v5509_v62  ;;  %v2484_v3 = vmul.f32 %v3462_v34, %v6799_v48  ;;  %v6800_v20 = vld [vmem:[#allocation39_spill] sm:$0xff] }
 0x1b9   :  { %v883_v47 = vmul.f32 %v882_v18, %v5431_v60  ;;  %vm886_vm5 = vcmp.eq.f32.partialorder %v5431_v60, 0.0  ;;  %v1957_v8 = vsub.f32 1.5, %v1956_v55  ;;  %v2549_v10 = vmul.f32 %v3464_v52, %v4389_v61  ;;  %v5537_v52 = vld [vmem:[%s6650_s0 + $0xe8] sm:$0xff]  }
 0x1ba   :  { %v887_v23 = vand.u32 2147483648, %v5431_v60  ;;  %v868_v31 = vmul.f32 0.5, %v867_v35  ;;  %1539 = vadd.xlane.f32.xlu0 %v1420_v29  ;;  %3471 = vrsqrt.f32 %v5512_v33  ;;  %vm1960_vm6 = vcmp.eq.f32.partialorder %v5444_v12, inf }
 0x1bb   :  { %v3466_v56 = vpop.eup %3465  ;;  %v885_v59 = vsel %vm884_vm4, %v5431_v60, %v883_v47  ;;  %v1958_v24 = vmul.f32 %v3458_v21, %v1957_v8  ;;  %3473 = vrsqrt.f32 %v5520_v30  ;;  %vm1962_vm7 = vcmp.eq.f32.partialorder %v5444_v12, 0.0 }
 0x1bc   :  { %v3468_v34 = vpop.eup %3467  ;;  %v2485_v18 = vmul.f32 %v3466_v56, %v6800_v20  ;;  %v1963_v61 = vand.u32 2147483648, %v5444_v12  ;;  %v869_v55 = vsub.f32 1.5, %v868_v31  ;;  %v888_v21 = vsel %vm886_vm5, %v887_v23, %v885_v59 }
 0x1bd   :  { %v3470_v35 = vpop.eup %3469  ;;  %v1959_v29 = vmul.f32 %v1958_v24, %v5444_v12  ;;  %vm872_vm8 = vcmp.eq.f32.partialorder %v5453_v63, inf  ;;  %v1978_v48 = vmul.f32 %v3468_v34, %v5498_v7  ;;  %vm874_vm9 = vcmp.eq.f32.partialorder %v5453_v63, 0.0 }
 0x1be   :  { %v2613_v47 = vsub.f32 %v2485_v18, %v2549_v10  ;;  %v2548_v8 = vmul.f32 %v3470_v35, %v4397_v44  ;;  %v870_v56 = vmul.f32 %v3460_v43, %v869_v55  ;;  %v875_v20 = vand.u32 2147483648, %v5453_v63 }
 0x1bf   :  { %v1961_v31 = vsel %vm1960_vm6, %v5444_v12, %v1959_v29  ;;  %v1979_v60 = vmul.f32 %v3468_v34, %v1978_v48  ;;  %v5551_v23 = vunpack.c.l.bf16 %v5537_v52  ;;  %v1271_v14 = vadd.f32 1e-10, %v888_v21 }
 0x1c0   :  { %v3472_v59 = vpop.eup %3471  ;;  %v2612_v24 = vsub.f32 %v2484_v3, %v2548_v8  ;;  %v1964_v10 = vsel %vm1962_vm7, %v1963_v61, %v1961_v31  ;;  %v871_v44 = vmul.f32 %v870_v56, %v5453_v63  ;;  %vm1984_vm10 = vcmp.eq.f32.partialorder %v5498_v7, inf  ;;  %v5564_v61 = vpop.xlane.xlu2 %415 }
 0x1c1   :  { %6801 = vst [vmem:[#allocation17_spill] sm:$0xff] %v5551_v23  ;;  %v3474_v43 = vpop.eup %3473  ;;  %v2358_v18 = vadd.f32 1e-10, %v1964_v10  ;;  %v1980_v55 = vmul.f32 0.5, %v1979_v60  ;;  %v890_v35 = vmul.f32 %v3472_v59, %v5512_v33  ;;  %v335_v29 = vmul.f32 %v5551_v23, %v5551_v23 }
 0x1c2   :  { %v2677_v48 = vmul.f32 %v2613_v47, %v2613_v47  ;;  %v2676_v62 = vmul.f32 %v2612_v24, %v2612_v24  ;;  %v873_v3 = vsel %vm872_vm8, %v5453_v63, %v871_v44  ;;  %v1966_v12 = vmul.f32 %v3474_v43, %v5520_v30 }
 0x1c3   :  { %3475 = vrcp.f32 %v2358_v18  ;;  %v876_v21 = vsel %vm874_vm9, %v875_v20, %v873_v3  ;;  %v1981_v8 = vsub.f32 1.5, %v1980_v55  ;;  %v891_v56 = vmul.f32 %v3472_v59, %v890_v35  ;;  %457 = vadd.xlane.f32.xlu2 %v335_v29  ;;  %v5578_v55 = vpop.xlane.xlu1 %1501 }
 0x1c4   :  { %v2745_v31 = vmul.f32 %v5105_v15, %v2676_v62  ;;  %v1270_v60 = vadd.f32 1e-10, %v876_v21  ;;  %v1967_v47 = vmul.f32 %v3474_v43, %v1966_v12  ;;  %v5570_v24 = vunpack.c.h.bf16 %v5469_v32  ;;  %v5594_v12 = vpop.xlane.xlu0 %413 }
 0x1c5   :  { %v1982_v10 = vmul.f32 %v3468_v34, %v1981_v8  ;;  %v892_v44 = vmul.f32 0.5, %v891_v56  ;;  %v5573_v23 = vunpack.c.h.bf16 %v5478_v5  ;;  %3477 = vrsqrt.f32 %v5564_v61 }
 0x1c6   :  { %6802 = vst [vmem:[#allocation18_spill] sm:$0xff] %v5570_v24  ;;  %v2746_v63 = vmul.f32 %v5105_v15, %v2677_v48  ;;  %v2808_v20 = vadd.f32 %v5515_v41, %v2745_v31  ;;  %3479 = vrcp.f32 %v1270_v60  ;;  %v1968_v18 = vmul.f32 0.5, %v1967_v47  ;;  %v6804_v60 = vld [vmem:[#allocation41_spill] sm:$0xff] }
 0x1c7   :  { %6803 = vst [vmem:[#allocation19_spill] sm:$0xff] %v5573_v23  ;;  %v1983_v62 = vmul.f32 %v1982_v10, %v5498_v7  ;;  %v893_v35 = vsub.f32 1.5, %v892_v44  ;;  %v1422_v32 = vmul.f32 %v5570_v24, %v5570_v24  ;;  %v334_v5 = vmul.f32 %v5573_v23, %v5573_v23 }
 0x1c8   :  { %v5585_v34 = vadd.f32 %v2808_v20, %v2746_v63  ;;  %vm1986_vm11 = vcmp.eq.f32.partialorder %v5498_v7, 0.0  ;;  %v1987_v15 = vand.u32 2147483648, %v5498_v7  ;;  %v1969_v41 = vsub.f32 1.5, %v1968_v18  ;;  %v6805_v20 = vld [vmem:[#allocation42_spill] sm:$0xff] }
 0x1c9   :  { %v3476_v29 = vpop.eup %3475  ;;  %v1985_v48 = vsel %vm1984_vm10, %v5498_v7, %v1983_v62  ;;  %v894_v3 = vmul.f32 %v3472_v59, %v893_v35  ;;  %vm896_vm12 = vcmp.eq.f32.partialorder %v5512_v33, inf  ;;  %1543 = vadd.xlane.f32.xlu1 %v1422_v32  ;;  %455 = vadd.xlane.f32.xlu0 %v334_v5  ;;  %3481 = vrsqrt.f32 %v5578_v55 }
 0x1ca   :  { %v1988_v21 = vsel %vm1986_vm11, %v1987_v15, %v1985_v48  ;;  %vm898_vm13 = vcmp.eq.f32.partialorder %v5512_v33, 0.0  ;;  %v899_v8 = vand.u32 2147483648, %v5512_v33  ;;  %v1970_v56 = vmul.f32 %v3474_v43, %v1969_v41  ;;  %v3191_v43 = vld [vmem:[%s6651_s1 + $0xe8] sm:$0xff]  }
 0x1cb   :  { %v3478_v31 = vpop.eup %3477  ;;  %3483 = vrcp.f32 %v1271_v14  ;;  %v2550_v47 = vmul.f32 %v3476_v29, %v6804_v60  ;;  %v2360_v7 = vadd.f32 1e-10, %v1988_v21  ;;  %v895_v59 = vmul.f32 %v894_v3, %v5512_v33 }
 0x1cc   :  { %v3480_v10 = vpop.eup %3479  ;;  %v1971_v44 = vmul.f32 %v1970_v56, %v5520_v30  ;;  %vm1972_vm14 = vcmp.eq.f32.partialorder %v5520_v30, inf  ;;  %v914_v63 = vmul.f32 %v3478_v31, %v5564_v61  ;;  %3485 = vrsqrt.f32 %v5594_v12 }
 0x1cd   :  { %v2486_v14 = vmul.f32 %v3480_v10, %v6805_v20  ;;  %3487 = vrcp.f32 %v2360_v7  ;;  %v897_v18 = vsel %vm896_vm12, %v5512_v33, %v895_v59  ;;  %v1975_v62 = vand.u32 2147483648, %v5520_v30  ;;  %v5622_v33 = vpop.xlane.xlu2 %1505 }
 0x1ce   :  { %v900_v35 = vsel %vm898_vm13, %v899_v8, %v897_v18  ;;  %v1973_v32 = vsel %vm1972_vm14, %v5520_v30, %v1971_v44  ;;  %vm1974_vm15 = vcmp.eq.f32.partialorder %v5520_v30, 0.0  ;;  %v915_v5 = vmul.f32 %v3478_v31, %v914_v63 }
 0x1cf   :  { %v3482_v15 = vpop.eup %3481  ;;  %v2614_v41 = vsub.f32 %v2486_v14, %v2550_v47  ;;  %v1272_v29 = vadd.f32 1e-10, %v900_v35  ;;  %v1976_v48 = vsel %vm1974_vm15, %v1975_v62, %v1973_v32  ;;  %v5616_v3 = vunpack.c.h.bf16 %v3191_v43  ;;  %v5640_v35 = vpop.xlane.xlu1 %417  ;;  %v6809_v32 = vld [vmem:[#allocation40_spill] sm:$0xff] }
 0x1d0   :  { %v2359_v21 = vadd.f32 1e-10, %v1976_v48  ;;  %v916_v56 = vmul.f32 0.5, %v915_v5  ;;  %v1990_v60 = vmul.f32 %v3482_v15, %v5578_v55  ;;  %v5620_v7 = vunpack.c.h.bf16 %v5537_v52  ;;  %v5633_v52 = vld [vmem:[%s6652_s2] ss:$0 sm:$0xff]  ;;  %v5643_v48 = vpop.xlane.xlu0 %1503 }
 0x1d1   :  { %6806 = vst [vmem:[#allocation20_spill] sm:$0xff] %v5616_v3  ;;  %v3484_v8 = vpop.eup %3483  ;;  %v2678_v59 = vmul.f32 %v2614_v41, %v2614_v41  ;;  %3489 = vrcp.f32 %v1272_v29  ;;  %v1424_v30 = vmul.f32 %v5616_v3, %v5616_v3  ;;  %v5626_v47 = vunpack.c.l.bf16 %v3191_v43 }
 0x1d2   :  { %6807 = vst [vmem:[#allocation21_spill] sm:$0xff] %v5620_v7  ;;  %v3486_v10 = vpop.eup %3485  ;;  %3491 = vrcp.f32 %v2359_v21  ;;  %v917_v44 = vsub.f32 1.5, %v916_v56  ;;  %v1991_v63 = vmul.f32 %v3482_v15, %v1990_v60  ;;  %v336_v20 = vmul.f32 %v5620_v7, %v5620_v7  ;;  %v6810_v60 = vld [vmem:[#allocation43_spill] sm:$0xff] }
 0x1d3   :  { %6808 = vst [vmem:[#allocation6_spill] sm:$0xff] %v5626_v47  ;;  %v3488_v14 = vpop.eup %3487  ;;  %v2747_v18 = vmul.f32 %v5633_v52, %v2678_v59  ;;  %v902_v62 = vmul.f32 %v3486_v10, %v5594_v12  ;;  %1547 = vadd.xlane.f32.xlu2 %v1424_v30  ;;  %v1423_v43 = vmul.f32 %v5626_v47, %v5626_v47  ;;  %3493 = vrsqrt.f32 %v5622_v33 }
 0x1d4   :  { %v2487_v5 = vmul.f32 %v3484_v8, %v6809_v32  ;;  %v918_v41 = vmul.f32 %v3478_v31, %v917_v44  ;;  %v1992_v29 = vmul.f32 0.5, %v1991_v63  ;;  %459 = vadd.xlane.f32.xlu1 %v336_v20  ;;  %vm920_vm0 = vcmp.eq.f32.partialorder %v5564_v61, inf  ;;  %v6811_v63 = vld [vmem:[#allocation44_spill] sm:$0xff]  ;;  %v6812_v32 = vld [vmem:[#allocation45_spill] sm:$0xff] }
 0x1d5   :  { %v2810_v21 = vadd.f32 %v5585_v34, %v2747_v18  ;;  %vm922_vm1 = vcmp.eq.f32.partialorder %v5564_v61, 0.0  ;;  %v903_v56 = vmul.f32 %v3486_v10, %v902_v62  ;;  %1545 = vadd.xlane.f32.xlu0 %v1423_v43  ;;  %v2552_v59 = vmul.f32 %v3488_v14, %v6810_v60  ;;  %v3161_v62 = vld [vmem:[%s6650_s0 + $0xf0] sm:$0xff]  }
 0x1d6   :  { %v919_v30 = vmul.f32 %v918_v41, %v5564_v61  ;;  %v1993_v3 = vsub.f32 1.5, %v1992_v29  ;;  %3495 = vrsqrt.f32 %v5640_v35  ;;  %v923_v8 = vand.u32 2147483648, %v5564_v61 }
 0x1d7   :  { %v3490_v31 = vpop.eup %3489  ;;  %vm1996_vm2 = vcmp.eq.f32.partialorder %v5578_v55, inf  ;;  %v904_v44 = vmul.f32 0.5, %v903_v56  ;;  %3497 = vrsqrt.f32 %v5643_v48  ;;  %vm1998_vm3 = vcmp.eq.f32.partialorder %v5578_v55, 0.0 }
 0x1d8   :  { %v3492_v34 = vpop.eup %3491  ;;  %v2488_v20 = vmul.f32 %v3490_v31, %v6811_v63  ;;  %v1994_v18 = vmul.f32 %v3482_v15, %v1993_v3  ;;  %v1999_v14 = vand.u32 2147483648, %v5578_v55  ;;  %v921_v29 = vsel %vm920_vm0, %v5564_v61, %v919_v30 }
 0x1d9   :  { %v3494_v43 = vpop.eup %3493  ;;  %v2551_v41 = vmul.f32 %v3492_v34, %v6812_v32  ;;  %v905_v56 = vsub.f32 1.5, %v904_v44  ;;  %vm908_vm4 = vcmp.eq.f32.partialorder %v5594_v12, inf  ;;  %vm910_vm5 = vcmp.eq.f32.partialorder %v5594_v12, 0.0 }
 0x1da   :  { %v2616_v60 = vsub.f32 %v2488_v20, %v2552_v59  ;;  %v1995_v15 = vmul.f32 %v1994_v18, %v5578_v55  ;;  %v2014_v3 = vmul.f32 %v3494_v43, %v5622_v33  ;;  %v911_v7 = vand.u32 2147483648, %v5594_v12 }
 0x1db   :  { %v2615_v31 = vsub.f32 %v2487_v5, %v2551_v41  ;;  %v906_v63 = vmul.f32 %v3486_v10, %v905_v56  ;;  %v5669_v47 = vunpack.c.h.bf16 %v3161_v62  ;;  %v924_v30 = vsel %vm922_vm1, %v923_v8, %v921_v29 }
 0x1dc   :  { %v3496_v34 = vpop.eup %3495  ;;  %v2680_v32 = vmul.f32 %v2616_v60, %v2616_v60  ;;  %v1997_v59 = vsel %vm1996_vm2, %v5578_v55, %v1995_v15  ;;  %v2015_v44 = vmul.f32 %v3494_v43, %v2014_v3  ;;  %vm2020_vm6 = vcmp.eq.f32.partialorder %v5622_v33, inf  ;;  %v5687_v60 = vld [vmem:[%s6651_s1 + $0xf0] sm:$0xff]  }
 0x1dd   :  { %6813 = vst [vmem:[#allocation22_spill] sm:$0xff] %v5669_v47  ;;  %v3498_v20 = vpop.eup %3497  ;;  %v2679_v18 = vmul.f32 %v2615_v31, %v2615_v31  ;;  %v2000_v5 = vsel %vm1998_vm3, %v1999_v14, %v1997_v59  ;;  %v907_v10 = vmul.f32 %v906_v63, %v5594_v12  ;;  %v926_v41 = vmul.f32 %v3496_v34, %v5640_v35  ;;  %v5695_v31 = vpop.xlane.xlu2 %421 }
 0x1de   :  { %v2749_v56 = vmul.f32 %v5633_v52, %v2680_v32  ;;  %v2361_v61 = vadd.f32 1e-10, %v2000_v5  ;;  %v2016_v8 = vmul.f32 0.5, %v2015_v44  ;;  %vm2022_vm7 = vcmp.eq.f32.partialorder %v5622_v33, 0.0 }
 0x1df   :  { %v2002_v29 = vmul.f32 %v3498_v20, %v5643_v48  ;;  %v2748_v55 = vmul.f32 %v5633_v52, %v2679_v18  ;;  %v909_v14 = vsel %vm908_vm4, %v5594_v12, %v907_v10  ;;  %v927_v15 = vmul.f32 %v3496_v34, %v926_v41 }
 0x1e0   :  { %v338_v3 = vmul.f32 %v5669_v47, %v5669_v47  ;;  %3499 = vrcp.f32 %v2361_v61  ;;  %v912_v63 = vsel %vm910_vm5, %v911_v7, %v909_v14  ;;  %v2017_v32 = vsub.f32 1.5, %v2016_v8  ;;  %v5707_v7 = vpop.xlane.xlu1 %1507 }
 0x1e1   :  { %v2003_v59 = vmul.f32 %v3498_v20, %v2002_v29  ;;  %v2811_v44 = vadd.f32 %v2810_v21, %v2748_v55  ;;  %v1273_v5 = vadd.f32 1e-10, %v912_v63  ;;  %v928_v24 = vmul.f32 0.5, %v927_v15 }
 0x1e2   :  { %463 = vadd.xlane.f32.xlu2 %v338_v3  ;;  %v5700_v18 = vunpack.c.l.bf16 %v5687_v60  ;;  %v2018_v10 = vmul.f32 %v3494_v43, %v2017_v32  ;;  %v5702_v23 = vunpack.c.l.bf16 %v3161_v62  ;;  %3501 = vrsqrt.f32 %v5695_v31 }
 0x1e3   :  { %v2004_v41 = vmul.f32 0.5, %v2003_v59  ;;  %v1274_v47 = vadd.f32 1e-10, %v924_v30  ;;  %v5705_v61 = vadd.f32 %v2811_v44, %v2749_v56  ;;  %3503 = vrcp.f32 %v1273_v5  ;;  %v5717_v30 = vpop.xlane.xlu0 %419 }
 0x1e4   :  { %v929_v12 = vsub.f32 1.5, %v928_v24  ;;  %v2019_v21 = vmul.f32 %v2018_v10, %v5622_v33  ;;  %v1425_v29 = vmul.f32 %v5700_v18, %v5700_v18  ;;  %v337_v43 = vmul.f32 %v5702_v23, %v5702_v23  ;;  %v5745_v10 = vld [vmem:[%s6650_s0 + $0xf8] sm:$0xff]  }
 0x1e5   :  { %v2005_v8 = vsub.f32 1.5, %v2004_v41  ;;  %v2023_v62 = vand.u32 2147483648, %v5622_v33  ;;  %vm932_vm8 = vcmp.eq.f32.partialorder %v5640_v35, inf  ;;  %vm934_vm9 = vcmp.eq.f32.partialorder %v5640_v35, 0.0  ;;  %v6814_v41 = vld [vmem:[#allocation47_spill] sm:$0xff] }
 0x1e6   :  { %v930_v55 = vmul.f32 %v3496_v34, %v929_v12  ;;  %v3500_v24 = vpop.eup %3499  ;;  %v2021_v56 = vsel %vm2020_vm6, %v5622_v33, %v2019_v21  ;;  %v935_v14 = vand.u32 2147483648, %v5640_v35  ;;  %1549 = vadd.xlane.f32.xlu1 %v1425_v29  ;;  %461 = vadd.xlane.f32.xlu0 %v337_v43  ;;  %3505 = vrsqrt.f32 %v5707_v7 }
 0x1e7   :  { %v2006_v15 = vmul.f32 %v3498_v20, %v2005_v8  ;;  %3507 = vrcp.f32 %v1274_v47  ;;  %v2024_v34 = vsel %vm2022_vm7, %v2023_v62, %v2021_v56  ;;  %vm2008_vm10 = vcmp.eq.f32.partialorder %v5643_v48, inf }
 0x1e8   :  { %v931_v3 = vmul.f32 %v930_v55, %v5640_v35  ;;  %v3502_v63 = vpop.eup %3501  ;;  %v2553_v32 = vmul.f32 %v3500_v24, %v4612_v46  ;;  %v2363_v59 = vadd.f32 1e-10, %v2024_v34  ;;  %3509 = vrsqrt.f32 %v5717_v30  ;;  %v5740_v46 = vld [vmem:[%s6651_s1 + $0xf8] sm:$0xff]  }
 0x1e9   :  { %v2007_v44 = vmul.f32 %v2006_v15, %v5643_v48  ;;  %v3504_v20 = vpop.eup %3503  ;;  %vm2010_vm11 = vcmp.eq.f32.partialorder %v5643_v48, 0.0  ;;  %v2011_v33 = vand.u32 2147483648, %v5643_v48  ;;  %v950_v5 = vmul.f32 %v3502_v63, %v5695_v31 }
 0x1ea   :  { %v933_v47 = vsel %vm932_vm8, %v5640_v35, %v931_v3  ;;  %v2489_v12 = vmul.f32 %v3504_v20, %v6814_v41  ;;  %3511 = vrcp.f32 %v2363_v59  ;;  %v5754_v15 = vunpack.c.l.bf16 %v5740_v46 }
 0x1eb   :  { %v936_v21 = vsel %vm934_vm9, %v935_v14, %v933_v47  ;;  %v2009_v8 = vsel %vm2008_vm10, %v5643_v48, %v2007_v44  ;;  %v951_v62 = vmul.f32 %v3502_v63, %v950_v5  ;;  %v5757_v34 = vunpack.c.l.bf16 %v5745_v10  ;;  %v5763_v48 = vpop.xlane.xlu2 %1511 }
 0x1ec   :  { %v1275_v29 = vadd.f32 1e-10, %v936_v21  ;;  %v2012_v43 = vsel %vm2010_vm11, %v2011_v33, %v2009_v8  ;;  %v3506_v55 = vpop.eup %3505  ;;  %v2617_v24 = vsub.f32 %v2489_v12, %v2553_v32  ;;  %6815 = vst [vmem:[#allocation7_spill] sm:$0xff] %v5754_v15  ;;  %v5761_v59 = vunpack.c.h.bf16 %v5687_v60  ;;  %v5772_v60 = vpop.xlane.xlu1 %423  ;;  %v6817_v8 = vld [vmem:[#allocation46_spill] sm:$0xff] }
 0x1ed   :  { %v2362_v56 = vadd.f32 1e-10, %v2012_v43  ;;  %6816 = vst [vmem:[#allocation8_spill] sm:$0xff] %v5757_v34  ;;  %v3508_v3 = vpop.eup %3507  ;;  %v952_v35 = vmul.f32 0.5, %v951_v62  ;;  %v2026_v14 = vmul.f32 %v3506_v55, %v5707_v7  ;;  %v1427_v32 = vmul.f32 %v5754_v15, %v5754_v15  ;;  %v6818_v15 = vld [vmem:[#allocation48_spill] sm:$0xff] }
 0x1ee   :  { %3513 = vrcp.f32 %v1275_v29  ;;  %v3510_v44 = vpop.eup %3509  ;;  %v2681_v20 = vmul.f32 %v2617_v24, %v2617_v24  ;;  %v339_v47 = vmul.f32 %v5757_v34, %v5757_v34  ;;  %v1426_v12 = vmul.f32 %v5761_v59, %v5761_v59 }
 0x1ef   :  { %3515 = vrcp.f32 %v2362_v56  ;;  %v953_v33 = vsub.f32 1.5, %v952_v35  ;;  %v2027_v5 = vmul.f32 %v3506_v55, %v2026_v14  ;;  %v938_v41 = vmul.f32 %v3510_v44, %v5717_v30  ;;  %1553 = vadd.xlane.f32.xlu2 %v1427_v32  ;;  %v5779_v35 = vpop.xlane.xlu0 %1509 }
 0x1f0   :  { %v3512_v21 = vpop.eup %3511  ;;  %v2490_v29 = vmul.f32 %v3508_v3, %v6817_v8  ;;  %v2750_v43 = vmul.f32 %v5633_v52, %v2681_v20  ;;  %vm956_vm12 = vcmp.eq.f32.partialorder %v5695_v31, inf  ;;  %465 = vadd.xlane.f32.xlu1 %v339_v47  ;;  %3517 = vrsqrt.f32 %v5763_v48  ;;  %1551 = vadd.xlane.f32.xlu0 %v1426_v12 }
 0x1f1   :  { %v954_v62 = vmul.f32 %v3502_v63, %v953_v33  ;;  %vm958_vm13 = vcmp.eq.f32.partialorder %v5695_v31, 0.0  ;;  %v2028_v24 = vmul.f32 0.5, %v2027_v5  ;;  %v939_v56 = vmul.f32 %v3510_v44, %v938_v41 }
 0x1f2   :  { %v2813_v14 = vadd.f32 %v5705_v61, %v2750_v43  ;;  %v2555_v3 = vmul.f32 %v3512_v21, %v6818_v15  ;;  %v959_v20 = vand.u32 2147483648, %v5695_v31  ;;  %3519 = vrsqrt.f32 %v5772_v60 }
 0x1f3   :  { %v955_v47 = vmul.f32 %v954_v62, %v5695_v31  ;;  %v2029_v8 = vsub.f32 1.5, %v2028_v24  ;;  %vm2032_vm14 = vcmp.eq.f32.partialorder %v5707_v7, inf  ;;  %v940_v63 = vmul.f32 0.5, %v939_v56 }
 0x1f4   :  { %v3514_v32 = vpop.eup %3513  ;;  %vm2034_vm15 = vcmp.eq.f32.partialorder %v5707_v7, 0.0  ;;  %v2035_v61 = vand.u32 2147483648, %v5707_v7  ;;  %3521 = vrsqrt.f32 %v5779_v35  ;;  %vm944_vm0 = vcmp.eq.f32.partialorder %v5717_v30, inf }
 0x1f5   :  { %v3516_v33 = vpop.eup %3515  ;;  %v2491_v5 = vmul.f32 %v3514_v32, %v4691_v19  ;;  %v957_v41 = vsel %vm956_vm12, %v5695_v31, %v955_v47  ;;  %v2030_v12 = vmul.f32 %v3506_v55, %v2029_v8  ;;  %v941_v21 = vsub.f32 1.5, %v940_v63  ;;  %v5805_v31 = vpop.xlane.xlu2 %427 }
 0x1f6   :  { %v2554_v15 = vmul.f32 %v3516_v33, %v4712_v37  ;;  %v3518_v43 = vpop.eup %3517  ;;  %v960_v24 = vsel %vm958_vm13, %v959_v20, %v957_v41  ;;  %vm946_vm1 = vcmp.eq.f32.partialorder %v5717_v30, 0.0  ;;  %v947_v37 = vand.u32 2147483648, %v5717_v30 }
 0x1f7   :  { %v2619_v62 = vsub.f32 %v2491_v5, %v2555_v3  ;;  %v2031_v56 = vmul.f32 %v2030_v12, %v5707_v7  ;;  %v942_v32 = vmul.f32 %v3510_v44, %v941_v21  ;;  %v1277_v47 = vadd.f32 1e-10, %v960_v24 }
 0x1f8   :  { %v2618_v19 = vsub.f32 %v2490_v29, %v2554_v15  ;;  %v3520_v33 = vpop.eup %3519  ;;  %v2050_v55 = vmul.f32 %v3518_v43, %v5763_v48  ;;  %v5803_v3 = vunpack.c.h.bf16 %v5740_v46  ;;  %v5812_v44 = vunpack.c.h.bf16 %v5745_v10 }
 0x1f9   :  { %v2683_v34 = vmul.f32 %v2619_v62, %v2619_v62  ;;  %v2033_v29 = vsel %vm2032_vm14, %v5707_v7, %v2031_v56  ;;  %v943_v8 = vmul.f32 %v942_v32, %v5717_v30  ;;  %v962_v41 = vmul.f32 %v3520_v33, %v5772_v60 }
 0x1fa   :  { %v2682_v20 = vmul.f32 %v2618_v19, %v2618_v19  ;;  %v3522_v63 = vpop.eup %3521  ;;  %v2036_v15 = vsel %vm2034_vm15, %v2035_v61, %v2033_v29  ;;  %v2051_v46 = vmul.f32 %v3518_v43, %v2050_v55  ;;  %v1428_v7 = vmul.f32 %v5803_v3, %v5803_v3 }
 0x1fb   :  { %v2752_v5 = vmul.f32 %v5633_v52, %v2683_v34  ;;  %v2364_v21 = vadd.f32 1e-10, %v2036_v15  ;;  %v945_v62 = vsel %vm944_vm0, %v5717_v30, %v943_v8  ;;  %v2038_v24 = vmul.f32 %v3522_v63, %v5779_v35  ;;  %v5830_v8 = vpop.xlane.xlu1 %1513 }
 0x1fc   :  { %v2751_v12 = vmul.f32 %v5633_v52, %v2682_v20  ;;  %v948_v10 = vsel %vm946_vm1, %v947_v37, %v945_v62  ;;  %v2052_v19 = vmul.f32 0.5, %v2051_v46  ;;  %v963_v34 = vmul.f32 %v3520_v33, %v962_v41  ;;  %1555 = vadd.xlane.f32.xlu1 %v1428_v7  ;;  %v5834_v46 = vpop.xlane.xlu0 %425 }
 0x1fd   :  { %3523 = vrcp.f32 %v2364_v21  ;;  %v1276_v56 = vadd.f32 1e-10, %v948_v10  ;;  %v2039_v32 = vmul.f32 %v3522_v63, %v2038_v24  ;;  %v340_v29 = vmul.f32 %v5812_v44, %v5812_v44 }
 0x1fe   :  { %v2814_v61 = vadd.f32 %v2813_v14, %v2751_v12  ;;  %v2053_v55 = vsub.f32 1.5, %v2052_v19  ;;  %v964_v20 = vmul.f32 0.5, %v963_v34  ;;  %3525 = vrsqrt.f32 %v5805_v31 }
 0x1ff   :  { %3527 = vrcp.f32 %v1276_v56  ;;  %v2040_v37 = vmul.f32 0.5, %v2039_v32  ;;  %467 = vadd.xlane.f32.xlu0 %v340_v29  ;;  %vm2056_vm2 = vcmp.eq.f32.partialorder %v5763_v48, inf  ;;  %vm2058_vm3 = vcmp.eq.f32.partialorder %v5763_v48, 0.0 }
 0x200   :  { %v5832_v30 = vadd.f32 %v2814_v61, %v2752_v5  ;;  %3529 = vrcp.f32 %v1277_v47  ;;  %v2054_v15 = vmul.f32 %v3518_v43, %v2053_v55  ;;  %v965_v14 = vsub.f32 1.5, %v964_v20  ;;  %v5842_v47 = vpop.xlane.xlu2 %1517 }
 0x201   :  { %v2041_v41 = vsub.f32 1.5, %v2040_v37  ;;  %3531 = vrsqrt.f32 %v5830_v8  ;;  %v2059_v5 = vand.u32 2147483648, %v5763_v48  ;;  %vm968_vm4 = vcmp.eq.f32.partialorder %v5772_v60, inf }
 0x202   :  { %v2055_v12 = vmul.f32 %v2054_v15, %v5763_v48  ;;  %v966_v21 = vmul.f32 %v3520_v33, %v965_v14  ;;  %vm970_vm5 = vcmp.eq.f32.partialorder %v5772_v60, 0.0  ;;  %v971_v62 = vand.u32 2147483648, %v5772_v60 }
 0x203   :  { %v3524_v43 = vpop.eup %3523  ;;  %v2042_v24 = vmul.f32 %v3522_v63, %v2041_v41  ;;  %3533 = vrsqrt.f32 %v5834_v46  ;;  %vm2044_vm6 = vcmp.eq.f32.partialorder %v5779_v35, inf  ;;  %v2047_v29 = vand.u32 2147483648, %v5779_v35 }
 0x204   :  { %v3526_v10 = vpop.eup %3525  ;;  %v2556_v19 = vmul.f32 %v3524_v43, %v4765_v50  ;;  %v2057_v34 = vsel %vm2056_vm2, %v5763_v48, %v2055_v12  ;;  %v967_v33 = vmul.f32 %v966_v21, %v5772_v60  ;;  %3535 = vrsqrt.f32 %v5842_v47 }
 0x205   :  { %v3528_v7 = vpop.eup %3527  ;;  %v2060_v61 = vsel %vm2058_vm3, %v2059_v5, %v2057_v34  ;;  %v2043_v56 = vmul.f32 %v2042_v24, %v5779_v35  ;;  %v986_v63 = vmul.f32 %v3526_v10, %v5805_v31  ;;  %vm2046_vm7 = vcmp.eq.f32.partialorder %v5779_v35, 0.0 }
 0x206   :  { %v3530_v32 = vpop.eup %3529  ;;  %v2492_v50 = vmul.f32 %v3528_v7, %v4771_v9  ;;  %v2366_v55 = vadd.f32 1e-10, %v2060_v61  ;;  %v969_v20 = vsel %vm968_vm4, %v5772_v60, %v967_v33  ;;  %vm992_vm8 = vcmp.eq.f32.partialorder %v5805_v31, inf  ;;  %v5870_v60 = vpop.xlane.xlu1 %429 }
 0x207   :  { %v3532_v37 = vpop.eup %3531  ;;  %v972_v48 = vsel %vm970_vm5, %v971_v62, %v969_v20  ;;  %v2045_v15 = vsel %vm2044_vm6, %v5779_v35, %v2043_v56  ;;  %v987_v14 = vmul.f32 %v3526_v10, %v986_v63  ;;  %v2493_v21 = vmul.f32 %v3530_v32, %v4762_v26 }
 0x208   :  { %v2620_v41 = vsub.f32 %v2492_v50, %v2556_v19  ;;  %3537 = vrcp.f32 %v2366_v55  ;;  %v1278_v12 = vadd.f32 1e-10, %v972_v48  ;;  %v2048_v9 = vsel %vm2046_vm7, %v2047_v29, %v2045_v15  ;;  %v5874_v19 = vpop.xlane.xlu0 %1515 }
 0x209   :  { %v3534_v5 = vpop.eup %3533  ;;  %v2365_v43 = vadd.f32 1e-10, %v2048_v9  ;;  %v988_v24 = vmul.f32 0.5, %v987_v14  ;;  %v2062_v34 = vmul.f32 %v3532_v37, %v5830_v8  ;;  %vm994_vm9 = vcmp.eq.f32.partialorder %v5805_v31, 0.0 }
 0x20a   :  { %v2684_v62 = vmul.f32 %v2620_v41, %v2620_v41  ;;  %3539 = vrcp.f32 %v1278_v12  ;;  %v974_v35 = vmul.f32 %v3534_v5, %v5834_v46  ;;  %v3536_v33 = vpop.eup %3535  ;;  %v995_v61 = vand.u32 2147483648, %v5805_v31  ;;  %v5886_v41 = vpop.xlane.xlu2 %433 }
 0x20b   :  { %3541 = vrcp.f32 %v2365_v43  ;;  %v989_v7 = vsub.f32 1.5, %v988_v24  ;;  %v2063_v26 = vmul.f32 %v3532_v37, %v2062_v34  ;;  %vm2068_vm10 = vcmp.eq.f32.partialorder %v5830_v8, inf }
 0x20c   :  { %v2753_v56 = vmul.f32 %v5633_v52, %v2684_v62  ;;  %v975_v63 = vmul.f32 %v3534_v5, %v974_v35  ;;  %v2086_v32 = vmul.f32 %v3536_v33, %v5842_v47  ;;  %3543 = vrsqrt.f32 %v5870_v60 }
 0x20d   :  { %v990_v50 = vmul.f32 %v3526_v10, %v989_v7  ;;  %v2064_v55 = vmul.f32 0.5, %v2063_v26  ;;  %vm2070_vm11 = vcmp.eq.f32.partialorder %v5830_v8, 0.0  ;;  %v2071_v20 = vand.u32 2147483648, %v5830_v8 }
 0x20e   :  { %3545 = vrsqrt.f32 %v5874_v19  ;;  %v3538_v29 = vpop.eup %3537  ;;  %v2816_v48 = vadd.f32 %v5832_v30, %v2753_v56  ;;  %v976_v15 = vmul.f32 0.5, %v975_v63  ;;  %vm980_vm12 = vcmp.eq.f32.partialorder %v5834_v46, inf }
 0x20f   :  { %v2087_v14 = vmul.f32 %v3536_v33, %v2086_v32  ;;  %v2558_v12 = vmul.f32 %v3538_v29, %v4817_v54  ;;  %v991_v10 = vmul.f32 %v990_v50, %v5805_v31  ;;  %v2065_v9 = vsub.f32 1.5, %v2064_v55 }
 0x210   :  { %vm982_vm13 = vcmp.eq.f32.partialorder %v5834_v46, 0.0  ;;  %v3540_v43 = vpop.eup %3539  ;;  %v977_v24 = vsub.f32 1.5, %v976_v15  ;;  %v983_v34 = vand.u32 2147483648, %v5834_v46  ;;  %vm2092_vm14 = vcmp.eq.f32.partialorder %v5842_v47, inf }
 0x211   :  { %v2088_v62 = vmul.f32 0.5, %v2087_v14  ;;  %v3542_v30 = vpop.eup %3541  ;;  %v2494_v35 = vmul.f32 %v3540_v43, %v4827_v17  ;;  %v993_v7 = vsel %vm992_vm8, %v5805_v31, %v991_v10  ;;  %v2066_v54 = vmul.f32 %v3532_v37, %v2065_v9 }
 0x212   :  { %3547 = vrsqrt.f32 %v5886_v41  ;;  %v3544_v26 = vpop.eup %3543  ;;  %v2557_v56 = vmul.f32 %v3542_v30, %v4829_v0  ;;  %v978_v63 = vmul.f32 %v3534_v5, %v977_v24  ;;  %vm2094_vm15 = vcmp.eq.f32.partialorder %v5842_v47, 0.0 }
 0x213   :  { %v2089_v32 = vsub.f32 1.5, %v2088_v62  ;;  %v2622_v55 = vsub.f32 %v2494_v35, %v2558_v12  ;;  %v996_v29 = vsel %vm994_vm9, %v995_v61, %v993_v7  ;;  %v2067_v17 = vmul.f32 %v2066_v54, %v5830_v8  ;;  %v5920_v54 = vpop.xlane.xlu1 %1519 }
 0x214   :  { %v3546_v50 = vpop.eup %3545  ;;  %v998_v15 = vmul.f32 %v3544_v26, %v5870_v60  ;;  %v2621_v14 = vsub.f32 %v2493_v21, %v2557_v56  ;;  %v979_v37 = vmul.f32 %v978_v63, %v5834_v46  ;;  %v2095_v12 = vand.u32 2147483648, %v5842_v47 }
 0x215   :  { %v2090_v10 = vmul.f32 %v3536_v33, %v2089_v32  ;;  %v2074_v9 = vmul.f32 %v3546_v50, %v5874_v19  ;;  %v2686_v0 = vmul.f32 %v2622_v55, %v2622_v55  ;;  %v2069_v5 = vsel %vm2068_vm10, %v5830_v8, %v2067_v17 }
 0x216   :  { %v999_v43 = vmul.f32 %v3544_v26, %v998_v15  ;;  %v2685_v31 = vmul.f32 %v2621_v14, %v2621_v14  ;;  %v2072_v61 = vsel %vm2070_vm11, %v2071_v20, %v2069_v5  ;;  %v981_v21 = vsel %vm980_vm12, %v5834_v46, %v979_v37  ;;  %v5931_v15 = vpop.xlane.xlu0 %431 }
 0x217   :  { %v2091_v33 = vmul.f32 %v2090_v10, %v5842_v47  ;;  %v1280_v62 = vadd.f32 1e-10, %v996_v29  ;;  %v2367_v30 = vadd.f32 1e-10, %v2072_v61  ;;  %v984_v35 = vsel %vm982_vm13, %v983_v34, %v981_v21 }
 0x218   :  { %v5916_v24 = vpop.eup %3547  ;;  %v1000_v7 = vmul.f32 0.5, %v999_v43  ;;  %v2754_v56 = vmul.f32 %v5633_v52, %v2685_v31  ;;  %v1279_v8 = vadd.f32 1e-10, %v984_v35  ;;  %v2075_v63 = vmul.f32 %v3546_v50, %v2074_v9 }
 0x219   :  { %v2093_v20 = vsel %vm2092_vm14, %v5842_v47, %v2091_v33  ;;  %v2755_v32 = vmul.f32 %v5633_v52, %v2686_v0  ;;  %3549 = vrcp.f32 %v2367_v30  ;;  %v1022_v17 = vmul.f32 %v5916_v24, %v5886_v41 }
 0x21a   :  { %v2096_v55 = vsel %vm2094_vm15, %v2095_v12, %v2093_v20  ;;  %v1001_v29 = vsub.f32 1.5, %v1000_v7  ;;  %v2817_v46 = vadd.f32 %v2816_v48, %v2754_v56  ;;  %3551 = vrcp.f32 %v1279_v8  ;;  %v5939_v12 = vpop.xlane.xlu2 %1523 }
 0x21b   :  { %v2076_v34 = vmul.f32 0.5, %v2075_v63  ;;  %v2369_v14 = vadd.f32 1e-10, %v2096_v55  ;;  %3553 = vrcp.f32 %v1280_v62  ;;  %vm1004_vm0 = vcmp.eq.f32.partialorder %v5870_v60, inf  ;;  %v5949_v35 = vpop.xlane.xlu1 %435 }
 0x21c   :  { %v1002_v37 = vmul.f32 %v3544_v26, %v1001_v29  ;;  %v2818_v10 = vadd.f32 %v2817_v46, %v2755_v32  ;;  %3555 = vrsqrt.f32 %v5920_v54  ;;  %v1007_v47 = vand.u32 2147483648, %v5870_v60 }
 0x21d   :  { %v2077_v9 = vsub.f32 1.5, %v2076_v34  ;;  %v1023_v5 = vmul.f32 %v5916_v24, %v1022_v17  ;;  %3557 = vrsqrt.f32 %v5931_v15  ;;  %vm1006_vm1 = vcmp.eq.f32.partialorder %v5870_v60, 0.0 }
 0x21e   :  { %v1003_v0 = vmul.f32 %v1002_v37, %v5870_v60  ;;  %3559 = vrcp.f32 %v2369_v14  ;;  %vm2080_vm2 = vcmp.eq.f32.partialorder %v5874_v19, inf  ;;  %v2083_v30 = vand.u32 2147483648, %v5874_v19  ;;  %v5955_v55 = vpop.xlane.xlu0 %1521 }
 0x21f   :  { %v2078_v48 = vmul.f32 %v3546_v50, %v2077_v9  ;;  %v3550_v43 = vpop.eup %3549  ;;  %3561 = vrsqrt.f32 %v5939_v12  ;;  %vm2082_vm3 = vcmp.eq.f32.partialorder %v5874_v19, 0.0  ;;  %v1031_v34 = vand.u32 2147483648, %v5886_v41 }
 0x220   :  { %v1005_v26 = vsel %vm1004_vm0, %v5870_v60, %v1003_v0  ;;  %v3552_v31 = vpop.eup %3551  ;;  %v2559_v61 = vmul.f32 %v3550_v43, %v4889_v40  ;;  %v1024_v40 = vmul.f32 0.5, %v1023_v5  ;;  %vm2104_vm4 = vcmp.eq.f32.partialorder %v5920_v54, inf }
 0x221   :  { %v1008_v21 = vsel %vm1006_vm1, %v1007_v47, %v1005_v26  ;;  %v2079_v33 = vmul.f32 %v2078_v48, %v5874_v19  ;;  %v2495_v50 = vmul.f32 %v3552_v31, %v4896_v11  ;;  %v3554_v7 = vpop.eup %3553  ;;  %vm2106_vm5 = vcmp.eq.f32.partialorder %v5920_v54, 0.0 }
 0x222   :  { %v1281_v62 = vadd.f32 1e-10, %v1008_v21  ;;  %v3556_v56 = vpop.eup %3555  ;;  %v1025_v14 = vsub.f32 1.5, %v1024_v40  ;;  %v2107_v43 = vand.u32 2147483648, %v5920_v54  ;;  %vm1016_vm6 = vcmp.eq.f32.partialorder %v5931_v15, inf }
 0x223   :  { %v2081_v60 = vsel %vm2080_vm2, %v5874_v19, %v2079_v33  ;;  %v2623_v8 = vsub.f32 %v2495_v50, %v2559_v61  ;;  %v3558_v63 = vpop.eup %3557  ;;  %v2098_v11 = vmul.f32 %v3556_v56, %v5920_v54  ;;  %v2496_v19 = vmul.f32 %v3554_v7, %v4885_v58 }
 0x224   :  { %3563 = vrcp.f32 %v1281_v62  ;;  %v2084_v20 = vsel %vm2082_vm3, %v2083_v30, %v2081_v60  ;;  %v3560_v29 = vpop.eup %3559  ;;  %v1010_v17 = vmul.f32 %v3558_v63, %v5931_v15  ;;  %vm1018_vm7 = vcmp.eq.f32.partialorder %v5931_v15, 0.0 }
 0x225   :  { %v2368_v32 = vadd.f32 1e-10, %v2084_v20  ;;  %3565 = vrsqrt.f32 %v5949_v35  ;;  %v2687_v46 = vmul.f32 %v2623_v8, %v2623_v8  ;;  %v2099_v37 = vmul.f32 %v3556_v56, %v2098_v11  ;;  %v3562_v9 = vpop.eup %3561 }
 0x226   :  { %v1011_v47 = vmul.f32 %v3558_v63, %v1010_v17  ;;  %v2561_v48 = vmul.f32 %v3560_v29, %v4955_v51  ;;  %v2122_v58 = vmul.f32 %v3562_v9, %v5939_v12  ;;  %v1026_v50 = vmul.f32 %v5916_v24, %v1025_v14 }
 0x227   :  { %3567 = vrcp.f32 %v2368_v32  ;;  %v2756_v0 = vmul.f32 %v5633_v52, %v2687_v46  ;;  %v2100_v5 = vmul.f32 0.5, %v2099_v37  ;;  %vm1028_vm8 = vcmp.eq.f32.partialorder %v5886_v41, inf }
 0x228   :  { %3569 = vrsqrt.f32 %v5955_v55  ;;  %v1012_v61 = vmul.f32 0.5, %v1011_v47  ;;  %v2123_v62 = vmul.f32 %v3562_v9, %v2122_v58  ;;  %v1019_v7 = vand.u32 2147483648, %v5931_v15 }
 0x229   :  { %v2819_v31 = vadd.f32 %v2818_v10, %v2756_v0  ;;  %v2101_v51 = vsub.f32 1.5, %v2100_v5  ;;  %vm2128_vm9 = vcmp.eq.f32.partialorder %v5939_v12, inf  ;;  %vm2130_vm10 = vcmp.eq.f32.partialorder %v5939_v12, 0.0 }
 0x22a   :  { %v3564_v26 = vpop.eup %3563  ;;  %v1013_v30 = vsub.f32 1.5, %v1012_v61  ;;  %v2124_v20 = vmul.f32 0.5, %v2123_v62  ;;  %vm1030_vm11 = vcmp.eq.f32.partialorder %v5886_v41, 0.0  ;;  %v2131_v29 = vand.u32 2147483648, %v5939_v12 }
 0x22b   :  { %v3566_v21 = vpop.eup %3565  ;;  %v2497_v33 = vmul.f32 %v3564_v26, %v4962_v39  ;;  %v2102_v8 = vmul.f32 %v3556_v56, %v2101_v51  ;;  %v5976_v39 = vpop.xlane.xlu1 %1525  ;;  %v1027_v17 = vmul.f32 %v1026_v50, %v5886_v41  ;;  %vm1040_vm12 = vcmp.eq.f32.partialorder %v5949_v35, inf }
 0x22c   :  { %v1034_v10 = vmul.f32 %v3566_v21, %v5949_v35  ;;  %v1014_v11 = vmul.f32 %v3558_v63, %v1013_v30  ;;  %v2125_v37 = vsub.f32 1.5, %v2124_v20  ;;  %3571 = vrsqrt.f32 %v5976_v39 }
 0x22d   :  { %v3568_v60 = vpop.eup %3567  ;;  %v2625_v40 = vsub.f32 %v2497_v33, %v2561_v48  ;;  %v2103_v14 = vmul.f32 %v2102_v8, %v5920_v54  ;;  %v5995_v33 = vpop.xlane.xlu2 %439  ;;  %vm1042_vm13 = vcmp.eq.f32.partialorder %v5949_v35, 0.0  ;;  %vm2116_vm14 = vcmp.eq.f32.partialorder %v5955_v55, inf }
 0x22e   :  { %v3570_v24 = vpop.eup %3569  ;;  %v2560_v32 = vmul.f32 %v3568_v60, %v4976_v27  ;;  %v1035_v46 = vmul.f32 %v3566_v21, %v1034_v10  ;;  %v1015_v47 = vmul.f32 %v1014_v11, %v5931_v15  ;;  %v2126_v5 = vmul.f32 %v3562_v9, %v2125_v37 }
 0x22f   :  { %v2110_v56 = vmul.f32 %v3570_v24, %v5955_v55  ;;  %v2689_v27 = vmul.f32 %v2625_v40, %v2625_v40  ;;  %v2105_v63 = vsel %vm2104_vm4, %v5920_v54, %v2103_v14  ;;  %v1029_v54 = vsel %vm1028_vm8, %v5886_v41, %v1027_v17 }
 0x230   :  { %v2624_v0 = vsub.f32 %v2496_v19, %v2560_v32  ;;  %v1036_v48 = vmul.f32 0.5, %v1035_v46  ;;  %v2108_v61 = vsel %vm2106_vm5, %v2107_v43, %v2105_v63  ;;  %v1017_v19 = vsel %vm1016_vm6, %v5931_v15, %v1015_v47 }
 0x231   :  { %v2111_v58 = vmul.f32 %v3570_v24, %v2110_v56  ;;  %v2370_v50 = vadd.f32 1e-10, %v2108_v61  ;;  %v1020_v51 = vsel %vm1018_vm7, %v1019_v7, %v1017_v19  ;;  %v2127_v62 = vmul.f32 %v2126_v5, %v5939_v12  ;;  %v6008_v7 = vpop.xlane.xlu0 %437 }
 0x232   :  { %v2688_v26 = vmul.f32 %v2624_v0, %v2624_v0  ;;  %v1037_v9 = vsub.f32 1.5, %v1036_v48  ;;  %v1282_v43 = vadd.f32 1e-10, %v1020_v51  ;;  %v2758_v60 = vmul.f32 %v5633_v52, %v2689_v27  ;;  %v3572_v8 = vpop.eup %3571 }
 0x233   :  { %v2112_v10 = vmul.f32 0.5, %v2111_v58  ;;  %3573 = vrcp.f32 %v2370_v50  ;;  %v2129_v40 = vsel %vm2128_vm9, %v5939_v12, %v2127_v62  ;;  %v2134_v14 = vmul.f32 %v3572_v8, %v5976_v39  ;;  %v6036_v51 = vpop.xlane.xlu1 %441 }
 0x234   :  { %v2757_v30 = vmul.f32 %v5633_v52, %v2688_v26  ;;  %v1038_v15 = vmul.f32 %v3566_v21, %v1037_v9  ;;  %3575 = vrcp.f32 %v1282_v43  ;;  %v2132_v32 = vsel %vm2130_vm10, %v2131_v29, %v2129_v40 }
 0x235   :  { %v2113_v11 = vsub.f32 1.5, %v2112_v10  ;;  %v1032_v52 = vsel %vm1030_vm11, %v1031_v34, %v1029_v54  ;;  %v2372_v46 = vadd.f32 1e-10, %v2132_v32  ;;  %v1043_v37 = vand.u32 2147483648, %v5949_v35 }
 0x236   :  { %v2820_v20 = vadd.f32 %v2819_v31, %v2757_v30  ;;  %v1039_v17 = vmul.f32 %v1038_v15, %v5949_v35  ;;  %3577 = vrsqrt.f32 %v5995_v33  ;;  %v2135_v41 = vmul.f32 %v3572_v8, %v2134_v14  ;;  %v6051_v15 = vld [vmem:[%s6652_s2] ss:$0 sm:$0xff] }
 0x237   :  { %v2114_v56 = vmul.f32 %v3570_v24, %v2113_v11  ;;  %3579 = vrcp.f32 %v2372_v46  ;;  %v1283_v34 = vadd.f32 1e-10, %v1032_v52  ;;  %v2119_v24 = vand.u32 2147483648, %v5955_v55 }
 0x238   :  { %v2821_v21 = vadd.f32 %v2820_v20, %v2758_v60  ;;  %v1041_v12 = vsel %vm1040_vm12, %v5949_v35, %v1039_v17  ;;  %3581 = vrsqrt.f32 %v6008_v7  ;;  %v2136_v48 = vmul.f32 0.5, %v2135_v41  ;;  %v6031_v35 = vpop.xlane.xlu2 %1529 }
 0x239   :  { %v1044_v31 = vsel %vm1042_vm13, %v1043_v37, %v1041_v12  ;;  %v2115_v29 = vmul.f32 %v2114_v56, %v5955_v55  ;;  %v3574_v0 = vpop.eup %3573  ;;  %vm2118_vm15 = vcmp.eq.f32.partialorder %v5955_v55, 0.0  ;;  %vm2140_vm0 = vcmp.eq.f32.partialorder %v5976_v39, inf }
 0x23a   :  { %v1284_v47 = vadd.f32 1e-10, %v1044_v31  ;;  %v3576_v27 = vpop.eup %3575  ;;  %v2562_v63 = vmul.f32 %v3574_v0, %v5026_v16  ;;  %v2137_v50 = vsub.f32 1.5, %v2136_v48  ;;  %v6039_v16 = vpop.xlane.xlu0 %1527  ;;  %v2143_v52 = vand.u32 2147483648, %v5976_v39 }
 0x23b   :  { %v2117_v5 = vsel %vm2116_vm14, %v5955_v55, %v2115_v29  ;;  %v2498_v58 = vmul.f32 %v3576_v27, %v5030_v57  ;;  %vm2142_vm1 = vcmp.eq.f32.partialorder %v5976_v39, 0.0  ;;  %vm1052_vm2 = vcmp.eq.f32.partialorder %v6008_v7, inf }
 0x23c   :  { %3583 = vrcp.f32 %v1284_v47  ;;  %v2120_v26 = vsel %vm2118_vm15, %v2119_v24, %v2117_v5  ;;  %v6034_v61 = vpop.eup %3577  ;;  %v2138_v30 = vmul.f32 %v3572_v8, %v2137_v50  ;;  %vm1054_vm3 = vcmp.eq.f32.partialorder %v6008_v7, 0.0 }
 0x23d   :  { %3585 = vrcp.f32 %v1283_v34  ;;  %v2371_v19 = vadd.f32 1e-10, %v2120_v26  ;;  %v3580_v62 = vpop.eup %3579  ;;  %v2626_v9 = vsub.f32 %v2498_v58, %v2562_v63  ;;  %v1058_v10 = vmul.f32 %v6034_v61, %v5995_v33  ;;  %v6074_v58 = vpop.xlane.xlu1 %1531 }
 0x23e   :  { %3587 = vrsqrt.f32 %v6031_v35  ;;  %v3582_v55 = vpop.eup %3581  ;;  %v2564_v43 = vmul.f32 %v3580_v62, %v5085_v1  ;;  %v2139_v60 = vmul.f32 %v2138_v30, %v5976_v39  ;;  %v1055_v26 = vand.u32 2147483648, %v6008_v7 }
 0x23f   :  { %3589 = vrcp.f32 %v2371_v19  ;;  %v2690_v54 = vmul.f32 %v2626_v9, %v2626_v9  ;;  %v1046_v57 = vmul.f32 %v3582_v55, %v6008_v7  ;;  %v1059_v12 = vmul.f32 %v6034_v61, %v1058_v10 }
 0x240   :  { %3591 = vrsqrt.f32 %v6036_v51  ;;  %v2141_v11 = vsel %vm2140_vm0, %v5976_v39, %v2139_v60  ;;  %v6066_v0 = vpop.xlane.xlu2 %445  ;;  %vm1064_vm4 = vcmp.eq.f32.partialorder %v5995_v33, inf  ;;  %vm1066_vm5 = vcmp.eq.f32.partialorder %v5995_v33, 0.0 }
 0x241   :  { %3593 = vrsqrt.f32 %v6039_v16  ;;  %v2759_v8 = vmul.f32 %v6051_v15, %v2690_v54  ;;  %v1047_v20 = vmul.f32 %v3582_v55, %v1046_v57  ;;  %v2144_v41 = vsel %vm2142_vm1, %v2143_v52, %v2141_v11 }
 0x242   :  { %v3584_v40 = vpop.eup %3583  ;;  %v2373_v24 = vadd.f32 1e-10, %v2144_v41  ;;  %v1060_v27 = vmul.f32 0.5, %v1059_v12  ;;  %3595 = vrsqrt.f32 %v6066_v0  ;;  %v6085_v10 = vpop.xlane.xlu0 %443  ;;  %vm2164_vm6 = vcmp.eq.f32.partialorder %v6031_v35, inf }
 0x243   :  { %v3586_v32 = vpop.eup %3585  ;;  %v2500_v1 = vmul.f32 %v3584_v40, %v5091_v28  ;;  %v2822_v17 = vadd.f32 %v2821_v21, %v2759_v8  ;;  %v1048_v14 = vmul.f32 0.5, %v1047_v20  ;;  %vm2166_vm7 = vcmp.eq.f32.partialorder %v6031_v35, 0.0 }
 0x244   :  { %v3588_v46 = vpop.eup %3587  ;;  %v2499_v31 = vmul.f32 %v3586_v32, %v5023_v45  ;;  %3597 = vrcp.f32 %v2373_v24  ;;  %v1061_v9 = vsub.f32 1.5, %v1060_v27  ;;  %vm1076_vm8 = vcmp.eq.f32.partialorder %v6036_v51, inf }
 0x245   :  { %v3590_v37 = vpop.eup %3589  ;;  %v6059_v56 = vsub.f32 %v2500_v1, %v2564_v43  ;;  %v1049_v29 = vsub.f32 1.5, %v1048_v14  ;;  %v2158_v21 = vmul.f32 %v3588_v46, %v6031_v35  ;;  %3599 = vrsqrt.f32 %v6074_v58  ;;  %v6097_v14 = vpop.xlane.xlu1 %447 }
 0x246   :  { %v6062_v34 = vpop.eup %3591  ;;  %v2563_v28 = vmul.f32 %v3590_v37, %v5093_v36  ;;  %v1062_v8 = vmul.f32 %v6034_v61, %v1061_v9  ;;  %vm2152_vm9 = vcmp.eq.f32.partialorder %v6039_v16, inf  ;;  %vm1078_vm10 = vcmp.eq.f32.partialorder %v6036_v51, 0.0 }
 0x247   :  { %v3594_v47 = vpop.eup %3593  ;;  %v1050_v48 = vmul.f32 %v3582_v55, %v1049_v29  ;;  %v1070_v63 = vmul.f32 %v6062_v34, %v6036_v51  ;;  %v2159_v19 = vmul.f32 %v3588_v46, %v2158_v21  ;;  %vm2154_vm11 = vcmp.eq.f32.partialorder %v6039_v16, 0.0 }
 0x248   :  { %v2627_v39 = vsub.f32 %v2499_v31, %v2563_v28  ;;  %v2146_v36 = vmul.f32 %v3594_v47, %v6039_v16  ;;  %v6087_v60 = vpop.eup %3595  ;;  %v6093_v52 = vpop.xlane.xlu2 %1535  ;;  %v1063_v37 = vmul.f32 %v1062_v8, %v5995_v33  ;;  %vm1100_vm12 = vcmp.eq.f32.partialorder %v6066_v0, inf }
 0x249   :  { %v1051_v45 = vmul.f32 %v1050_v48, %v6008_v7  ;;  %v1071_v30 = vmul.f32 %v6062_v34, %v1070_v63  ;;  %v2160_v40 = vmul.f32 0.5, %v2159_v19  ;;  %v1094_v1 = vmul.f32 %v6087_v60, %v6066_v0 }
 0x24a   :  { %v2691_v5 = vmul.f32 %v2627_v39, %v2627_v39  ;;  %v2147_v43 = vmul.f32 %v3594_v47, %v2146_v36  ;;  %v6108_v27 = vpop.xlane.xlu0 %1533  ;;  %v1065_v63 = vsel %vm1064_vm4, %v5995_v33, %v1063_v37  ;;  %vm1102_vm13 = vcmp.eq.f32.partialorder %v6066_v0, 0.0 }
 0x24b   :  { %v1053_v62 = vsel %vm1052_vm2, %v6008_v7, %v1051_v45  ;;  %v3598_v7 = vpop.eup %3597  ;;  %v1072_v20 = vmul.f32 0.5, %v1071_v30  ;;  %v2161_v11 = vsub.f32 1.5, %v2160_v40  ;;  %v1095_v28 = vmul.f32 %v6087_v60, %v1094_v1 }
 0x24c   :  { %v2760_v50 = vmul.f32 %v6051_v15, %v2691_v5  ;;  %v1056_v55 = vsel %vm1054_vm3, %v1055_v26, %v1053_v62  ;;  %v2148_v32 = vmul.f32 0.5, %v2147_v43  ;;  %v2565_v12 = vmul.f32 %v3598_v7, %v5168_v6 }
 0x24d   :  { %v1285_v57 = vadd.f32 1e-10, %v1056_v55  ;;  %v1073_v41 = vsub.f32 1.5, %v1072_v20  ;;  %v2162_v39 = vmul.f32 %v3588_v46, %v2161_v11  ;;  %v1079_v1 = vand.u32 2147483648, %v6036_v51  ;;  %v6141_v11 = vpop.xlane.xlu1 %1537 }
 0x24e   :  { %v6082_v54 = vadd.f32 %v2822_v17, %v2760_v50  ;;  %v6095_v17 = vpop.eup %3599  ;;  %v2149_v31 = vsub.f32 1.5, %v2148_v32  ;;  %v1067_v50 = vand.u32 2147483648, %v5995_v33  ;;  %v2167_v33 = vand.u32 2147483648, %v6031_v35 }
 0x24f   :  { %3601 = vrcp.f32 %v1285_v57  ;;  %v2170_v24 = vmul.f32 %v6095_v17, %v6074_v58  ;;  %v1074_v5 = vmul.f32 %v6062_v34, %v1073_v41  ;;  %v2163_v46 = vmul.f32 %v2162_v39, %v6031_v35 }
 0x250   :  { %3603 = vrsqrt.f32 %v6085_v10  ;;  %v2150_v45 = vmul.f32 %v3594_v47, %v2149_v31  ;;  %v1068_v34 = vsel %vm1066_vm5, %v1067_v50, %v1065_v63  ;;  %v6130_v8 = vpop.xlane.xlu2 %451  ;;  %vm2176_vm14 = vcmp.eq.f32.partialorder %v6074_v58, inf }
 0x251   :  { %3605 = vrsqrt.f32 %v6093_v52  ;;  %v2171_v36 = vmul.f32 %v6095_v17, %v2170_v24  ;;  %v1075_v47 = vmul.f32 %v1074_v5, %v6036_v51  ;;  %v2165_v30 = vsel %vm2164_vm6, %v6031_v35, %v2163_v46 }
 0x252   :  { %3607 = vrsqrt.f32 %v6097_v14  ;;  %v2151_v9 = vmul.f32 %v2150_v45, %v6039_v16  ;;  %v1286_v32 = vadd.f32 1e-10, %v1068_v34  ;;  %v2168_v37 = vsel %vm2166_vm7, %v2167_v33, %v2165_v30  ;;  %v6157_v45 = vpop.xlane.xlu0 %449 }
 0x253   :  { %3609 = vrsqrt.f32 %v6108_v27  ;;  %v2172_v57 = vmul.f32 0.5, %v2171_v36  ;;  %vm1088_vm15 = vcmp.eq.f32.partialorder %v6085_v10, inf  ;;  %vm2178_vm0 = vcmp.eq.f32.partialorder %v6074_v58, 0.0 }
 0x254   :  { %3611 = vrsqrt.f32 %v6130_v8  ;;  %vm1090_vm1 = vcmp.eq.f32.partialorder %v6085_v10, 0.0  ;;  %vm2200_vm2 = vcmp.eq.f32.partialorder %v6093_v52, inf  ;;  %vm2202_vm3 = vcmp.eq.f32.partialorder %v6093_v52, 0.0 }
 0x255   :  { %v3602_v61 = vpop.eup %3601  ;;  %v2173_v41 = vsub.f32 1.5, %v2172_v57  ;;  %3613 = vrsqrt.f32 %v6141_v11  ;;  %vm1112_vm4 = vcmp.eq.f32.partialorder %v6097_v14, inf  ;;  %vm1114_vm5 = vcmp.eq.f32.partialorder %v6097_v14, 0.0 }
 0x256   :  { %v3604_v29 = vpop.eup %3603  ;;  %v2501_v21 = vmul.f32 %v3602_v61, %v5176_v2  ;;  %v1096_v2 = vmul.f32 0.5, %v1095_v28  ;;  %v2153_v61 = vsel %vm2152_vm9, %v6039_v16, %v2151_v9  ;;  %3615 = vrcp.f32 %v1286_v32 }
 0x257   :  { %v1082_v48 = vmul.f32 %v3604_v29, %v6085_v10  ;;  %v6118_v19 = vpop.eup %3605  ;;  %v2174_v46 = vmul.f32 %v6095_v17, %v2173_v41  ;;  %3617 = vrsqrt.f32 %v6157_v45  ;;  %v1103_v32 = vand.u32 2147483648, %v6066_v0 }
 0x258   :  { %v6111_v6 = vsub.f32 %v2501_v21, %v2565_v12  ;;  %v6121_v62 = vpop.eup %3607  ;;  %v1097_v55 = vsub.f32 1.5, %v1096_v2  ;;  %v2194_v40 = vmul.f32 %v6118_v19, %v6093_v52  ;;  %v1077_v12 = vsel %vm1076_vm8, %v6036_v51, %v1075_v47 }
 0x259   :  { %v1083_v26 = vmul.f32 %v3604_v29, %v1082_v48  ;;  %v1106_v7 = vmul.f32 %v6121_v62, %v6097_v14  ;;  %v6136_v20 = vpop.eup %3609  ;;  %v2155_v21 = vand.u32 2147483648, %v6039_v16  ;;  %v2375_v48 = vadd.f32 1e-10, %v2168_v37 }
 0x25a   :  { %v1098_v35 = vmul.f32 %v6087_v60, %v1097_v55  ;;  %v2195_v28 = vmul.f32 %v6118_v19, %v2194_v40  ;;  %v2182_v24 = vmul.f32 %v6136_v20, %v6108_v27  ;;  %v2692_v60 = vmul.f32 %v6059_v56, %v6059_v56  ;;  %v6162_v51 = vpop.eup %3611  ;;  %v6165_v56 = vpop.xlane.xlu2 %1541 }
 0x25b   :  { %v1084_v43 = vmul.f32 0.5, %v1083_v26  ;;  %v1107_v39 = vmul.f32 %v6121_v62, %v1106_v7  ;;  %v1080_v63 = vsel %vm1078_vm10, %v1079_v1, %v1077_v12  ;;  %v2156_v5 = vsel %vm2154_vm11, %v2155_v21, %v2153_v61  ;;  %v6167_v47 = vpop.eup %3613  ;;  %v6188_v61 = vpop.xlane.xlu1 %453 }
 0x25c   :  { %v1099_v2 = vmul.f32 %v1098_v35, %v6066_v0  ;;  %v2196_v26 = vmul.f32 0.5, %v2195_v28  ;;  %v2183_v34 = vmul.f32 %v6136_v20, %v2182_v24  ;;  %v1287_v16 = vadd.f32 1e-10, %v1080_v63  ;;  %v3616_v17 = vpop.eup %3615 }
 0x25d   :  { %v1085_v31 = vsub.f32 1.5, %v1084_v43  ;;  %v1108_v50 = vmul.f32 0.5, %v1107_v39  ;;  %v6170_v9 = vmul.f32 %v6051_v15, %v2692_v60  ;;  %3619 = vrcp.f32 %v2375_v48  ;;  %v6190_v35 = vpop.eup %3617 }
 0x25e   :  { %v2374_v55 = vadd.f32 1e-10, %v2156_v5  ;;  %v2175_v30 = vmul.f32 %v2174_v46, %v6074_v58  ;;  %v2197_v43 = vsub.f32 1.5, %v2196_v26  ;;  %v2184_v33 = vmul.f32 0.5, %v2183_v34  ;;  %v6203_v5 = vpop.xlane.xlu0 %1539 }
 0x25f   :  { %v1086_v36 = vmul.f32 %v3604_v29, %v1085_v31  ;;  %v1101_v29 = vsel %vm1100_vm12, %v6066_v0, %v1099_v2  ;;  %v1109_v40 = vsub.f32 1.5, %v1108_v50  ;;  %v1130_v7 = vmul.f32 %v6162_v51, %v6130_v8 }
 0x260   :  { %3621 = vrsqrt.f32 %v6165_v56  ;;  %v2206_v1 = vmul.f32 %v6167_v47, %v6141_v11  ;;  %v6184_v37 = vmul.f32 %v3616_v17, %v5156_v49  ;;  %v2179_v12 = vand.u32 2147483648, %v6074_v58 }
 0x261   :  { %v1087_v57 = vmul.f32 %v1086_v36, %v6085_v10  ;;  %3623 = vrcp.f32 %v1287_v16  ;;  %v1104_v41 = vsel %vm1102_vm13, %v1103_v32, %v1101_v29  ;;  %v2177_v31 = vsel %vm2176_vm14, %v6074_v58, %v2175_v30 }
 0x262   :  { %3625 = vrcp.f32 %v2374_v55  ;;  %v2198_v0 = vmul.f32 %v6118_v19, %v2197_v43  ;;  %v1110_v21 = vmul.f32 %v6121_v62, %v1109_v40  ;;  %v2185_v39 = vsub.f32 1.5, %v2184_v33  ;;  %v6216_v55 = vpop.xlane.xlu2 %457  ;;  %v6819_v43 = vld [vmem:[#allocation10_spill] sm:$0xff] }
 0x263   :  { %v3620_v28 = vpop.eup %3619  ;;  %v1089_v49 = vsel %vm1088_vm15, %v6085_v10, %v1087_v57  ;;  %v1131_v24 = vmul.f32 %v6162_v51, %v1130_v7  ;;  %v1091_v60 = vand.u32 2147483648, %v6085_v10  ;;  %v2207_v48 = vmul.f32 %v6167_v47, %v2206_v1  ;;  %v6820_v7 = vld [vmem:[#allocation11_spill] sm:$0xff]  ;;  %v6821_v1 = vld [vmem:[#allocation12_spill] sm:$0xff] }
 0x264   :  { %v1118_v63 = vmul.f32 %v6190_v35, %v6157_v45  ;;  %3627 = vrsqrt.f32 %v6188_v61  ;;  %v2203_v62 = vand.u32 2147483648, %v6093_v52  ;;  %v1289_v46 = vadd.f32 1e-10, %v1104_v41 }
 0x265   :  { %v2180_v36 = vsel %vm2178_vm0, %v2179_v12, %v2177_v31  ;;  %v1092_v26 = vsel %vm1090_vm1, %v1091_v60, %v1089_v49  ;;  %v2199_v34 = vmul.f32 %v2198_v0, %v6093_v52  ;;  %v1111_v16 = vmul.f32 %v1110_v21, %v6097_v14  ;;  %v6237_v49 = vpop.xlane.xlu1 %1543 }
 0x266   :  { %v6205_v19 = vpop.eup %3621  ;;  %v2186_v58 = vmul.f32 %v6136_v20, %v2185_v39  ;;  %v1132_v10 = vmul.f32 0.5, %v1131_v24  ;;  %v2208_v17 = vmul.f32 0.5, %v2207_v48  ;;  %v1119_v29 = vmul.f32 %v6190_v35, %v1118_v63 }
 0x267   :  { %v3624_v2 = vpop.eup %3623  ;;  %v2230_v30 = vmul.f32 %v6205_v19, %v6165_v56  ;;  %3629 = vrsqrt.f32 %v6203_v5  ;;  %v2693_v57 = vmul.f32 %v6111_v6, %v6111_v6  ;;  %v2567_v40 = vmul.f32 %v3620_v28, %v6819_v43 }
 0x268   :  { %v3626_v50 = vpop.eup %3625  ;;  %v2376_v33 = vadd.f32 1e-10, %v2180_v36  ;;  %v2503_v32 = vmul.f32 %v3624_v2, %v6820_v7  ;;  %3631 = vrcp.f32 %v1289_v46  ;;  %v1288_v41 = vadd.f32 1e-10, %v1092_v26  ;;  %v6249_v36 = vpop.xlane.xlu0 %455 }
 0x269   :  { %v2566_v12 = vmul.f32 %v3626_v50, %v6821_v1  ;;  %v2201_v31 = vsel %vm2200_vm2, %v6093_v52, %v2199_v34  ;;  %v1113_v6 = vsel %vm1112_vm4, %v6097_v14, %v1111_v16  ;;  %v2187_v0 = vmul.f32 %v2186_v58, %v6108_v27 }
 0x26a   :  { %v6226_v20 = vpop.eup %3627  ;;  %v1133_v28 = vsub.f32 1.5, %v1132_v10  ;;  %v2209_v21 = vsub.f32 1.5, %v2208_v17  ;;  %v1120_v39 = vmul.f32 0.5, %v1119_v29  ;;  %v2231_v24 = vmul.f32 %v6205_v19, %v2230_v30 }
 0x26b   :  { %3633 = vrsqrt.f32 %v6216_v55  ;;  %v1115_v60 = vand.u32 2147483648, %v6097_v14  ;;  %vm2188_vm6 = vcmp.eq.f32.partialorder %v6108_v27, inf  ;;  %v1142_v48 = vmul.f32 %v6226_v20, %v6188_v61  ;;  %v6266_v14 = vpop.xlane.xlu2 %1547 }
 0x26c   :  { %3635 = vrcp.f32 %v2376_v33  ;;  %v2631_v2 = vsub.f32 %v2503_v32, %v2567_v40  ;;  %v2630_v46 = vsub.f32 %v6184_v37, %v2566_v12  ;;  %vm2190_vm7 = vcmp.eq.f32.partialorder %v6108_v27, 0.0 }
 0x26d   :  { %v6245_v63 = vpop.eup %3629  ;;  %3637 = vrcp.f32 %v1288_v41  ;;  %v6252_v26 = vmul.f32 %v6051_v15, %v2693_v57  ;;  %v2204_v50 = vsel %vm2202_vm3, %v2203_v62, %v2201_v31  ;;  %v1116_v34 = vsel %vm1114_vm5, %v1115_v60, %v1113_v6 }
 0x26e   :  { %v2189_v16 = vsel %vm2188_vm6, %v6108_v27, %v2187_v0  ;;  %v3632_v58 = vpop.eup %3631  ;;  %v1134_v10 = vmul.f32 %v6162_v51, %v1133_v28  ;;  %v2210_v37 = vmul.f32 %v6167_v47, %v2209_v21  ;;  %v1121_v17 = vsub.f32 1.5, %v1120_v39 }
 0x26f   :  { %v2232_v29 = vmul.f32 0.5, %v2231_v24  ;;  %v2191_v30 = vand.u32 2147483648, %v6108_v27  ;;  %v1143_v57 = vmul.f32 %v6226_v20, %v1142_v48  ;;  %v2218_v52 = vmul.f32 %v6245_v63, %v6203_v5  ;;  %v6287_v27 = vpop.xlane.xlu1 %459 }
 0x270   :  { %3639 = vrsqrt.f32 %v6237_v49  ;;  %v6270_v43 = vmul.f32 %v2631_v2, %v2631_v2  ;;  %v2694_v51 = vmul.f32 %v2630_v46, %v2630_v46  ;;  %v2378_v40 = vadd.f32 1e-10, %v2204_v50 }
 0x271   :  { %v6268_v62 = vpop.eup %3633  ;;  %vm1136_vm8 = vcmp.eq.f32.partialorder %v6130_v8, inf  ;;  %v6274_v33 = vmul.f32 %v3632_v58, %v5279_v25  ;;  %v1290_v7 = vadd.f32 1e-10, %v1116_v34  ;;  %v2192_v32 = vsel %vm2190_vm7, %v2191_v30, %v2189_v16  ;;  %v6304_v34 = vpop.xlane.xlu0 %1545 }
 0x272   :  { %v3636_v47 = vpop.eup %3635  ;;  %vm1138_vm9 = vcmp.eq.f32.partialorder %v6130_v8, 0.0  ;;  %v1139_v1 = vand.u32 2147483648, %v6130_v8  ;;  %v1135_v41 = vmul.f32 %v1134_v10, %v6130_v8  ;;  %v2211_v31 = vmul.f32 %v2210_v37, %v6141_v11 }
 0x273   :  { %v3638_v12 = vpop.eup %3637  ;;  %v1122_v6 = vmul.f32 %v6190_v35, %v1121_v17  ;;  %v2233_v0 = vsub.f32 1.5, %v2232_v29  ;;  %v1144_v28 = vmul.f32 0.5, %v1143_v57  ;;  %v2219_v25 = vmul.f32 %v6245_v63, %v2218_v52  ;;  %v6318_v17 = vpop.xlane.xlu2 %463 }
 0x274   :  { %v1166_v21 = vmul.f32 %v6268_v62, %v6216_v55  ;;  %3641 = vrsqrt.f32 %v6249_v36  ;;  %v6290_v39 = vmul.f32 %v6051_v15, %v2694_v51  ;;  %vm2212_vm10 = vcmp.eq.f32.partialorder %v6141_v11, inf }
 0x275   :  { %3643 = vrcp.f32 %v2378_v40  ;;  %vm2214_vm11 = vcmp.eq.f32.partialorder %v6141_v11, 0.0  ;;  %v2568_v24 = vmul.f32 %v3636_v47, %v5303_v22  ;;  %v2504_v60 = vmul.f32 %v3638_v12, %v5311_v53 }
 0x276   :  { %v6294_v35 = vpop.eup %3639  ;;  %3645 = vrcp.f32 %v1290_v7  ;;  %v2377_v48 = vadd.f32 1e-10, %v2192_v32  ;;  %v1137_v2 = vsel %vm1136_vm8, %v6130_v8, %v1135_v41  ;;  %v2213_v15 = vsel %vm2212_vm10, %v6141_v11, %v2211_v31 }
 0x277   :  { %v1123_v46 = vmul.f32 %v1122_v6, %v6157_v45  ;;  %v2234_v50 = vmul.f32 %v6205_v19, %v2233_v0  ;;  %v1145_v16 = vsub.f32 1.5, %v1144_v28  ;;  %v2220_v58 = vmul.f32 0.5, %v2219_v25  ;;  %v6340_v28 = vpop.xlane.xlu1 %1549 }
 0x278   :  { %v1167_v22 = vmul.f32 %v6268_v62, %v1166_v21  ;;  %3647 = vrsqrt.f32 %v6266_v14  ;;  %v2215_v53 = vand.u32 2147483648, %v6141_v11  ;;  %vm1124_vm12 = vcmp.eq.f32.partialorder %v6157_v45, inf }
 0x279   :  { %v2242_v10 = vmul.f32 %v6294_v35, %v6237_v49  ;;  %3649 = vrsqrt.f32 %v6287_v27  ;;  %vm1126_vm13 = vcmp.eq.f32.partialorder %v6157_v45, 0.0  ;;  %v1127_v19 = vand.u32 2147483648, %v6157_v45 }
 0x27a   :  { %v6313_v37 = vpop.eup %3641  ;;  %3651 = vrcp.f32 %v2377_v48  ;;  %vm2236_vm14 = vcmp.eq.f32.partialorder %v6165_v56, inf  ;;  %v2632_v30 = vsub.f32 %v2504_v60, %v2568_v24  ;;  %v1140_v57 = vsel %vm1138_vm9, %v1139_v1, %v1137_v2  ;;  %v6822_v1 = vld [vmem:[#allocation9_spill] sm:$0xff] }
 0x27b   :  { %v3644_v29 = vpop.eup %3643  ;;  %v2216_v52 = vsel %vm2214_vm11, %v2215_v53, %v2213_v15  ;;  %v1125_v51 = vsel %vm1124_vm12, %v6157_v45, %v1123_v46  ;;  %vm2238_vm15 = vcmp.eq.f32.partialorder %v6165_v56, 0.0  ;;  %v2235_v47 = vmul.f32 %v2234_v50, %v6165_v56 }
 0x27c   :  { %v3646_v40 = vpop.eup %3645  ;;  %v1146_v7 = vmul.f32 %v6226_v20, %v1145_v16  ;;  %v2221_v32 = vsub.f32 1.5, %v2220_v58  ;;  %v1168_v12 = vmul.f32 0.5, %v1167_v22  ;;  %v2239_v41 = vand.u32 2147483648, %v6165_v56  ;;  %v6359_v22 = vpop.xlane.xlu0 %461 }
 0x27d   :  { %v2243_v31 = vmul.f32 %v6294_v35, %v2242_v10  ;;  %v1154_v8 = vmul.f32 %v6313_v37, %v6249_v36  ;;  %3653 = vrsqrt.f32 %v6304_v34  ;;  %v6336_v6 = vmul.f32 %v3644_v29, %v6822_v1 }
 0x27e   :  { %v6333_v11 = vpop.eup %3647  ;;  %v1292_v0 = vadd.f32 1e-10, %v1140_v57  ;;  %vm1148_vm0 = vcmp.eq.f32.partialorder %v6188_v61, inf  ;;  %v1151_v20 = vand.u32 2147483648, %v6188_v61  ;;  %v6344_v21 = vmul.f32 %v2632_v30, %v2632_v30  ;;  %v6824_v30 = vld [vmem:[#allocation14_spill] sm:$0xff] }
 0x27f   :  { %v6342_v25 = vpop.eup %3649  ;;  %v2379_v24 = vadd.f32 1e-10, %v2216_v52  ;;  %v1128_v60 = vsel %vm1126_vm13, %v1127_v19, %v1125_v51  ;;  %vm1150_vm1 = vcmp.eq.f32.partialorder %v6188_v61, 0.0  ;;  %3655 = vrsqrt.f32 %v6318_v17 }
 0x280   :  { %v3652_v48 = vpop.eup %3651  ;;  %v2237_v2 = vsel %vm2236_vm14, %v6165_v56, %v2235_v47  ;;  %v1147_v15 = vmul.f32 %v1146_v7, %v6188_v61  ;;  %v2222_v46 = vmul.f32 %v6245_v63, %v2221_v32  ;;  %v1169_v50 = vsub.f32 1.5, %v1168_v12  ;;  %v6823_v63 = vld [vmem:[#allocation13_spill] sm:$0xff] }
 0x281   :  { %v2244_v16 = vmul.f32 0.5, %v2243_v31  ;;  %v1155_v58 = vmul.f32 %v6313_v37, %v1154_v8  ;;  %v2266_v45 = vmul.f32 %v6333_v11, %v6266_v14  ;;  %3657 = vrsqrt.f32 %v6340_v28 }
 0x282   :  { %3659 = vrcp.f32 %v1292_v0  ;;  %v1291_v53 = vadd.f32 1e-10, %v1128_v60  ;;  %vm2224_vm2 = vcmp.eq.f32.partialorder %v6203_v5, inf  ;;  %v1178_v10 = vmul.f32 %v6342_v25, %v6287_v27 }
 0x283   :  { %v6364_v19 = vpop.eup %3653  ;;  %v6367_v29 = vmul.f32 %v3646_v40, %v6823_v63  ;;  %v2569_v57 = vmul.f32 %v3652_v48, %v6824_v30  ;;  %3661 = vrcp.f32 %v2379_v24  ;;  %vm2226_vm3 = vcmp.eq.f32.partialorder %v6203_v5, 0.0  ;;  %v6379_v40 = vpop.xlane.xlu2 %1553 }
 0x284   :  { %v2227_v52 = vand.u32 2147483648, %v6203_v5  ;;  %v2240_v51 = vsel %vm2238_vm15, %v2239_v41, %v2237_v2  ;;  %v1149_v47 = vsel %vm1148_vm0, %v6188_v61, %v1147_v15  ;;  %v2223_v7 = vmul.f32 %v2222_v46, %v6203_v5  ;;  %v6407_v46 = vpop.xlane.xlu1 %465 }
 0x285   :  { %3663 = vrsqrt.f32 %v6359_v22  ;;  %v6381_v32 = vpop.eup %3655  ;;  %v1170_v12 = vmul.f32 %v6268_v62, %v1169_v50  ;;  %v2245_v31 = vsub.f32 1.5, %v2244_v16  ;;  %v1156_v8 = vmul.f32 0.5, %v1155_v58 }
 0x286   :  { %v2267_v1 = vmul.f32 %v6333_v11, %v2266_v45  ;;  %3665 = vrcp.f32 %v1291_v53  ;;  %vm1172_vm4 = vcmp.eq.f32.partialorder %v6216_v55, inf  ;;  %v1179_v56 = vmul.f32 %v6342_v25, %v1178_v10 }
 0x287   :  { %v2254_v41 = vmul.f32 %v6364_v19, %v6304_v34  ;;  %v6389_v0 = vpop.eup %3657  ;;  %v6392_v24 = vsub.f32 %v6274_v33, %v2569_v57  ;;  %vm1174_vm5 = vcmp.eq.f32.partialorder %v6216_v55, 0.0  ;;  %v1175_v62 = vand.u32 2147483648, %v6216_v55 }
 0x288   :  { %v1202_v60 = vmul.f32 %v6381_v32, %v6318_v17  ;;  %3667 = vrsqrt.f32 %v6379_v40  ;;  %v6399_v48 = vpop.eup %3659  ;;  %v2381_v2 = vadd.f32 1e-10, %v2240_v51  ;;  %v1152_v15 = vsel %vm1150_vm1, %v1151_v20, %v1149_v47 }
 0x289   :  { %v2225_v33 = vsel %vm2224_vm2, %v6203_v5, %v2223_v7  ;;  %vm2248_vm6 = vcmp.eq.f32.partialorder %v6237_v49, inf  ;;  %v3662_v50 = vpop.eup %3661  ;;  %v1171_v16 = vmul.f32 %v1170_v12, %v6216_v55  ;;  %v2246_v58 = vmul.f32 %v6294_v35, %v2245_v31  ;;  %v6421_v35 = vpop.xlane.xlu0 %1551 }
 0x28a   :  { %v1157_v45 = vsub.f32 1.5, %v1156_v8  ;;  %v2268_v53 = vmul.f32 0.5, %v2267_v1  ;;  %v2251_v61 = vand.u32 2147483648, %v6237_v49  ;;  %v1180_v20 = vmul.f32 0.5, %v1179_v56 }
 0x28b   :  { %v6411_v10 = vpop.eup %3663  ;;  %v2255_v63 = vmul.f32 %v6364_v19, %v2254_v41  ;;  %v2278_v30 = vmul.f32 %v6389_v0, %v6340_v28  ;;  %v1293_v57 = vadd.f32 1e-10, %v1152_v15  ;;  %vm2250_vm7 = vcmp.eq.f32.partialorder %v6237_v49, 0.0 }
 0x28c   :  { %v1163_v51 = vand.u32 2147483648, %v6249_v36  ;;  %v1203_v47 = vmul.f32 %v6381_v32, %v1202_v60  ;;  %3669 = vrsqrt.f32 %v6407_v46  ;;  %v3666_v7 = vpop.eup %3665  ;;  %v6424_v12 = vmul.f32 %v3662_v50, %v5429_v4 }
 0x28d   :  { %3671 = vrcp.f32 %v2381_v2  ;;  %v2228_v31 = vsel %vm2226_vm3, %v2227_v52, %v2225_v33  ;;  %vm1160_vm8 = vcmp.eq.f32.partialorder %v6249_v36, inf  ;;  %v1190_v8 = vmul.f32 %v6411_v10, %v6359_v22 }
 0x28e   :  { %v6431_v1 = vpop.eup %3667  ;;  %v1173_v56 = vsel %vm1172_vm4, %v6216_v55, %v1171_v16  ;;  %v2247_v41 = vmul.f32 %v2246_v58, %v6237_v49  ;;  %v1158_v4 = vmul.f32 %v6313_v37, %v1157_v45  ;;  %v2269_v60 = vsub.f32 1.5, %v2268_v53 }
 0x28f   :  { %v1181_v2 = vsub.f32 1.5, %v1180_v20  ;;  %v2256_v15 = vmul.f32 0.5, %v2255_v63  ;;  %v2279_v5 = vmul.f32 %v6389_v0, %v2278_v30  ;;  %3673 = vrsqrt.f32 %v6421_v35 }
 0x290   :  { %3675 = vrcp.f32 %v1293_v57  ;;  %v2380_v52 = vadd.f32 1e-10, %v2228_v31  ;;  %vm1162_vm9 = vcmp.eq.f32.partialorder %v6249_v36, 0.0  ;;  %v2275_v33 = vand.u32 2147483648, %v6266_v14 }
 0x291   :  { %v1204_v50 = vmul.f32 0.5, %v1203_v47  ;;  %v6443_v16 = vmul.f32 %v3666_v7, %v5440_v42  ;;  %v1176_v37 = vsel %vm1174_vm5, %v1175_v62, %v1173_v56  ;;  %vm2272_vm10 = vcmp.eq.f32.partialorder %v6266_v14, inf  ;;  %v6464_v7 = vpop.xlane.xlu1 %1555 }
 0x292   :  { %v1191_v58 = vmul.f32 %v6411_v10, %v1190_v8  ;;  %v2302_v45 = vmul.f32 %v6431_v1, %v6379_v40  ;;  %v6451_v53 = vpop.eup %3669  ;;  %v2249_v20 = vsel %vm2248_vm6, %v6237_v49, %v2247_v41  ;;  %v1159_v63 = vmul.f32 %v1158_v4, %v6249_v36 }
 0x293   :  { %v2270_v42 = vmul.f32 %v6333_v11, %v2269_v60  ;;  %vm1184_vm11 = vcmp.eq.f32.partialorder %v6287_v27, inf  ;;  %v6459_v55 = vpop.eup %3671  ;;  %v1182_v62 = vmul.f32 %v6342_v25, %v1181_v2  ;;  %v2257_v30 = vsub.f32 1.5, %v2256_v15 }
 0x294   :  { %v2280_v57 = vmul.f32 0.5, %v2279_v5  ;;  %v1214_v47 = vmul.f32 %v6451_v53, %v6407_v46  ;;  %3677 = vrcp.f32 %v2380_v52  ;;  %v1295_v31 = vadd.f32 1e-10, %v1176_v37 }
 0x295   :  { %vm2274_vm12 = vcmp.eq.f32.partialorder %v6266_v14, 0.0  ;;  %v1187_v8 = vand.u32 2147483648, %v6287_v27  ;;  %v1205_v11 = vsub.f32 1.5, %v1204_v50  ;;  %v3674_v56 = vpop.eup %3673  ;;  %v2252_v41 = vsel %vm2250_vm7, %v2251_v61, %v2249_v20 }
 0x296   :  { %vm1186_vm13 = vcmp.eq.f32.partialorder %v6287_v27, 0.0  ;;  %v2263_v25 = vand.u32 2147483648, %v6304_v34  ;;  %v1192_v4 = vmul.f32 0.5, %v1191_v58  ;;  %v2303_v60 = vmul.f32 %v6431_v1, %v2302_v45  ;;  %v6473_v2 = vpop.eup %3675  ;;  %v6485_v58 = vpop.xlane.xlu0 %467 }
 0x297   :  { %v1161_v15 = vsel %vm1160_vm8, %v6249_v36, %v1159_v63  ;;  %v2271_v5 = vmul.f32 %v2270_v42, %v6266_v14  ;;  %vm2260_vm14 = vcmp.eq.f32.partialorder %v6304_v34, inf  ;;  %v2290_v49 = vmul.f32 %v3674_v56, %v6421_v35 }
 0x298   :  { %3679 = vrsqrt.f32 %v6464_v7  ;;  %v1183_v61 = vmul.f32 %v1182_v62, %v6287_v27  ;;  %v2258_v52 = vmul.f32 %v6364_v19, %v2257_v30  ;;  %v2281_v50 = vsub.f32 1.5, %v2280_v57 }
 0x299   :  { %v1215_v37 = vmul.f32 %v6451_v53, %v1214_v47  ;;  %3681 = vrcp.f32 %v1295_v31  ;;  %v1206_v45 = vmul.f32 %v6381_v32, %v1205_v11  ;;  %vm1208_vm15 = vcmp.eq.f32.partialorder %v6318_v17, inf }
 0x29a   :  { %v2291_v20 = vmul.f32 %v3674_v56, %v2290_v49  ;;  %v2382_v63 = vadd.f32 1e-10, %v2252_v41  ;;  %v1164_v42 = vsel %vm1162_vm9, %v1163_v51, %v1161_v15  ;;  %vm2262_vm0 = vcmp.eq.f32.partialorder %v6304_v34, 0.0  ;;  %v6494_v30 = vpop.eup %3677 }
 0x29b   :  { %v1193_v19 = vsub.f32 1.5, %v1192_v4  ;;  %v2304_v62 = vmul.f32 0.5, %v2303_v60  ;;  %v2273_v57 = vsel %vm2272_vm10, %v6266_v14, %v2271_v5  ;;  %v1211_v32 = vand.u32 2147483648, %v6318_v17 }
 0x29c   :  { %v2292_v47 = vmul.f32 0.5, %v2291_v20  ;;  %3683 = vrsqrt.f32 %v6485_v58  ;;  %v1185_v36 = vsel %vm1184_vm11, %v6287_v27, %v1183_v61  ;;  %v2259_v51 = vmul.f32 %v2258_v52, %v6304_v34 }
 0x29d   :  { %vm1210_vm1 = vcmp.eq.f32.partialorder %v6318_v17, 0.0  ;;  %v2282_v31 = vmul.f32 %v6389_v0, %v2281_v50  ;;  %v1216_v11 = vmul.f32 0.5, %v1215_v37  ;;  %v1294_v4 = vadd.f32 1e-10, %v1164_v42 }
 0x29e   :  { %v3680_v41 = vpop.eup %3679  ;;  %v1207_v60 = vmul.f32 %v1206_v45, %v6318_v17  ;;  %vm2284_vm2 = vcmp.eq.f32.partialorder %v6340_v28, inf  ;;  %v2293_v15 = vsub.f32 1.5, %v2292_v47  ;;  %v2276_v5 = vsel %vm2274_vm12, %v2275_v33, %v2273_v57 }
 0x29f   :  { %vm2286_vm3 = vcmp.eq.f32.partialorder %v6340_v28, 0.0  ;;  %v1194_v49 = vmul.f32 %v6411_v10, %v1193_v19  ;;  %v2305_v61 = vsub.f32 1.5, %v2304_v62  ;;  %v2314_v0 = vmul.f32 %v3680_v41, %v6464_v7  ;;  %v6516_v52 = vpop.eup %3681 }
 0x2a0   :  { %3685 = vrcp.f32 %v2382_v63  ;;  %v1188_v50 = vsel %vm1186_vm13, %v1187_v8, %v1185_v36  ;;  %v2287_v37 = vand.u32 2147483648, %v6340_v28  ;;  %vm1196_vm4 = vcmp.eq.f32.partialorder %v6359_v22, inf }
 0x2a1   :  { %v2261_v14 = vsel %vm2260_vm14, %v6304_v34, %v2259_v51  ;;  %v2283_v33 = vmul.f32 %v2282_v31, %v6340_v28  ;;  %vm1198_vm5 = vcmp.eq.f32.partialorder %v6359_v22, 0.0  ;;  %v1217_v10 = vsub.f32 1.5, %v1216_v11 }
 0x2a2   :  { %v2315_v45 = vmul.f32 %v3680_v41, %v2314_v0  ;;  %v3684_v20 = vpop.eup %3683  ;;  %3687 = vrcp.f32 %v1294_v4  ;;  %v2384_v63 = vadd.f32 1e-10, %v2276_v5  ;;  %v1209_v27 = vsel %vm1208_vm15, %v6318_v17, %v1207_v60 }
 0x2a3   :  { %v2294_v8 = vmul.f32 %v3674_v56, %v2293_v15  ;;  %v1195_v42 = vmul.f32 %v1194_v49, %v6359_v22  ;;  %v2306_v19 = vmul.f32 %v6431_v1, %v2305_v61  ;;  %v1226_v57 = vmul.f32 %v3684_v20, %v6485_v58 }
 0x2a4   :  { %v2316_v62 = vmul.f32 0.5, %v2315_v45  ;;  %v1296_v47 = vadd.f32 1e-10, %v1188_v50  ;;  %v2264_v36 = vsel %vm2262_vm0, %v2263_v25, %v2261_v14  ;;  %v1199_v51 = vand.u32 2147483648, %v6359_v22 }
 0x2a5   :  { %vm2308_vm6 = vcmp.eq.f32.partialorder %v6379_v40, inf  ;;  %v2285_v56 = vsel %vm2284_vm2, %v6340_v28, %v2283_v33  ;;  %vm2310_vm7 = vcmp.eq.f32.partialorder %v6379_v40, 0.0  ;;  %v1218_v1 = vmul.f32 %v6451_v53, %v1217_v10 }
 0x2a6   :  { %v2317_v31 = vsub.f32 1.5, %v2316_v62  ;;  %v1227_v11 = vmul.f32 %v3684_v20, %v1226_v57  ;;  %v6544_v4 = vpop.eup %3685  ;;  %3689 = vrcp.f32 %v2384_v63  ;;  %v1212_v34 = vsel %vm1210_vm1, %v1211_v32, %v1209_v27 }
 0x2a7   :  { %v2311_v25 = vand.u32 2147483648, %v6379_v40  ;;  %v2295_v60 = vmul.f32 %v2294_v8, %v6421_v35  ;;  %v1197_v15 = vsel %vm1196_vm4, %v6359_v22, %v1195_v42  ;;  %v2307_v5 = vmul.f32 %v2306_v19, %v6379_v40 }
 0x2a8   :  { %v2318_v49 = vmul.f32 %v3680_v41, %v2317_v31  ;;  %v1228_v53 = vmul.f32 0.5, %v1227_v11  ;;  %v3688_v61 = vpop.eup %3687  ;;  %v2383_v0 = vadd.f32 1e-10, %v2264_v36  ;;  %v2288_v50 = vsel %vm2286_vm3, %v2287_v37, %v2285_v56 }
 0x2a9   :  { %vm1220_vm8 = vcmp.eq.f32.partialorder %v6407_v46, inf  ;;  %vm1222_vm9 = vcmp.eq.f32.partialorder %v6407_v46, 0.0  ;;  %3691 = vrcp.f32 %v1296_v47  ;;  %v1219_v17 = vmul.f32 %v1218_v1, %v6407_v46 }
 0x2aa   :  { %vm2296_vm10 = vcmp.eq.f32.partialorder %v6421_v35, inf  ;;  %v1229_v32 = vsub.f32 1.5, %v1228_v53  ;;  %v1298_v14 = vadd.f32 1e-10, %v1212_v34  ;;  %v1200_v41 = vsel %vm1198_vm5, %v1199_v51, %v1197_v15 }
 0x2ab   :  { %v2297_v33 = vsel %vm2296_vm10, %v6421_v35, %v2295_v60  ;;  %v2319_v10 = vmul.f32 %v2318_v49, %v6464_v7  ;;  %v2385_v28 = vadd.f32 1e-10, %v2288_v50  ;;  %v2309_v37 = vsel %vm2308_vm6, %v6379_v40, %v2307_v5  ;;  %v6825_v60 = vld [vmem:[#allocation16_spill] sm:$0xff] }
 0x2ac   :  { %v2299_v45 = vand.u32 2147483648, %v6421_v35  ;;  %v1230_v63 = vmul.f32 %v3684_v20, %v1229_v32  ;;  %v6568_v27 = vpop.eup %3689  ;;  %3693 = vrcp.f32 %v2383_v0  ;;  %v1223_v8 = vand.u32 2147483648, %v6407_v46 }
 0x2ad   :  { %vm2298_vm11 = vcmp.eq.f32.partialorder %v6421_v35, 0.0  ;;  %vm2320_vm12 = vcmp.eq.f32.partialorder %v6464_v7, inf  ;;  %v1297_v22 = vadd.f32 1e-10, %v1200_v41  ;;  %v1221_v42 = vsel %vm1220_vm8, %v6407_v46, %v1219_v17  ;;  %v6826_v46 = vld [vmem:[#allocation19_spill] sm:$0xff] }
 0x2ae   :  { %v2300_v19 = vsel %vm2298_vm11, %v2299_v45, %v2297_v33  ;;  %v1231_v62 = vmul.f32 %v1230_v63, %v6485_v58  ;;  %3695 = vrcp.f32 %v1298_v14  ;;  %v2321_v20 = vsel %vm2320_vm12, %v6464_v7, %v2319_v10 }
 0x2af   :  { %vm1232_vm13 = vcmp.eq.f32.partialorder %v6485_v58, inf  ;;  %v2312_v57 = vsel %vm2310_vm7, %v2311_v25, %v2309_v37  ;;  %v3692_v47 = vpop.eup %3691  ;;  %3697 = vrcp.f32 %v2385_v28  ;;  %vm2322_vm14 = vcmp.eq.f32.partialorder %v6464_v7, 0.0  ;;  %v6830_v37 = vld [vmem:[#allocation17_spill] sm:$0xff] }
 0x2b0   :  { %v2323_v35 = vand.u32 2147483648, %v6464_v7  ;;  %v1233_v36 = vsel %vm1232_vm13, %v6485_v58, %v1231_v62  ;;  %v2386_v51 = vadd.f32 1e-10, %v2300_v19  ;;  %vm1234_vm15 = vcmp.eq.f32.partialorder %v6485_v58, 0.0  ;;  %v6832_v19 = vld [vmem:[#allocation20_spill] sm:$0xff] }
 0x2b1   :  { %v1235_v56 = vand.u32 2147483648, %v6485_v58  ;;  %v1224_v1 = vsel %vm1222_vm9, %v1223_v8, %v1221_v42  ;;  %3699 = vrcp.f32 %v1297_v22  ;;  %v2387_v40 = vadd.f32 1e-10, %v2312_v57  ;;  %v6831_v8 = vld [vmem:[#allocation21_spill] sm:$0xff] }
 0x2b2   :  { %v2324_v31 = vsel %vm2322_vm14, %v2323_v35, %v2321_v20  ;;  %v2508_v11 = vmul.f32 %v6399_v48, %v5404_v13  ;;  %v3694_v34 = vpop.eup %3693  ;;  %v2509_v7 = vmul.f32 %v6473_v2, %v5492_v38  ;;  %v2572_v15 = vmul.f32 %v6494_v30, %v6825_v60 }
 0x2b3   :  { %v1236_v25 = vsel %vm1234_vm15, %v1235_v56, %v1233_v36  ;;  %v2824_v58 = vadd.f32 %v6082_v54, %v6170_v9  ;;  %v1299_v5 = vadd.f32 1e-10, %v1224_v1  ;;  %v2510_v49 = vmul.f32 %v3688_v61, %v6826_v46  ;;  %v6827_v54 = vld [vmem:[#allocation15_spill] sm:$0xff]  ;;  %v6828_v61 = vld [vmem:[#allocation18_spill] sm:$0xff] }
 0x2b4   :  { %v2634_v53 = vsub.f32 %v6367_v29, %v6336_v6  ;;  %v2635_v13 = vsub.f32 %v6443_v16, %v6424_v12  ;;  %v3696_v48 = vpop.eup %3695  ;;  %3701 = vrcp.f32 %v2386_v51  ;;  %v2388_v0 = vadd.f32 1e-10, %v2324_v31  ;;  %v6611_v12 = vld [vmem:[%s6652_s2] ss:$0 sm:$0xff] }
 0x2b5   :  { %v2697_v38 = vmul.f32 %v6392_v24, %v6392_v24  ;;  %v2825_v2 = vadd.f32 %v2824_v58, %v6252_v26  ;;  %v3698_v30 = vpop.eup %3697  ;;  %v1300_v50 = vadd.f32 1e-10, %v1236_v25  ;;  %3703 = vrcp.f32 %v2387_v40 }
 0x2b6   :  { %v2573_v9 = vmul.f32 %v6459_v55, %v6827_v54  ;;  %v2574_v6 = vmul.f32 %v6544_v4, %v6828_v61  ;;  %v2636_v29 = vsub.f32 %v2508_v11, %v2572_v15  ;;  %v2764_v24 = vmul.f32 %v6611_v12, %v6270_v43  ;;  %v6829_v55 = vld [vmem:[#allocation6_spill] sm:$0xff]  ;;  %v6834_v15 = vld [vmem:[#allocation8_spill] sm:$0xff] }
 0x2b7   :  { %v2765_v26 = vmul.f32 %v6611_v12, %v6344_v21  ;;  %v2826_v16 = vadd.f32 %v2825_v2, %v6290_v39  ;;  %v3700_v17 = vpop.eup %3699  ;;  %3705 = vrcp.f32 %v1299_v5  ;;  %v2575_v32 = vmul.f32 %v3694_v34, %v6829_v55  ;;  %v6833_v34 = vld [vmem:[#allocation22_spill] sm:$0xff]  ;;  %v6835_v5 = vld [vmem:[#allocation7_spill] sm:$0xff] }
 0x2b8   :  { %v2698_v14 = vmul.f32 %v2634_v53, %v2634_v53  ;;  %3707 = vrcp.f32 %v2388_v0  ;;  %v2699_v4 = vmul.f32 %v2635_v13, %v2635_v13  ;;  %v2766_v41 = vmul.f32 %v6611_v12, %v2697_v38 }
 0x2b9   :  { %v2827_v33 = vadd.f32 %v2826_v16, %v2764_v24  ;;  %3709 = vrcp.f32 %v1300_v50  ;;  %v2637_v10 = vsub.f32 %v2509_v7, %v2573_v9  ;;  %v2511_v43 = vmul.f32 %v6516_v52, %v6830_v37 }
 0x2ba   :  { %v3702_v28 = vpop.eup %3701  ;;  %v2638_v45 = vsub.f32 %v2510_v49, %v2574_v6  ;;  %v2700_v21 = vmul.f32 %v2636_v29, %v2636_v29  ;;  %v2512_v22 = vmul.f32 %v3692_v47, %v6831_v8  ;;  %v2513_v42 = vmul.f32 %v3700_v17, %v5702_v23 }
 0x2bb   :  { %v2828_v63 = vadd.f32 %v2827_v33, %v2765_v26  ;;  %v3704_v39 = vpop.eup %3703  ;;  %v2576_v62 = vmul.f32 %v6568_v27, %v6832_v19  ;;  %v2577_v20 = vmul.f32 %v3698_v30, %v5700_v18  ;;  %v2639_v57 = vsub.f32 %v2511_v43, %v2575_v32 }
 0x2bc   :  { %v2767_v35 = vmul.f32 %v6611_v12, %v2698_v14  ;;  %v2768_v36 = vmul.f32 %v6611_v12, %v2699_v4  ;;  %v2578_v56 = vmul.f32 %v3702_v28, %v5761_v59  ;;  %v2701_v1 = vmul.f32 %v2637_v10, %v2637_v10 }
 0x2bd   :  { %v2829_v51 = vadd.f32 %v2828_v63, %v2766_v41  ;;  %v3706_v52 = vpop.eup %3705  ;;  %v2702_v40 = vmul.f32 %v2638_v45, %v2638_v45  ;;  %v2769_v47 = vmul.f32 %v6611_v12, %v2700_v21  ;;  %v2514_v27 = vmul.f32 %v3696_v48, %v6833_v34 }
 0x2be   :  { %v3708_v31 = vpop.eup %3707  ;;  %v2640_v25 = vsub.f32 %v2512_v22, %v2576_v62  ;;  %v2641_v18 = vsub.f32 %v2513_v42, %v2577_v20  ;;  %v2703_v7 = vmul.f32 %v2639_v57, %v2639_v57  ;;  %v2515_v58 = vmul.f32 %v3706_v52, %v6834_v15 }
 0x2bf   :  { %v2830_v23 = vadd.f32 %v2829_v51, %v2767_v35  ;;  %v3710_v11 = vpop.eup %3709  ;;  %v2579_v46 = vmul.f32 %v3704_v39, %v6835_v5  ;;  %v2642_v49 = vsub.f32 %v2514_v27, %v2578_v56  ;;  %v2770_v59 = vmul.f32 %v6611_v12, %v2701_v1 }
 0x2c0   :  { %v2516_v53 = vmul.f32 %v3710_v11, %v5812_v44  ;;  %v2580_v13 = vmul.f32 %v3708_v31, %v5803_v3  ;;  %v2771_v0 = vmul.f32 %v6611_v12, %v2702_v40  ;;  %v2704_v2 = vmul.f32 %v2640_v25, %v2640_v25 }
 0x2c1   :  { %v2831_v60 = vadd.f32 %v2830_v23, %v2768_v36  ;;  %v2705_v48 = vmul.f32 %v2641_v18, %v2641_v18  ;;  %v2772_v30 = vmul.f32 %v6611_v12, %v2703_v7  ;;  %v2643_v54 = vsub.f32 %v2515_v58, %v2579_v46 }
 0x2c2   :  { %v2644_v9 = vsub.f32 %v2516_v53, %v2580_v13  ;;  %v2706_v61 = vmul.f32 %v2642_v49, %v2642_v49  ;;  %v2773_v29 = vmul.f32 %v6611_v12, %v2704_v2  ;;  %vm19_vm0 = vcmask 0  }
 0x2c3   :  { %v2832_v38 = vadd.f32 %v2831_v60, %v2769_v47  ;;  %v2774_v24 = vmul.f32 %v6611_v12, %v2705_v48  ;;  %v2707_v44 = vmul.f32 %v2643_v54, %v2643_v54  ;;  %v3741_v10 = vmov 0.0  }
 0x2c4   :  { %v2708_v16 = vmul.f32 %v2644_v9, %v2644_v9  ;;  %v2775_v3 = vmul.f32 %v6611_v12, %v2706_v61  ;;  %20 = vst.msk [vmem:[#allocation2] sm:$0x1] %vm19_vm0, %v3741_v10 }
 0x2c5   :  { %v2833_v50 = vadd.f32 %v2832_v38, %v2770_v59  ;;  %v2776_v32 = vmul.f32 %v6611_v12, %v2707_v44 }
 0x2c6   :  { %v2777_v14 = vmul.f32 %v6611_v12, %v2708_v16 }
 0x2c7   :  { %v2834_v6 = vadd.f32 %v2833_v50, %v2771_v0 }
 0x2c9   :  { %v2835_v26 = vadd.f32 %v2834_v6, %v2772_v30 }
 0x2cb   :  { %v2836_v17 = vadd.f32 %v2835_v26, %v2773_v29  ;;  %v2709_v8 = vld [vmem:[#allocation2] sm:$0x1] }
 0x2cd   :  { %v2837_v55 = vadd.f32 %v2836_v17, %v2774_v24 }
 0x2cf   :  { %v2838_v4 = vadd.f32 %v2837_v55, %v2775_v3 }
 0x2d1   :  { %v2839_v41 = vadd.f32 %v2838_v4, %v2776_v32 }
 0x2d3   :  { %v2840_v33 = vadd.f32 %v2839_v41, %v2777_v14 }
 0x2d5   :  { %2841 = vadd.xlane.f32.xlu2 %v2840_v33 }
 0x348   :  { %v2842_v28 = vpop.xlane.xlu2 %2841 }
 0x349   :  { %v2843_v37 = vrot.slane %v2842_v28, 4 }
 0x34b   :  { %v2844_v43 = vadd.f32 %v2843_v37, %v2842_v28 }
 0x34d   :  { %v2845_v45 = vrot.slane %v2844_v43, 2 }
 0x34f   :  { %v2846_v21 = vadd.f32 %v2845_v45, %v2844_v43 }
 0x351   :  { %v2847_v63 = vrot.slane %v2846_v21, 1 }
 0x353   :  { %v2848_v39 = vadd.f32 %v2847_v63, %v2846_v21 }
 0x355   :  { %3194 = vpush %v2848_v39 }
 0x386   :  { %s3195_s2 = spop %3194 }
 0x387   :  { %v2850_v22 = vstv %s3195_s2 }
 0x388   :  { %v2851_v12 = vadd.f32 %v2850_v22, %v2709_v8 }
 0x38a   :  { %2853 = vst.msk [vmem:[#allocation2] sm:$0x1] %vm19_vm0, %v2851_v12 }
 0x391   :  { %v2857_v42 = vld [vmem:[#allocation2] sm:$0x1] }
 0x392   :  { %v2858_v19 = vmul.f32 0.001953125, %v2857_v42 }
 0x394   :  { %2859 = vst.msk [vmem:[#allocation3] sm:$0x1] %vm19_vm0, %v2858_v19 }
 0x395   :  { %2870 = dma.vmem_to_hbm [thread:$0]  %s2866_s14, 16, %s2868_s17, [#allocation4]  }
 0x396   :  { %3739 = dma.done.wait [#allocation4], 16  }
 0x397   :  { %3740 = vsyncadd [#allocation4], 4294967280 }
 0x398   :  { %2875 = vsyncpa [#allocation4], 1 }

// kernel: perceptual_loss.6
= control target key start
LH: loop header
LB: loop body
LE: loop exit
PB: predicated region body
PF: predicated region fallthrough
CT: control target
= control target key end

     0   :  { %s3818_s12 = smov 0   ;;  %s3820_s13 = smov 0   ;;  %s4882_s0 = inlined_call_operand.vmem [shape: bf16[4,342,3], index: 0, kind: input, shape index: {}]   ;;  %s4883_s1 = inlined_call_operand.vmem [shape: bf16[9,3,128], index: 1, kind: input, shape index: {}]   ;;  %s4884_s2 = inlined_call_operand.vmem [shape: f32[1,128], index: 2, kind: input, shape index: {}]   ;;  %s4885_s3 = inlined_call_operand.vmem [shape: bf16[4,288,128], index: 3, kind: output, shape index: {}]  }
   0x1   :  { %s3822_s14 = smov 0  }
   0x2 LB: > { %s25_s15 = sadd.s32 1, %s3791_s13  ;;  %p3177_p0 = scmp.ge.s32.totalorder %s3795_s14, 1  ;;  %s3795_s14 = sphi %s3822_s14, %s13_s14   ;;  %s3791_s13 = sphi %s3820_s13, %s4913_s13   ;;  %s3787_s12 = sphi %s3818_s12, %s4912_s12  }
   0x3   : > { %p27_p1 = scmp.ge.s32.totalorder %s25_s15, 4  ;;  %p151_p2 = scmp.lt.s32.totalorder %s3795_s14, 5 }
   0x5   : > { %s4915_s15 = smov (%p27_p1, %s25_s15), 0  ;;  %p152_p3 = pnand %p3177_p0, %p151_p2 }
   0x7   : > { %155 = sbr.rel (%p152_p3) target bundleno = 820 (0x334), region = 32 }
   0xc   : > { %v3180_v0 = vld [vmem:[%s4883_s1 + $0x2] sm:$0x3]  ;;  %vm532_vm0 = vcmask 1040384   ;;  %vm533_vm1 = vcmask 1041408   ;;  %p179_p4 = scmp.lt.s32.totalorder %s3787_s12, 3  ;;  %v3797_v1 = vmov 65535  }
   0xd   : > { %v534_v2 = vsel %vm532_vm0, 4294967295, %v3797_v1  ;;  %v3285_v3 = vld [vmem:[%s4883_s1 + $0x4] sm:$0x3]  ;;  %v231_v5 = vld [vmem:[%s4883_s1] sm:$0x3]  ;;  %vm477_vm3 = vcmask 23552  }
   0xe   : > { %v3842_v4 = vsel %vm533_vm1, %v534_v2, 0  ;;  %s4917_s12 = smov (!%p179_p4, %s3787_s12), 3  ;;  %v3391_v6 = vld [vmem:[%s4883_s1 + $0x8] sm:$0x3]  ;;  %vm328_vm2 = vsmask.f32 7424 }
   0xf   : > { %v537_v7 = vand.u32 %v3180_v0, %v3842_v4  ;;  %v875_v8 = vand.u32 %v3285_v3, %v3842_v4  ;;  %v675_v9 = vand.u32 %v3842_v4, %v231_v5  ;;  %v1605_v10 = vand.u32 %v3391_v6, %v3842_v4  ;;  %s3724_s24 = smul.u32 172, %s4917_s12  ;;  %v3304_v48 = vld [vmem:[%s4883_s1 + $0x6] sm:$0x3] }
  0x10   : > { %v1236_v56 = vand.u32 %v3304_v48, %v3842_v4  ;;  %vm782_vm4 = vcmask 1046528   ;;  %vm1379_vm5 = vsmask.f32 6400  ;;  %vm2345_vm6 = vsmask.f32 5376  ;;  %s3725_s17 = smul.u32 144, %s4917_s12 }
  0x11   : > { %3721 = vmatpush.bf16.msra.mxu1 %v537_v7  ;;  %3722 = vmatpush.bf16.msra.mxu2 %v537_v7  ;;  %s3860_s27 = scalar_lea.vmem %s4882_s0, %s3724_s24  ;;  %vm1748_vm7 = vcmask 1045504   ;;  %vm2714_vm8 = vcmask 1044480  }
  0x12   : > { %546 = vmatpush.bf16.msra.mxu0 %v537_v7  ;;  %v3863_v11 = vld [vmem:[%s3860_s27 + $0x28] sm:$0xff]  ;;  %v3866_v12 = vld [vmem:[%s3860_s27 + $0x30] sm:$0xff]  ;;  %v3872_v14 = vld [vmem:[%s3860_s27 + $0x58] sm:$0xff]  ;;  %3723 = vmatpush.bf16.msra.mxu3 %v537_v7  ;;  %s4632_s20 = scalar_lea.vmem %s4885_s3, %s3725_s17 }
  0x13   : > { %v3869_v13 = vld [vmem:[%s3860_s27 + $0x50] sm:$0xff]  ;;  %v3875_v15 = vld [vmem:[%s3860_s27] sm:$0xff]   ;;  %v3878_v16 = vld [vmem:[%s3860_s27 + $0x8] sm:$0xff]  ;;  %v369_v17 = vshll.u32 %v3863_v11, 16  ;;  %v373_v18 = vshrl.u32 %v3863_v11, 16  ;;  %v377_v19 = vshll.u32 %v3866_v12, 16 }
  0x14   : > { %v409_v20 = vshll.u32 %v3869_v13, 16  ;;  %v413_v21 = vshrl.u32 %v3869_v13, 16  ;;  %v417_v22 = vshll.u32 %v3872_v14, 16  ;;  %v330_v23 = vshrl.u32 %v3875_v15, 16  ;;  %v3896_v34 = vld [vmem:[%s3860_s27 + $0x78] sm:$0xff]  ;;  %v3571_v35 = vld [vmem:[%s3860_s27 + $0x80] sm:$0xff] }
  0x15   : > { %884 = vmatpush.bf16.msrb.mxu2 %v875_v8  ;;  %684 = vmatpush.bf16.msrb.mxu1 %v675_v9  ;;  %v332_v24 = vshll.u32 %v3875_v15, 16  ;;  %v3888_v25 = vrot.slane %v369_v17, 1  ;;  %v379_v26 = vrot.slane %v377_v19, 1  ;;  %v337_v28 = vshll.u32 %v3878_v16, 16  ;;  %v3905_v40 = vld [vmem:[%s3860_s27 + $0x38] sm:$0xff]  ;;  %v3909_v41 = vld [vmem:[%s3860_s27 + $0x60] sm:$0xff] }
  0x16   : > { %1614 = vmatpush.bf16.msrb.mxu0 %v1605_v10  ;;  %v3890_v27 = vrot.slane %v409_v20, 1  ;;  %v419_v29 = vrot.slane %v417_v22, 1  ;;  %v449_v42 = vshll.u32 %v3896_v34, 16  ;;  %v453_v43 = vshrl.u32 %v3896_v34, 16  ;;  %v3914_v45 = vld [vmem:[%s3860_s27 + $0x10] sm:$0xff]  ;;  %1245 = vmatpush.bf16.msrb.mxu3 %v1236_v56  ;;  %v3572_v62 = vld [vmem:[%s3860_s27 + $0x88] sm:$0xff] }
  0x17   : > { %v334_v30 = vrot.slane %v332_v24, 1  ;;  %v375_v31 = vor.u32 %v373_v18, %v3888_v25  ;;  %v339_v33 = vrot.slane %v337_v28, 1  ;;  %v457_v44 = vshll.u32 %v3571_v35, 16  ;;  %v3933_v63 = vld [vmem:[%s3860_s27 + $0x48] sm:$0xff]  ;;  %v3942_v9 = vld [vmem:[%s3860_s27 + $0x40] sm:$0xff]  ;;  %v3980_v56 = vld [vmem:[%s3860_s27 + $0x70] sm:$0xff] }
  0x18   : > { %v415_v32 = vor.u32 %v413_v21, %v3890_v27  ;;  %v3916_v46 = vrot.slane %v449_v42, 1  ;;  %v381_v49 = vshrl.u32 %v3866_v12, 16  ;;  %v385_v50 = vshll.u32 %v3905_v40, 16  ;;  %v3945_v10 = vld [vmem:[%s3860_s27 + $0x68] sm:$0xff]  ;;  %v3950_v21 = vld [vmem:[%s3860_s27 + $0x18] sm:$0xff] }
  0x19   : > { %v335_v36 = vor.u32 %v334_v30, %v330_v23  ;;  %v380_v37 = vsel %vm328_vm2, %v375_v31, %v379_v26  ;;  %v459_v47 = vrot.slane %v457_v44, 1  ;;  %v421_v51 = vshrl.u32 %v3872_v14, 16  ;;  %v232_v22 = vld [vmem:[%s3860_s27 + $0x90] sm:$0x1]  ;;  %v3959_v31 = vld [vmem:[%s3860_s27 + $0x20] sm:$0xff] }
  0x1a   : > { %v420_v38 = vsel %vm328_vm2, %v415_v32, %v419_v29  ;;  %3254 = vmatmul.msk.bf16.vlgmr.msra.gmra.mxu1 %vm477_vm3, %v380_v37  ;;  %v425_v52 = vshll.u32 %v3909_v41, 16  ;;  %v455_v53 = vor.u32 %v453_v43, %v3916_v46  ;;  %v341_v54 = vshrl.u32 %v3878_v16, 16 }
  0x1b   : > { %3259 = vmatmul.msk.bf16.vlgmr.msra.gmra.mxu2 %vm477_vm3, %v420_v38  ;;  %v340_v39 = vsel %vm328_vm2, %v335_v36, %v339_v33  ;;  %v345_v55 = vshll.u32 %v3914_v45, 16  ;;  %v383_v58 = vor.u32 %v381_v49, %v379_v26  ;;  %v387_v59 = vrot.slane %v385_v50, 1 }
  0x1c   : > { %3249 = vmatmul.msk.bf16.vlgmr.msra.gmra.mxu0 %vm477_vm3, %v340_v39  ;;  %v460_v57 = vsel %vm328_vm2, %v455_v53, %v459_v47  ;;  %v423_v60 = vor.u32 %v421_v51, %v419_v29  ;;  %v427_v61 = vrot.slane %v425_v52, 1  ;;  %v343_v0 = vor.u32 %v341_v54, %v339_v33 }
  0x1d   : > { %3264 = vmatmul.msk.bf16.vlgmr.msra.gmra.mxu3 %vm477_vm3, %v460_v57  ;;  %v347_v1 = vrot.slane %v345_v55, 1  ;;  %v388_v2 = vsel %vm328_vm2, %v383_v58, %v387_v59  ;;  %v461_v5 = vshrl.u32 %v3571_v35, 16  ;;  %v465_v6 = vshll.u32 %v3572_v62, 16 }
  0x1e   : > { %v428_v3 = vsel %vm328_vm2, %v423_v60, %v427_v61  ;;  %v401_v7 = vshll.u32 %v3933_v63, 16  ;;  %v405_v20 = vshrl.u32 %v3933_v63, 16  ;;  %v389_v24 = vshrl.u32 %v3905_v40, 16 }
  0x1f   : > { %v348_v8 = vsel %vm328_vm2, %v343_v0, %v347_v1  ;;  %v463_v17 = vor.u32 %v461_v5, %v459_v47  ;;  %v467_v18 = vrot.slane %v465_v6, 1  ;;  %v393_v26 = vshll.u32 %v3942_v9, 16 }
  0x20   : > { %v403_v19 = vrot.slane %v401_v7, 1  ;;  %v429_v28 = vshrl.u32 %v3909_v41, 16  ;;  %v433_v29 = vshll.u32 %v3945_v10, 16  ;;  %v308_v32 = vunpack.c.l.b16 %v232_v22  ;;  %v3573_v22 = vld [vmem:[%s3860_s27 + $0x10] sm:$0xff] }
  0x21   : > { %v468_v30 = vsel %vm328_vm2, %v463_v17, %v467_v18  ;;  %v349_v35 = vshrl.u32 %v3914_v45, 16  ;;  %v353_v36 = vshll.u32 %v3950_v21, 16  ;;  %v391_v37 = vor.u32 %v389_v24, %v387_v59 }
  0x22   : > { %v407_v23 = vor.u32 %v405_v20, %v403_v19  ;;  %v395_v38 = vrot.slane %v393_v26, 1  ;;  %v431_v39 = vor.u32 %v429_v28, %v427_v61  ;;  %v435_v42 = vrot.slane %v433_v29, 1  ;;  %v3429_v26 = vld [vmem:[%s4883_s1 + $0xc] sm:$0x3] }
  0x23   : > { %v361_v43 = vshll.u32 %v3959_v31, 16  ;;  %v3969_v44 = vpack.c.b16 %v308_v32, %v308_v32  ;;  %v351_v47 = vor.u32 %v349_v35, %v347_v1  ;;  %v355_v48 = vrot.slane %v353_v36, 1  ;;  %v3410_v32 = vld [vmem:[%s4883_s1 + $0xa] sm:$0x3] }
  0x24   : > { %v3963_v33 = vsel %vm328_vm2, %v407_v23, %v3890_v27  ;;  %v396_v27 = vsel %vm328_vm2, %v391_v37, %v395_v38  ;;  %v436_v49 = vsel %vm328_vm2, %v431_v39, %v435_v42  ;;  %v469_v51 = vshrl.u32 %v3572_v62, 16  ;;  %v3535_v37 = vld [vmem:[%s4883_s1 + $0x10] sm:$0x3] }
  0x25   : > { %v363_v50 = vrot.slane %v361_v43, 1  ;;  %v473_v52 = vshll.u32 %v3969_v44, 16  ;;  %v365_v53 = vshrl.u32 %v3959_v31, 16  ;;  %v356_v54 = vsel %vm328_vm2, %v351_v47, %v355_v48 }
  0x26   : > { %v471_v57 = vor.u32 %v469_v51, %v467_v18  ;;  %v397_v60 = vshrl.u32 %v3942_v9, 16  ;;  %v437_v61 = vshrl.u32 %v3945_v10, 16  ;;  %v441_v62 = vshll.u32 %v3980_v56, 16 }
  0x27   : > { %v367_v55 = vor.u32 %v365_v53, %v363_v50  ;;  %v475_v58 = vrot.slane %v473_v52, 1  ;;  %v357_v1 = vshrl.u32 %v3950_v21, 16  ;;  %v2202_v29 = vand.u32 %v3429_v26, %v3842_v4 }
  0x28   : > { %v399_v5 = vor.u32 %v397_v60, %v395_v38  ;;  %v439_v6 = vor.u32 %v437_v61, %v435_v42  ;;  %v443_v7 = vrot.slane %v441_v62, 1  ;;  %v1841_v36 = vand.u32 %v3410_v32, %v3842_v4 }
  0x29   : > { %v372_v59 = vsel %vm328_vm2, %v367_v55, %v3888_v25  ;;  %v476_v0 = vsel %vm328_vm2, %v471_v57, %v475_v58  ;;  %v359_v17 = vor.u32 %v357_v1, %v355_v48  ;;  %2211 = vmatpush.bf16.msra.mxu2 %v2202_v29  ;;  %v2807_v38 = vand.u32 %v3535_v37, %v3842_v4  ;;  %v3574_v48 = vld [vmem:[%s3860_s27 + $0x18] sm:$0xff]  ;;  %v3575_v1 = vld [vmem:[%s3860_s27 + $0x20] sm:$0xff] }
  0x2a   : > { %3255 = vmatmul.msk.bf16.gmra.mxu1 %vm477_vm3, %v388_v2  ;;  %v1012_v2 = vld [vmem:[%s3860_s27 + $0x8] sm:$0xe]  ;;  %v404_v18 = vsel %vm328_vm2, %v399_v5, %v403_v19  ;;  %v444_v20 = vsel %vm328_vm2, %v439_v6, %v443_v7  ;;  %v1145_v19 = vrot.slane %v3573_v22, 1  ;;  %v445_v39 = vshrl.u32 %v3980_v56, 16 }
  0x2b   : > { %3260 = vmatmul.msk.bf16.gmra.mxu2 %vm477_vm3, %v428_v3  ;;  %v3991_v3 = vld [vmem:[%s3860_s27 + $0xc] sm:$0xf]  ;;  %v1088_v25 = vunpack.c.l.b16 %v1012_v2  ;;  %v364_v24 = vsel %vm328_vm2, %v359_v17, %v363_v50  ;;  %1850 = vmatpush.bf16.msra.mxu1 %v1841_v36  ;;  %v1389_v52 = vshrl.u32 %v3573_v22, 16  ;;  %v1392_v53 = vshll.u32 %v3573_v22, 16 }
  0x2c   : > { %3250 = vmatmul.msk.bf16.gmra.mxu0 %vm477_vm3, %v348_v8  ;;  %v4886_v8 = vunpack.c.l.b16 %v3991_v3  ;;  %v447_v43 = vor.u32 %v445_v39, %v443_v7  ;;  %v1149_v5 = vrot.slane %v3575_v1, 1  ;;  %v1398_v6 = vshrl.u32 %v3574_v48, 16 }
  0x2d   : > { %3265 = vmatmul.msk.bf16.gmra.mxu3 %vm477_vm3, %v468_v30  ;;  %v3516_v30 = vld [vmem:[%s4883_s1 + $0xe] sm:$0x3]  ;;  %2816 = vmatpush.bf16.msra.mxu0 %v2807_v38  ;;  %v1391_v58 = vrot.slane %v1389_v52, 1  ;;  %v1394_v60 = vrot.slane %v1392_v53, 2  ;;  %v1401_v7 = vshll.u32 %v3574_v48, 16  ;;  %v3577_v38 = vld [vmem:[%s3860_s27 + $0x30] sm:$0xff] }
  0x2e   : > { %v1125_v23 = vpack.c.b16 %v4886_v8, %v1088_v25  ;;  %v2571_v35 = vand.u32 %v3516_v30, %v3842_v4  ;;  %v452_v47 = vsel %vm328_vm2, %v447_v43, %v3916_v46  ;;  %v3701_v4 = vld [vmem:[%s3860_s27] sm:$0xf0]  ;;  %v1400_v17 = vrot.slane %v1398_v6, 1 }
  0x2f   : > { %v1395_v62 = vor.u32 %v1394_v60, %v1391_v58  ;;  %v1153_v39 = vrot.slane %v3577_v38, 1  ;;  %v3579_v6 = vld [vmem:[%s3860_s27 + $0x40] sm:$0xff] }
  0x30   : > { %v1144_v28 = vrot.slane %v1125_v23, 1  ;;  %2580 = vmatpush.bf16.msra.mxu3 %v2571_v35  ;;  %v1381_v50 = vshrl.u32 %v1125_v23, 16  ;;  %v1384_v51 = vshll.u32 %v1125_v23, 16  ;;  %v788_v35 = vrot.slane %v3950_v21, 1  ;;  %v3583_v8 = vld [vmem:[%s3860_s27 + $0x60] sm:$0xff] }
  0x32   : > { %v1146_v42 = vsel %vm782_vm4, %v1144_v28, %v1145_v19  ;;  %v1383_v46 = vrot.slane %v1381_v50, 1  ;;  %v1386_v57 = vrot.slane %v1384_v51, 2  ;;  %v1407_v28 = vshrl.u32 %v3575_v1, 16  ;;  %v3578_v51 = vld [vmem:[%s3860_s27 + $0x38] sm:$0xff] }
  0x34   : > { %v1387_v61 = vor.u32 %v1386_v57, %v1383_v46  ;;  %v1409_v30 = vrot.slane %v1407_v28, 1  ;;  %v1428_v46 = vshll.u32 %v3577_v38, 16 }
  0x36   : > { %v1396_v2 = vsel %vm1379_vm5, %v1387_v61, %v1395_v62  ;;  %v1430_v61 = vrot.slane %v1428_v46, 2 }
  0x3a   : > { %3256 = vmatmul.msk.bf16.gmra.mxu1 %vm477_vm3, %v396_v27  ;;  %v1147_v27 = vrot.slane %v3574_v48, 1 }
  0x3b   : > { %3261 = vmatmul.msk.bf16.gmra.mxu2 %vm477_vm3, %v436_v49  ;;  %v3702_v49 = vld [vmem:[%s3860_s27] sm:$0xe] }
  0x3c   : > { %3251 = vmatmul.msk.bf16.gmra.mxu0 %vm477_vm3, %v356_v54  ;;  %v3703_v54 = vor.u32 %v3702_v49, %v3701_v4  ;;  %v1148_v55 = vsel %vm782_vm4, %v1145_v19, %v1147_v27  ;;  %v1150_v25 = vsel %vm782_vm4, %v1147_v27, %v1149_v5  ;;  %v1410_v19 = vshll.u32 %v3575_v1, 16 }
  0x3d   : > { %3266 = vmatmul.msk.bf16.gmra.mxu3 %vm477_vm3, %v476_v0  ;;  %v790_v27 = vrot.slane %v3959_v31, 1 }
  0x3e   : > { %v1412_v32 = vrot.slane %v1410_v19, 2  ;;  %v794_v19 = vrot.slane %v3866_v12, 1 }
  0x40   : > { %v1413_v36 = vor.u32 %v1412_v32, %v1409_v30 }
  0x4a   : > { %3257 = vmatmul.msk.bf16.gmra.mxu1 %vm477_vm3, %v404_v18  ;;  %v1403_v18 = vrot.slane %v1401_v7, 2 }
  0x4b   : > { %3262 = vmatmul.msk.bf16.gmra.mxu2 %vm477_vm3, %v444_v20  ;;  %v786_v20 = vrot.slane %v3914_v45, 1 }
  0x4c   : > { %3252 = vmatmul.msk.bf16.gmra.mxu0 %vm477_vm3, %v364_v24  ;;  %v1404_v22 = vor.u32 %v1403_v18, %v1400_v17  ;;  %v1157_v17 = vrot.slane %v3579_v6, 1  ;;  %v1434_v18 = vshrl.u32 %v3578_v51, 16 }
  0x4d   : > { %3373 = vmatmul.msk.bf16.vlgmr.msrb.gmra.mxu3 %vm477_vm3, %v1146_v42  ;;  %v789_v37 = vsel %vm782_vm4, %v786_v20, %v788_v35 }
  0x4e   : > { %v1405_v24 = vsel %vm1379_vm5, %v1395_v62, %v1404_v22  ;;  %v1436_v28 = vrot.slane %v1434_v18, 1 }
  0x5a   : > { %3258 = vmatmul.msk.bf16.gmra.mxu1 %vm477_vm3, %v3963_v33  ;;  %v783_v33 = vrot.slane %v3703_v54, 1  ;;  %v1155_v54 = vrot.slane %v3578_v51, 1 }
  0x5b   : > { %3263 = vmatmul.msk.bf16.gmra.mxu2 %vm477_vm3, %v452_v47 }
  0x5c   : > { %3253 = vmatmul.msk.bf16.gmra.mxu0 %vm477_vm3, %v372_v59  ;;  %v784_v59 = vrot.slane %v3878_v16, 1  ;;  %v1156_v60 = vsel %vm782_vm4, %v1153_v39, %v1155_v54 }
  0x5d   : > { %3374 = vmatmul.msk.bf16.gmra.mxu3 %vm477_vm3, %v1148_v55  ;;  %v1425_v55 = vshrl.u32 %v3577_v38, 16 }
  0x5e   : > { %v785_v0 = vsel %vm782_vm4, %v783_v33, %v784_v59  ;;  %v787_v23 = vsel %vm782_vm4, %v784_v59, %v786_v20  ;;  %v1437_v20 = vshll.u32 %v3578_v51, 16  ;;  %v796_v51 = vrot.slane %v3905_v40, 1 }
  0x5f   : > { %v1427_v59 = vrot.slane %v1425_v55, 1 }
  0x61   : > { %v1431_v62 = vor.u32 %v1430_v61, %v1427_v59  ;;  %v3581_v59 = vld [vmem:[%s3860_s27 + $0x50] sm:$0xff] }
  0x6a   : > { %3267 = vmatmul.msk.bf16.vlgmr.msrb.gmra.mxu1 %vm477_vm3, %v3875_v15  ;;  %v3576_v15 = vld [vmem:[%s3860_s27 + $0x28] sm:$0xff] }
  0x6b   : > { %3286 = vmatmul.msk.bf16.vlgmr.msrb.gmra.mxu2 %vm477_vm3, %v785_v0  ;;  %v1151_v26 = vrot.slane %v3576_v15, 1  ;;  %v1416_v42 = vshrl.u32 %v3576_v15, 16  ;;  %v1419_v43 = vshll.u32 %v3576_v15, 16 }
  0x6c   : > { %3392 = vmatmul.msk.bf16.vlgmr.msrb.gmra.mxu0 %vm477_vm3, %v1396_v2 }
  0x6d   : > { %3375 = vmatmul.msk.bf16.gmra.mxu3 %vm477_vm3, %v1150_v25  ;;  %v1152_v29 = vsel %vm782_vm4, %v1149_v5, %v1151_v26  ;;  %v1154_v47 = vsel %vm782_vm4, %v1151_v26, %v1153_v39  ;;  %v1418_v48 = vrot.slane %v1416_v42, 1  ;;  %v1421_v4 = vrot.slane %v1419_v43, 2 }
  0x6e   : > { %v1443_v42 = vshrl.u32 %v3579_v6, 16  ;;  %v1446_v43 = vshll.u32 %v3579_v6, 16 }
  0x6f   : > { %v1422_v49 = vor.u32 %v1421_v4, %v1418_v48 }
  0x71   : > { %v1423_v53 = vsel %vm1379_vm5, %v1413_v36, %v1422_v49  ;;  %v1432_v25 = vsel %vm1379_vm5, %v1422_v49, %v1431_v62 }
  0x7a   : > { %3268 = vmatmul.msk.bf16.gmra.mxu1 %vm477_vm3, %v3878_v16  ;;  %v1414_v16 = vsel %vm1379_vm5, %v1404_v22, %v1413_v36 }
  0x7b   : > { %3287 = vmatmul.msk.bf16.gmra.mxu2 %vm477_vm3, %v787_v23 }
  0x7c   : > { %3393 = vmatmul.msk.bf16.gmra.mxu0 %vm477_vm3, %v1405_v24  ;;  %v1158_v24 = vsel %vm782_vm4, %v1155_v54, %v1157_v17 }
  0x7d   : > { %3376 = vmatmul.msk.bf16.gmra.mxu3 %vm477_vm3, %v1152_v29 }
  0x8a   : > { %3269 = vmatmul.msk.bf16.gmra.mxu1 %vm477_vm3, %v3914_v45  ;;  %v791_v45 = vsel %vm782_vm4, %v788_v35, %v790_v27 }
  0x8b   : > { %3288 = vmatmul.msk.bf16.gmra.mxu2 %vm477_vm3, %v789_v37  ;;  %v3580_v37 = vld [vmem:[%s3860_s27 + $0x48] sm:$0xff] }
  0x8c   : > { %3394 = vmatmul.msk.bf16.gmra.mxu0 %vm477_vm3, %v1414_v16  ;;  %v1159_v39 = vrot.slane %v3580_v37, 1  ;;  %v1455_v6 = vshll.u32 %v3580_v37, 16 }
  0x8d   : > { %3377 = vmatmul.msk.bf16.gmra.mxu3 %vm477_vm3, %v1154_v47 }
  0x97   : > { %v4065_v50 = vpop.f32.mrf.mxu1 }
  0x99   : > { %v4069_v52 = vpop.f32.mrf.mxu0 }
  0x9a   : > { %3270 = vmatmul.msk.bf16.gmra.mxu1 %vm477_vm3, %v3950_v21  ;;  %v792_v21 = vrot.slane %v3863_v11, 1 }
  0x9b   : > { %3289 = vmatmul.msk.bf16.gmra.mxu2 %vm477_vm3, %v791_v45  ;;  %v1445_v45 = vrot.slane %v1443_v42, 1  ;;  %v3582_v42 = vld [vmem:[%s3860_s27 + $0x58] sm:$0xff] }
  0x9c   : > { %3395 = vmatmul.msk.bf16.gmra.mxu0 %vm477_vm3, %v1423_v53  ;;  %v793_v5 = vsel %vm782_vm4, %v790_v27, %v792_v21  ;;  %v795_v36 = vsel %vm782_vm4, %v792_v21, %v794_v19  ;;  %v1160_v27 = vsel %vm782_vm4, %v1157_v17, %v1159_v39 }
  0x9d   : > { %3378 = vmatmul.msk.bf16.gmra.mxu3 %vm477_vm3, %v1156_v60  ;;  %v797_v60 = vsel %vm782_vm4, %v794_v19, %v796_v51 }
  0x9e   : > { %v4076_v57 = vpop.f32.mrf.mxu2 }
  0x9f   : > { %v4078_v58 = vpop.f32.mrf.mxu1 }
  0xa0   : > { %v4087_v1 = vpop.f32.mrf.mxu3 }
  0xa1   : > { %v4081_v33 = vpop.f32.mrf.mxu0  ;;  %4888 = vst [vmem:[#allocation2_spill] sm:$0xff] %v4087_v1 }
  0xa6   : > { %v4085_v0 = vpop.f32.mrf.mxu2 }
  0xa7   : > { %v4089_v2 = vpop.f32.mrf.mxu1 }
  0xa8   : > { %v4102_v23 = vpop.f32.mrf.mxu3 }
  0xa9   : > { %v4093_v7 = vpop.f32.mrf.mxu0  ;;  %4889 = vst [vmem:[#allocation3_spill] sm:$0xff] %v4102_v23 }
  0xaa   : > { %3271 = vmatmul.msk.bf16.gmra.mxu1 %vm477_vm3, %v3959_v31  ;;  %v1439_v31 = vrot.slane %v1437_v20, 2 }
  0xab   : > { %3290 = vmatmul.msk.bf16.gmra.mxu2 %vm477_vm3, %v793_v5  ;;  %v1452_v5 = vshrl.u32 %v3580_v37, 16 }
  0xac   : > { %3396 = vmatmul.msk.bf16.gmra.mxu0 %vm477_vm3, %v1432_v25  ;;  %v1440_v29 = vor.u32 %v1439_v31, %v1436_v28  ;;  %v798_v31 = vrot.slane %v3942_v9, 1 }
  0xad   : > { %3379 = vmatmul.msk.bf16.gmra.mxu3 %vm477_vm3, %v1158_v24  ;;  %v1454_v28 = vrot.slane %v1452_v5, 1 }
  0xae   : > { %v4100_v22 = vpop.f32.mrf.mxu2  ;;  %v1441_v16 = vsel %vm1379_vm5, %v1431_v62, %v1440_v29  ;;  %v1161_v62 = vrot.slane %v3581_v59, 1 }
  0xaf   : > { %v4104_v15 = vpop.f32.mrf.mxu1 }
  0xb0   : > { %v4113_v32 = vpop.f32.mrf.mxu3  ;;  %v1162_v20 = vsel %vm782_vm4, %v1159_v39, %v1161_v62 }
  0xb1   : > { %v4107_v26 = vpop.f32.mrf.mxu0  ;;  %4890 = vst [vmem:[#allocation4_spill] sm:$0xff] %v4113_v32 }
  0xb6   : > { %v4111_v30 = vpop.f32.mrf.mxu2 }
  0xb7   : > { %v4115_v35 = vpop.f32.mrf.mxu1 }
  0xb8   : > { %v4128_v48 = vpop.f32.mrf.mxu3 }
  0xb9   : > { %v4119_v38 = vpop.f32.mrf.mxu0  ;;  %4891 = vst [vmem:[#allocation5_spill] sm:$0xff] %v4128_v48 }
  0xba   : > { %3272 = vmatmul.msk.bf16.gmra.mxu1 %vm477_vm3, %v3863_v11  ;;  %v1448_v11 = vrot.slane %v1446_v43, 2 }
  0xbb   : > { %3291 = vmatmul.msk.bf16.gmra.mxu2 %vm477_vm3, %v795_v36 }
  0xbc   : > { %3397 = vmatmul.msk.bf16.gmra.mxu0 %vm477_vm3, %v1441_v16  ;;  %v1449_v53 = vor.u32 %v1448_v11, %v1445_v45  ;;  %v799_v16 = vsel %vm782_vm4, %v796_v51, %v798_v31  ;;  %v1461_v45 = vshrl.u32 %v3581_v59, 16  ;;  %v1464_v11 = vshll.u32 %v3581_v59, 16 }
  0xbd   : > { %3380 = vmatmul.msk.bf16.gmra.mxu3 %vm477_vm3, %v1160_v27  ;;  %v1163_v27 = vrot.slane %v3582_v42, 1 }
  0xbe   : > { %v4126_v47 = vpop.f32.mrf.mxu2  ;;  %v1450_v21 = vsel %vm1379_vm5, %v1440_v29, %v1449_v53 }
  0xbf   : > { %v4130_v4 = vpop.f32.mrf.mxu1  ;;  %v1164_v5 = vsel %vm782_vm4, %v1161_v62, %v1163_v27  ;;  %v1165_v62 = vrot.slane %v3583_v8, 1 }
  0xc0   : > { %v4139_v55 = vpop.f32.mrf.mxu3 }
  0xc1   : > { %v4133_v49 = vpop.f32.mrf.mxu0  ;;  %4892 = vst [vmem:[#allocation6_spill] sm:$0xff] %v4139_v55  ;;  %v1166_v32 = vsel %vm782_vm4, %v1163_v27, %v1165_v62  ;;  %v3584_v27 = vld [vmem:[%s3860_s27 + $0x68] sm:$0xff] }
  0xc6   : > { %v4137_v54 = vpop.f32.mrf.mxu2 }
  0xc7   : > { %v4141_v46 = vpop.f32.mrf.mxu1 }
  0xc8   : > { %v4154_v17 = vpop.f32.mrf.mxu3 }
  0xc9   : > { %v4145_v61 = vpop.f32.mrf.mxu0  ;;  %4893 = vst [vmem:[#allocation7_spill] sm:$0xff] %v4154_v17 }
  0xca   : > { %3273 = vmatmul.msk.bf16.gmra.mxu1 %vm477_vm3, %v3866_v12  ;;  %v1457_v12 = vrot.slane %v1455_v6, 2 }
  0xcb   : > { %3292 = vmatmul.msk.bf16.gmra.mxu2 %vm477_vm3, %v797_v60 }
  0xcc   : > { %3398 = vmatmul.msk.bf16.gmra.mxu0 %vm477_vm3, %v1450_v21  ;;  %v1458_v19 = vor.u32 %v1457_v12, %v1454_v28 }
  0xcd   : > { %3381 = vmatmul.msk.bf16.gmra.mxu3 %vm477_vm3, %v1162_v20  ;;  %v1466_v20 = vrot.slane %v1464_v11, 2  ;;  %v1470_v11 = vshrl.u32 %v3582_v42, 16 }
  0xce   : > { %v4152_v25 = vpop.f32.mrf.mxu2  ;;  %v1459_v39 = vsel %vm1379_vm5, %v1449_v53, %v1458_v19  ;;  %v1463_v53 = vrot.slane %v1461_v45, 1 }
  0xcf   : > { %v4156_v18 = vpop.f32.mrf.mxu1  ;;  %v1472_v1 = vrot.slane %v1470_v11, 1 }
  0xd0   : > { %v1247_v36 = vpop.f32.mrf.mxu3  ;;  %v1467_v28 = vor.u32 %v1466_v20, %v1463_v53 }
  0xd1   : > { %v4159_v24 = vpop.f32.mrf.mxu0 }
  0xd2   : > { %v1468_v55 = vsel %vm1379_vm5, %v1458_v19, %v1467_v28 }
  0xd6   : > { %v4163_v29 = vpop.f32.mrf.mxu2 }
  0xd7   : > { %v4165_v37 = vpop.f32.mrf.mxu1 }
  0xd8   : > { %v1249_v21 = vpop.f32.mrf.mxu3 }
  0xd9   : > { %v4169_v43 = vpop.f32.mrf.mxu0 }
  0xda   : > { %3274 = vmatmul.msk.bf16.gmra.mxu1 %vm477_vm3, %v3905_v40  ;;  %v800_v40 = vrot.slane %v3933_v63, 1 }
  0xdb   : > { %3293 = vmatmul.msk.bf16.gmra.mxu2 %vm477_vm3, %v799_v16 }
  0xdc   : > { %3399 = vmatmul.msk.bf16.gmra.mxu0 %vm477_vm3, %v1459_v39  ;;  %v801_v39 = vsel %vm782_vm4, %v798_v31, %v800_v40 }
  0xdd   : > { %3382 = vmatmul.msk.bf16.gmra.mxu3 %vm477_vm3, %v1164_v5  ;;  %v1473_v5 = vshll.u32 %v3582_v42, 16 }
  0xde   : > { %v4176_v60 = vpop.f32.mrf.mxu2 }
  0xdf   : > { %4894 = vst [vmem:[#allocation8_spill] sm:$0xff] %v4176_v60  ;;  %v4178_v51 = vpop.f32.mrf.mxu1 }
  0xe0   : > { %v1252_v16 = vpop.f32.mrf.mxu3 }
  0xe1   : > { %v4181_v6 = vpop.f32.mrf.mxu0 }
  0xe6   : > { %v4185_v12 = vpop.f32.mrf.mxu2 }
  0xe7   : > { %4895 = vst [vmem:[#allocation9_spill] sm:$0xff] %v4185_v12  ;;  %v686_v59 = vpop.f32.mrf.mxu1 }
  0xe8   : > { %v687_v45 = vadd.f32 %v686_v59, %v4069_v52  ;;  %v1254_v20 = vpop.f32.mrf.mxu3 }
  0xe9   : > { %v1616_v17 = vpop.f32.mrf.mxu0 }
  0xea   : > { %3275 = vmatmul.msk.bf16.gmra.mxu1 %vm477_vm3, %v3942_v9  ;;  %v1475_v9 = vrot.slane %v1473_v5, 2  ;;  %v1482_v5 = vshll.u32 %v3583_v8, 16 }
  0xeb   : > { %3294 = vmatmul.msk.bf16.gmra.mxu2 %vm477_vm3, %v801_v39 }
  0xec   : > { %3400 = vmatmul.msk.bf16.gmra.mxu0 %vm477_vm3, %v1468_v55  ;;  %v802_v55 = vrot.slane %v3869_v13, 1  ;;  %v1476_v42 = vor.u32 %v1475_v9, %v1472_v1 }
  0xed   : > { %3383 = vmatmul.msk.bf16.gmra.mxu3 %vm477_vm3, %v1166_v32 }
  0xee   : > { %v886_v53 = vpop.f32.mrf.mxu2  ;;  %v803_v60 = vsel %vm782_vm4, %v800_v40, %v802_v55  ;;  %v1477_v11 = vsel %vm1379_vm5, %v1467_v28, %v1476_v42 }
  0xef   : > { %v976_v48 = vadd.f32 %v886_v53, %v687_v45  ;;  %v688_v31 = vpop.f32.mrf.mxu1 }
  0xf0   : > { %v689_v52 = vadd.f32 %v688_v31, %v4081_v33  ;;  %v1257_v12 = vpop.f32.mrf.mxu3  ;;  %v1167_v33 = vrot.slane %v3584_v27, 1 }
  0xf1   : > { %v1337_v19 = vadd.f32 %v1247_v36, %v976_v48  ;;  %v1618_v23 = vpop.f32.mrf.mxu0 }
  0xf2   : > { %v1168_v28 = vsel %vm782_vm4, %v1165_v62, %v1167_v33  ;;  %v3585_v62 = vld [vmem:[%s3860_s27 + $0x70] sm:$0xff] }
  0xf3   : > { %v4197_v39 = vadd.f32 %v1616_v17, %v1337_v19  ;;  %v1479_v17 = vshrl.u32 %v3583_v8, 16 }
  0xf6   : > { %v888_v59 = vpop.f32.mrf.mxu2 }
  0xf7   : > { %v977_v45 = vadd.f32 %v888_v59, %v689_v52  ;;  %v691_v53 = vpop.f32.mrf.mxu1  ;;  %v1481_v52 = vrot.slane %v1479_v17, 1  ;;  %v804_v59 = vrot.slane %v3872_v14, 1 }
  0xf8   : > { %v692_v1 = vadd.f32 %v691_v53, %v4093_v7  ;;  %v1259_v31 = vpop.f32.mrf.mxu3 }
  0xf9   : > { %v1338_v48 = vadd.f32 %v1249_v21, %v977_v45  ;;  %v1621_v36 = vpop.f32.mrf.mxu0 }
  0xfa   : > { %3276 = vmatmul.msk.bf16.gmra.mxu1 %vm477_vm3, %v3933_v63 }
  0xfb   : > { %3295 = vmatmul.msk.bf16.gmra.mxu2 %vm477_vm3, %v803_v60  ;;  %v4207_v32 = vadd.f32 %v1618_v23, %v1338_v48  ;;  %v1484_v60 = vrot.slane %v1482_v5, 2 }
  0xfc   : > { %3401 = vmatmul.msk.bf16.gmra.mxu0 %vm477_vm3, %v1477_v11 }
  0xfd   : > { %3384 = vmatmul.msk.bf16.gmra.mxu3 %vm477_vm3, %v1168_v28  ;;  %v1485_v8 = vor.u32 %v1484_v60, %v1481_v52 }
  0xfe   : > { %v891_v40 = vpop.f32.mrf.mxu2 }
  0xff   : > { %v978_v21 = vadd.f32 %v891_v40, %v692_v1  ;;  %v693_v19 = vpop.f32.mrf.mxu1  ;;  %v805_v1 = vsel %vm782_vm4, %v802_v55, %v804_v59  ;;  %v1486_v17 = vsel %vm1379_vm5, %v1476_v42, %v1485_v8 }
 0x100   : > { %v694_v7 = vadd.f32 %v693_v19, %v4107_v26  ;;  %v1262_v53 = vpop.f32.mrf.mxu3  ;;  %v1169_v26 = vrot.slane %v3585_v62, 1  ;;  %v1491_v19 = vshll.u32 %v3584_v27, 16 }
 0x101   : > { %v1339_v9 = vadd.f32 %v1252_v16, %v978_v21  ;;  %v1623_v63 = vpop.f32.mrf.mxu0  ;;  %v1488_v21 = vshrl.u32 %v3584_v27, 16 }
 0x102   : > { %v1170_v42 = vsel %vm782_vm4, %v1167_v33, %v1169_v26  ;;  %v3586_v33 = vld [vmem:[%s3860_s27 + $0x78] sm:$0xff] }
 0x103   : > { %v4213_v23 = vadd.f32 %v1621_v36, %v1339_v9  ;;  %v1490_v60 = vrot.slane %v1488_v21, 1 }
 0x106   : > { %v893_v45 = vpop.f32.mrf.mxu2 }
 0x107   : > { %v979_v48 = vadd.f32 %v893_v45, %v694_v7  ;;  %v696_v11 = vpop.f32.mrf.mxu1  ;;  %v1493_v7 = vrot.slane %v1491_v19, 2  ;;  %v806_v45 = vrot.slane %v3909_v41, 1 }
 0x108   : > { %v697_v5 = vadd.f32 %v696_v11, %v4119_v38  ;;  %v1264_v28 = vpop.f32.mrf.mxu3 }
 0x109   : > { %v1340_v16 = vadd.f32 %v1254_v20, %v979_v48  ;;  %v1626_v40 = vpop.f32.mrf.mxu0  ;;  %v1494_v27 = vor.u32 %v1493_v7, %v1490_v60 }
 0x10a   : > { %3277 = vmatmul.msk.bf16.gmra.mxu1 %vm477_vm3, %v3869_v13 }
 0x10b   : > { %3296 = vmatmul.msk.bf16.gmra.mxu2 %vm477_vm3, %v805_v1  ;;  %v4223_v36 = vadd.f32 %v1623_v63, %v1340_v16  ;;  %v1495_v21 = vsel %vm1379_vm5, %v1485_v8, %v1494_v27 }
 0x10c   : > { %3402 = vmatmul.msk.bf16.gmra.mxu0 %vm477_vm3, %v1486_v17  ;;  %v807_v17 = vsel %vm782_vm4, %v804_v59, %v806_v45 }
 0x10d   : > { %3385 = vmatmul.msk.bf16.gmra.mxu3 %vm477_vm3, %v1170_v42 }
 0x10e   : > { %v896_v55 = vpop.f32.mrf.mxu2 }
 0x10f   : > { %v980_v20 = vadd.f32 %v896_v55, %v697_v5  ;;  %v698_v9 = vpop.f32.mrf.mxu1  ;;  %v1497_v55 = vshrl.u32 %v3585_v62, 16 }
 0x110   : > { %v699_v38 = vadd.f32 %v698_v9, %v4133_v49  ;;  %v1267_v11 = vpop.f32.mrf.mxu3  ;;  %v1171_v49 = vrot.slane %v3586_v33, 1 }
 0x111   : > { %v1341_v52 = vadd.f32 %v1257_v12, %v980_v20  ;;  %v1628_v13 = vpop.f32.mrf.mxu0  ;;  %v1500_v20 = vshll.u32 %v3585_v62, 16  ;;  %v1499_v60 = vrot.slane %v1497_v55, 1 }
 0x112   : > { %v1172_v8 = vsel %vm782_vm4, %v1169_v26, %v1171_v49  ;;  %v3587_v26 = vld [vmem:[%s3860_s27 + $0x80] sm:$0xff] }
 0x113   : > { %v4229_v63 = vadd.f32 %v1626_v40, %v1341_v52  ;;  %v1502_v7 = vrot.slane %v1500_v20, 2  ;;  %v1506_v20 = vshrl.u32 %v3586_v33, 16 }
 0x115   : > { %v1503_v62 = vor.u32 %v1502_v7, %v1499_v60  ;;  %v810_v7 = vrot.slane %v3980_v56, 1 }
 0x116   : > { %v898_v48 = vpop.f32.mrf.mxu2 }
 0x117   : > { %v981_v1 = vadd.f32 %v898_v48, %v699_v38  ;;  %v701_v16 = vpop.f32.mrf.mxu1  ;;  %v808_v38 = vrot.slane %v3945_v10, 1 }
 0x118   : > { %v702_v19 = vadd.f32 %v701_v16, %v4145_v61  ;;  %v1269_v9 = vpop.f32.mrf.mxu3 }
 0x119   : > { %v1342_v12 = vadd.f32 %v1259_v31, %v981_v1  ;;  %v1631_v5 = vpop.f32.mrf.mxu0 }
 0x11a   : > { %3278 = vmatmul.msk.bf16.gmra.mxu1 %vm477_vm3, %v3872_v14 }
 0x11b   : > { %3297 = vmatmul.msk.bf16.gmra.mxu2 %vm477_vm3, %v807_v17  ;;  %v4239_v40 = vadd.f32 %v1628_v13, %v1342_v12  ;;  %v809_v12 = vsel %vm782_vm4, %v806_v45, %v808_v38 }
 0x11c   : > { %3403 = vmatmul.msk.bf16.gmra.mxu0 %vm477_vm3, %v1495_v21 }
 0x11d   : > { %3386 = vmatmul.msk.bf16.gmra.mxu3 %vm477_vm3, %v1172_v8 }
 0x11e   : > { %v901_v59 = vpop.f32.mrf.mxu2 }
 0x11f   : > { %v982_v31 = vadd.f32 %v901_v59, %v702_v19  ;;  %v703_v42 = vpop.f32.mrf.mxu1  ;;  %v1504_v19 = vsel %vm1379_vm5, %v1494_v27, %v1503_v62  ;;  %v1509_v59 = vshll.u32 %v3586_v33, 16 }
 0x120   : > { %v704_v61 = vadd.f32 %v703_v42, %v4159_v24  ;;  %v1272_v1 = vpop.f32.mrf.mxu3  ;;  %v1173_v24 = vrot.slane %v3587_v26, 1 }
 0x121   : > { %v1343_v52 = vadd.f32 %v1262_v53, %v982_v31  ;;  %v1633_v14 = vpop.f32.mrf.mxu0  ;;  %v1511_v60 = vrot.slane %v1509_v59, 2  ;;  %v1518_v59 = vshll.u32 %v3587_v26, 16 }
 0x122   : > { %v1174_v27 = vsel %vm782_vm4, %v1171_v49, %v1173_v24  ;;  %v3588_v49 = vld [vmem:[%s3860_s27 + $0x88] sm:$0xff] }
 0x123   : > { %v4245_v13 = vadd.f32 %v1631_v5, %v1343_v52  ;;  %v1508_v52 = vrot.slane %v1506_v20, 1  ;;  %v1515_v20 = vshrl.u32 %v3587_v26, 16 }
 0x125   : > { %v1512_v33 = vor.u32 %v1511_v60, %v1508_v52  ;;  %v812_v52 = vrot.slane %v3896_v34, 1 }
 0x126   : > { %v903_v48 = vpop.f32.mrf.mxu2 }
 0x127   : > { %v983_v16 = vadd.f32 %v903_v48, %v704_v61  ;;  %v706_v17 = vpop.f32.mrf.mxu1 }
 0x128   : > { %v707_v55 = vadd.f32 %v706_v17, %v4169_v43  ;;  %v1274_v31 = vpop.f32.mrf.mxu3 }
 0x129   : > { %v1344_v53 = vadd.f32 %v1264_v28, %v983_v16  ;;  %v1636_v21 = vpop.f32.mrf.mxu0 }
 0x12a   : > { %3279 = vmatmul.msk.bf16.gmra.mxu1 %vm477_vm3, %v3909_v41 }
 0x12b   : > { %3298 = vmatmul.msk.bf16.gmra.mxu2 %vm477_vm3, %v809_v12  ;;  %v4255_v5 = vadd.f32 %v1633_v14, %v1344_v53  ;;  %v811_v12 = vsel %vm782_vm4, %v808_v38, %v810_v7 }
 0x12c   : > { %3404 = vmatmul.msk.bf16.gmra.mxu0 %vm477_vm3, %v1504_v19  ;;  %v1513_v19 = vsel %vm1379_vm5, %v1503_v62, %v1512_v33 }
 0x12d   : > { %3387 = vmatmul.msk.bf16.gmra.mxu3 %vm477_vm3, %v1174_v27  ;;  %v1517_v27 = vrot.slane %v1515_v20, 1 }
 0x12e   : > { %v906_v45 = vpop.f32.mrf.mxu2 }
 0x12f   : > { %v984_v28 = vadd.f32 %v906_v45, %v707_v55  ;;  %v708_v42 = vpop.f32.mrf.mxu1 }
 0x130   : > { %v709_v43 = vadd.f32 %v708_v42, %v4181_v6  ;;  %v1277_v48 = vpop.f32.mrf.mxu3  ;;  %v1175_v6 = vrot.slane %v3588_v49, 1 }
 0x131   : > { %v1345_v8 = vadd.f32 %v1267_v11, %v984_v28  ;;  %v1638_v41 = vpop.f32.mrf.mxu0 }
 0x132   : > { %v1176_v62 = vsel %vm782_vm4, %v1173_v24, %v1175_v6  ;;  %v3589_v24 = vld [vmem:[%s3860_s27 + $0x90] sm:$0xff] }
 0x133   : > { %v4261_v14 = vadd.f32 %v1636_v21, %v1345_v8  ;;  %v1520_v8 = vrot.slane %v1518_v59, 2 }
 0x135   : > { %v1521_v26 = vor.u32 %v1520_v8, %v1517_v27 }
 0x136   : > { %v908_v61 = vpop.f32.mrf.mxu2 }
 0x137   : > { %v985_v16 = vadd.f32 %v908_v61, %v709_v43  ;;  %v711_v17 = vpop.f32.mrf.mxu1 }
 0x138   : > { %v712_v55 = vadd.f32 %v711_v17, %v4065_v50  ;;  %v1279_v45 = vpop.f32.mrf.mxu3  ;;  %v813_v17 = vsel %vm782_vm4, %v810_v7, %v812_v52  ;;  %v1524_v7 = vshrl.u32 %v3588_v49, 16 }
 0x139   : > { %v1346_v11 = vadd.f32 %v1269_v9, %v985_v16  ;;  %v1641_v53 = vpop.f32.mrf.mxu0 }
 0x13a   : > { %3280 = vmatmul.msk.bf16.gmra.mxu1 %vm477_vm3, %v3945_v10 }
 0x13b   : > { %3299 = vmatmul.msk.bf16.gmra.mxu2 %vm477_vm3, %v811_v12  ;;  %v4271_v21 = vadd.f32 %v1638_v41, %v1346_v11  ;;  %v1522_v11 = vsel %vm1379_vm5, %v1512_v33, %v1521_v26 }
 0x13c   : > { %3405 = vmatmul.msk.bf16.gmra.mxu0 %vm477_vm3, %v1513_v19  ;;  %v1527_v19 = vshll.u32 %v3588_v49, 16 }
 0x13d   : > { %3388 = vmatmul.msk.bf16.gmra.mxu3 %vm477_vm3, %v1176_v62  ;;  %v1048_v62 = vld [vmem:[%s3860_s27 + $0x98] sm:$0x1] }
 0x13e   : > { %v911_v38 = vpop.f32.mrf.mxu2 }
 0x13f   : > { %v986_v9 = vadd.f32 %v911_v38, %v712_v55  ;;  %v713_v28 = vpop.f32.mrf.mxu1 }
 0x140   : > { %v714_v50 = vadd.f32 %v713_v28, %v4078_v58  ;;  %v1282_v43 = vpop.f32.mrf.mxu3  ;;  %v1177_v58 = vrot.slane %v3589_v24, 1  ;;  %v1529_v28 = vrot.slane %v1527_v19, 2 }
 0x141   : > { %v1347_v42 = vadd.f32 %v1272_v1, %v986_v9  ;;  %v1643_v10 = vpop.f32.mrf.mxu0  ;;  %v1526_v9 = vrot.slane %v1524_v7, 1  ;;  %v3753_v7 = vld [vmem:[%s3860_s27 + $0x78] sm:$0xff] }
 0x143   : > { %v4277_v41 = vadd.f32 %v1641_v53, %v1347_v42 }
 0x146   : > { %v913_v60 = vpop.f32.mrf.mxu2 }
 0x147   : > { %v987_v61 = vadd.f32 %v913_v60, %v714_v50  ;;  %v716_v16 = vpop.f32.mrf.mxu1 }
 0x148   : > { %v717_v53 = vadd.f32 %v716_v16, %v4089_v2  ;;  %v4291_v55 = vpop.f32.mrf.mxu3  ;;  %v4299_v2 = vld [vmem:[%s3860_s27 + $0x80] sm:$0xff] }
 0x149   : > { %v1348_v1 = vadd.f32 %v1274_v31, %v987_v61  ;;  %v1646_v12 = vpop.f32.mrf.mxu0  ;;  %v814_v49 = vrot.slane %v4299_v2, 1 }
 0x14a   : > { %3281 = vmatmul.msk.bf16.gmra.mxu1 %vm477_vm3, %v3980_v56  ;;  %v1178_v56 = vsel %vm782_vm4, %v1175_v6, %v1177_v58  ;;  %v1530_v6 = vor.u32 %v1529_v28, %v1526_v9  ;;  %v4323_v28 = vld [vmem:[%s3860_s27 + $0x18] sm:$0xff] }
 0x14b   : > { %3300 = vmatmul.msk.bf16.gmra.mxu2 %vm477_vm3, %v813_v17  ;;  %v4287_v34 = vadd.f32 %v1643_v10, %v1348_v1  ;;  %v1124_v10 = vunpack.c.l.b16 %v1048_v62  ;;  %v815_v61 = vsel %vm782_vm4, %v812_v52, %v814_v49 }
 0x14c   : > { %3406 = vmatmul.msk.bf16.gmra.mxu0 %vm477_vm3, %v1522_v11  ;;  %v1978_v11 = vld [vmem:[%s3860_s27 + $0x10] sm:$0xc] }
 0x14d   : > { %3389 = vmatmul.msk.bf16.gmra.mxu3 %vm477_vm3, %v1178_v56  ;;  %v1143_v16 = vpack.c.b16 %v1124_v10, %v1124_v10  ;;  %v2054_v52 = vunpack.c.l.b16 %v1978_v11 }
 0x14e   : > { %v916_v31 = vpop.f32.mrf.mxu2 }
 0x14f   : > { %v988_v33 = vadd.f32 %v916_v31, %v717_v53  ;;  %v718_v20 = vpop.f32.mrf.mxu1  ;;  %v4309_v53 = vld [vmem:[%s3860_s27 + $0x14] sm:$0xf]  ;;  %v1179_v19 = vrot.slane %v1143_v16, 1  ;;  %v1533_v31 = vshrl.u32 %v3589_v24, 16 }
 0x150   : > { %v719_v27 = vadd.f32 %v718_v20, %v4104_v15  ;;  %v4303_v8 = vpop.f32.mrf.mxu3 }
 0x151   : > { %v1349_v59 = vadd.f32 %v1277_v48, %v988_v33  ;;  %v1648_v38 = vpop.f32.mrf.mxu0  ;;  %v1536_v33 = vshll.u32 %v3589_v24, 16 }
 0x153   : > { %v4296_v42 = vadd.f32 %v1646_v12, %v1349_v59  ;;  %v1531_v12 = vsel %vm1379_vm5, %v1521_v26, %v1530_v6 }
 0x156   : > { %v918_v48 = vpop.f32.mrf.mxu2 }
 0x157   : > { %v989_v50 = vadd.f32 %v918_v48, %v719_v27  ;;  %v721_v60 = vpop.f32.mrf.mxu1  ;;  %v1535_v48 = vrot.slane %v1533_v31, 1 }
 0x158   : > { %v722_v26 = vadd.f32 %v721_v60, %v4115_v35  ;;  %v4319_v56 = vpop.f32.mrf.mxu3  ;;  %v1373_v35 = vld [vmem:[%s3860_s27 + $0x98] sm:$0x3]  ;;  %v4331_v60 = vld [vmem:[%s3860_s27 + $0x88] sm:$0xff] }
 0x159   : > { %v1350_v17 = vadd.f32 %v1279_v45, %v989_v50  ;;  %v1651_v1 = vpop.f32.mrf.mxu0  ;;  %v4887_v45 = vunpack.c.l.b16 %v4309_v53  ;;  %v1538_v50 = vrot.slane %v1536_v33, 2  ;;  %v816_v24 = vrot.slane %v4331_v60, 1 }
 0x15a   : > { %3282 = vmatmul.msk.bf16.gmra.mxu1 %vm477_vm3, %v3753_v7  ;;  %v1377_v7 = vunpack.c.l.b16 %v1373_v35 }
 0x15b   : > { %3301 = vmatmul.msk.bf16.gmra.mxu2 %vm477_vm3, %v815_v61  ;;  %v4314_v15 = vadd.f32 %v1648_v38, %v1350_v17  ;;  %v1180_v38 = vsel %vm782_vm4, %v1177_v58, %v1179_v19  ;;  %v4327_v62 = vpack.c.b16 %v4887_v45, %v2054_v52  ;;  %v2355_v17 = vshrl.u32 %v4323_v28, 16 }
 0x15c   : > { %3407 = vmatmul.msk.bf16.gmra.mxu0 %vm477_vm3, %v1531_v12  ;;  %v1539_v11 = vor.u32 %v1538_v50, %v1535_v48  ;;  %v817_v31 = vsel %vm782_vm4, %v814_v49, %v816_v24 }
 0x15d   : > { %4896 = vst [vmem:[#allocation10_spill] sm:$0xff] %v4314_v15  ;;  %3390 = vmatmul.msk.bf16.gmra.mxu3 %vm477_vm3, %v1180_v38  ;;  %v2347_v58 = vshrl.u32 %v4327_v62, 16  ;;  %v2350_v16 = vshll.u32 %v4327_v62, 16  ;;  %v4347_v15 = vpack.c.b16 %v1377_v7, %v1377_v7  ;;  %v818_v7 = vrot.slane %v3969_v44, 1 }
 0x15e   : > { %v921_v20 = vpop.f32.mrf.mxu2 }
 0x15f   : > { %v990_v59 = vadd.f32 %v921_v20, %v722_v26  ;;  %v723_v9 = vpop.f32.mrf.mxu1  ;;  %v2349_v33 = vrot.slane %v2347_v58, 2  ;;  %v2352_v20 = vrot.slane %v2350_v16, 3 }
 0x160   : > { %v724_v12 = vadd.f32 %v723_v9, %v4130_v4  ;;  %v4342_v52 = vpop.f32.mrf.mxu3 }
 0x161   : > { %v1351_v10 = vadd.f32 %v1282_v43, %v990_v59  ;;  %v1653_v27 = vpop.f32.mrf.mxu0  ;;  %v2358_v43 = vshll.u32 %v4323_v28, 16  ;;  %v2357_v59 = vrot.slane %v2355_v17, 2  ;;  %v2353_v49 = vor.u32 %v2352_v20, %v2349_v33 }
 0x163   : > { %v4335_v61 = vadd.f32 %v1651_v1, %v1351_v10  ;;  %v2360_v38 = vrot.slane %v2358_v43, 3 }
 0x165   : > { %4897 = vst [vmem:[#allocation11_spill] sm:$0xff] %v4335_v61  ;;  %v1540_v61 = vsel %vm1379_vm5, %v1530_v6, %v1539_v11  ;;  %v2361_v9 = vor.u32 %v2360_v38, %v2357_v59  ;;  %v1545_v6 = vshll.u32 %v4347_v15, 16  ;;  %v819_v38 = vsel %vm782_vm4, %v816_v24, %v818_v7  ;;  %v4392_v7 = vld [vmem:[%s3860_s27 + $0x28] sm:$0xff] }
 0x166   : > { %v923_v19 = vpop.f32.mrf.mxu2 }
 0x167   : > { %v991_v26 = vadd.f32 %v923_v19, %v724_v12  ;;  %v726_v1 = vpop.f32.mrf.mxu1  ;;  %v2362_v16 = vsel %vm2345_vm6, %v2353_v49, %v2361_v9 }
 0x168   : > { %v727_v48 = vadd.f32 %v726_v1, %v4141_v46  ;;  %v4358_v35 = vpop.f32.mrf.mxu3  ;;  %v1547_v46 = vrot.slane %v1545_v6, 2  ;;  %v2708_v6 = vld [vmem:[%s3860_s27 + $0x10] sm:$0x8] }
 0x169   : > { %v1352_v10 = vadd.f32 %v4291_v55, %v991_v26  ;;  %v1656_v45 = vpop.f32.mrf.mxu0  ;;  %v1542_v55 = vshrl.u32 %v4347_v15, 16 }
 0x16a   : > { %3283 = vmatmul.msk.bf16.gmra.mxu1 %vm477_vm3, %v4299_v2 }
 0x16b   : > { %3302 = vmatmul.msk.bf16.gmra.mxu2 %vm477_vm3, %v817_v31  ;;  %v4352_v4 = vadd.f32 %v1653_v27, %v1352_v10  ;;  %v4362_v27 = vld [vmem:[%s3860_s27 + $0x20] sm:$0xff]  ;;  %v1544_v43 = vrot.slane %v1542_v55, 1  ;;  %v1742_v10 = vld [vmem:[%s3860_s27 + $0x8] sm:$0xc] }
 0x16c   : > { %3408 = vmatmul.msk.bf16.gmra.mxu0 %vm477_vm3, %v1540_v61  ;;  %v2364_v19 = vshrl.u32 %v4362_v27, 16  ;;  %v2367_v26 = vshll.u32 %v4362_v27, 16 }
 0x16d   : > { %3517 = vmatmul.msk.bf16.vlgmr.msra.gmra.mxu3 %vm477_vm3, %v2362_v16  ;;  %v1548_v1 = vor.u32 %v1547_v46, %v1544_v43 }
 0x16e   : > { %v926_v50 = vpop.f32.mrf.mxu2  ;;  %v2369_v49 = vrot.slane %v2367_v26, 3  ;;  %v4899_v26 = vunpack.c.l.b16 %v4309_v53 }
 0x16f   : > { %v992_v58 = vadd.f32 %v926_v50, %v727_v48  ;;  %v728_v2 = vpop.f32.mrf.mxu1  ;;  %v1549_v55 = vsel %vm1379_vm5, %v1539_v11, %v1548_v1  ;;  %v3755_v1 = vld [vmem:[%s3860_s27 + $0x10] sm:$0xff] }
 0x170   : > { %v729_v31 = vadd.f32 %v728_v2, %v4156_v18  ;;  %v1746_v18 = vunpack.c.l.b16 %v1742_v10  ;;  %v2716_v10 = vrot.slane %v4323_v28, 3 }
 0x171   : > { %v1353_v61 = vadd.f32 %v4303_v8, %v992_v58  ;;  %v1658_v17 = vpop.f32.mrf.mxu0  ;;  %v4372_v8 = vpop.f32.mrf.mxu3 }
 0x173   : > { %v4366_v12 = vadd.f32 %v1656_v45, %v1353_v61  ;;  %v2366_v45 = vrot.slane %v2364_v19, 2  ;;  %v4898_v61 = vunpack.c.l.b16 %v3991_v3  ;;  %v2110_v3 = vrot.slane %v4327_v62, 2 }
 0x175   : > { %v2370_v24 = vor.u32 %v2369_v49, %v2366_v45  ;;  %v1747_v43 = vpack.c.b16 %v4898_v61, %v1746_v18 }
 0x176   : > { %v928_v33 = vpop.f32.mrf.mxu2 }
 0x177   : > { %v993_v20 = vadd.f32 %v928_v33, %v729_v31  ;;  %v731_v59 = vpop.f32.mrf.mxu1  ;;  %v2371_v46 = vsel %vm2345_vm6, %v2361_v9, %v2370_v24  ;;  %v1750_v33 = vrot.slane %v3755_v1, 2  ;;  %v2373_v9 = vshrl.u32 %v4392_v7, 16 }
 0x178   : > { %v732_v58 = vadd.f32 %v731_v59, %v4165_v37  ;;  %v1749_v37 = vrot.slane %v1747_v43, 2  ;;  %v2111_v59 = vrot.slane %v4323_v28, 2 }
 0x179   : > { %v1354_v44 = vadd.f32 %v4319_v56, %v993_v20  ;;  %v1661_v48 = vpop.f32.mrf.mxu0  ;;  %v2712_v56 = vunpack.c.l.b16 %v2708_v6  ;;  %v4386_v16 = vpop.f32.mrf.mxu3  ;;  %v2375_v6 = vrot.slane %v2373_v9, 2 }
 0x17a   : > { %3284 = vmatmul.msk.bf16.gmra.mxu1 %vm477_vm3, %v4331_v60  ;;  %v2112_v62 = vsel %vm1748_vm7, %v2110_v3, %v2111_v59  ;;  %v2113_v3 = vrot.slane %v4362_v27, 2 }
 0x17b   : > { %3303 = vmatmul.msk.bf16.gmra.mxu2 %vm477_vm3, %v819_v38  ;;  %v4382_v50 = vadd.f32 %v1658_v17, %v1354_v44  ;;  %v2713_v31 = vpack.c.b16 %v4899_v26, %v2712_v56  ;;  %v2376_v38 = vshll.u32 %v4392_v7, 16 }
 0x17c   : > { %3409 = vmatmul.msk.bf16.gmra.mxu0 %vm477_vm3, %v1549_v55  ;;  %v1751_v55 = vsel %vm1748_vm7, %v1749_v37, %v1750_v33  ;;  %v3756_v37 = vld [vmem:[%s3860_s27 + $0x18] sm:$0xff] }
 0x17d   : > { %3518 = vmatmul.msk.bf16.gmra.mxu3 %vm477_vm3, %v2371_v46  ;;  %v2715_v53 = vrot.slane %v2713_v31, 3  ;;  %v2378_v18 = vrot.slane %v2376_v38, 3  ;;  %v1752_v1 = vrot.slane %v3756_v37, 2 }
 0x17e   : > { %v931_v2 = vpop.f32.mrf.mxu2 }
 0x17f   : > { %v994_v11 = vadd.f32 %v931_v2, %v732_v58  ;;  %v733_v60 = vpop.f32.mrf.mxu1  ;;  %v2379_v2 = vor.u32 %v2378_v18, %v2375_v6 }
 0x181   : > { %v1355_v17 = vadd.f32 %v4342_v52, %v994_v11  ;;  %v1663_v19 = vpop.f32.mrf.mxu0  ;;  %v734_v52 = vadd.f32 %v733_v60, %v4178_v51  ;;  %v1302_v49 = vpop.f32.mrf.mxu3  ;;  %v2717_v51 = vsel %vm2714_vm8, %v2715_v53, %v2716_v10 }
 0x183   : > { %v4399_v20 = vadd.f32 %v1661_v48, %v1355_v17  ;;  %v4419_v17 = vld [vmem:[%s3860_s27 + $0x30] sm:$0xff] }
 0x184   : > { %v2385_v9 = vshll.u32 %v4419_v17, 16 }
 0x186   : > { %v933_v45 = vpop.f32.mrf.mxu2 }
 0x187   : > { %v995_v44 = vadd.f32 %v933_v45, %v734_v52  ;;  %v736_v48 = vpop.f32.mrf.mxu1 }
 0x188   : > { %v737_v11 = vadd.f32 %v736_v48, %v4076_v57  ;;  %v2382_v57 = vshrl.u32 %v4419_v17, 16  ;;  %v2114_v48 = vsel %vm1748_vm7, %v2111_v59, %v2113_v3 }
 0x189   : > { %v1356_v58 = vadd.f32 %v4358_v35, %v995_v44  ;;  %v1666_v56 = vpop.f32.mrf.mxu0  ;;  %v1304_v43 = vpop.f32.mrf.mxu3  ;;  %v2380_v35 = vsel %vm2345_vm6, %v2370_v24, %v2379_v2  ;;  %v2718_v24 = vrot.slane %v4362_v27, 3  ;;  %v1753_v44 = vsel %vm1748_vm7, %v1750_v33, %v1752_v1 }
 0x18a   : > { %3411 = vmatmul.msk.bf16.vlgmr.msra.gmra.mxu1 %vm477_vm3, %v1751_v55  ;;  %v2384_v55 = vrot.slane %v2382_v57, 2 }
 0x18b   : > { %3498 = vmatmul.msk.bf16.vlgmr.msra.gmra.mxu2 %vm477_vm3, %v2112_v62  ;;  %v4413_v28 = vadd.f32 %v1663_v19, %v1356_v58  ;;  %v2387_v62 = vrot.slane %v2385_v9, 3  ;;  %v2719_v58 = vsel %vm2714_vm8, %v2716_v10, %v2718_v24 }
 0x18c   : > { %3536 = vmatmul.msk.bf16.vlgmr.msra.gmra.mxu0 %vm477_vm3, %v2717_v51 }
 0x18d   : > { %3519 = vmatmul.msk.bf16.gmra.mxu3 %vm477_vm3, %v2380_v35  ;;  %v2388_v27 = vor.u32 %v2387_v62, %v2384_v55  ;;  %v3757_v35 = vld [vmem:[%s3860_s27 + $0x20] sm:$0xff] }
 0x18e   : > { %v936_v61 = vpop.f32.mrf.mxu2 }
 0x18f   : > { %v996_v60 = vadd.f32 %v936_v61, %v737_v11  ;;  %v738_v46 = vpop.f32.mrf.mxu1  ;;  %v4443_v61 = vld [vmem:[%s3860_s27 + $0x38] sm:$0xff] }
 0x190   : > { %v739_v38 = vadd.f32 %v738_v46, %v4085_v0  ;;  %v2394_v37 = vshll.u32 %v4443_v61, 16 }
 0x191   : > { %v1357_v26 = vadd.f32 %v4372_v8, %v996_v60  ;;  %v1668_v31 = vpop.f32.mrf.mxu0  ;;  %v1307_v53 = vpop.f32.mrf.mxu3 }
 0x193   : > { %v4423_v19 = vadd.f32 %v1666_v56, %v1357_v26  ;;  %v1754_v26 = vrot.slane %v3757_v35, 2 }
 0x196   : > { %v938_v52 = vpop.f32.mrf.mxu2 }
 0x197   : > { %v997_v8 = vadd.f32 %v938_v52, %v739_v38  ;;  %v741_v45 = vpop.f32.mrf.mxu1 }
 0x198   : > { %v742_v33 = vadd.f32 %v741_v45, %v4100_v22  ;;  %v2391_v22 = vshrl.u32 %v4443_v61, 16 }
 0x199   : > { %v1358_v6 = vadd.f32 %v4386_v16, %v997_v8  ;;  %v1671_v18 = vpop.f32.mrf.mxu0  ;;  %v1309_v56 = vpop.f32.mrf.mxu3  ;;  %v2389_v16 = vsel %vm2345_vm6, %v2379_v2, %v2388_v27  ;;  %v2720_v2 = vrot.slane %v4392_v7, 3  ;;  %v1755_v8 = vsel %vm1748_vm7, %v1752_v1, %v1754_v26 }
 0x19a   : > { %3412 = vmatmul.msk.bf16.gmra.mxu1 %vm477_vm3, %v1753_v44  ;;  %v2393_v44 = vrot.slane %v2391_v22, 2 }
 0x19b   : > { %3499 = vmatmul.msk.bf16.gmra.mxu2 %vm477_vm3, %v2114_v48  ;;  %v4437_v0 = vadd.f32 %v1668_v31, %v1358_v6  ;;  %v2115_v31 = vrot.slane %v4392_v7, 2  ;;  %v2396_v48 = vrot.slane %v2394_v37, 3  ;;  %v2721_v6 = vsel %vm2714_vm8, %v2718_v24, %v2720_v2 }
 0x19c   : > { %3537 = vmatmul.msk.bf16.gmra.mxu0 %vm477_vm3, %v2719_v58 }
 0x19d   : > { %3520 = vmatmul.msk.bf16.gmra.mxu3 %vm477_vm3, %v2389_v16  ;;  %v2116_v45 = vsel %vm1748_vm7, %v2113_v3, %v2115_v31  ;;  %v2397_v7 = vor.u32 %v2396_v48, %v2393_v44  ;;  %v3758_v16 = vld [vmem:[%s3860_s27 + $0x28] sm:$0xff] }
 0x19e   : > { %v941_v59 = vpop.f32.mrf.mxu2 }
 0x19f   : > { %v998_v51 = vadd.f32 %v941_v59, %v742_v33  ;;  %v743_v11 = vpop.f32.mrf.mxu1  ;;  %v4465_v59 = vld [vmem:[%s3860_s27 + $0x40] sm:$0xff] }
 0x1a0   : > { %v744_v57 = vadd.f32 %v743_v11, %v4111_v30  ;;  %v2403_v35 = vshll.u32 %v4465_v59, 16 }
 0x1a1   : > { %v1359_v10 = vadd.f32 %v1302_v49, %v998_v51  ;;  %v1673_v60 = vpop.f32.mrf.mxu0  ;;  %v1312_v38 = vpop.f32.mrf.mxu3 }
 0x1a3   : > { %v4446_v46 = vadd.f32 %v1671_v18, %v1359_v10  ;;  %v1756_v10 = vrot.slane %v3758_v16, 2 }
 0x1a6   : > { %v943_v9 = vpop.f32.mrf.mxu2 }
 0x1a7   : > { %v999_v49 = vadd.f32 %v943_v9, %v744_v57  ;;  %v746_v52 = vpop.f32.mrf.mxu1 }
 0x1a8   : > { %v747_v1 = vadd.f32 %v746_v52, %v4126_v47  ;;  %v2400_v47 = vshrl.u32 %v4465_v59, 16 }
 0x1a9   : > { %v1360_v55 = vadd.f32 %v1304_v43, %v999_v49  ;;  %v1676_v62 = vpop.f32.mrf.mxu0  ;;  %v1314_v18 = vpop.f32.mrf.mxu3  ;;  %v2398_v43 = vsel %vm2345_vm6, %v2388_v27, %v2397_v7  ;;  %v2722_v27 = vrot.slane %v4419_v17, 3  ;;  %v1757_v49 = vsel %vm1748_vm7, %v1754_v26, %v1756_v10 }
 0x1aa   : > { %3413 = vmatmul.msk.bf16.gmra.mxu1 %vm477_vm3, %v1755_v8  ;;  %v2402_v8 = vrot.slane %v2400_v47, 2 }
 0x1ab   : > { %3500 = vmatmul.msk.bf16.gmra.mxu2 %vm477_vm3, %v2116_v45  ;;  %v4459_v30 = vadd.f32 %v1673_v60, %v1360_v55  ;;  %v2117_v60 = vrot.slane %v4419_v17, 2  ;;  %v2405_v45 = vrot.slane %v2403_v35, 3  ;;  %v2723_v55 = vsel %vm2714_vm8, %v2720_v2, %v2722_v27 }
 0x1ac   : > { %3538 = vmatmul.msk.bf16.gmra.mxu0 %vm477_vm3, %v2721_v6 }
 0x1ad   : > { %3521 = vmatmul.msk.bf16.gmra.mxu3 %vm477_vm3, %v2398_v43  ;;  %v2118_v52 = vsel %vm1748_vm7, %v2115_v31, %v2117_v60  ;;  %v2406_v17 = vor.u32 %v2405_v45, %v2402_v8  ;;  %v3759_v43 = vld [vmem:[%s3860_s27 + $0x30] sm:$0xff] }
 0x1ae   : > { %v946_v3 = vpop.f32.mrf.mxu2 }
 0x1af   : > { %v1000_v58 = vadd.f32 %v946_v3, %v747_v1  ;;  %v748_v33 = vpop.f32.mrf.mxu1  ;;  %v4487_v3 = vld [vmem:[%s3860_s27 + $0x48] sm:$0xff] }
 0x1b0   : > { %v749_v22 = vadd.f32 %v748_v33, %v4137_v54  ;;  %v2412_v16 = vshll.u32 %v4487_v3, 16 }
 0x1b1   : > { %v1361_v24 = vadd.f32 %v1307_v53, %v1000_v58  ;;  %v1678_v51 = vpop.f32.mrf.mxu0  ;;  %v1317_v57 = vpop.f32.mrf.mxu3 }
 0x1b3   : > { %v4468_v11 = vadd.f32 %v1676_v62, %v1361_v24  ;;  %v1758_v24 = vrot.slane %v3759_v43, 2  ;;  %v2121_v43 = vrot.slane %v4465_v59, 2 }
 0x1b6   : > { %v948_v37 = vpop.f32.mrf.mxu2 }
 0x1b7   : > { %v1001_v53 = vadd.f32 %v948_v37, %v749_v22  ;;  %v751_v9 = vpop.f32.mrf.mxu1 }
 0x1b8   : > { %v752_v26 = vadd.f32 %v751_v9, %v4152_v25  ;;  %v2409_v25 = vshrl.u32 %v4487_v3, 16 }
 0x1b9   : > { %v1362_v44 = vadd.f32 %v1309_v56, %v1001_v53  ;;  %v1681_v48 = vpop.f32.mrf.mxu0  ;;  %v1319_v62 = vpop.f32.mrf.mxu3  ;;  %v2407_v56 = vsel %vm2345_vm6, %v2397_v7, %v2406_v17  ;;  %v2724_v7 = vrot.slane %v4443_v61, 3  ;;  %v1759_v53 = vsel %vm1748_vm7, %v1756_v10, %v1758_v24  ;;  %v4900_v10 = vld [vmem:[#allocation8_spill] sm:$0xff] }
 0x1ba   : > { %3414 = vmatmul.msk.bf16.gmra.mxu1 %vm477_vm3, %v1757_v49  ;;  %v2411_v49 = vrot.slane %v2409_v25, 2 }
 0x1bb   : > { %3501 = vmatmul.msk.bf16.gmra.mxu2 %vm477_vm3, %v2118_v52  ;;  %v4481_v54 = vadd.f32 %v1678_v51, %v1362_v44  ;;  %v2119_v51 = vrot.slane %v4443_v61, 2  ;;  %v2414_v52 = vrot.slane %v2412_v16, 3  ;;  %v2725_v44 = vsel %vm2714_vm8, %v2722_v27, %v2724_v7 }
 0x1bc   : > { %3539 = vmatmul.msk.bf16.gmra.mxu0 %vm477_vm3, %v2723_v55 }
 0x1bd   : > { %3522 = vmatmul.msk.bf16.gmra.mxu3 %vm477_vm3, %v2407_v56  ;;  %v2120_v9 = vsel %vm1748_vm7, %v2117_v60, %v2119_v51  ;;  %v2415_v61 = vor.u32 %v2414_v52, %v2411_v49  ;;  %v2122_v49 = vsel %vm1748_vm7, %v2119_v51, %v2121_v43 }
 0x1be   : > { %v951_v31 = vpop.f32.mrf.mxu2 }
 0x1bf   : > { %v1002_v6 = vadd.f32 %v951_v31, %v752_v26  ;;  %v753_v1 = vpop.f32.mrf.mxu1 }
 0x1c0   : > { %v754_v47 = vadd.f32 %v753_v1, %v4163_v29 }
 0x1c1   : > { %v1363_v2 = vadd.f32 %v1312_v38, %v1002_v6  ;;  %v1683_v58 = vpop.f32.mrf.mxu0  ;;  %v1322_v22 = vpop.f32.mrf.mxu3  ;;  %v4509_v6 = vld [vmem:[%s3860_s27 + $0x50] sm:$0xff] }
 0x1c2   : > { %v2418_v25 = vshrl.u32 %v4509_v6, 16  ;;  %v2421_v16 = vshll.u32 %v4509_v6, 16 }
 0x1c3   : > { %v4490_v33 = vadd.f32 %v1681_v48, %v1363_v2  ;;  %v3760_v2 = vld [vmem:[%s3860_s27 + $0x38] sm:$0xff] }
 0x1c4   : > { %v2420_v52 = vrot.slane %v2418_v25, 2 }
 0x1c6   : > { %v953_v35 = vpop.f32.mrf.mxu2 }
 0x1c7   : > { %v1003_v38 = vadd.f32 %v953_v35, %v754_v47  ;;  %v756_v37 = vpop.f32.mrf.mxu1  ;;  %v4901_v47 = vld [vmem:[#allocation9_spill] sm:$0xff] }
 0x1c8   : > { %v757_v48 = vadd.f32 %v756_v37, %v4900_v10 }
 0x1c9   : > { %v1364_v8 = vadd.f32 %v1314_v18, %v1003_v38  ;;  %v1686_v45 = vpop.f32.mrf.mxu0  ;;  %v1324_v55 = vpop.f32.mrf.mxu3  ;;  %v2416_v18 = vsel %vm2345_vm6, %v2406_v17, %v2415_v61  ;;  %v2726_v17 = vrot.slane %v4465_v59, 3 }
 0x1ca   : > { %3415 = vmatmul.msk.bf16.gmra.mxu1 %vm477_vm3, %v1759_v53 }
 0x1cb   : > { %3502 = vmatmul.msk.bf16.gmra.mxu2 %vm477_vm3, %v2120_v9  ;;  %v4503_v29 = vadd.f32 %v1683_v58, %v1364_v8  ;;  %v1760_v58 = vrot.slane %v3760_v2, 2  ;;  %v2423_v8 = vrot.slane %v2421_v16, 3  ;;  %v2727_v10 = vsel %vm2714_vm8, %v2724_v7, %v2726_v17 }
 0x1cc   : > { %3540 = vmatmul.msk.bf16.gmra.mxu0 %vm477_vm3, %v2725_v44 }
 0x1cd   : > { %3523 = vmatmul.msk.bf16.gmra.mxu3 %vm477_vm3, %v2416_v18  ;;  %v1761_v9 = vsel %vm1748_vm7, %v1758_v24, %v1760_v58  ;;  %v4902_v24 = vld [vmem:[#allocation2_spill] sm:$0xff] }
 0x1ce   : > { %v956_v60 = vpop.f32.mrf.mxu2 }
 0x1cf   : > { %v1004_v26 = vadd.f32 %v956_v60, %v757_v48  ;;  %v758_v31 = vpop.f32.mrf.mxu1  ;;  %v2424_v48 = vor.u32 %v2423_v8, %v2420_v52 }
 0x1d0   : > { %v759_v35 = vadd.f32 %v758_v31, %v4901_v47  ;;  %v2123_v47 = vrot.slane %v4487_v3, 2 }
 0x1d1   : > { %v1365_v27 = vadd.f32 %v1317_v57, %v1004_v26  ;;  %v1688_v1 = vpop.f32.mrf.mxu0  ;;  %v1327_v37 = vpop.f32.mrf.mxu3 }
 0x1d3   : > { %v4512_v56 = vadd.f32 %v1686_v45, %v1365_v27  ;;  %v4531_v27 = vld [vmem:[%s3860_s27 + $0x58] sm:$0xff] }
 0x1d6   : > { %v958_v38 = vpop.f32.mrf.mxu2 }
 0x1d7   : > { %v1005_v57 = vadd.f32 %v958_v38, %v759_v35  ;;  %v761_v53 = vpop.f32.mrf.mxu1  ;;  %v2427_v35 = vshrl.u32 %v4531_v27, 16  ;;  %v2430_v38 = vshll.u32 %v4531_v27, 16 }
 0x1d8   : > { %v762_v60 = vadd.f32 %v761_v53, %v4902_v24 }
 0x1d9   : > { %v1366_v45 = vadd.f32 %v1319_v62, %v1005_v57  ;;  %v1691_v44 = vpop.f32.mrf.mxu0  ;;  %v1329_v26 = vpop.f32.mrf.mxu3  ;;  %v2425_v62 = vsel %vm2345_vm6, %v2415_v61, %v2424_v48  ;;  %v4903_v57 = vld [vmem:[#allocation3_spill] sm:$0xff]  ;;  %v2728_v61 = vrot.slane %v4487_v3, 3 }
 0x1da   : > { %3416 = vmatmul.msk.bf16.gmra.mxu1 %vm477_vm3, %v1761_v9 }
 0x1db   : > { %3503 = vmatmul.msk.bf16.gmra.mxu2 %vm477_vm3, %v2122_v49  ;;  %v4525_v59 = vadd.f32 %v1688_v1, %v1366_v45  ;;  %v3761_v1 = vld [vmem:[%s3860_s27 + $0x40] sm:$0xff]  ;;  %v2124_v45 = vsel %vm1748_vm7, %v2121_v43, %v2123_v47 }
 0x1dc   : > { %3541 = vmatmul.msk.bf16.gmra.mxu0 %vm477_vm3, %v2727_v10  ;;  %v1762_v16 = vrot.slane %v3761_v1, 2  ;;  %v2432_v10 = vrot.slane %v2430_v38, 3 }
 0x1dd   : > { %3524 = vmatmul.msk.bf16.gmra.mxu3 %vm477_vm3, %v2425_v62 }
 0x1de   : > { %v961_v51 = vpop.f32.mrf.mxu2  ;;  %v1763_v8 = vsel %vm1748_vm7, %v1760_v58, %v1762_v16  ;;  %v4904_v58 = vld [vmem:[#allocation4_spill] sm:$0xff] }
 0x1df   : > { %v1006_v31 = vadd.f32 %v961_v51, %v762_v60  ;;  %v763_v18 = vpop.f32.mrf.mxu1  ;;  %v2729_v51 = vsel %vm2714_vm8, %v2726_v17, %v2728_v61 }
 0x1e0   : > { %v764_v53 = vadd.f32 %v763_v18, %v4903_v57 }
 0x1e1   : > { %v1367_v7 = vadd.f32 %v1322_v22, %v1006_v31  ;;  %v1693_v2 = vpop.f32.mrf.mxu0  ;;  %v1332_v49 = vpop.f32.mrf.mxu3 }
 0x1e3   : > { %v4534_v25 = vadd.f32 %v1691_v44, %v1367_v7  ;;  %v2429_v44 = vrot.slane %v2427_v35, 2  ;;  %v4553_v35 = vld [vmem:[%s3860_s27 + $0x60] sm:$0xff] }
 0x1e5   : > { %v2433_v31 = vor.u32 %v2432_v10, %v2429_v44 }
 0x1e6   : > { %v963_v9 = vpop.f32.mrf.mxu2 }
 0x1e7   : > { %v1007_v22 = vadd.f32 %v963_v9, %v764_v53  ;;  %v766_v52 = vpop.f32.mrf.mxu1  ;;  %v2125_v9 = vrot.slane %v4509_v6, 2 }
 0x1e8   : > { %v767_v18 = vadd.f32 %v766_v52, %v4904_v58  ;;  %v2439_v52 = vshll.u32 %v4553_v35, 16 }
 0x1e9   : > { %v1368_v24 = vadd.f32 %v1324_v55, %v1007_v22  ;;  %v1696_v60 = vpop.f32.mrf.mxu0  ;;  %v1334_v62 = vpop.f32.mrf.mxu3  ;;  %v2434_v55 = vsel %vm2345_vm6, %v2424_v48, %v2433_v31  ;;  %v2436_v22 = vshrl.u32 %v4553_v35, 16  ;;  %v2730_v48 = vrot.slane %v4509_v6, 3 }
 0x1ea   : > { %3417 = vmatmul.msk.bf16.gmra.mxu1 %vm477_vm3, %v1763_v8  ;;  %v4905_v8 = vld [vmem:[#allocation5_spill] sm:$0xff] }
 0x1eb   : > { %3504 = vmatmul.msk.bf16.gmra.mxu2 %vm477_vm3, %v2124_v45  ;;  %v4547_v3 = vadd.f32 %v1693_v2, %v1368_v24  ;;  %v3762_v2 = vld [vmem:[%s3860_s27 + $0x48] sm:$0xff]  ;;  %v2438_v58 = vrot.slane %v2436_v22, 2 }
 0x1ec   : > { %3542 = vmatmul.msk.bf16.gmra.mxu0 %vm477_vm3, %v2729_v51  ;;  %v1764_v53 = vrot.slane %v3762_v2, 2 }
 0x1ed   : > { %3525 = vmatmul.msk.bf16.gmra.mxu3 %vm477_vm3, %v2434_v55  ;;  %v2731_v55 = vsel %vm2714_vm8, %v2728_v61, %v2730_v48 }
 0x1ee   : > { %v966_v43 = vpop.f32.mrf.mxu2  ;;  %v1765_v51 = vsel %vm1748_vm7, %v1762_v16, %v1764_v53  ;;  %v4906_v16 = vld [vmem:[#allocation6_spill] sm:$0xff] }
 0x1ef   : > { %v1008_v7 = vadd.f32 %v966_v43, %v767_v18  ;;  %v768_v1 = vpop.f32.mrf.mxu1  ;;  %v2441_v18 = vrot.slane %v2439_v52, 3 }
 0x1f0   : > { %v769_v45 = vadd.f32 %v768_v1, %v4905_v8  ;;  %v4575_v8 = vld [vmem:[%s3860_s27 + $0x68] sm:$0xff] }
 0x1f1   : > { %v1369_v17 = vadd.f32 %v1327_v37, %v1008_v7  ;;  %v1698_v38 = vpop.f32.mrf.mxu0  ;;  %v2582_v10 = vpop.f32.mrf.mxu3  ;;  %v2442_v1 = vor.u32 %v2441_v18, %v2438_v58  ;;  %v4907_v58 = vld [vmem:[#allocation7_spill] sm:$0xff] }
 0x1f3   : > { %v4556_v57 = vadd.f32 %v1696_v60, %v1369_v17  ;;  %v2126_v60 = vsel %vm1748_vm7, %v2123_v47, %v2125_v9 }
 0x1f6   : > { %v968_v44 = vpop.f32.mrf.mxu2 }
 0x1f7   : > { %v1009_v37 = vadd.f32 %v968_v44, %v769_v45  ;;  %v771_v24 = vpop.f32.mrf.mxu1 }
 0x1f8   : > { %v772_v17 = vadd.f32 %v771_v24, %v4906_v16  ;;  %v2445_v24 = vshrl.u32 %v4575_v8, 16 }
 0x1f9   : > { %v1370_v43 = vadd.f32 %v1329_v26, %v1009_v37  ;;  %v1701_v7 = vpop.f32.mrf.mxu0  ;;  %v2584_v2 = vpop.f32.mrf.mxu3  ;;  %v2443_v26 = vsel %vm2345_vm6, %v2433_v31, %v2442_v1  ;;  %v2732_v31 = vrot.slane %v4531_v27, 3 }
 0x1fa   : > { %3418 = vmatmul.msk.bf16.gmra.mxu1 %vm477_vm3, %v1765_v51  ;;  %v2127_v51 = vrot.slane %v4531_v27, 2 }
 0x1fb   : > { %3505 = vmatmul.msk.bf16.gmra.mxu2 %vm477_vm3, %v2126_v60  ;;  %v4569_v6 = vadd.f32 %v1698_v38, %v1370_v43  ;;  %v3763_v38 = vld [vmem:[%s3860_s27 + $0x50] sm:$0xff]  ;;  %v2448_v60 = vshll.u32 %v4575_v8, 16 }
 0x1fc   : > { %3543 = vmatmul.msk.bf16.gmra.mxu0 %vm477_vm3, %v2731_v55  ;;  %v1766_v37 = vrot.slane %v3763_v38, 2  ;;  %v2733_v38 = vsel %vm2714_vm8, %v2730_v48, %v2732_v31  ;;  %v4601_v48 = vld [vmem:[%s3860_s27 + $0x70] sm:$0xff] }
 0x1fd   : > { %3526 = vmatmul.msk.bf16.gmra.mxu3 %vm477_vm3, %v2443_v26 }
 0x1fe   : > { %v971_v47 = vpop.f32.mrf.mxu2 }
 0x1ff   : > { %v1010_v22 = vadd.f32 %v971_v47, %v772_v17  ;;  %v773_v52 = vpop.f32.mrf.mxu1  ;;  %v2128_v17 = vsel %vm1748_vm7, %v2125_v9, %v2127_v51  ;;  %v2447_v47 = vrot.slane %v2445_v24, 2 }
 0x200   : > { %v774_v18 = vadd.f32 %v773_v52, %v4907_v58 }
 0x201   : > { %v1371_v61 = vadd.f32 %v1332_v49, %v1010_v22  ;;  %v1703_v45 = vpop.f32.mrf.mxu0  ;;  %v4586_v55 = vpop.f32.mrf.mxu3  ;;  %v2450_v22 = vrot.slane %v2448_v60, 3 }
 0x203   : > { %v4578_v44 = vadd.f32 %v1701_v7, %v1371_v61  ;;  %v1767_v7 = vsel %vm1748_vm7, %v1764_v53, %v1766_v37  ;;  %v2451_v52 = vor.u32 %v2450_v22, %v2447_v47  ;;  %v2734_v47 = vrot.slane %v4553_v35, 3 }
 0x205   : > { %v2452_v58 = vsel %vm2345_vm6, %v2442_v1, %v2451_v52 }
 0x206   : > { %v973_v43 = vpop.f32.mrf.mxu2 }
 0x207   : > { %v1011_v49 = vadd.f32 %v973_v43, %v774_v18  ;;  %v1852_v16 = vpop.f32.mrf.mxu1 }
 0x208   : > { %v1942_v53 = vadd.f32 %v1852_v16, %v4197_v39  ;;  %v2457_v39 = vshll.u32 %v4601_v48, 16 }
 0x209   : > { %v1372_v26 = vadd.f32 %v1334_v62, %v1011_v49  ;;  %v2818_v61 = vpop.f32.mrf.mxu0  ;;  %v4597_v24 = vpop.f32.mrf.mxu3 }
 0x20a   : > { %3419 = vmatmul.msk.bf16.gmra.mxu1 %vm477_vm3, %v1767_v7  ;;  %v2129_v7 = vrot.slane %v4553_v35, 2 }
 0x20b   : > { %3506 = vmatmul.msk.bf16.gmra.mxu2 %vm477_vm3, %v2128_v17  ;;  %v4593_v27 = vadd.f32 %v1703_v45, %v1372_v26  ;;  %v3764_v45 = vld [vmem:[%s3860_s27 + $0x58] sm:$0xff]  ;;  %v2454_v17 = vshrl.u32 %v4601_v48, 16 }
 0x20c   : > { %3544 = vmatmul.msk.bf16.gmra.mxu0 %vm477_vm3, %v2733_v38  ;;  %v1768_v49 = vrot.slane %v3764_v45, 2  ;;  %v2735_v45 = vsel %vm2714_vm8, %v2732_v31, %v2734_v47 }
 0x20d   : > { %4908 = vst [vmem:[#allocation8_spill] sm:$0xff] %v4593_v27  ;;  %3527 = vmatmul.msk.bf16.gmra.mxu3 %vm477_vm3, %v2452_v58  ;;  %v2456_v58 = vrot.slane %v2454_v17, 2 }
 0x20e   : > { %v2213_v9 = vpop.f32.mrf.mxu2 }
 0x20f   : > { %v2303_v60 = vadd.f32 %v2213_v9, %v1942_v53  ;;  %v1854_v62 = vpop.f32.mrf.mxu1  ;;  %v1769_v9 = vsel %vm1748_vm7, %v1766_v37, %v1768_v49 }
 0x210   : > { %v1943_v16 = vadd.f32 %v1854_v62, %v4207_v32  ;;  %v2459_v32 = vrot.slane %v2457_v39, 3 }
 0x211   : > { %v2820_v18 = vpop.f32.mrf.mxu0  ;;  %v2672_v43 = vadd.f32 %v2582_v10, %v2303_v60  ;;  %v4610_v1 = vpop.f32.mrf.mxu3  ;;  %v4615_v10 = vld [vmem:[%s4884_s2] ss:$0 sm:$0xff]  ;;  %v2130_v60 = vsel %vm1748_vm7, %v2127_v51, %v2129_v7 }
 0x212   : > { %v2460_v37 = vor.u32 %v2459_v32, %v2456_v58 }
 0x213   : > { %v2908_v26 = vadd.f32 %v2818_v61, %v2672_v43 }
 0x215   : > { %v2948_v27 = vadd.f32 %v4615_v10, %v2908_v26  ;;  %v4636_v26 = vld [vmem:[%s3860_s27 + $0x78] sm:$0xff] }
 0x216   : > { %v2215_v22 = vpop.f32.mrf.mxu2  ;;  %v2463_v58 = vshrl.u32 %v4636_v26, 16  ;;  %v2466_v32 = vshll.u32 %v4636_v26, 16 }
 0x217   : > { %v2304_v38 = vadd.f32 %v2215_v22, %v1943_v16  ;;  %v1857_v53 = vpop.f32.mrf.mxu1  ;;  %v2984_v31 = vmax.f32 %v2948_v27, 0.0  ;;  %v2461_v22 = vsel %vm2345_vm6, %v2451_v52, %v2460_v37  ;;  %v3765_v27 = vld [vmem:[%s3860_s27 + $0x60] sm:$0xff]  ;;  %v2736_v52 = vrot.slane %v4575_v8, 3 }
 0x219   : > { %v2673_v62 = vadd.f32 %v2584_v2, %v2304_v38  ;;  %v2823_v35 = vpop.f32.mrf.mxu0  ;;  %v1944_v2 = vadd.f32 %v1857_v53, %v4213_v23  ;;  %v4627_v17 = vpop.f32.mrf.mxu3  ;;  %v1770_v53 = vrot.slane %v3765_v27, 2  ;;  %v2737_v27 = vsel %vm2714_vm8, %v2734_v47, %v2736_v52 }
 0x21a   : > { %3420 = vmatmul.msk.bf16.gmra.mxu1 %vm477_vm3, %v1769_v9 }
 0x21b   : > { %v2909_v61 = vadd.f32 %v2820_v18, %v2673_v62  ;;  %3507 = vmatmul.msk.bf16.gmra.mxu2 %vm477_vm3, %v2130_v60  ;;  %v2131_v60 = vrot.slane %v4575_v8, 2 }
 0x21c   : > { %3545 = vmatmul.msk.bf16.gmra.mxu0 %vm477_vm3, %v2735_v45 }
 0x21d   : > { %v2949_v51 = vadd.f32 %v4615_v10, %v2909_v61  ;;  %3528 = vmatmul.msk.bf16.gmra.mxu3 %vm477_vm3, %v2461_v22 }
 0x21e   : > { %v2218_v43 = vpop.f32.mrf.mxu2 }
 0x21f   : > { %v2985_v39 = vmax.f32 %v2949_v51, 0.0  ;;  %v2305_v18 = vadd.f32 %v2218_v43, %v1944_v2  ;;  %v1859_v16 = vpop.f32.mrf.mxu1  ;;  %v1771_v43 = vsel %vm1748_vm7, %v1768_v49, %v1770_v53 }
 0x220   : > { %v1945_v62 = vadd.f32 %v1859_v16, %v4223_v36 }
 0x221   : > { %v3614_v38 = vpack.c.bf16 %v2985_v39, %v2984_v31  ;;  %v2825_v9 = vpop.f32.mrf.mxu0  ;;  %v2674_v23 = vadd.f32 %v4586_v55, %v2305_v18  ;;  %v4647_v61 = vpop.f32.mrf.mxu3  ;;  %v2132_v31 = vsel %vm1748_vm7, %v2129_v7, %v2131_v60  ;;  %v2465_v39 = vrot.slane %v2463_v58, 2 }
 0x222   : > { %v2468_v18 = vrot.slane %v2466_v32, 3 }
 0x223   : > { %3615 = vst [vmem:[%s4632_s20] sm:$0xff] %v3614_v38   ;;  %v2910_v51 = vadd.f32 %v2823_v35, %v2674_v23 }
 0x224   : > { %v2469_v49 = vor.u32 %v2468_v18, %v2465_v39 }
 0x225   : > { %v2950_v36 = vadd.f32 %v4615_v10, %v2910_v51 }
 0x226   : > { %v2220_v45 = vpop.f32.mrf.mxu2  ;;  %v2470_v32 = vsel %vm2345_vm6, %v2460_v37, %v2469_v49  ;;  %v2738_v37 = vrot.slane %v4601_v48, 3 }
 0x227   : > { %v2306_v2 = vadd.f32 %v2220_v45, %v1945_v62  ;;  %v1862_v55 = vpop.f32.mrf.mxu1  ;;  %v2986_v47 = vmax.f32 %v2950_v36, 0.0  ;;  %v4663_v62 = vld [vmem:[%s3860_s27 + $0x80] sm:$0xff] }
 0x228   : > { %v2475_v39 = vshll.u32 %v4663_v62, 16 }
 0x229   : > { %v2675_v22 = vadd.f32 %v4597_v24, %v2306_v2  ;;  %v2828_v38 = vpop.f32.mrf.mxu0  ;;  %v1946_v24 = vadd.f32 %v1862_v55, %v4229_v63  ;;  %v4659_v16 = vpop.f32.mrf.mxu3  ;;  %v2133_v55 = vrot.slane %v4601_v48, 2 }
 0x22a   : > { %3421 = vmatmul.msk.bf16.gmra.mxu1 %vm477_vm3, %v1771_v43  ;;  %v3766_v43 = vld [vmem:[%s3860_s27 + $0x68] sm:$0xff] }
 0x22b   : > { %v2911_v8 = vadd.f32 %v2825_v9, %v2675_v22  ;;  %3508 = vmatmul.msk.bf16.gmra.mxu2 %vm477_vm3, %v2132_v31  ;;  %v1772_v63 = vrot.slane %v3766_v43, 2  ;;  %v2472_v31 = vshrl.u32 %v4663_v62, 16 }
 0x22c   : > { %3546 = vmatmul.msk.bf16.gmra.mxu0 %vm477_vm3, %v2737_v27 }
 0x22d   : > { %v2951_v7 = vadd.f32 %v4615_v10, %v2911_v8  ;;  %3529 = vmatmul.msk.bf16.gmra.mxu3 %vm477_vm3, %v2470_v32  ;;  %v2739_v32 = vsel %vm2714_vm8, %v2736_v52, %v2738_v37 }
 0x22e   : > { %v2223_v35 = vpop.f32.mrf.mxu2 }
 0x22f   : > { %v2987_v23 = vmax.f32 %v2951_v7, 0.0  ;;  %v2307_v58 = vadd.f32 %v2223_v35, %v1946_v24  ;;  %v1864_v9 = vpop.f32.mrf.mxu1  ;;  %v1773_v7 = vsel %vm1748_vm7, %v1770_v53, %v1772_v63  ;;  %v2134_v24 = vsel %vm1748_vm7, %v2131_v60, %v2133_v55 }
 0x230   : > { %v1947_v18 = vadd.f32 %v1864_v9, %v4239_v40  ;;  %v2474_v35 = vrot.slane %v2472_v31, 2  ;;  %v4690_v31 = vld [vmem:[%s3860_s27 + $0x88] sm:$0xff] }
 0x231   : > { %v3619_v45 = vpack.c.bf16 %v2987_v23, %v2986_v47  ;;  %v2830_v51 = vpop.f32.mrf.mxu0  ;;  %v2676_v2 = vadd.f32 %v4610_v1, %v2307_v58  ;;  %v4674_v27 = vpop.f32.mrf.mxu3  ;;  %v2477_v47 = vrot.slane %v2475_v39, 3 }
 0x233   : > { %3704 = vst [vmem:[%s4632_s20 + $0x8] sm:$0xff] %v3619_v45   ;;  %v2912_v36 = vadd.f32 %v2828_v38, %v2676_v2  ;;  %v2478_v53 = vor.u32 %v2477_v47, %v2474_v35 }
 0x235   : > { %v2952_v40 = vadd.f32 %v4615_v10, %v2912_v36  ;;  %v2479_v43 = vsel %vm2345_vm6, %v2469_v49, %v2478_v53  ;;  %v3767_v36 = vld [vmem:[%s3860_s27 + $0x70] sm:$0xff]  ;;  %v2740_v49 = vrot.slane %v4636_v26, 3 }
 0x236   : > { %v2225_v22 = vpop.f32.mrf.mxu2 }
 0x237   : > { %v2308_v8 = vadd.f32 %v2225_v22, %v1947_v18  ;;  %v1867_v1 = vpop.f32.mrf.mxu1  ;;  %v2988_v52 = vmax.f32 %v2952_v40, 0.0 }
 0x239   : > { %v2677_v23 = vadd.f32 %v4627_v17, %v2308_v8  ;;  %v2833_v58 = vpop.f32.mrf.mxu0  ;;  %v1948_v17 = vadd.f32 %v1867_v1, %v4245_v13  ;;  %v4686_v9 = vpop.f32.mrf.mxu3  ;;  %v1774_v13 = vrot.slane %v3767_v36, 2  ;;  %v2135_v8 = vrot.slane %v4636_v26, 2 }
 0x23a   : > { %3422 = vmatmul.msk.bf16.gmra.mxu1 %vm477_vm3, %v1773_v7  ;;  %v2481_v1 = vshrl.u32 %v4690_v31, 16  ;;  %v2484_v7 = vshll.u32 %v4690_v31, 16 }
 0x23b   : > { %v2913_v48 = vadd.f32 %v2830_v51, %v2677_v23  ;;  %3509 = vmatmul.msk.bf16.gmra.mxu2 %vm477_vm3, %v2134_v24  ;;  %v1775_v40 = vsel %vm1748_vm7, %v1772_v63, %v1774_v13 }
 0x23c   : > { %3547 = vmatmul.msk.bf16.gmra.mxu0 %vm477_vm3, %v2739_v32 }
 0x23d   : > { %v2953_v60 = vadd.f32 %v4615_v10, %v2913_v48  ;;  %3530 = vmatmul.msk.bf16.gmra.mxu3 %vm477_vm3, %v2479_v43  ;;  %v2136_v48 = vsel %vm1748_vm7, %v2133_v55, %v2135_v8 }
 0x23e   : > { %v2228_v38 = vpop.f32.mrf.mxu2 }
 0x23f   : > { %v2989_v45 = vmax.f32 %v2953_v60, 0.0  ;;  %v2309_v2 = vadd.f32 %v2228_v38, %v1948_v17  ;;  %v1869_v51 = vpop.f32.mrf.mxu1  ;;  %v2483_v60 = vrot.slane %v2481_v1, 2  ;;  %v2486_v17 = vrot.slane %v2484_v7, 3 }
 0x240   : > { %v1949_v24 = vadd.f32 %v1869_v51, %v4255_v5 }
 0x241   : > { %v3624_v39 = vpack.c.bf16 %v2989_v45, %v2988_v52  ;;  %v2835_v18 = vpop.f32.mrf.mxu0  ;;  %v2678_v22 = vadd.f32 %v4647_v61, %v2309_v2  ;;  %v4701_v47 = vpop.f32.mrf.mxu3  ;;  %v2741_v45 = vsel %vm2714_vm8, %v2738_v37, %v2740_v49  ;;  %v2487_v63 = vor.u32 %v2486_v17, %v2483_v60 }
 0x243   : > { %3705 = vst [vmem:[%s4632_s20 + $0x10] sm:$0xff] %v3624_v39   ;;  %v2914_v23 = vadd.f32 %v2833_v58, %v2678_v22  ;;  %v4717_v22 = vld [vmem:[%s3860_s27 + $0x90] sm:$0xff] }
 0x245   : > { %v2954_v5 = vadd.f32 %v4615_v10, %v2914_v23  ;;  %v2490_v23 = vshrl.u32 %v4717_v22, 16 }
 0x246   : > { %v2230_v35 = vpop.f32.mrf.mxu2 }
 0x247   : > { %v2310_v32 = vadd.f32 %v2230_v35, %v1949_v24  ;;  %v1872_v61 = vpop.f32.mrf.mxu1  ;;  %v2990_v37 = vmax.f32 %v2954_v5, 0.0  ;;  %v3768_v24 = vld [vmem:[%s3860_s27 + $0x78] sm:$0xff]  ;;  %v2137_v35 = vrot.slane %v4663_v62, 2  ;;  %v2492_v5 = vrot.slane %v2490_v23, 2  ;;  %v3769_v23 = vld [vmem:[%s3860_s27 + $0x80] sm:$0xff] }
 0x249   : > { %v2679_v38 = vadd.f32 %v4659_v16, %v2310_v32  ;;  %v2838_v52 = vpop.f32.mrf.mxu0  ;;  %v1950_v16 = vadd.f32 %v1872_v61, %v4261_v14  ;;  %v4713_v2 = vpop.f32.mrf.mxu3  ;;  %v1776_v14 = vrot.slane %v3768_v24, 2  ;;  %v2493_v32 = vshll.u32 %v4717_v22, 16 }
 0x24a   : > { %3423 = vmatmul.msk.bf16.gmra.mxu1 %vm477_vm3, %v1775_v40 }
 0x24b   : > { %v2915_v26 = vadd.f32 %v2835_v18, %v2679_v38  ;;  %3510 = vmatmul.msk.bf16.gmra.mxu2 %vm477_vm3, %v2136_v48  ;;  %v2488_v18 = vsel %vm2345_vm6, %v2478_v53, %v2487_v63  ;;  %v2742_v53 = vrot.slane %v4663_v62, 3  ;;  %v1777_v38 = vsel %vm1748_vm7, %v1774_v13, %v1776_v14 }
 0x24c   : > { %3548 = vmatmul.msk.bf16.gmra.mxu0 %vm477_vm3, %v2741_v45  ;;  %v2138_v45 = vsel %vm1748_vm7, %v2135_v8, %v2137_v35 }
 0x24d   : > { %v2955_v55 = vadd.f32 %v4615_v10, %v2915_v26  ;;  %3531 = vmatmul.msk.bf16.gmra.mxu3 %vm477_vm3, %v2488_v18  ;;  %v2495_v26 = vrot.slane %v2493_v32, 3  ;;  %v2139_v32 = vrot.slane %v4690_v31, 2 }
 0x24e   : > { %v2233_v58 = vpop.f32.mrf.mxu2 }
 0x24f   : > { %v2991_v51 = vmax.f32 %v2955_v55, 0.0  ;;  %v2311_v43 = vadd.f32 %v2233_v58, %v1950_v16  ;;  %v1874_v39 = vpop.f32.mrf.mxu1  ;;  %v2743_v58 = vsel %vm2714_vm8, %v2740_v49, %v2742_v53  ;;  %v2496_v13 = vor.u32 %v2495_v26, %v2492_v5 }
 0x250   : > { %v1951_v61 = vadd.f32 %v1874_v39, %v4271_v21  ;;  %v2140_v26 = vsel %vm1748_vm7, %v2137_v35, %v2139_v32 }
 0x251   : > { %v3629_v36 = vpack.c.bf16 %v2991_v51, %v2990_v37  ;;  %v2840_v1 = vpop.f32.mrf.mxu0  ;;  %v2680_v7 = vadd.f32 %v4674_v27, %v2311_v43  ;;  %v4728_v48 = vpop.f32.mrf.mxu3  ;;  %v2497_v18 = vsel %vm2345_vm6, %v2487_v63, %v2496_v13 }
 0x253   : > { %3706 = vst [vmem:[%s4632_s20 + $0x18] sm:$0xff] %v3629_v36   ;;  %v2916_v60 = vadd.f32 %v2838_v52, %v2680_v7  ;;  %v4744_v36 = vld [vmem:[%s3860_s27 + $0x98] sm:$0xff] }
 0x255   : > { %v2956_v21 = vadd.f32 %v4615_v10, %v2916_v60  ;;  %v2744_v60 = vrot.slane %v4690_v31, 3 }
 0x256   : > { %v2235_v40 = vpop.f32.mrf.mxu2 }
 0x257   : > { %v2312_v17 = vadd.f32 %v2235_v40, %v1951_v61  ;;  %v1877_v27 = vpop.f32.mrf.mxu1  ;;  %v2992_v49 = vmax.f32 %v2956_v21, 0.0  ;;  %v2499_v61 = vshrl.u32 %v4744_v36, 16  ;;  %v2502_v40 = vshll.u32 %v4744_v36, 16 }
 0x259   : > { %v2681_v55 = vadd.f32 %v4686_v9, %v2312_v17  ;;  %v2843_v16 = vpop.f32.mrf.mxu0  ;;  %v1952_v9 = vadd.f32 %v1877_v27, %v4277_v41  ;;  %v4740_v37 = vpop.f32.mrf.mxu3  ;;  %v1778_v41 = vrot.slane %v3769_v23, 2 }
 0x25a   : > { %3424 = vmatmul.msk.bf16.gmra.mxu1 %vm477_vm3, %v1777_v38 }
 0x25b   : > { %v2917_v62 = vadd.f32 %v2840_v1, %v2681_v55  ;;  %3511 = vmatmul.msk.bf16.gmra.mxu2 %vm477_vm3, %v2138_v45  ;;  %v1779_v5 = vsel %vm1748_vm7, %v1776_v14, %v1778_v41  ;;  %v2501_v55 = vrot.slane %v2499_v61, 2  ;;  %v3770_v61 = vld [vmem:[%s3860_s27 + $0x88] sm:$0xff] }
 0x25c   : > { %3549 = vmatmul.msk.bf16.gmra.mxu0 %vm477_vm3, %v2743_v58  ;;  %v2504_v58 = vrot.slane %v2502_v40, 3  ;;  %v2141_v40 = vrot.slane %v4717_v22, 2 }
 0x25d   : > { %v2957_v8 = vadd.f32 %v4615_v10, %v2917_v62  ;;  %3532 = vmatmul.msk.bf16.gmra.mxu3 %vm477_vm3, %v2497_v18 }
 0x25e   : > { %v2238_v52 = vpop.f32.mrf.mxu2  ;;  %v2505_v14 = vor.u32 %v2504_v58, %v2501_v55 }
 0x25f   : > { %v2993_v51 = vmax.f32 %v2957_v8, 0.0  ;;  %v2313_v43 = vadd.f32 %v2238_v52, %v1952_v9  ;;  %v1879_v39 = vpop.f32.mrf.mxu1  ;;  %v2745_v8 = vsel %vm2714_vm8, %v2742_v53, %v2744_v60 }
 0x260   : > { %v1953_v63 = vadd.f32 %v1879_v39, %v4287_v34  ;;  %v2339_v34 = vld [vmem:[%s3860_s27 + $0xa0] sm:$0x7]  ;;  %v2506_v18 = vsel %vm2345_vm6, %v2496_v13, %v2505_v14  ;;  %v2746_v13 = vrot.slane %v4717_v22, 3 }
 0x261   : > { %v3634_v1 = vpack.c.bf16 %v2993_v51, %v2992_v49  ;;  %v2845_v7 = vpop.f32.mrf.mxu0  ;;  %v2682_v24 = vadd.f32 %v4701_v47, %v2313_v43  ;;  %v4755_v27 = vpop.f32.mrf.mxu3  ;;  %v2343_v35 = vunpack.c.l.b16 %v2339_v34 }
 0x263   : > { %3707 = vst [vmem:[%s4632_s20 + $0x20] sm:$0xff] %v3634_v1   ;;  %v2918_v38 = vadd.f32 %v2843_v16, %v2682_v24  ;;  %v4771_v1 = vpack.c.b16 %v2343_v35, %v2343_v35  ;;  %v2747_v35 = vsel %vm2714_vm8, %v2744_v60, %v2746_v13 }
 0x265   : > { %v2958_v31 = vadd.f32 %v4615_v10, %v2918_v38  ;;  %v4909_v38 = vld [vmem:[#allocation10_spill] sm:$0xff] }
 0x266   : > { %v2240_v17 = vpop.f32.mrf.mxu2 }
 0x267   : > { %v2314_v47 = vadd.f32 %v2240_v17, %v1953_v63  ;;  %v1882_v45 = vpop.f32.mrf.mxu1  ;;  %v2994_v49 = vmax.f32 %v2958_v31, 0.0  ;;  %v2508_v63 = vshrl.u32 %v4771_v1, 16  ;;  %v2511_v17 = vshll.u32 %v4771_v1, 16 }
 0x269   : > { %v2683_v21 = vadd.f32 %v4713_v2, %v2314_v47  ;;  %v2848_v62 = vpop.f32.mrf.mxu0  ;;  %v1954_v2 = vadd.f32 %v1882_v45, %v4296_v42  ;;  %v4768_v53 = vpop.f32.mrf.mxu3  ;;  %v1780_v42 = vrot.slane %v3770_v61, 2  ;;  %v2513_v34 = vrot.slane %v2511_v17, 3 }
 0x26a   : > { %3425 = vmatmul.msk.bf16.gmra.mxu1 %vm477_vm3, %v1779_v5 }
 0x26b   : > { %v2919_v9 = vadd.f32 %v2845_v7, %v2683_v21  ;;  %3512 = vmatmul.msk.bf16.gmra.mxu2 %vm477_vm3, %v2140_v26  ;;  %v1781_v58 = vsel %vm1748_vm7, %v1778_v41, %v1780_v42  ;;  %v2142_v21 = vsel %vm1748_vm7, %v2139_v32, %v2141_v40 }
 0x26c   : > { %3550 = vmatmul.msk.bf16.gmra.mxu0 %vm477_vm3, %v2745_v8  ;;  %v2510_v8 = vrot.slane %v2508_v63, 2  ;;  %v2143_v63 = vrot.slane %v4744_v36, 2 }
 0x26d   : > { %v2959_v16 = vadd.f32 %v4615_v10, %v2919_v9  ;;  %3533 = vmatmul.msk.bf16.gmra.mxu3 %vm477_vm3, %v2506_v18 }
 0x26e   : > { %v2243_v52 = vpop.f32.mrf.mxu2  ;;  %v2514_v41 = vor.u32 %v2513_v34, %v2510_v8  ;;  %v2014_v34 = vld [vmem:[%s3860_s27 + $0xa0] sm:$0x3] }
 0x26f   : > { %v2995_v51 = vmax.f32 %v2959_v16, 0.0  ;;  %v2315_v43 = vadd.f32 %v2243_v52, %v1954_v2  ;;  %v1884_v39 = vpop.f32.mrf.mxu1 }
 0x270   : > { %v1955_v47 = vadd.f32 %v1884_v39, %v4909_v38  ;;  %v2515_v39 = vsel %vm2345_vm6, %v2505_v14, %v2514_v41  ;;  %v2748_v38 = vrot.slane %v4744_v36, 3  ;;  %v2090_v36 = vunpack.c.l.b16 %v2014_v34 }
 0x271   : > { %v3639_v7 = vpack.c.bf16 %v2995_v51, %v2994_v49  ;;  %v2850_v24 = vpop.f32.mrf.mxu0  ;;  %v2684_v23 = vadd.f32 %v4728_v48, %v2315_v43  ;;  %v4782_v5 = vpop.f32.mrf.mxu3 }
 0x272   : > { %v2749_v8 = vsel %vm2714_vm8, %v2746_v13, %v2748_v38  ;;  %v2109_v41 = vpack.c.b16 %v2090_v36, %v2090_v36 }
 0x273   : > { %3708 = vst [vmem:[%s4632_s20 + $0x28] sm:$0xff] %v3639_v7   ;;  %v2920_v26 = vadd.f32 %v2848_v62, %v2684_v23  ;;  %v4910_v62 = vld [vmem:[#allocation11_spill] sm:$0xff]  ;;  %v3771_v23 = vld [vmem:[%s3860_s27 + $0x90] sm:$0xff] }
 0x274   : > { %v1782_v61 = vrot.slane %v3771_v23, 2 }
 0x275   : > { %v2960_v16 = vadd.f32 %v4615_v10, %v2920_v26 }
 0x276   : > { %v2245_v45 = vpop.f32.mrf.mxu2 }
 0x277   : > { %v2316_v55 = vadd.f32 %v2245_v45, %v1955_v47  ;;  %v1887_v48 = vpop.f32.mrf.mxu1  ;;  %v2996_v49 = vmax.f32 %v2960_v16, 0.0 }
 0x278   : > { %v1956_v2 = vadd.f32 %v1887_v48, %v4910_v62  ;;  %v1783_v48 = vsel %vm1748_vm7, %v1780_v42, %v1782_v61 }
 0x279   : > { %v2685_v31 = vadd.f32 %v4740_v37, %v2316_v55  ;;  %v2853_v9 = vpop.f32.mrf.mxu0  ;;  %v2624_v52 = vpop.f32.mrf.mxu3 }
 0x27a   : > { %3426 = vmatmul.msk.bf16.gmra.mxu1 %vm477_vm3, %v1781_v58 }
 0x27b   : > { %v2921_v22 = vadd.f32 %v2850_v24, %v2685_v31  ;;  %3513 = vmatmul.msk.bf16.gmra.mxu2 %vm477_vm3, %v2142_v21 }
 0x27c   : > { %3551 = vmatmul.msk.bf16.gmra.mxu0 %vm477_vm3, %v2747_v35 }
 0x27d   : > { %v2961_v32 = vadd.f32 %v4615_v10, %v2921_v22  ;;  %3534 = vmatmul.msk.bf16.gmra.mxu3 %vm477_vm3, %v2515_v39 }
 0x27e   : > { %v2248_v37 = vpop.f32.mrf.mxu2 }
 0x27f   : > { %v2997_v60 = vmax.f32 %v2961_v32, 0.0  ;;  %v2317_v51 = vadd.f32 %v2248_v37, %v1956_v2  ;;  %v1889_v43 = vpop.f32.mrf.mxu1  ;;  %v1784_v37 = vrot.slane %v4347_v15, 2 }
 0x280   : > { %v1957_v17 = vadd.f32 %v1889_v43, %v4352_v4 }
 0x281   : > { %v3644_v18 = vpack.c.bf16 %v2997_v60, %v2996_v49  ;;  %v2855_v7 = vpop.f32.mrf.mxu0  ;;  %v2686_v24 = vadd.f32 %v4755_v27, %v2317_v51  ;;  %v2627_v45 = vpop.f32.mrf.mxu3  ;;  %v2144_v27 = vsel %vm1748_vm7, %v2141_v40, %v2143_v63  ;;  %v2145_v49 = vrot.slane %v2109_v41, 2 }
 0x282   : > { %v2750_v51 = vrot.slane %v4771_v1, 3 }
 0x283   : > { %3709 = vst [vmem:[%s4632_s20 + $0x30] sm:$0xff] %v3644_v18   ;;  %v2922_v26 = vadd.f32 %v2853_v9, %v2686_v24  ;;  %v1785_v24 = vsel %vm1748_vm7, %v1782_v61, %v1784_v37  ;;  %v2146_v23 = vsel %vm1748_vm7, %v2143_v63, %v2145_v49 }
 0x285   : > { %v2962_v31 = vadd.f32 %v4615_v10, %v2922_v26 }
 0x286   : > { %v2250_v47 = vpop.f32.mrf.mxu2 }
 0x287   : > { %v2318_v14 = vadd.f32 %v2250_v47, %v1957_v17  ;;  %v1892_v55 = vpop.f32.mrf.mxu1  ;;  %v2998_v35 = vmax.f32 %v2962_v31, 0.0 }
 0x288   : > { %v1958_v40 = vadd.f32 %v1892_v55, %v4366_v12 }
 0x289   : > { %v2687_v58 = vadd.f32 %v4768_v53, %v2318_v14  ;;  %v2858_v21 = vpop.f32.mrf.mxu0  ;;  %v2629_v9 = vpop.f32.mrf.mxu3 }
 0x28a   : > { %3427 = vmatmul.msk.bf16.gmra.mxu1 %vm477_vm3, %v1783_v48 }
 0x28b   : > { %v2923_v4 = vadd.f32 %v2855_v7, %v2687_v58  ;;  %3514 = vmatmul.msk.bf16.gmra.mxu2 %vm477_vm3, %v2144_v27 }
 0x28c   : > { %3552 = vmatmul.msk.bf16.gmra.mxu0 %vm477_vm3, %v2749_v8 }
 0x28d   : > { %v2963_v42 = vadd.f32 %v4615_v10, %v2923_v4 }
 0x28e   : > { %v2253_v53 = vpop.f32.mrf.mxu2 }
 0x28f   : > { %v2999_v13 = vmax.f32 %v2963_v42, 0.0  ;;  %v2319_v16 = vadd.f32 %v2253_v53, %v1958_v40  ;;  %v1894_v22 = vpop.f32.mrf.mxu1 }
 0x290   : > { %v1959_v60 = vadd.f32 %v1894_v22, %v4382_v50 }
 0x291   : > { %v3649_v32 = vpack.c.bf16 %v2999_v13, %v2998_v35  ;;  %v2860_v62 = vpop.f32.mrf.mxu0  ;;  %v2688_v2 = vadd.f32 %v4782_v5, %v2319_v16  ;;  %v2632_v43 = vpop.f32.mrf.mxu3  ;;  %v2751_v5 = vsel %vm2714_vm8, %v2748_v38, %v2750_v51 }
 0x293   : > { %3710 = vst [vmem:[%s4632_s20 + $0x38] sm:$0xff] %v3649_v32   ;;  %v2924_v39 = vadd.f32 %v2858_v21, %v2688_v2 }
 0x295   : > { %v2964_v15 = vadd.f32 %v4615_v10, %v2924_v39 }
 0x296   : > { %v2255_v12 = vpop.f32.mrf.mxu2 }
 0x297   : > { %v2320_v18 = vadd.f32 %v2255_v12, %v1959_v60  ;;  %v1897_v7 = vpop.f32.mrf.mxu1 }
 0x298   : > { %v1960_v1 = vadd.f32 %v1897_v7, %v4399_v20 }
 0x299   : > { %v2689_v17 = vadd.f32 %v2624_v52, %v2320_v18  ;;  %v2863_v47 = vpop.f32.mrf.mxu0  ;;  %v2634_v63 = vpop.f32.mrf.mxu3  ;;  %v3000_v52 = vmax.f32 %v2964_v15, 0.0 }
 0x29a   : > { %3428 = vmatmul.msk.bf16.gmra.mxu1 %vm477_vm3, %v1785_v24 }
 0x29b   : > { %v2925_v26 = vadd.f32 %v2860_v62, %v2689_v17  ;;  %3515 = vmatmul.msk.bf16.gmra.mxu2 %vm477_vm3, %v2146_v23 }
 0x29c   : > { %3553 = vmatmul.msk.bf16.gmra.mxu0 %vm477_vm3, %v2751_v5 }
 0x29d   : > { %v2965_v50 = vadd.f32 %v4615_v10, %v2925_v26 }
 0x29e   : > { %v2258_v61 = vpop.f32.mrf.mxu2 }
 0x29f   : > { %v3001_v14 = vmax.f32 %v2965_v50, 0.0  ;;  %v2321_v55 = vadd.f32 %v2258_v61, %v1960_v1  ;;  %v1899_v38 = vpop.f32.mrf.mxu1 }
 0x2a0   : > { %v1961_v21 = vadd.f32 %v1899_v38, %v4413_v28 }
 0x2a1   : > { %v3654_v48 = vpack.c.bf16 %v3001_v14, %v3000_v52  ;;  %v2865_v27 = vpop.f32.mrf.mxu0  ;;  %v2690_v58 = vadd.f32 %v2627_v45, %v2321_v55  ;;  %v2637_v34 = vpop.f32.mrf.mxu3 }
 0x2a3   : > { %3711 = vst [vmem:[%s4632_s20 + $0x40] sm:$0xff] %v3654_v48   ;;  %v2926_v31 = vadd.f32 %v2863_v47, %v2690_v58 }
 0x2a5   : > { %v2966_v40 = vadd.f32 %v4615_v10, %v2926_v31 }
 0x2a6   : > { %v2260_v8 = vpop.f32.mrf.mxu2 }
 0x2a7   : > { %v2322_v4 = vadd.f32 %v2260_v8, %v1961_v21  ;;  %v1902_v36 = vpop.f32.mrf.mxu1  ;;  %v3002_v22 = vmax.f32 %v2966_v40, 0.0 }
 0x2a8   : > { %v1962_v13 = vadd.f32 %v1902_v36, %v4423_v19 }
 0x2a9   : > { %v2691_v42 = vadd.f32 %v2629_v9, %v2322_v4  ;;  %v2868_v20 = vpop.f32.mrf.mxu0  ;;  %v2639_v32 = vpop.f32.mrf.mxu3 }
 0x2ab   : > { %v2927_v53 = vadd.f32 %v2865_v27, %v2691_v42 }
 0x2ad   : > { %v2967_v35 = vadd.f32 %v4615_v10, %v2927_v53 }
 0x2ae   : > { %v2263_v16 = vpop.f32.mrf.mxu2 }
 0x2af   : > { %v3003_v45 = vmax.f32 %v2967_v35, 0.0  ;;  %v2323_v41 = vadd.f32 %v2263_v16, %v1962_v13  ;;  %v1904_v28 = vpop.f32.mrf.mxu1 }
 0x2b0   : > { %v1963_v9 = vadd.f32 %v1904_v28, %v4437_v0 }
 0x2b1   : > { %v3659_v62 = vpack.c.bf16 %v3003_v45, %v3002_v22  ;;  %v2870_v2 = vpop.f32.mrf.mxu0  ;;  %v2692_v37 = vadd.f32 %v2632_v43, %v2323_v41  ;;  %v2642_v19 = vpop.f32.mrf.mxu3 }
 0x2b3   : > { %3712 = vst [vmem:[%s4632_s20 + $0x48] sm:$0xff] %v3659_v62   ;;  %v2928_v60 = vadd.f32 %v2868_v20, %v2692_v37 }
 0x2b5   : > { %v2968_v7 = vadd.f32 %v4615_v10, %v2928_v60 }
 0x2b6   : > { %v2265_v49 = vpop.f32.mrf.mxu2 }
 0x2b7   : > { %v2324_v51 = vadd.f32 %v2265_v49, %v1963_v9  ;;  %v1907_v12 = vpop.f32.mrf.mxu1  ;;  %v3004_v5 = vmax.f32 %v2968_v7, 0.0 }
 0x2b8   : > { %v1964_v17 = vadd.f32 %v1907_v12, %v4446_v46 }
 0x2b9   : > { %v2693_v39 = vadd.f32 %v2634_v63, %v2324_v51  ;;  %v2873_v18 = vpop.f32.mrf.mxu0  ;;  %v2644_v61 = vpop.f32.mrf.mxu3 }
 0x2bb   : > { %v2929_v24 = vadd.f32 %v2870_v2, %v2693_v39 }
 0x2bd   : > { %v2969_v23 = vadd.f32 %v4615_v10, %v2929_v24 }
 0x2be   : > { %v2268_v47 = vpop.f32.mrf.mxu2 }
 0x2bf   : > { %v3005_v43 = vmax.f32 %v2969_v23, 0.0  ;;  %v2325_v15 = vadd.f32 %v2268_v47, %v1964_v17  ;;  %v1909_v0 = vpop.f32.mrf.mxu1 }
 0x2c0   : > { %v1965_v63 = vadd.f32 %v1909_v0, %v4459_v30 }
 0x2c1   : > { %v3664_v26 = vpack.c.bf16 %v3005_v43, %v3004_v5  ;;  %v2875_v50 = vpop.f32.mrf.mxu0  ;;  %v2694_v1 = vadd.f32 %v2637_v34, %v2325_v15  ;;  %v2647_v4 = vpop.f32.mrf.mxu3 }
 0x2c3   : > { %3713 = vst [vmem:[%s4632_s20 + $0x50] sm:$0xff] %v3664_v26   ;;  %v2930_v14 = vadd.f32 %v2873_v18, %v2694_v1 }
 0x2c5   : > { %v2970_v46 = vadd.f32 %v4615_v10, %v2930_v14 }
 0x2c6   : > { %v2270_v52 = vpop.f32.mrf.mxu2 }
 0x2c7   : > { %v2326_v55 = vadd.f32 %v2270_v52, %v1965_v63  ;;  %v1912_v38 = vpop.f32.mrf.mxu1  ;;  %v3006_v34 = vmax.f32 %v2970_v46, 0.0 }
 0x2c8   : > { %v1966_v8 = vadd.f32 %v1912_v38, %v4468_v11 }
 0x2c9   : > { %v2695_v48 = vadd.f32 %v2639_v32, %v2326_v55  ;;  %v2878_v27 = vpop.f32.mrf.mxu0  ;;  %v2649_v41 = vpop.f32.mrf.mxu3 }
 0x2cb   : > { %v2931_v58 = vadd.f32 %v2875_v50, %v2695_v48 }
 0x2cd   : > { %v2971_v21 = vadd.f32 %v4615_v10, %v2931_v58 }
 0x2ce   : > { %v2273_v31 = vpop.f32.mrf.mxu2 }
 0x2cf   : > { %v3007_v36 = vmax.f32 %v2971_v21, 0.0  ;;  %v2327_v42 = vadd.f32 %v2273_v31, %v1966_v8  ;;  %v1914_v30 = vpop.f32.mrf.mxu1 }
 0x2d0   : > { %v1967_v35 = vadd.f32 %v1914_v30, %v4481_v54 }
 0x2d1   : > { %v3669_v20 = vpack.c.bf16 %v3007_v36, %v3006_v34  ;;  %v2880_v40 = vpop.f32.mrf.mxu0  ;;  %v2696_v53 = vadd.f32 %v2642_v19, %v2327_v42  ;;  %v2652_v18 = vpop.f32.mrf.mxu3 }
 0x2d3   : > { %3714 = vst [vmem:[%s4632_s20 + $0x58] sm:$0xff] %v3669_v20   ;;  %v2932_v16 = vadd.f32 %v2878_v27, %v2696_v53 }
 0x2d5   : > { %v2972_v32 = vadd.f32 %v4615_v10, %v2932_v16 }
 0x2d6   : > { %v2275_v13 = vpop.f32.mrf.mxu2 }
 0x2d7   : > { %v2328_v22 = vadd.f32 %v2275_v13, %v1967_v35  ;;  %v1917_v45 = vpop.f32.mrf.mxu1  ;;  %v3008_v49 = vmax.f32 %v2972_v32, 0.0 }
 0x2d8   : > { %v1968_v37 = vadd.f32 %v1917_v45, %v4490_v33 }
 0x2d9   : > { %v2697_v28 = vadd.f32 %v2644_v61, %v2328_v22  ;;  %v2883_v11 = vpop.f32.mrf.mxu0  ;;  %v2654_v0 = vpop.f32.mrf.mxu3 }
 0x2db   : > { %v2933_v62 = vadd.f32 %v2880_v40, %v2697_v28 }
 0x2dd   : > { %v2973_v2 = vadd.f32 %v4615_v10, %v2933_v62 }
 0x2de   : > { %v2278_v9 = vpop.f32.mrf.mxu2 }
 0x2df   : > { %v3009_v60 = vmax.f32 %v2973_v2, 0.0  ;;  %v2329_v51 = vadd.f32 %v2278_v9, %v1968_v37  ;;  %v1919_v54 = vpop.f32.mrf.mxu1 }
 0x2e0   : > { %v1969_v7 = vadd.f32 %v1919_v54, %v4503_v29 }
 0x2e1   : > { %v3674_v12 = vpack.c.bf16 %v3009_v60, %v3008_v49  ;;  %v2885_v39 = vpop.f32.mrf.mxu0  ;;  %v2698_v19 = vadd.f32 %v2647_v4, %v2329_v51  ;;  %v2657_v46 = vpop.f32.mrf.mxu3 }
 0x2e3   : > { %3715 = vst [vmem:[%s4632_s20 + $0x60] sm:$0xff] %v3674_v12   ;;  %v2934_v23 = vadd.f32 %v2883_v11, %v2698_v19 }
 0x2e5   : > { %v2974_v33 = vadd.f32 %v4615_v10, %v2934_v23 }
 0x2e6   : > { %v2280_v24 = vpop.f32.mrf.mxu2 }
 0x2e7   : > { %v2330_v17 = vadd.f32 %v2280_v24, %v1969_v7  ;;  %v1922_v47 = vpop.f32.mrf.mxu1  ;;  %v3010_v61 = vmax.f32 %v2974_v33, 0.0 }
 0x2e8   : > { %v1970_v50 = vadd.f32 %v1922_v47, %v4512_v56 }
 0x2e9   : > { %v2699_v5 = vadd.f32 %v2649_v41, %v2330_v17  ;;  %v2888_v43 = vpop.f32.mrf.mxu0  ;;  %v2659_v35 = vpop.f32.mrf.mxu3 }
 0x2eb   : > { %v2935_v15 = vadd.f32 %v2885_v39, %v2699_v5 }
 0x2ed   : > { %v2975_v26 = vadd.f32 %v4615_v10, %v2935_v15 }
 0x2ee   : > { %v2283_v1 = vpop.f32.mrf.mxu2 }
 0x2ef   : > { %v3011_v63 = vmax.f32 %v2975_v26, 0.0  ;;  %v2331_v52 = vadd.f32 %v2283_v1, %v1970_v50  ;;  %v1924_v29 = vpop.f32.mrf.mxu1 }
 0x2f0   : > { %v1971_v48 = vadd.f32 %v1924_v29, %v4525_v59 }
 0x2f1   : > { %v3679_v14 = vpack.c.bf16 %v3011_v63, %v3010_v61  ;;  %v2890_v55 = vpop.f32.mrf.mxu0  ;;  %v2700_v38 = vadd.f32 %v2652_v18, %v2331_v52  ;;  %v2662_v2 = vpop.f32.mrf.mxu3 }
 0x2f3   : > { %3716 = vst [vmem:[%s4632_s20 + $0x68] sm:$0xff] %v3679_v14   ;;  %v2936_v58 = vadd.f32 %v2888_v43, %v2700_v38  ;;  %v4911_v38 = vld [vmem:[#allocation8_spill] sm:$0xff] }
 0x2f5   : > { %v2976_v56 = vadd.f32 %v4615_v10, %v2936_v58 }
 0x2f6   : > { %v2285_v27 = vpop.f32.mrf.mxu2 }
 0x2f7   : > { %v2332_v21 = vadd.f32 %v2285_v27, %v1971_v48  ;;  %v1927_v8 = vpop.f32.mrf.mxu1  ;;  %v3012_v20 = vmax.f32 %v2976_v56, 0.0 }
 0x2f8   : > { %v1972_v42 = vadd.f32 %v1927_v8, %v4534_v25 }
 0x2f9   : > { %v2701_v31 = vadd.f32 %v2654_v0, %v2332_v21  ;;  %v2893_v4 = vpop.f32.mrf.mxu0  ;;  %v2664_v7 = vpop.f32.mrf.mxu3 }
 0x2fb   : > { %v2937_v34 = vadd.f32 %v2890_v55, %v2701_v31 }
 0x2fd   : > { %v2977_v36 = vadd.f32 %v4615_v10, %v2937_v34 }
 0x2fe   : > { %v2288_v30 = vpop.f32.mrf.mxu2 }
 0x2ff   : > { %v3013_v40 = vmax.f32 %v2977_v36, 0.0  ;;  %v2333_v53 = vadd.f32 %v2288_v30, %v1972_v42  ;;  %v1929_v59 = vpop.f32.mrf.mxu1 }
 0x300   : > { %v1973_v45 = vadd.f32 %v1929_v59, %v4547_v3 }
 0x301   : > { %v3684_v13 = vpack.c.bf16 %v3013_v40, %v3012_v20  ;;  %v2895_v16 = vpop.f32.mrf.mxu0  ;;  %v2702_v22 = vadd.f32 %v2657_v46, %v2333_v53  ;;  %v2667_v50 = vpop.f32.mrf.mxu3 }
 0x303   : > { %3717 = vst [vmem:[%s4632_s20 + $0x70] sm:$0xff] %v3684_v13   ;;  %v2938_v28 = vadd.f32 %v2893_v4, %v2702_v22 }
 0x305   : > { %v2978_v25 = vadd.f32 %v4615_v10, %v2938_v28 }
 0x306   : > { %v2290_v41 = vpop.f32.mrf.mxu2 }
 0x307   : > { %v2334_v11 = vadd.f32 %v2290_v41, %v1973_v45  ;;  %v1932_v32 = vpop.f32.mrf.mxu1  ;;  %v3014_v54 = vmax.f32 %v2978_v25, 0.0 }
 0x308   : > { %v1974_v60 = vadd.f32 %v1932_v32, %v4556_v57 }
 0x309   : > { %v2703_v62 = vadd.f32 %v2659_v35, %v2334_v11  ;;  %v2898_v9 = vpop.f32.mrf.mxu0  ;;  %v2669_v21 = vpop.f32.mrf.mxu3 }
 0x30b   : > { %v2939_v37 = vadd.f32 %v2895_v16, %v2703_v62 }
 0x30d   : > { %v2979_v49 = vadd.f32 %v4615_v10, %v2939_v37 }
 0x30e   : > { %v2293_v51 = vpop.f32.mrf.mxu2 }
 0x30f   : > { %v3015_v12 = vmax.f32 %v2979_v49, 0.0  ;;  %v2335_v39 = vadd.f32 %v2293_v51, %v1974_v60  ;;  %v1934_v3 = vpop.f32.mrf.mxu1 }
 0x310   : > { %v1975_v24 = vadd.f32 %v1934_v3, %v4569_v6 }
 0x311   : > { %v3689_v18 = vpack.c.bf16 %v3015_v12, %v3014_v54  ;;  %v2704_v19 = vadd.f32 %v2662_v2, %v2335_v39  ;;  %v2900_v23 = vpop.f32.mrf.mxu0 }
 0x313   : > { %3718 = vst [vmem:[%s4632_s20 + $0x78] sm:$0xff] %v3689_v18   ;;  %v2940_v47 = vadd.f32 %v2898_v9, %v2704_v19 }
 0x315   : > { %v2980_v57 = vadd.f32 %v4615_v10, %v2940_v47 }
 0x316   : > { %v2295_v17 = vpop.f32.mrf.mxu2 }
 0x317   : > { %v2336_v5 = vadd.f32 %v2295_v17, %v1975_v24  ;;  %v1937_v43 = vpop.f32.mrf.mxu1  ;;  %v3016_v61 = vmax.f32 %v2980_v57, 0.0 }
 0x318   : > { %v1976_v26 = vadd.f32 %v1937_v43, %v4578_v44  ;;  %v3772_v44 = vld [vmem:[%s4884_s2] ss:$0 sm:$0xff] }
 0x319   : > { %v2705_v33 = vadd.f32 %v2664_v7, %v2336_v5  ;;  %v2903_v6 = vpop.f32.mrf.mxu0 }
 0x31b   : > { %v2941_v15 = vadd.f32 %v2900_v23, %v2705_v33 }
 0x31d   : > { %v2981_v0 = vadd.f32 %v4615_v10, %v2941_v15 }
 0x31e   : > { %v2298_v1 = vpop.f32.mrf.mxu2 }
 0x31f   : > { %v3017_v63 = vmax.f32 %v2981_v0, 0.0  ;;  %v2337_v52 = vadd.f32 %v2298_v1, %v1976_v26  ;;  %v1939_v14 = vpop.f32.mrf.mxu1 }
 0x320   : > { %v1977_v48 = vadd.f32 %v1939_v14, %v4911_v38 }
 0x321   : > { %v3694_v29 = vpack.c.bf16 %v3017_v63, %v3016_v61  ;;  %v2706_v55 = vadd.f32 %v2667_v50, %v2337_v52  ;;  %v2905_v8 = vpop.f32.mrf.mxu0 }
 0x323   : > { %3719 = vst [vmem:[%s4632_s20 + $0x80] sm:$0xff] %v3694_v29   ;;  %v2942_v46 = vadd.f32 %v2903_v6, %v2706_v55 }
 0x325   : > { %v2982_v31 = vadd.f32 %v3772_v44, %v2942_v46 }
 0x326   : > { %v2300_v27 = vpop.f32.mrf.mxu2 }
 0x327   : > { %v2338_v58 = vadd.f32 %v2300_v27, %v1977_v48  ;;  %v3018_v34 = vmax.f32 %v2982_v31, 0.0 }
 0x329   : > { %v2707_v10 = vadd.f32 %v2669_v21, %v2338_v58 }
 0x32b   : > { %v2943_v4 = vadd.f32 %v2905_v8, %v2707_v10 }
 0x32d   : > { %v2983_v56 = vadd.f32 %v3772_v44, %v2943_v4 }
 0x32f   : > { %v3019_v36 = vmax.f32 %v2983_v56, 0.0 }
 0x331   : > { %v3699_v42 = vpack.c.bf16 %v3019_v36, %v3018_v34 }
 0x333   : > { %3720 = vst [vmem:[%s4632_s20 + $0x88] sm:$0xff] %v3699_v42  }
 0x334 PF: > { %s13_s14 = sadd.s32 1, %s3795_s14   ;;  %s4912_s12 = smov %s3791_s13 }
 0x335   : > { %p10_p5 = scmp.ge.s32.totalorder %s13_s14, 6   ;;  %s4913_s13 = smov %s4915_s15 }
 0x337   :  { %12 = sbr.rel (!%p10_p5) target bundleno = 2 (0x2), region = 70 }

// kernel: perceptual_loss.9
= control target key start
LH: loop header
LB: loop body
LE: loop exit
PB: predicated region body
PF: predicated region fallthrough
CT: control target
= control target key end

     0   :  { %s1741_s0 = inlined_call_operand.vmem [shape: bf16[128,128], index: 0, kind: input, shape index: {}]   ;;  %s1742_s1 = inlined_call_operand.vmem [shape: bf16[128,128], index: 1, kind: input, shape index: {}]   ;;  %s1743_s2 = inlined_call_operand.vmem [shape: f32[1,128], index: 2, kind: input, shape index: {}]   ;;  %s1744_s3 = inlined_call_operand.hbm [shape: f32[1,1], index: 3, kind: output, shape index: {}]  }
   0x1   :  { %v797_v0 = vld [vmem:[%s1742_s1] sm:$0xff]   ;;  %v828_v1 = vld [vmem:[%s1741_s0 + $0x8] sm:$0xff]  }
   0x2   :  { %v765_v2 = vld [vmem:[%s1741_s0] sm:$0xff]   ;;  %v1032_v3 = vunpack.c.l.bf16 %v797_v0  ;;  %v1034_v4 = vunpack.c.l.bf16 %v828_v1  ;;  %v835_v6 = vld [vmem:[%s1742_s1 + $0x8] sm:$0xff]  }
   0x3   :  { %v1036_v5 = vunpack.c.l.bf16 %v765_v2 }
   0x4   :  { %v357_v7 = vmul.f32 %v1032_v3, %v1032_v3  ;;  %v87_v8 = vmul.f32 %v1034_v4, %v1034_v4 }
   0x5   :  { %v85_v9 = vmul.f32 %v1036_v5, %v1036_v5 }
   0x6   :  { %8 = vsyncpa [#allocation4], 0  ;;  %373 = vadd.xlane.f32.xlu1 %v357_v7  ;;  %105 = vadd.xlane.f32.xlu2 %v87_v8  ;;  %v1047_v10 = vunpack.c.h.bf16 %v797_v0  ;;  %v1049_v11 = vunpack.c.l.bf16 %v835_v6  ;;  %v1051_v12 = vunpack.c.h.bf16 %v765_v2  ;;  %v829_v16 = vld [vmem:[%s1741_s0 + $0x10] sm:$0xff]   ;;  %v1062_v17 = vunpack.c.h.bf16 %v835_v6  ;;  %v837_v30 = vld [vmem:[%s1742_s1 + $0x18] sm:$0xff]   ;;  %s1002_s17 = smov [#allocation3]   ;;  %s755_s21 = sshll.u32 %s1744_s3, 4  ;;  %s756_s21 = int_to_ptr.hbm [resolvable:$true] %s755_s21 }
   0x7   :  { %101 = vadd.xlane.f32.xlu0 %v85_v9  ;;  %v1064_v18 = vunpack.c.l.bf16 %v829_v16  ;;  %v1066_v19 = vunpack.c.h.bf16 %v828_v1  ;;  %v836_v23 = vld [vmem:[%s1742_s1 + $0x10] sm:$0xff]   ;;  %v1077_v24 = vunpack.c.h.bf16 %v829_v16  ;;  %v830_v31 = vld [vmem:[%s1741_s0 + $0x18] sm:$0xff]   ;;  %v1095_v32 = vunpack.c.l.bf16 %v837_v30  ;;  %v831_v38 = vld [vmem:[%s1741_s0 + $0x20] sm:$0xff]   ;;  %s753_s18 = sshll.u32 %s1002_s17, 4  ;;  %s754_s18 = int_to_ptr.vmem [resolvable:$true] %s753_s18 }
   0x8   :  { %v358_v13 = vmul.f32 %v1047_v10, %v1047_v10  ;;  %v359_v14 = vmul.f32 %v1049_v11, %v1049_v11  ;;  %v86_v15 = vmul.f32 %v1051_v12, %v1051_v12  ;;  %v360_v20 = vmul.f32 %v1062_v17, %v1062_v17  ;;  %v838_v39 = vld [vmem:[%s1742_s1 + $0x20] sm:$0xff]   ;;  %v832_v46 = vld [vmem:[%s1741_s0 + $0x28] sm:$0xff]   ;;  %v840_v60 = vld [vmem:[%s1742_s1 + $0x30] sm:$0xff]  }
   0x9   :  { %v89_v21 = vmul.f32 %v1064_v18, %v1064_v18  ;;  %v88_v22 = vmul.f32 %v1066_v19, %v1066_v19  ;;  %v1079_v25 = vunpack.c.h.bf16 %v836_v23  ;;  %v1081_v26 = vunpack.c.l.bf16 %v836_v23  ;;  %v839_v53 = vld [vmem:[%s1742_s1 + $0x28] sm:$0xff]   ;;  %v833_v61 = vld [vmem:[%s1741_s0 + $0x30] sm:$0xff]   ;;  %v834_v7 = vld [vmem:[%s1741_s0 + $0x38] sm:$0xff]  }
   0xa   :  { %v90_v27 = vmul.f32 %v1077_v24, %v1077_v24  ;;  %v1097_v33 = vunpack.c.h.bf16 %v830_v31  ;;  %v1099_v34 = vunpack.c.l.bf16 %v830_v31  ;;  %v363_v35 = vmul.f32 %v1095_v32, %v1095_v32  ;;  %v841_v8 = vld [vmem:[%s1742_s1 + $0x38] sm:$0xff]  }
   0xb   :  { %v362_v28 = vmul.f32 %v1079_v25, %v1079_v25  ;;  %v361_v29 = vmul.f32 %v1081_v26, %v1081_v26  ;;  %v1113_v40 = vunpack.c.l.bf16 %v831_v38  ;;  %v1115_v41 = vunpack.c.l.bf16 %v838_v39 }
   0xc   :  { %v92_v36 = vmul.f32 %v1097_v33, %v1097_v33  ;;  %v91_v37 = vmul.f32 %v1099_v34, %v1099_v34  ;;  %v1117_v42 = vunpack.c.h.bf16 %v837_v30  ;;  %v1128_v47 = vunpack.c.h.bf16 %v838_v39 }
   0xd   :  { %v93_v43 = vmul.f32 %v1113_v40, %v1113_v40  ;;  %v365_v44 = vmul.f32 %v1115_v41, %v1115_v41  ;;  %v1130_v48 = vunpack.c.l.bf16 %v832_v46  ;;  %v1132_v49 = vunpack.c.h.bf16 %v831_v38 }
   0xe   :  { %375 = vadd.xlane.f32.xlu1 %v358_v13  ;;  %377 = vadd.xlane.f32.xlu2 %v359_v14  ;;  %v364_v45 = vmul.f32 %v1117_v42, %v1117_v42  ;;  %v366_v50 = vmul.f32 %v1128_v47, %v1128_v47  ;;  %v1143_v54 = vunpack.c.h.bf16 %v832_v46  ;;  %v1145_v55 = vunpack.c.h.bf16 %v839_v53 }
   0xf   :  { %103 = vadd.xlane.f32.xlu0 %v86_v15  ;;  %v95_v51 = vmul.f32 %v1130_v48, %v1130_v48  ;;  %v94_v52 = vmul.f32 %v1132_v49, %v1132_v49  ;;  %v1147_v56 = vunpack.c.l.bf16 %v839_v53  ;;  %v1161_v62 = vunpack.c.l.bf16 %v840_v60 }
  0x10   :  { %v96_v57 = vmul.f32 %v1143_v54, %v1143_v54  ;;  %v368_v58 = vmul.f32 %v1145_v55, %v1145_v55  ;;  %v1163_v63 = vunpack.c.h.bf16 %v833_v61  ;;  %v1165_v0 = vunpack.c.l.bf16 %v833_v61 }
  0x11   :  { %v367_v59 = vmul.f32 %v1147_v56, %v1147_v56  ;;  %1753 = vst [vmem:[#allocation6_spill] sm:$0xff] %v1161_v62  ;;  %v369_v1 = vmul.f32 %v1161_v62, %v1161_v62  ;;  %v1179_v9 = vunpack.c.l.bf16 %v834_v7  ;;  %v1181_v13 = vunpack.c.l.bf16 %v841_v8 }
  0x12   :  { %1754 = vst [vmem:[#allocation7_spill] sm:$0xff] %v1163_v63  ;;  %v98_v2 = vmul.f32 %v1163_v63, %v1163_v63  ;;  %v97_v6 = vmul.f32 %v1165_v0, %v1165_v0  ;;  %v1183_v14 = vunpack.c.h.bf16 %v840_v60 }
  0x13   :  { %1755 = vst [vmem:[#allocation8_spill] sm:$0xff] %v1165_v0  ;;  %v99_v15 = vmul.f32 %v1179_v9, %v1179_v9  ;;  %v371_v16 = vmul.f32 %v1181_v13, %v1181_v13 }
  0x14   :  { %1756 = vst [vmem:[#allocation9_spill] sm:$0xff] %v1179_v9 }
  0x15   :  { %1757 = vst [vmem:[#allocation10_spill] sm:$0xff] %v1181_v13 }
  0x16   :  { %379 = vadd.xlane.f32.xlu1 %v360_v20  ;;  %109 = vadd.xlane.f32.xlu2 %v89_v21  ;;  %1758 = vst [vmem:[#allocation11_spill] sm:$0xff] %v1183_v14  ;;  %v370_v20 = vmul.f32 %v1183_v14, %v1183_v14  ;;  %v1191_v21 = vunpack.c.h.bf16 %v841_v8 }
  0x17   :  { %107 = vadd.xlane.f32.xlu0 %v88_v22  ;;  %v1193_v22 = vunpack.c.h.bf16 %v834_v7 }
  0x18   :  { %1759 = vst [vmem:[#allocation12_spill] sm:$0xff] %v1191_v21  ;;  %v372_v23 = vmul.f32 %v1191_v21, %v1191_v21 }
  0x19   :  { %1760 = vst [vmem:[#allocation13_spill] sm:$0xff] %v1193_v22 }
  0x1e   :  { %111 = vadd.xlane.f32.xlu1 %v90_v27  ;;  %383 = vadd.xlane.f32.xlu2 %v362_v28  ;;  %v100_v27 = vmul.f32 %v1193_v22, %v1193_v22 }
  0x1f   :  { %381 = vadd.xlane.f32.xlu0 %v361_v29 }
  0x26   :  { %385 = vadd.xlane.f32.xlu1 %v363_v35  ;;  %115 = vadd.xlane.f32.xlu2 %v92_v36 }
  0x27   :  { %113 = vadd.xlane.f32.xlu0 %v91_v37 }
  0x2e   :  { %117 = vadd.xlane.f32.xlu1 %v93_v43  ;;  %389 = vadd.xlane.f32.xlu2 %v365_v44 }
  0x2f   :  { %387 = vadd.xlane.f32.xlu0 %v364_v45 }
  0x36   :  { %391 = vadd.xlane.f32.xlu1 %v366_v50  ;;  %121 = vadd.xlane.f32.xlu2 %v95_v51 }
  0x37   :  { %119 = vadd.xlane.f32.xlu0 %v94_v52 }
  0x3e   :  { %123 = vadd.xlane.f32.xlu1 %v96_v57  ;;  %395 = vadd.xlane.f32.xlu2 %v368_v58 }
  0x3f   :  { %393 = vadd.xlane.f32.xlu0 %v367_v59 }
  0x46   :  { %397 = vadd.xlane.f32.xlu1 %v369_v1  ;;  %127 = vadd.xlane.f32.xlu2 %v98_v2 }
  0x47   :  { %125 = vadd.xlane.f32.xlu0 %v97_v6 }
  0x4e   :  { %129 = vadd.xlane.f32.xlu1 %v99_v15  ;;  %401 = vadd.xlane.f32.xlu2 %v371_v16 }
  0x4f   :  { %399 = vadd.xlane.f32.xlu0 %v370_v20 }
  0x56   :  { %403 = vadd.xlane.f32.xlu1 %v372_v23 }
  0x57   :  { %131 = vadd.xlane.f32.xlu0 %v100_v27 }
  0x79   :  { %v374_v28 = vpop.xlane.xlu1 %373  ;;  %v1199_v29 = vpop.xlane.xlu2 %105 }
  0x7a   :  { %847 = vrsqrt.f32 %v374_v28  ;;  %v102_v30 = vpop.xlane.xlu0 %101  ;;  %vm412_vm0 = vcmp.eq.f32.partialorder %v374_v28, inf  ;;  %vm414_vm1 = vcmp.eq.f32.partialorder %v374_v28, 0.0  ;;  %v415_v20 = vand.u32 2147483648, %v374_v28 }
  0x7b   :  { %849 = vrsqrt.f32 %v1199_v29  ;;  %vm140_vm2 = vcmp.eq.f32.partialorder %v102_v30, inf  ;;  %vm142_vm3 = vcmp.eq.f32.partialorder %v102_v30, 0.0  ;;  %vm164_vm4 = vcmp.eq.f32.partialorder %v1199_v29, inf }
  0x7c   :  { %851 = vrsqrt.f32 %v102_v30  ;;  %vm166_vm5 = vcmp.eq.f32.partialorder %v1199_v29, 0.0 }
  0x80   :  { %v848_v31 = vpop.eup %847 }
  0x81   :  { %v850_v35 = vpop.eup %849  ;;  %v406_v36 = vmul.f32 %v848_v31, %v374_v28  ;;  %v1202_v37 = vpop.xlane.xlu1 %375 }
  0x82   :  { %v1204_v38 = vpop.xlane.xlu2 %377  ;;  %v852_v39 = vpop.eup %851  ;;  %v158_v43 = vmul.f32 %v850_v35, %v1199_v29  ;;  %853 = vrsqrt.f32 %v1202_v37  ;;  %vm424_vm6 = vcmp.eq.f32.partialorder %v1202_v37, inf  ;;  %vm426_vm8 = vcmp.eq.f32.partialorder %v1202_v37, 0.0 }
  0x83   :  { %v1208_v44 = vpop.xlane.xlu0 %103  ;;  %v407_v45 = vmul.f32 %v848_v31, %v406_v36  ;;  %v134_v46 = vmul.f32 %v852_v39, %v102_v30  ;;  %855 = vrsqrt.f32 %v1204_v38  ;;  %vm436_vm7 = vcmp.eq.f32.partialorder %v1204_v38, inf }
  0x84   :  { %v159_v50 = vmul.f32 %v850_v35, %v158_v43  ;;  %857 = vrsqrt.f32 %v1208_v44  ;;  %vm438_vm9 = vcmp.eq.f32.partialorder %v1204_v38, 0.0  ;;  %vm152_vm10 = vcmp.eq.f32.partialorder %v1208_v44, inf }
  0x85   :  { %v408_v51 = vmul.f32 0.5, %v407_v45  ;;  %v135_v52 = vmul.f32 %v852_v39, %v134_v46  ;;  %vm154_vm11 = vcmp.eq.f32.partialorder %v1208_v44, 0.0 }
  0x86   :  { %v160_v59 = vmul.f32 0.5, %v159_v50  ;;  %v143_v50 = vand.u32 2147483648, %v102_v30 }
  0x87   :  { %v409_v53 = vsub.f32 1.5, %v408_v51  ;;  %v136_v57 = vmul.f32 0.5, %v135_v52 }
  0x88   :  { %v854_v58 = vpop.eup %853  ;;  %v161_v36 = vsub.f32 1.5, %v160_v59 }
  0x89   :  { %v856_v60 = vpop.eup %855  ;;  %v410_v61 = vmul.f32 %v848_v31, %v409_v53  ;;  %v137_v1 = vsub.f32 1.5, %v136_v57  ;;  %v418_v2 = vmul.f32 %v854_v58, %v1202_v37  ;;  %v1213_v6 = vpop.xlane.xlu1 %379 }
  0x8a   :  { %v430_v7 = vmul.f32 %v856_v60, %v1204_v38  ;;  %859 = vrsqrt.f32 %v1213_v6  ;;  %v1217_v8 = vpop.xlane.xlu2 %109  ;;  %v858_v15 = vpop.eup %857  ;;  %vm448_vm12 = vcmp.eq.f32.partialorder %v1213_v6, inf  ;;  %vm450_vm13 = vcmp.eq.f32.partialorder %v1213_v6, 0.0 }
  0x8b   :  { %v411_v16 = vmul.f32 %v410_v61, %v374_v28  ;;  %v138_v23 = vmul.f32 %v852_v39, %v137_v1  ;;  %v419_v27 = vmul.f32 %v854_v58, %v418_v2  ;;  %v146_v43 = vmul.f32 %v858_v15, %v1208_v44  ;;  %v1223_v13 = vpop.xlane.xlu0 %107 }
  0x8c   :  { %v431_v31 = vmul.f32 %v856_v60, %v430_v7  ;;  %861 = vrsqrt.f32 %v1217_v8  ;;  %v162_v1 = vmul.f32 %v850_v35, %v161_v36  ;;  %vm188_vm14 = vcmp.eq.f32.partialorder %v1217_v8, inf }
  0x8d   :  { %v413_v45 = vsel %vm412_vm0, %v374_v28, %v411_v16  ;;  %v139_v46 = vmul.f32 %v138_v23, %v102_v30  ;;  %v420_v52 = vmul.f32 0.5, %v419_v27  ;;  %v147_v57 = vmul.f32 %v858_v15, %v146_v43 }
  0x8e   :  { %v416_v51 = vsel %vm414_vm1, %v415_v20, %v413_v45  ;;  %v432_v53 = vmul.f32 0.5, %v431_v31  ;;  %v163_v20 = vmul.f32 %v162_v1, %v1199_v29  ;;  %vm190_vm15 = vcmp.eq.f32.partialorder %v1217_v8, 0.0 }
  0x8f   :  { %v597_v21 = vadd.f32 1e-10, %v416_v51  ;;  %v141_v61 = vsel %vm140_vm2, %v102_v30, %v139_v46  ;;  %v148_v7 = vmul.f32 0.5, %v147_v57  ;;  %v421_v23 = vsub.f32 1.5, %v420_v52 }
  0x90   :  { %v860_v39 = vpop.eup %859  ;;  %v144_v59 = vsel %vm142_vm3, %v143_v50, %v141_v61  ;;  %v433_v22 = vsub.f32 1.5, %v432_v53  ;;  %v165_v50 = vsel %vm164_vm4, %v1199_v29, %v163_v20  ;;  %vm176_vm0 = vcmp.eq.f32.partialorder %v1223_v13, inf }
  0x91   :  { %863 = vrcp.f32 %v597_v21  ;;  %v325_v2 = vadd.f32 1e-10, %v144_v59  ;;  %v442_v16 = vmul.f32 %v860_v39, %v1213_v6  ;;  %v149_v27 = vsub.f32 1.5, %v148_v7  ;;  %v1231_v36 = vpop.xlane.xlu1 %111 }
  0x92   :  { %v1225_v28 = vpop.eup %861  ;;  %v422_v30 = vmul.f32 %v854_v58, %v421_v23  ;;  %v434_v35 = vmul.f32 %v856_v60, %v433_v22  ;;  %v1240_v57 = vpop.xlane.xlu2 %383  ;;  %vm178_vm1 = vcmp.eq.f32.partialorder %v1223_v13, 0.0  ;;  %vm200_vm2 = vcmp.eq.f32.partialorder %v1231_v36, inf }
  0x93   :  { %865 = vrcp.f32 %v325_v2  ;;  %v443_v31 = vmul.f32 %v860_v39, %v442_v16  ;;  %v182_v21 = vmul.f32 %v1225_v28, %v1217_v8  ;;  %v150_v51 = vmul.f32 %v858_v15, %v149_v27  ;;  %v1252_v7 = vpop.xlane.xlu0 %381 }
  0x94   :  { %867 = vrsqrt.f32 %v1223_v13  ;;  %v423_v58 = vmul.f32 %v422_v30, %v1202_v37  ;;  %v435_v22 = vmul.f32 %v434_v35, %v1204_v38  ;;  %v427_v27 = vand.u32 2147483648, %v1202_v37 }
  0x95   :  { %v444_v52 = vmul.f32 0.5, %v443_v31  ;;  %v183_v60 = vmul.f32 %v1225_v28, %v182_v21  ;;  %869 = vrsqrt.f32 %v1231_v36  ;;  %v151_v59 = vmul.f32 %v150_v51, %v1208_v44 }
  0x96   :  { %871 = vrsqrt.f32 %v1240_v57  ;;  %v437_v16 = vsel %vm436_vm7, %v1204_v38, %v435_v22  ;;  %v439_v31 = vand.u32 2147483648, %v1204_v38  ;;  %v155_v38 = vand.u32 2147483648, %v1208_v44 }
  0x97   :  { %v864_v43 = vpop.eup %863  ;;  %v445_v2 = vsub.f32 1.5, %v444_v52  ;;  %v184_v23 = vmul.f32 0.5, %v183_v60  ;;  %873 = vrsqrt.f32 %v1252_v7  ;;  %vm202_vm3 = vcmp.eq.f32.partialorder %v1231_v36, 0.0 }
  0x98   :  { %v645_v45 = vmul.f32 %v864_v43, %v1032_v3  ;;  %v167_v3 = vand.u32 2147483648, %v1199_v29  ;;  %v425_v29 = vsel %vm424_vm6, %v1202_v37, %v423_v58  ;;  %vm472_vm4 = vcmp.eq.f32.partialorder %v1240_v57, inf }
  0x99   :  { %v866_v46 = vpop.eup %865  ;;  %v1261_v21 = vpop.xlane.xlu1 %385  ;;  %v446_v51 = vmul.f32 %v860_v39, %v445_v2  ;;  %v185_v52 = vsub.f32 1.5, %v184_v23  ;;  %vm460_vm6 = vcmp.eq.f32.partialorder %v1252_v7, inf  ;;  %vm462_vm7 = vcmp.eq.f32.partialorder %v1252_v7, 0.0 }
  0x9a   :  { %v629_v53 = vmul.f32 %v866_v46, %v1036_v5  ;;  %v868_v61 = vpop.eup %867  ;;  %v168_v15 = vsel %vm166_vm5, %v167_v3, %v165_v50  ;;  %v440_v46 = vsel %vm438_vm9, %v439_v31, %v437_v16  ;;  %v153_v50 = vsel %vm152_vm10, %v1208_v44, %v151_v59 }
  0x9b   :  { %v170_v5 = vmul.f32 %v868_v61, %v1223_v13  ;;  %v327_v30 = vadd.f32 1e-10, %v168_v15  ;;  %v870_v43 = vpop.eup %869  ;;  %v599_v15 = vadd.f32 1e-10, %v440_v46  ;;  %v156_v39 = vsel %vm154_vm11, %v155_v38, %v153_v50  ;;  %v1276_v44 = vpop.xlane.xlu0 %113 }
  0x9c   :  { %v1245_v1 = vsub.f32 %v629_v53, %v645_v45  ;;  %v428_v45 = vsel %vm426_vm8, %v427_v27, %v425_v29  ;;  %v194_v37 = vmul.f32 %v870_v43, %v1231_v36  ;;  %v872_v58 = vpop.eup %871  ;;  %v447_v2 = vmul.f32 %v446_v51, %v1213_v6 }
  0x9d   :  { %v171_v20 = vmul.f32 %v868_v61, %v170_v5  ;;  %875 = vrcp.f32 %v327_v30  ;;  %v598_v22 = vadd.f32 1e-10, %v428_v45  ;;  %v466_v3 = vmul.f32 %v872_v58, %v1240_v57  ;;  %v1269_v5 = vpop.xlane.xlu2 %115 }
  0x9e   :  { %v195_v60 = vmul.f32 %v870_v43, %v194_v37  ;;  %877 = vrsqrt.f32 %v1261_v21  ;;  %v186_v29 = vmul.f32 %v1225_v28, %v185_v52  ;;  %v326_v27 = vadd.f32 1e-10, %v156_v39 }
  0x9f   :  { %v172_v35 = vmul.f32 0.5, %v171_v20  ;;  %v467_v23 = vmul.f32 %v872_v58, %v466_v3  ;;  %879 = vrsqrt.f32 %v1269_v5  ;;  %v874_v20 = vpop.eup %873  ;;  %v449_v45 = vsel %vm448_vm12, %v1213_v6, %v447_v2 }
  0xa0   :  { %v196_v16 = vmul.f32 0.5, %v195_v60  ;;  %881 = vrcp.f32 %v598_v22  ;;  %v454_v30 = vmul.f32 %v874_v20, %v1252_v7  ;;  %v187_v46 = vmul.f32 %v186_v29, %v1217_v8 }
  0xa1   :  { %v173_v53 = vsub.f32 1.5, %v172_v35  ;;  %v468_v31 = vmul.f32 0.5, %v467_v23  ;;  %883 = vrcp.f32 %v599_v15  ;;  %v1285_v51 = vpop.xlane.xlu1 %117  ;;  %v179_v38 = vand.u32 2147483648, %v1223_v13 }
  0xa2   :  { %v197_v50 = vsub.f32 1.5, %v196_v16  ;;  %v455_v37 = vmul.f32 %v874_v20, %v454_v30  ;;  %885 = vrsqrt.f32 %v1276_v44  ;;  %vm474_vm5 = vcmp.eq.f32.partialorder %v1240_v57, 0.0 }
  0xa3   :  { %v174_v59 = vmul.f32 %v868_v61, %v173_v53  ;;  %v451_v61 = vand.u32 2147483648, %v1213_v6  ;;  %v876_v35 = vpop.eup %875  ;;  %v469_v53 = vsub.f32 1.5, %v468_v31  ;;  %887 = vrcp.f32 %v326_v27 }
  0xa4   :  { %v1287_v52 = vpop.eup %877  ;;  %v456_v39 = vmul.f32 0.5, %v455_v37  ;;  %889 = vrsqrt.f32 %v1285_v51  ;;  %v198_v2 = vmul.f32 %v870_v43, %v197_v50  ;;  %v191_v27 = vand.u32 2147483648, %v1217_v8 }
  0xa5   :  { %v175_v28 = vmul.f32 %v174_v59, %v1223_v13  ;;  %v478_v22 = vmul.f32 %v1287_v52, %v1261_v21  ;;  %v1295_v60 = vpop.eup %879  ;;  %v452_v3 = vsel %vm450_vm13, %v451_v61, %v449_v45  ;;  %v189_v59 = vsel %vm188_vm14, %v1217_v8, %v187_v46  ;;  %v1309_v31 = vpop.xlane.xlu2 %389 }
  0xa6   :  { %v218_v16 = vmul.f32 %v1295_v60, %v1269_v5  ;;  %v882_v23 = vpop.eup %881  ;;  %v470_v6 = vmul.f32 %v872_v58, %v469_v53  ;;  %v457_v61 = vsub.f32 1.5, %v456_v39  ;;  %v631_v30 = vmul.f32 %v876_v35, %v1034_v4  ;;  %v1320_v58 = vpop.xlane.xlu0 %387 }
  0xa7   :  { %v177_v15 = vsel %vm176_vm0, %v1223_v13, %v175_v28  ;;  %v479_v29 = vmul.f32 %v1287_v52, %v478_v22  ;;  %v884_v28 = vpop.eup %883  ;;  %v600_v50 = vadd.f32 1e-10, %v452_v3  ;;  %v192_v37 = vsel %vm190_vm15, %v191_v27, %v189_v59  ;;  %v1332_v59 = vld [vmem:[%s1743_s2] ss:$0 sm:$0xff] }
  0xa8   :  { %v180_v45 = vsel %vm178_vm1, %v179_v38, %v177_v15  ;;  %v219_v43 = vmul.f32 %v1295_v60, %v218_v16  ;;  %v1314_v46 = vpop.eup %885  ;;  %v203_v13 = vand.u32 2147483648, %v1231_v36  ;;  %v199_v4 = vmul.f32 %v198_v2, %v1231_v36 }
  0xa9   :  { %v888_v53 = vpop.eup %887  ;;  %v458_v35 = vmul.f32 %v874_v20, %v457_v61  ;;  %v480_v38 = vmul.f32 0.5, %v479_v29  ;;  %891 = vrsqrt.f32 %v1309_v31  ;;  %v328_v15 = vadd.f32 1e-10, %v180_v45  ;;  %v1339_v29 = vpop.xlane.xlu1 %391 }
  0xaa   :  { %v1324_v22 = vpop.eup %889  ;;  %v471_v3 = vmul.f32 %v470_v6, %v1240_v57  ;;  %v220_v8 = vmul.f32 0.5, %v219_v43  ;;  %v206_v39 = vmul.f32 %v1314_v46, %v1276_v44  ;;  %v677_v20 = vmul.f32 %v1245_v1, %v1245_v1 }
  0xab   :  { %v647_v2 = vmul.f32 %v884_v28, %v1049_v11  ;;  %v646_v16 = vmul.f32 %v882_v23, %v1047_v10  ;;  %v630_v27 = vmul.f32 %v888_v53, %v1051_v12  ;;  %v329_v6 = vadd.f32 1e-10, %v192_v37 }
  0xac   :  { %v230_v61 = vmul.f32 %v1324_v22, %v1285_v51  ;;  %893 = vrcp.f32 %v600_v50  ;;  %v201_v1 = vsel %vm200_vm2, %v1231_v36, %v199_v4  ;;  %v459_v11 = vmul.f32 %v458_v35, %v1252_v7 }
  0xad   :  { %v481_v28 = vsub.f32 1.5, %v480_v38  ;;  %895 = vrcp.f32 %v328_v15  ;;  %v473_v45 = vsel %vm472_vm4, %v1240_v57, %v471_v3  ;;  %v221_v43 = vsub.f32 1.5, %v220_v8  ;;  %v1366_v8 = vpop.xlane.xlu2 %121 }
  0xae   :  { %v207_v10 = vmul.f32 %v1314_v46, %v206_v39  ;;  %v1354_v12 = vmul.f32 %v1332_v59, %v677_v20  ;;  %v663_v37 = vsub.f32 %v631_v30, %v647_v2  ;;  %v475_v50 = vand.u32 2147483648, %v1240_v57 }
  0xaf   :  { %v1351_v23 = vpop.eup %891  ;;  %v662_v53 = vsub.f32 %v630_v27, %v646_v16  ;;  %897 = vrcp.f32 %v329_v6  ;;  %v204_v4 = vsel %vm202_vm3, %v203_v13, %v201_v1  ;;  %v231_v35 = vmul.f32 %v1324_v22, %v230_v61  ;;  %v1372_v13 = vpop.xlane.xlu0 %119 }
  0xb0   :  { %v476_v38 = vsel %vm474_vm5, %v475_v50, %v473_v45  ;;  %v461_v15 = vsel %vm460_vm6, %v1252_v7, %v459_v11  ;;  %v463_v3 = vand.u32 2147483648, %v1252_v7  ;;  %v482_v30 = vmul.f32 %v1287_v52, %v481_v28 }
  0xb1   :  { %v222_v39 = vmul.f32 %v1295_v60, %v221_v43  ;;  %v208_v20 = vmul.f32 0.5, %v207_v10  ;;  %v502_v36 = vmul.f32 %v1351_v23, %v1309_v31  ;;  %899 = vrsqrt.f32 %v1320_v58  ;;  %v1382_v28 = vpop.xlane.xlu1 %123 }
  0xb2   :  { %v894_v57 = vpop.eup %893  ;;  %v1374_v2 = vmul.f32 %v663_v37, %v663_v37  ;;  %v330_v16 = vadd.f32 1e-10, %v204_v4  ;;  %vm484_vm8 = vcmp.eq.f32.partialorder %v1261_v21, inf  ;;  %v678_v27 = vmul.f32 %v662_v53, %v662_v53 }
  0xb3   :  { %v896_v52 = vpop.eup %895  ;;  %v464_v6 = vsel %vm462_vm7, %v463_v3, %v461_v15  ;;  %vm486_vm9 = vcmp.eq.f32.partialorder %v1261_v21, 0.0  ;;  %v232_v60 = vmul.f32 0.5, %v231_v35  ;;  %v602_v61 = vadd.f32 1e-10, %v476_v38 }
  0xb4   :  { %v483_v1 = vmul.f32 %v482_v30, %v1261_v21  ;;  %v487_v11 = vand.u32 2147483648, %v1261_v21  ;;  %vm224_vm10 = vcmp.eq.f32.partialorder %v1269_v5, inf  ;;  %v223_v7 = vmul.f32 %v222_v39, %v1269_v5 }
  0xb5   :  { %v898_v45 = vpop.eup %897  ;;  %v209_v43 = vsub.f32 1.5, %v208_v20  ;;  %v503_v10 = vmul.f32 %v1351_v23, %v502_v36  ;;  %901 = vrsqrt.f32 %v1339_v29  ;;  %v648_v37 = vmul.f32 %v894_v57, %v1062_v17  ;;  %v1411_v57 = vpop.xlane.xlu2 %395 }
  0xb6   :  { %v632_v50 = vmul.f32 %v896_v52, %v1066_v19  ;;  %903 = vrcp.f32 %v330_v16  ;;  %v601_v53 = vadd.f32 1e-10, %v464_v6  ;;  %v1392_v35 = vmul.f32 %v1332_v59, %v678_v27 }
  0xb7   :  { %v1389_v4 = vpop.eup %899  ;;  %vm226_vm11 = vcmp.eq.f32.partialorder %v1269_v5, 0.0  ;;  %v233_v38 = vsub.f32 1.5, %v232_v60  ;;  %905 = vrsqrt.f32 %v1366_v8  ;;  %v1397_v15 = vmul.f32 %v898_v45, %v1064_v18 }
  0xb8   :  { %907 = vrcp.f32 %v602_v61  ;;  %v227_v17 = vand.u32 2147483648, %v1269_v5  ;;  %v490_v19 = vmul.f32 %v1389_v4, %v1320_v58  ;;  %v485_v3 = vsel %vm484_vm8, %v1261_v21, %v483_v1 }
  0xb9   :  { %v225_v30 = vsel %vm224_vm10, %v1269_v5, %v223_v7  ;;  %v210_v39 = vmul.f32 %v1314_v46, %v209_v43  ;;  %v504_v20 = vmul.f32 0.5, %v503_v10  ;;  %v664_v36 = vsub.f32 %v632_v50, %v648_v37  ;;  %v1420_v46 = vpop.xlane.xlu0 %393  ;;  %v1440_v50 = vpop.xlane.xlu1 %397 }
  0xba   :  { %909 = vrcp.f32 %v601_v53  ;;  %vm212_vm12 = vcmp.eq.f32.partialorder %v1276_v44, inf  ;;  %v491_v18 = vmul.f32 %v1389_v4, %v490_v19  ;;  %vm214_vm13 = vcmp.eq.f32.partialorder %v1276_v44, 0.0 }
  0xbb   :  { %v1413_v16 = vpop.eup %901  ;;  %v215_v52 = vand.u32 2147483648, %v1276_v44  ;;  %v234_v27 = vmul.f32 %v1324_v22, %v233_v38  ;;  %vm236_vm14 = vcmp.eq.f32.partialorder %v1285_v51, inf  ;;  %911 = vrsqrt.f32 %v1372_v13 }
  0xbc   :  { %v904_v6 = vpop.eup %903  ;;  %v488_v60 = vsel %vm486_vm9, %v487_v11, %v485_v3  ;;  %v228_v61 = vsel %vm226_vm11, %v227_v17, %v225_v30  ;;  %v514_v1 = vmul.f32 %v1413_v16, %v1339_v29  ;;  %913 = vrsqrt.f32 %v1382_v28 }
  0xbd   :  { %v1429_v45 = vpop.eup %905  ;;  %v211_v22 = vmul.f32 %v210_v39, %v1276_v44  ;;  %vm238_vm15 = vcmp.eq.f32.partialorder %v1285_v51, 0.0  ;;  %v505_v7 = vsub.f32 1.5, %v504_v20  ;;  %v492_v43 = vmul.f32 0.5, %v491_v18 }
  0xbe   :  { %915 = vrsqrt.f32 %v1411_v57  ;;  %v908_v21 = vpop.eup %907  ;;  %v1434_v11 = vmul.f32 %v664_v36, %v664_v36  ;;  %v239_v5 = vand.u32 2147483648, %v1285_v51  ;;  %v515_v10 = vmul.f32 %v1413_v16, %v514_v1 }
  0xbf   :  { %v254_v37 = vmul.f32 %v1429_v45, %v1366_v8  ;;  %v603_v53 = vadd.f32 1e-10, %v488_v60  ;;  %v235_v38 = vmul.f32 %v234_v27, %v1285_v51  ;;  %917 = vrsqrt.f32 %v1420_v46 }
  0xc0   :  { %v910_v19 = vpop.eup %909  ;;  %v1446_v3 = vmul.f32 %v904_v6, %v1077_v24  ;;  %v332_v30 = vadd.f32 1e-10, %v228_v61  ;;  %vm508_vm0 = vcmp.eq.f32.partialorder %v1309_v31, inf  ;;  %v516_v39 = vmul.f32 0.5, %v515_v10 }
  0xc1   :  { %v255_v20 = vmul.f32 %v1429_v45, %v254_v37  ;;  %v912_v36 = vpop.eup %911  ;;  %v213_v18 = vsel %vm212_vm12, %v1276_v44, %v211_v22  ;;  %v506_v27 = vmul.f32 %v1351_v23, %v505_v7  ;;  %v493_v60 = vsub.f32 1.5, %v492_v43 }
  0xc2   :  { %919 = vrsqrt.f32 %v1440_v50  ;;  %v1455_v1 = vpop.eup %913  ;;  %v1458_v24 = vmul.f32 %v908_v21, %v1079_v25  ;;  %v517_v6 = vsub.f32 1.5, %v516_v39  ;;  %v242_v10 = vmul.f32 %v912_v36, %v1372_v13 }
  0xc3   :  { %v256_v61 = vmul.f32 0.5, %v255_v20  ;;  %921 = vrcp.f32 %v603_v53  ;;  %v237_v22 = vsel %vm236_vm14, %v1285_v51, %v235_v38  ;;  %vm510_vm1 = vcmp.eq.f32.partialorder %v1309_v31, 0.0  ;;  %v1474_v53 = vpop.xlane.xlu2 %127 }
  0xc4   :  { %v1461_v37 = vpop.eup %915  ;;  %v266_v7 = vmul.f32 %v1455_v1, %v1382_v28  ;;  %v649_v25 = vmul.f32 %v910_v19, %v1081_v26  ;;  %923 = vrcp.f32 %v332_v30  ;;  %v216_v43 = vsel %vm214_vm13, %v215_v52, %v213_v18  ;;  %v1483_v19 = vpop.xlane.xlu0 %125 }
  0xc5   :  { %vm496_vm2 = vcmp.eq.f32.partialorder %v1320_v58, inf  ;;  %v243_v21 = vmul.f32 %v912_v36, %v242_v10  ;;  %v1476_v39 = vpop.eup %917  ;;  %v507_v38 = vmul.f32 %v506_v27, %v1309_v31  ;;  %v494_v20 = vmul.f32 %v1389_v4, %v493_v60 }
  0xc6   :  { %v267_v23 = vmul.f32 %v1455_v1, %v266_v7  ;;  %v538_v26 = vmul.f32 %v1461_v37, %v1411_v57  ;;  %v240_v44 = vsel %vm238_vm15, %v239_v5, %v237_v22  ;;  %v518_v52 = vmul.f32 %v1413_v16, %v517_v6 }
  0xc7   :  { %v257_v30 = vsub.f32 1.5, %v256_v61  ;;  %v244_v18 = vmul.f32 0.5, %v243_v21  ;;  %vm498_vm3 = vcmp.eq.f32.partialorder %v1320_v58, 0.0  ;;  %v526_v60 = vmul.f32 %v1476_v39, %v1420_v46 }
  0xc8   :  { %v1488_v10 = vpop.eup %919  ;;  %v268_v27 = vmul.f32 0.5, %v267_v23  ;;  %v539_v4 = vmul.f32 %v1461_v37, %v538_v26  ;;  %925 = vrsqrt.f32 %v1474_v53  ;;  %v331_v7 = vadd.f32 1e-10, %v216_v43 }
  0xc9   :  { %vm520_vm4 = vcmp.eq.f32.partialorder %v1339_v29, inf  ;;  %v523_v51 = vand.u32 2147483648, %v1339_v29  ;;  %v245_v16 = vsub.f32 1.5, %v244_v18  ;;  %v922_v5 = vpop.eup %921  ;;  %v509_v6 = vsel %vm508_vm0, %v1309_v31, %v507_v38 }
  0xca   :  { %v495_v61 = vmul.f32 %v494_v20, %v1320_v58  ;;  %vm522_vm5 = vcmp.eq.f32.partialorder %v1339_v29, 0.0  ;;  %v540_v22 = vmul.f32 0.5, %v539_v4  ;;  %v527_v23 = vmul.f32 %v1476_v39, %v526_v60  ;;  %v1503_v21 = vpop.eup %923 }
  0xcb   :  { %v333_v43 = vadd.f32 1e-10, %v240_v44  ;;  %vm260_vm6 = vcmp.eq.f32.partialorder %v1366_v8, inf  ;;  %v269_v26 = vsub.f32 1.5, %v268_v27  ;;  %v550_v18 = vmul.f32 %v1488_v10, %v1440_v50 }
  0xcc   :  { %v1509_v17 = vsub.f32 %v1397_v15, %v649_v25  ;;  %v519_v38 = vmul.f32 %v518_v52, %v1339_v29  ;;  %v258_v20 = vmul.f32 %v1429_v45, %v257_v30  ;;  %v541_v9 = vsub.f32 1.5, %v540_v22 }
  0xcd   :  { %v1514_v4 = vmul.f32 %v922_v5, %v1095_v32  ;;  %v1761_v60 = vand.u32 2147483648, %v1309_v31  ;;  %v246_v27 = vmul.f32 %v912_v36, %v245_v16  ;;  %v528_v63 = vmul.f32 0.5, %v527_v23  ;;  %v1530_v36 = vpop.xlane.xlu1 %129  ;;  %v1537_v16 = vpop.xlane.xlu0 %399 }
  0xce   :  { %v1520_v14 = vpop.eup %925  ;;  %927 = vrcp.f32 %v331_v7  ;;  %v497_v15 = vsel %vm496_vm2, %v1320_v58, %v495_v61  ;;  %vm262_vm7 = vcmp.eq.f32.partialorder %v1366_v8, 0.0  ;;  %v263_v45 = vand.u32 2147483648, %v1366_v8 }
  0xcf   :  { %v512_v44 = vsel %vm510_vm1, %v1761_v60, %v509_v6  ;;  %929 = vrcp.f32 %v333_v43  ;;  %vm248_vm8 = vcmp.eq.f32.partialorder %v1372_v13, inf  ;;  %v270_v32 = vmul.f32 %v1455_v1, %v269_v26 }
  0xd0   :  { %v551_v31 = vmul.f32 %v1488_v10, %v550_v18  ;;  %v605_v25 = vadd.f32 1e-10, %v512_v44  ;;  %v521_v52 = vsel %vm520_vm4, %v1339_v29, %v519_v38  ;;  %v259_v30 = vmul.f32 %v258_v20, %v1366_v8 }
  0xd1   :  { %v542_v7 = vmul.f32 %v1461_v37, %v541_v9  ;;  %v1762_v5 = vand.u32 2147483648, %v1320_v58  ;;  %v247_v6 = vmul.f32 %v246_v27, %v1372_v13  ;;  %v529_v61 = vsub.f32 1.5, %v528_v63 }
  0xd2   :  { %v290_v22 = vmul.f32 %v1520_v14, %v1474_v53  ;;  %vm250_vm9 = vcmp.eq.f32.partialorder %v1372_v13, 0.0  ;;  %v251_v23 = vand.u32 2147483648, %v1372_v13  ;;  %vm272_vm10 = vcmp.eq.f32.partialorder %v1382_v28, inf }
  0xd3   :  { %v500_v1 = vsel %vm498_vm3, %v1762_v5, %v497_v15  ;;  %vm274_vm11 = vcmp.eq.f32.partialorder %v1382_v28, 0.0  ;;  %v524_v9 = vsel %vm522_vm5, %v523_v51, %v521_v52  ;;  %v271_v58 = vmul.f32 %v270_v32, %v1382_v28  ;;  %v1569_v15 = vpop.xlane.xlu2 %401 }
  0xd4   :  { %v275_v37 = vand.u32 2147483648, %v1382_v28  ;;  %v552_v43 = vmul.f32 0.5, %v551_v31  ;;  %v928_v63 = vpop.eup %927  ;;  %931 = vrcp.f32 %v605_v25  ;;  %v604_v26 = vadd.f32 1e-10, %v500_v1 }
  0xd5   :  { %v261_v18 = vsel %vm260_vm6, %v1366_v8, %v259_v30  ;;  %v543_v38 = vmul.f32 %v542_v7, %v1411_v57  ;;  %v1558_v20 = vpop.eup %929  ;;  %v249_v29 = vsel %vm248_vm8, %v1372_v13, %v247_v6  ;;  %v530_v51 = vmul.f32 %v1476_v39, %v529_v61  ;;  %v1594_v13 = vpop.xlane.xlu0 %131 }
  0xd6   :  { %v291_v60 = vmul.f32 %v1520_v14, %v290_v22  ;;  %933 = vrsqrt.f32 %v1483_v19  ;;  %v606_v44 = vadd.f32 1e-10, %v524_v9  ;;  %vm544_vm12 = vcmp.eq.f32.partialorder %v1411_v57, inf }
  0xd7   :  { %vm546_vm13 = vcmp.eq.f32.partialorder %v1411_v57, 0.0  ;;  %v547_v27 = vand.u32 2147483648, %v1411_v57  ;;  %v264_v32 = vsel %vm262_vm7, %v263_v45, %v261_v18  ;;  %v273_v39 = vsel %vm272_vm10, %v1382_v28, %v271_v58  ;;  %v1586_v45 = vpop.xlane.xlu1 %403 }
  0xd8   :  { %v553_v31 = vsub.f32 1.5, %v552_v43  ;;  %935 = vrsqrt.f32 %v1530_v36  ;;  %v1578_v25 = vmul.f32 %v928_v63, %v1099_v34  ;;  %v252_v52 = vsel %vm250_vm9, %v251_v23, %v249_v29 }
  0xd9   :  { %937 = vrcp.f32 %v604_v26  ;;  %v545_v30 = vsel %vm544_vm12, %v1411_v57, %v543_v38  ;;  %v531_v7 = vmul.f32 %v530_v51, %v1420_v46  ;;  %vm532_vm14 = vcmp.eq.f32.partialorder %v1420_v46, inf }
  0xda   :  { %v292_v8 = vmul.f32 0.5, %v291_v60  ;;  %939 = vrsqrt.f32 %v1569_v15  ;;  %v1588_v5 = vpop.eup %931  ;;  %v335_v1 = vadd.f32 1e-10, %v264_v32  ;;  %v276_v34 = vsel %vm274_vm11, %v275_v37, %v273_v39 }
  0xdb   :  { %vm534_vm15 = vcmp.eq.f32.partialorder %v1420_v46, 0.0  ;;  %941 = vrsqrt.f32 %v1537_v16  ;;  %v334_v61 = vadd.f32 1e-10, %v252_v52  ;;  %v548_v22 = vsel %vm546_vm13, %v547_v27, %v545_v30 }
  0xdc   :  { %v934_v6 = vpop.eup %933  ;;  %943 = vrcp.f32 %v606_v44  ;;  %v554_v23 = vmul.f32 %v1488_v10, %v553_v31  ;;  %v535_v9 = vand.u32 2147483648, %v1420_v46  ;;  %vm556_vm0 = vcmp.eq.f32.partialorder %v1440_v50, inf }
  0xdd   :  { %v278_v28 = vmul.f32 %v934_v6, %v1483_v19  ;;  %945 = vrsqrt.f32 %v1586_v45  ;;  %v336_v37 = vadd.f32 1e-10, %v276_v34  ;;  %v533_v43 = vsel %vm532_vm14, %v1420_v46, %v531_v7 }
  0xde   :  { %v936_v58 = vpop.eup %935  ;;  %v293_v63 = vsub.f32 1.5, %v292_v8  ;;  %947 = vrsqrt.f32 %v1594_v13  ;;  %v608_v10 = vadd.f32 1e-10, %v548_v22  ;;  %v555_v29 = vmul.f32 %v554_v23, %v1440_v50 }
  0xdf   :  { %v1607_v57 = vpop.eup %937  ;;  %949 = vrcp.f32 %v335_v1  ;;  %v279_v26 = vmul.f32 %v934_v6, %v278_v28  ;;  %v302_v18 = vmul.f32 %v936_v58, %v1530_v36  ;;  %vm558_vm1 = vcmp.eq.f32.partialorder %v1440_v50, 0.0 }
  0xe0   :  { %v940_v38 = vpop.eup %939  ;;  %951 = vrcp.f32 %v334_v61  ;;  %v559_v51 = vand.u32 2147483648, %v1440_v50  ;;  %v536_v44 = vsel %vm534_vm15, %v535_v9, %v533_v43  ;;  %vm296_vm2 = vcmp.eq.f32.partialorder %v1474_v53, inf }
  0xe1   :  { %v942_v60 = vpop.eup %941  ;;  %v280_v27 = vmul.f32 0.5, %v279_v26  ;;  %v303_v32 = vmul.f32 %v936_v58, %v302_v18  ;;  %v574_v39 = vmul.f32 %v940_v38, %v1569_v15  ;;  %953 = vrcp.f32 %v336_v37 }
  0xe2   :  { %v1617_v31 = vpop.eup %943  ;;  %v294_v52 = vmul.f32 %v1520_v14, %v293_v63  ;;  %v299_v30 = vand.u32 2147483648, %v1474_v53  ;;  %v562_v7 = vmul.f32 %v942_v60, %v1537_v16  ;;  %955 = vrcp.f32 %v608_v10 }
  0xe3   :  { %v946_v8 = vpop.eup %945  ;;  %v281_v1 = vsub.f32 1.5, %v280_v27  ;;  %vm284_vm3 = vcmp.eq.f32.partialorder %v1483_v19, inf  ;;  %v304_v46 = vmul.f32 0.5, %v303_v32  ;;  %v575_v34 = vmul.f32 %v940_v38, %v574_v39 }
  0xe4   :  { %v948_v61 = vpop.eup %947  ;;  %v607_v22 = vadd.f32 1e-10, %v536_v44  ;;  %v557_v23 = vsel %vm556_vm0, %v1440_v50, %v555_v29  ;;  %vm298_vm4 = vcmp.eq.f32.partialorder %v1474_v53, 0.0  ;;  %v563_v14 = vmul.f32 %v942_v60, %v562_v7 }
  0xe5   :  { %v586_v9 = vmul.f32 %v946_v8, %v1586_v45  ;;  %v1628_v28 = vpop.eup %949  ;;  %v282_v37 = vmul.f32 %v934_v6, %v281_v1  ;;  %v305_v43 = vsub.f32 1.5, %v304_v46  ;;  %v576_v63 = vmul.f32 0.5, %v575_v34 }
  0xe6   :  { %v314_v10 = vmul.f32 %v948_v61, %v1594_v13  ;;  %v1631_v26 = vpop.eup %951  ;;  %v295_v18 = vmul.f32 %v294_v52, %v1474_v53  ;;  %vm286_vm5 = vcmp.eq.f32.partialorder %v1483_v19, 0.0  ;;  %v564_v44 = vmul.f32 0.5, %v563_v14 }
  0xe7   :  { %v587_v29 = vmul.f32 %v946_v8, %v586_v9  ;;  %v287_v27 = vand.u32 2147483648, %v1483_v19  ;;  %v306_v32 = vmul.f32 %v936_v58, %v305_v43  ;;  %v577_v39 = vsub.f32 1.5, %v576_v63  ;;  %v1636_v0 = vpop.eup %953 }
  0xe8   :  { %v315_v7 = vmul.f32 %v948_v61, %v314_v10  ;;  %v560_v6 = vsel %vm558_vm1, %v559_v51, %v557_v23  ;;  %v283_v1 = vmul.f32 %v282_v37, %v1483_v19  ;;  %v565_v46 = vsub.f32 1.5, %v564_v44  ;;  %v1641_v62 = vpop.eup %955 }
  0xe9   :  { %v588_v34 = vmul.f32 0.5, %v587_v29  ;;  %957 = vrcp.f32 %v607_v22  ;;  %vm308_vm6 = vcmp.eq.f32.partialorder %v1530_v36, inf  ;;  %v578_v52 = vmul.f32 %v940_v38, %v577_v39 }
  0xea   :  { %v316_v14 = vmul.f32 0.5, %v315_v7  ;;  %v297_v58 = vsel %vm296_vm2, %v1474_v53, %v295_v18  ;;  %vm310_vm7 = vcmp.eq.f32.partialorder %v1530_v36, 0.0  ;;  %v566_v9 = vmul.f32 %v942_v60, %v565_v46 }
  0xeb   :  { %v589_v50 = vsub.f32 1.5, %v588_v34  ;;  %v609_v51 = vadd.f32 1e-10, %v560_v6  ;;  %v307_v23 = vmul.f32 %v306_v32, %v1530_v36  ;;  %v311_v37 = vand.u32 2147483648, %v1530_v36 }
  0xec   :  { %v317_v43 = vsub.f32 1.5, %v316_v14  ;;  %v285_v22 = vsel %vm284_vm3, %v1483_v19, %v283_v1  ;;  %v579_v38 = vmul.f32 %v578_v52, %v1569_v15  ;;  %v567_v63 = vmul.f32 %v566_v9, %v1537_v16 }
  0xed   :  { %v590_v10 = vmul.f32 %v946_v8, %v589_v50  ;;  %v300_v18 = vsel %vm298_vm4, %v299_v30, %v297_v58  ;;  %vm580_vm8 = vcmp.eq.f32.partialorder %v1569_v15, inf  ;;  %vm568_vm9 = vcmp.eq.f32.partialorder %v1537_v16, inf }
  0xee   :  { %v318_v60 = vmul.f32 %v948_v61, %v317_v43  ;;  %vm582_vm10 = vcmp.eq.f32.partialorder %v1569_v15, 0.0  ;;  %v583_v44 = vand.u32 2147483648, %v1569_v15  ;;  %v569_v29 = vsel %vm568_vm9, %v1537_v16, %v567_v63 }
  0xef   :  { %v591_v32 = vmul.f32 %v590_v10, %v1586_v45  ;;  %v958_v39 = vpop.eup %957  ;;  %v288_v8 = vsel %vm286_vm5, %v287_v27, %v285_v22  ;;  %v309_v53 = vsel %vm308_vm6, %v1530_v36, %v307_v23  ;;  %v571_v30 = vand.u32 2147483648, %v1537_v16  ;;  %v1763_v10 = vld [vmem:[#allocation6_spill] sm:$0xff] }
  0xf0   :  { %v319_v61 = vmul.f32 %v318_v60, %v1594_v13  ;;  %v338_v7 = vadd.f32 1e-10, %v300_v18  ;;  %v581_v6 = vsel %vm580_vm8, %v1569_v15, %v579_v38  ;;  %vm570_vm11 = vcmp.eq.f32.partialorder %v1537_v16, 0.0 }
  0xf1   :  { %vm592_vm12 = vcmp.eq.f32.partialorder %v1586_v45, inf  ;;  %959 = vrcp.f32 %v609_v51  ;;  %v572_v1 = vsel %vm570_vm11, %v571_v30, %v569_v29  ;;  %vm320_vm13 = vcmp.eq.f32.partialorder %v1594_v13, inf  ;;  %v1764_v29 = vld [vmem:[#allocation8_spill] sm:$0xff] }
  0xf2   :  { %v593_v19 = vsel %vm592_vm12, %v1586_v45, %v591_v32  ;;  %v337_v27 = vadd.f32 1e-10, %v288_v8  ;;  %v595_v46 = vand.u32 2147483648, %v1586_v45  ;;  %v321_v34 = vsel %vm320_vm13, %v1594_v13, %v319_v61 }
  0xf3   :  { %v312_v52 = vsel %vm310_vm7, %v311_v37, %v309_v53  ;;  %vm594_vm14 = vcmp.eq.f32.partialorder %v1586_v45, 0.0  ;;  %vm322_vm15 = vcmp.eq.f32.partialorder %v1594_v13, 0.0  ;;  %v323_v16 = vand.u32 2147483648, %v1594_v13 }
  0xf4   :  { %v584_v14 = vsel %vm582_vm10, %v583_v44, %v581_v6  ;;  %961 = vrcp.f32 %v338_v7  ;;  %v610_v58 = vadd.f32 1e-10, %v572_v1  ;;  %v596_v9 = vsel %vm594_vm14, %v595_v46, %v593_v19  ;;  %v1765_v7 = vld [vmem:[#allocation11_spill] sm:$0xff] }
  0xf5   :  { %v652_v50 = vmul.f32 %v1607_v57, %v1117_v42  ;;  %v324_v51 = vsel %vm322_vm15, %v323_v16, %v321_v34  ;;  %v339_v23 = vadd.f32 1e-10, %v312_v52  ;;  %v636_v36 = vmul.f32 %v1503_v21, %v1097_v33  ;;  %v1766_v6 = vld [vmem:[#allocation7_spill] sm:$0xff]  ;;  %v1767_v52 = vld [vmem:[#allocation9_spill] sm:$0xff] }
  0xf6   :  { %v637_v45 = vmul.f32 %v1558_v20, %v1113_v40  ;;  %963 = vrcp.f32 %v337_v27  ;;  %v611_v37 = vadd.f32 1e-10, %v584_v14  ;;  %v638_v15 = vmul.f32 %v1631_v26, %v1132_v49  ;;  %v1768_v14 = vld [vmem:[#allocation10_spill] sm:$0xff] }
  0xf7   :  { %v666_v13 = vsub.f32 %v1446_v3, %v1458_v24  ;;  %v960_v43 = vpop.eup %959  ;;  %v612_v22 = vadd.f32 1e-10, %v596_v9  ;;  %v653_v42 = vmul.f32 %v1588_v5, %v1115_v41  ;;  %v667_v57 = vsub.f32 %v1578_v25, %v1514_v4 }
  0xf8   :  { %v681_v33 = vmul.f32 %v1509_v17, %v1509_v17  ;;  %965 = vrcp.f32 %v610_v58  ;;  %v340_v40 = vadd.f32 1e-10, %v324_v51  ;;  %v654_v21 = vmul.f32 %v1617_v31, %v1128_v47  ;;  %v1769_v51 = vld [vmem:[#allocation13_spill] sm:$0xff] }
  0xf9   :  { %v668_v49 = vsub.f32 %v636_v36, %v652_v50  ;;  %967 = vrcp.f32 %v339_v23  ;;  %v700_v3 = vmul.f32 %v1332_v59, %v1374_v2  ;;  %v701_v24 = vmul.f32 %v1332_v59, %v1434_v11  ;;  %v1770_v36 = vld [vmem:[#allocation12_spill] sm:$0xff] }
  0xfa   :  { %v714_v41 = vadd.f32 %v1392_v35, %v1354_v12  ;;  %v962_v4 = vpop.eup %961  ;;  %969 = vrcp.f32 %v611_v37  ;;  %v655_v17 = vmul.f32 %v958_v39, %v1147_v56  ;;  %v682_v20 = vmul.f32 %v666_v13, %v666_v13 }
  0xfb   :  { %971 = vrcp.f32 %v612_v22  ;;  %v683_v25 = vmul.f32 %v667_v57, %v667_v57  ;;  %v702_v47 = vmul.f32 %v1332_v59, %v681_v33  ;;  %v639_v2 = vmul.f32 %v1628_v28, %v1130_v48 }
  0xfc   :  { %v715_v5 = vadd.f32 %v714_v41, %v700_v3  ;;  %v964_v31 = vpop.eup %963  ;;  %973 = vrcp.f32 %v340_v40  ;;  %v669_v26 = vsub.f32 %v637_v45, %v653_v42  ;;  %v670_v11 = vsub.f32 %v638_v15, %v654_v21 }
  0xfd   :  { %v684_v38 = vmul.f32 %v668_v49, %v668_v49  ;;  %v640_v35 = vmul.f32 %v1636_v0, %v1143_v54  ;;  %v656_v56 = vmul.f32 %v1641_v62, %v1145_v55  ;;  %v657_v18 = vmul.f32 %v960_v43, %v1763_v10 }
  0xfe   :  { %v716_v63 = vadd.f32 %v715_v5, %v701_v24  ;;  %v966_v12 = vpop.eup %965  ;;  %v671_v60 = vsub.f32 %v639_v2, %v655_v17  ;;  %v641_v32 = vmul.f32 %v964_v31, %v1764_v29  ;;  %v703_v39 = vmul.f32 %v1332_v59, %v682_v20 }
  0xff   :  { %v968_v44 = vpop.eup %967  ;;  %v704_v48 = vmul.f32 %v1332_v59, %v683_v25  ;;  %v685_v53 = vmul.f32 %v669_v26, %v669_v26  ;;  %v686_v30 = vmul.f32 %v670_v11, %v670_v11  ;;  %v658_v54 = vmul.f32 %v966_v12, %v1765_v7 }
 0x100   :  { %v717_v28 = vadd.f32 %v716_v63, %v702_v47  ;;  %v970_v8 = vpop.eup %969  ;;  %v705_v0 = vmul.f32 %v1332_v59, %v684_v38  ;;  %v642_v1 = vmul.f32 %v962_v4, %v1766_v6  ;;  %v672_v19 = vsub.f32 %v640_v35, %v656_v56 }
 0x101   :  { %v972_v61 = vpop.eup %971  ;;  %v673_v27 = vsub.f32 %v641_v32, %v657_v18  ;;  %v687_v46 = vmul.f32 %v671_v60, %v671_v60  ;;  %v643_v16 = vmul.f32 %v968_v44, %v1767_v52  ;;  %v659_v58 = vmul.f32 %v970_v8, %v1768_v14 }
 0x102   :  { %v718_v55 = vadd.f32 %v717_v28, %v703_v39  ;;  %v974_v62 = vpop.eup %973  ;;  %v706_v9 = vmul.f32 %v1332_v59, %v685_v53  ;;  %v707_v50 = vmul.f32 %v1332_v59, %v686_v30  ;;  %v660_v45 = vmul.f32 %v972_v61, %v1770_v36 }
 0x103   :  { %v644_v23 = vmul.f32 %v974_v62, %v1769_v51  ;;  %v674_v37 = vsub.f32 %v642_v1, %v658_v54  ;;  %v688_v13 = vmul.f32 %v672_v19, %v672_v19  ;;  %v689_v43 = vmul.f32 %v673_v27, %v673_v27 }
 0x104   :  { %v719_v34 = vadd.f32 %v718_v55, %v704_v48  ;;  %v708_v22 = vmul.f32 %v1332_v59, %v687_v46  ;;  %v675_v57 = vsub.f32 %v643_v16, %v659_v58  ;;  %vm19_vm0 = vcmask 0  }
 0x105   :  { %v676_v33 = vsub.f32 %v644_v23, %v660_v45  ;;  %v690_v40 = vmul.f32 %v674_v37, %v674_v37  ;;  %v709_v49 = vmul.f32 %v1332_v59, %v688_v13  ;;  %v710_v3 = vmul.f32 %v1332_v59, %v689_v43 }
 0x106   :  { %v720_v15 = vadd.f32 %v719_v34, %v705_v0  ;;  %v691_v41 = vmul.f32 %v675_v57, %v675_v57  ;;  %v1001_v11 = vmov 0.0  }
 0x107   :  { %v692_v4 = vmul.f32 %v676_v33, %v676_v33  ;;  %v711_v17 = vmul.f32 %v1332_v59, %v690_v40  ;;  %20 = vst.msk [vmem:[#allocation2] sm:$0x1] %vm19_vm0, %v1001_v11 }
 0x108   :  { %v721_v42 = vadd.f32 %v720_v15, %v706_v9  ;;  %v712_v47 = vmul.f32 %v1332_v59, %v691_v41 }
 0x109   :  { %v713_v5 = vmul.f32 %v1332_v59, %v692_v4 }
 0x10a   :  { %v722_v21 = vadd.f32 %v721_v42, %v707_v50 }
 0x10c   :  { %v723_v24 = vadd.f32 %v722_v21, %v708_v22 }
 0x10e   :  { %v724_v20 = vadd.f32 %v723_v24, %v709_v49  ;;  %v693_v60 = vld [vmem:[#allocation2] sm:$0x1] }
 0x110   :  { %v725_v25 = vadd.f32 %v724_v20, %v710_v3 }
 0x112   :  { %v726_v31 = vadd.f32 %v725_v25, %v711_v17 }
 0x114   :  { %v727_v2 = vadd.f32 %v726_v31, %v712_v47 }
 0x116   :  { %v728_v26 = vadd.f32 %v727_v2, %v713_v5 }
 0x118   :  { %729 = vadd.xlane.f32.xlu2 %v728_v26 }
 0x18b   :  { %v730_v38 = vpop.xlane.xlu2 %729 }
 0x18c   :  { %v731_v63 = vrot.slane %v730_v38, 4 }
 0x18e   :  { %v732_v12 = vadd.f32 %v731_v63, %v730_v38 }
 0x190   :  { %v733_v35 = vrot.slane %v732_v12, 2 }
 0x192   :  { %v734_v56 = vadd.f32 %v733_v35, %v732_v12 }
 0x194   :  { %v735_v10 = vrot.slane %v734_v56, 1 }
 0x196   :  { %v736_v18 = vadd.f32 %v735_v10, %v734_v56 }
 0x198   :  { %842 = vpush %v736_v18 }
 0x1c9   :  { %s843_s2 = spop %842 }
 0x1ca   :  { %v738_v44 = vstv %s843_s2 }
 0x1cb   :  { %v739_v59 = vadd.f32 %v738_v44, %v693_v60 }
 0x1cd   :  { %741 = vst.msk [vmem:[#allocation2] sm:$0x1] %vm19_vm0, %v739_v59 }
 0x1d4   :  { %v745_v29 = vld [vmem:[#allocation2] sm:$0x1] }
 0x1d5   :  { %v746_v32 = vmul.f32 0.0078125, %v745_v29 }
 0x1d7   :  { %747 = vst.msk [vmem:[#allocation3] sm:$0x1] %vm19_vm0, %v746_v32 }
 0x1d8   :  { %758 = dma.vmem_to_hbm [thread:$0]  %s754_s18, 16, %s756_s21, [#allocation4]  }
 0x1d9   :  { %999 = dma.done.wait [#allocation4], 16  }
 0x1da   :  { %1000 = vsyncadd [#allocation4], 4294967280 }
 0x1db   :  { %763 = vsyncpa [#allocation4], 1 }

// kernel: perceptual_loss.8
= control target key start
LH: loop header
LB: loop body
LE: loop exit
PB: predicated region body
PF: predicated region fallthrough
CT: control target
= control target key end

     0   :  { %s2559_s12 = smov 0   ;;  %s2561_s13 = smov 0   ;;  %s3018_s0 = inlined_call_operand.vmem [shape: bf16[4,333,128], index: 0, kind: input, shape index: {}]   ;;  %s3019_s1 = inlined_call_operand.vmem [shape: bf16[9,128,128], index: 1, kind: input, shape index: {}]   ;;  %s3020_s2 = inlined_call_operand.vmem [shape: f32[1,128], index: 2, kind: input, shape index: {}]   ;;  %s3021_s3 = inlined_call_operand.vmem [shape: bf16[4,72,128], index: 3, kind: output, shape index: {}]  }
   0x1   :  { %s2563_s14 = smov 0  }
   0x2 LB: > { %s25_s15 = sadd.s32 1, %s2533_s13  ;;  %p1793_p0 = scmp.ge.s32.totalorder %s2537_s14, 1  ;;  %s2537_s14 = sphi %s2563_s14, %s13_s14   ;;  %s2533_s13 = sphi %s2561_s13, %s3023_s13   ;;  %s2529_s12 = sphi %s2559_s12, %s3022_s12  }
   0x3   : > { %p27_p1 = scmp.ge.s32.totalorder %s25_s15, 4  ;;  %p151_p2 = scmp.lt.s32.totalorder %s2537_s14, 5 }
   0x5   : > { %s3025_s15 = smov (%p27_p1, %s25_s15), 0  ;;  %p152_p3 = pnand %p1793_p0, %p151_p2 }
   0x6   : > { %p179_p4 = scmp.lt.s32.totalorder (!%p152_p3), %s2529_s12, 3 }
   0x7   : > { %155 = sbr.rel (%p152_p3) target bundleno = 368 (0x170), region = 32 }
   0xc   : > { %v2366_v0 = vld [vmem:[%s3019_s1 + $0x78] sm:$0xff]  ;;  %v2365_v1 = vld [vmem:[%s3019_s1 + $0x70] sm:$0xff]  ;;  %s3027_s12 = smov (!%p179_p4, %s2529_s12), 3  ;;  %v2364_v4 = vld [vmem:[%s3019_s1 + $0x68] sm:$0xff]  ;;  %vm271_vm0 = vsmask.f32 7424 }
   0xd   : > { %364 = vmatpush.bf16.msra.mxu0 %v2366_v0  ;;  %2469 = vmatpush.bf16.msra.mxu1 %v2366_v0  ;;  %v2391_v2 = vld [vmem:[%s3019_s1 + $0xf8] sm:$0xff]  ;;  %v2390_v3 = vld [vmem:[%s3019_s1 + $0xf0] sm:$0xff]  ;;  %s2485_s26 = smul.u32 168, %s3027_s12  ;;  %v2389_v5 = vld [vmem:[%s3019_s1 + $0xe8] sm:$0xff]  ;;  %vm744_vm1 = vcmask 1046528  }
   0xe   : > { %2470 = vmatpush.bf16.msra.mxu2 %v2366_v0  ;;  %807 = vmatpush.bf16.msra.mxu3 %v2391_v2  ;;  %v2363_v6 = vld [vmem:[%s3019_s1 + $0x60] sm:$0xff]  ;;  %v2362_v9 = vld [vmem:[%s3019_s1 + $0x58] sm:$0xff]  ;;  %v2361_v17 = vld [vmem:[%s3019_s1 + $0x50] sm:$0xff]  ;;  %vm901_vm2 = vsmask.f32 6400  ;;  %s2486_s5 = smul.u32 36, %s3027_s12 }
   0xf   : > { %s2604_s6 = scalar_lea.vmem %s3018_s0, %s2485_s26  ;;  %v2388_v7 = vld [vmem:[%s3019_s1 + $0xe0] sm:$0xff]  ;;  %v2387_v13 = vld [vmem:[%s3019_s1 + $0xd8] sm:$0xff]  ;;  %v2386_v20 = vld [vmem:[%s3019_s1 + $0xd0] sm:$0xff] }
  0x10   : > { %v2354_v8 = vld [vmem:[%s2604_s6 + $0x28] sm:$0xff]  ;;  %v2356_v10 = vld [vmem:[%s2604_s6 + $0x38] sm:$0xff]  ;;  %v2620_v14 = vld [vmem:[%s2604_s6 + $0x30] sm:$0xff]  ;;  %s2989_s9 = scalar_lea.vmem %s3021_s3, %s2486_s5 }
  0x11   : > { %365 = vmatpush.bf16.msra.mxu0 %v2365_v1  ;;  %2471 = vmatpush.bf16.msra.mxu1 %v2365_v1  ;;  %v1830_v11 = vld [vmem:[%s2604_s6 + $0x48] sm:$0xf]  ;;  %v2358_v12 = vld [vmem:[%s2604_s6 + $0x48] sm:$0x10]  ;;  %v275_v15 = vshll.u32 %v2354_v8, 16  ;;  %v2623_v16 = vld [vmem:[%s2604_s6 + $0x40] sm:$0xff] }
  0x12   : > { %2472 = vmatpush.bf16.msra.mxu2 %v2365_v1  ;;  %808 = vmatpush.bf16.msra.mxu3 %v2390_v3  ;;  %v288_v18 = vshll.u32 %v2356_v10, 16  ;;  %v1831_v19 = vor.u32 %v2358_v12, %v1830_v11  ;;  %v273_v21 = vshrl.u32 %v2354_v8, 16  ;;  %v280_v23 = vshll.u32 %v2620_v14, 16  ;;  %v2360_v25 = vld [vmem:[%s3019_s1 + $0x48] sm:$0xff]  ;;  %v1998_v29 = vld [vmem:[%s2604_s6 + $0x50] sm:$0xe] }
  0x13   : > { %v277_v22 = vrot.slane %v275_v15, 1  ;;  %v296_v24 = vshll.u32 %v2623_v16, 16  ;;  %v292_v27 = vshrl.u32 %v2356_v10, 16  ;;  %v2380_v30 = vld [vmem:[%s2604_s6 + $0x50] sm:$0xf0]  ;;  %v2385_v31 = vld [vmem:[%s3019_s1 + $0xc8] sm:$0xff] }
  0x14   : > { %v2636_v26 = vrot.slane %v288_v18, 1  ;;  %v304_v28 = vshll.u32 %v1831_v19, 16  ;;  %v282_v33 = vrot.slane %v280_v23, 1  ;;  %v2359_v35 = vld [vmem:[%s3019_s1 + $0x40] sm:$0xff]  ;;  %v308_v38 = vshrl.u32 %v1831_v19, 16  ;;  %v2650_v39 = vld [vmem:[%s2604_s6 + $0x58] sm:$0xff] }
  0x15   : > { %366 = vmatpush.bf16.msra.mxu0 %v2364_v4  ;;  %2473 = vmatpush.bf16.msra.mxu1 %v2364_v4  ;;  %v278_v32 = vor.u32 %v277_v22, %v273_v21  ;;  %v298_v34 = vrot.slane %v296_v24, 1  ;;  %v2652_v40 = vor.u32 %v2380_v30, %v1998_v29  ;;  %v2353_v41 = vld [vmem:[%s3019_s1 + $0x38] sm:$0xff]  ;;  %v2384_v47 = vld [vmem:[%s3019_s1 + $0xc0] sm:$0xff]  ;;  %v746_v49 = vrot.slane %v2650_v39, 1  ;;  %v2352_v50 = vld [vmem:[%s3019_s1 + $0x30] sm:$0xff] }
  0x16   : > { %2474 = vmatpush.bf16.msra.mxu2 %v2364_v4  ;;  %809 = vmatpush.bf16.msra.mxu3 %v2389_v5  ;;  %v294_v36 = vor.u32 %v292_v27, %v2636_v26  ;;  %v2647_v37 = vrot.slane %v304_v28, 1  ;;  %v2379_v42 = vld [vmem:[%s3019_s1 + $0xb8] sm:$0xff]  ;;  %v2378_v52 = vld [vmem:[%s3019_s1 + $0xb0] sm:$0xff]  ;;  %v2351_v55 = vld [vmem:[%s3019_s1 + $0x28] sm:$0xff]  ;;  %v284_v59 = vshrl.u32 %v2620_v14, 16  ;;  %v300_v60 = vshrl.u32 %v2623_v16, 16 }
  0x17   : > { %v2404_v43 = vld [vmem:[%s3019_s1 + $0x138] sm:$0xff]  ;;  %v283_v44 = vsel %vm271_vm0, %v278_v32, %v282_v33  ;;  %v745_v48 = vrot.slane %v2652_v40, 1  ;;  %v2403_v53 = vld [vmem:[%s3019_s1 + $0x130] sm:$0xff]  ;;  %v2377_v57 = vld [vmem:[%s3019_s1 + $0xa8] sm:$0xff] }
  0x18   : > { %v299_v45 = vsel %vm271_vm0, %v294_v36, %v298_v34  ;;  %v310_v46 = vor.u32 %v308_v38, %v2647_v37  ;;  %v2437_v51 = vld [vmem:[%s3019_s1 + $0x1f8] sm:$0xff]  ;;  %v2436_v56 = vld [vmem:[%s3019_s1 + $0x1f0] sm:$0xff]  ;;  %v2402_v58 = vld [vmem:[%s3019_s1 + $0x128] sm:$0xff]  ;;  %v286_v0 = vor.u32 %v284_v59, %v282_v33  ;;  %v302_v1 = vor.u32 %v300_v60, %v298_v34 }
  0x19   : > { %367 = vmatpush.bf16.msra.mxu0 %v2363_v6  ;;  %2475 = vmatpush.bf16.msra.mxu1 %v2363_v6  ;;  %v747_v54 = vsel %vm744_vm1, %v745_v48, %v746_v49  ;;  %v2350_v61 = vld [vmem:[%s3019_s1 + $0x20] sm:$0xff]  ;;  %v2062_v2 = vld [vmem:[%s2604_s6 + $0x78] sm:$0xe]  ;;  %v2392_v3 = vld [vmem:[%s2604_s6 + $0x78] sm:$0xf0] }
  0x1a   : > { %2476 = vmatpush.bf16.msra.mxu2 %v2363_v6  ;;  %810 = vmatpush.bf16.msra.mxu3 %v2388_v7  ;;  %v2376_v62 = vld [vmem:[%s3019_s1 + $0xa0] sm:$0xff]  ;;  %v2349_v5 = vld [vmem:[%s3019_s1 + $0x18] sm:$0xff]  ;;  %v291_v10 = vsel %vm271_vm0, %v286_v0, %v2636_v26  ;;  %v307_v11 = vsel %vm271_vm0, %v302_v1, %v2647_v37  ;;  %v2348_v14 = vld [vmem:[%s3019_s1 + $0x10] sm:$0xff] }
  0x1b   : > { %v2401_v63 = vld [vmem:[%s3019_s1 + $0x120] sm:$0xff]  ;;  %v2375_v6 = vld [vmem:[%s3019_s1 + $0x98] sm:$0xff]  ;;  %v2374_v15 = vld [vmem:[%s3019_s1 + $0x90] sm:$0xff] }
  0x1c   : > { %v2712_v4 = vld [vmem:[%s2604_s6 + $0x60] sm:$0xff]  ;;  %v2400_v7 = vld [vmem:[%s3019_s1 + $0x118] sm:$0xff]  ;;  %v2399_v16 = vld [vmem:[%s3019_s1 + $0x110] sm:$0xff] }
  0x1d   : > { %368 = vmatpush.bf16.msra.mxu0 %v2362_v9  ;;  %2477 = vmatpush.bf16.msra.mxu1 %v2362_v9  ;;  %v2367_v8 = vld [vmem:[%s2604_s6] sm:$0xff]  ;;  %v2373_v26 = vld [vmem:[%s3019_s1 + $0x88] sm:$0xff]  ;;  %v2814_v0 = vld [vmem:[%s2604_s6 + $0x70] sm:$0xf] }
  0x1e   : > { %2478 = vmatpush.bf16.msra.mxu2 %v2362_v9  ;;  %811 = vmatpush.bf16.msra.mxu3 %v2387_v13  ;;  %v2063_v9 = vor.u32 %v2392_v3, %v2062_v2  ;;  %v2393_v12 = vld [vmem:[%s2604_s6 + $0x80] sm:$0xff]  ;;  %v748_v13 = vrot.slane %v2712_v4, 1  ;;  %v561_v18 = vshll.u32 %v2367_v8, 16  ;;  %v2398_v27 = vld [vmem:[%s3019_s1 + $0x108] sm:$0xff]  ;;  %v559_v28 = vshrl.u32 %v2367_v8, 16  ;;  %v2433_v2 = vld [vmem:[%s3019_s1 + $0x1d8] sm:$0xff] }
  0x1f   : > { %v911_v22 = vshrl.u32 %v2393_v12, 16  ;;  %v914_v23 = vshll.u32 %v2393_v12, 16  ;;  %v2372_v36 = vld [vmem:[%s3019_s1 + $0x80] sm:$0xff]  ;;  %v2422_v60 = vld [vmem:[%s3019_s1 + $0x1a8] sm:$0xff]  ;;  %v701_v1 = vld [vmem:[%s2604_s6 + $0x74] sm:$0x1] }
  0x20   : > { %v903_v19 = vshrl.u32 %v2063_v9, 16  ;;  %v906_v21 = vshll.u32 %v2063_v9, 16  ;;  %v749_v24 = vsel %vm744_vm1, %v746_v49, %v748_v13  ;;  %v563_v29 = vrot.slane %v561_v18, 1  ;;  %v2342_v49 = vld [vmem:[%s2604_s6] sm:$0xff]  ;;  %v2408_v18 = vld [vmem:[%s3019_s1 + $0x158] sm:$0xff] }
  0x21   : > { %369 = vmatpush.bf16.msra.mxu0 %v2361_v17  ;;  %2479 = vmatpush.bf16.msra.mxu1 %v2361_v17  ;;  %v913_v33 = vrot.slane %v911_v22, 1  ;;  %v916_v34 = vrot.slane %v914_v23, 2  ;;  %v2421_v8 = vld [vmem:[%s3019_s1 + $0x1a0] sm:$0xff]  ;;  %v2395_v22 = vld [vmem:[%s2604_s6 + $0x90] sm:$0xff] }
  0x22   : > { %2480 = vmatpush.bf16.msra.mxu2 %v2361_v17  ;;  %812 = vmatpush.bf16.msra.mxu3 %v2386_v20  ;;  %v2740_v17 = vld [vmem:[%s2604_s6 + $0x8] sm:$0xff]  ;;  %v908_v32 = vrot.slane %v906_v21, 2  ;;  %v564_v37 = vor.u32 %v563_v29, %v559_v28  ;;  %v2409_v9 = vld [vmem:[%s3019_s1 + $0x160] sm:$0xff]  ;;  %v2407_v28 = vld [vmem:[%s3019_s1 + $0x150] sm:$0xff]  ;;  %v929_v29 = vshrl.u32 %v2395_v22, 16 }
  0x23   : > { %v2435_v20 = vld [vmem:[%s3019_s1 + $0x1e8] sm:$0xff]  ;;  %v566_v30 = vshll.u32 %v2740_v17, 16  ;;  %v570_v3 = vshrl.u32 %v2740_v17, 16  ;;  %v2442_v12 = vld [vmem:[%s3019_s1 + $0x220] sm:$0xff] }
  0x25   : > { %370 = vmatpush.bf16.msra.mxu0 %v2360_v25  ;;  %2481 = vmatpush.bf16.msra.mxu1 %v2360_v25  ;;  %v568_v38 = vrot.slane %v566_v30, 1  ;;  %v932_v30 = vshll.u32 %v2395_v22, 16 }
  0x26   : > { %2482 = vmatpush.bf16.msra.mxu2 %v2360_v25  ;;  %813 = vmatpush.bf16.msra.mxu3 %v2385_v31  ;;  %v2347_v25 = vld [vmem:[%s3019_s1 + $0x8] sm:$0xff]  ;;  %v905_v31 = vrot.slane %v903_v19, 1 }
  0x27   : > { %v569_v48 = vsel %vm271_vm0, %v564_v37, %v568_v38  ;;  %v931_v37 = vrot.slane %v929_v29, 1 }
  0x29   : > { %371 = vmatpush.bf16.msra.mxu0 %v2359_v35  ;;  %2483 = vmatpush.bf16.msra.mxu1 %v2359_v35 }
  0x2a   : > { %2484 = vmatpush.bf16.msra.mxu2 %v2359_v35  ;;  %814 = vmatpush.bf16.msra.mxu3 %v2384_v47  ;;  %v2346_v35 = vld [vmem:[%s3019_s1] sm:$0xff]  ;;  %v2779_v47 = vld [vmem:[%s2604_s6 + $0x68] sm:$0xff] }
  0x2c   : > { %372 = vmatmul.bf16.vlgmr.msra.gmra.mxu0 %v283_v44  ;;  %382 = vmatmul.bf16.vlgmr.msra.gmra.mxu1 %v299_v45  ;;  %v909_v44 = vor.u32 %v908_v32, %v905_v31  ;;  %v917_v45 = vor.u32 %v916_v34, %v913_v33  ;;  %v2418_v32 = vld [vmem:[%s3019_s1 + $0x188] sm:$0xff]  ;;  %v2440_v33 = vld [vmem:[%s3019_s1 + $0x210] sm:$0xff] }
  0x2d   : > { %473 = vmatpush.bf16.msrb.mxu1 %v2353_v41  ;;  %999 = vmatpush.bf16.msrb.mxu0 %v2404_v43  ;;  %v2397_v41 = vld [vmem:[%s3019_s1 + $0x100] sm:$0xff]  ;;  %v2412_v43 = vld [vmem:[%s3019_s1 + $0x178] sm:$0xff]  ;;  %v2431_v34 = vld [vmem:[%s3019_s1 + $0x1c8] sm:$0xff] }
  0x2e   : > { %650 = vmatpush.bf16.msrb.mxu2 %v2379_v42  ;;  %1501 = vmatpush.bf16.msrb.mxu3 %v2437_v51  ;;  %v2424_v42 = vld [vmem:[%s3019_s1 + $0x1b8] sm:$0xff]  ;;  %v2423_v51 = vld [vmem:[%s3019_s1 + $0x1b0] sm:$0xff] }
  0x2f   : > { %392 = vmatmul.bf16.vlgmr.msra.gmra.mxu2 %v310_v46  ;;  %815 = vmatmul.bf16.vlgmr.msra.gmra.mxu3 %v747_v54  ;;  %v2445_v46 = vld [vmem:[%s3019_s1 + $0x238] sm:$0xff]  ;;  %v750_v54 = vrot.slane %v2779_v47, 1 }
  0x31   : > { %474 = vmatpush.bf16.msrb.mxu1 %v2352_v50  ;;  %1000 = vmatpush.bf16.msrb.mxu0 %v2403_v53  ;;  %v918_v50 = vsel %vm901_vm2, %v909_v44, %v917_v45  ;;  %v2394_v53 = vld [vmem:[%s2604_s6 + $0x88] sm:$0xff]  ;;  %v2078_v44 = vld [vmem:[%s2604_s6 + $0x98] sm:$0xf] }
  0x32   : > { %651 = vmatpush.bf16.msrb.mxu2 %v2378_v52  ;;  %1502 = vmatpush.bf16.msrb.mxu3 %v2436_v56  ;;  %v2411_v52 = vld [vmem:[%s3019_s1 + $0x170] sm:$0xff]  ;;  %v2434_v56 = vld [vmem:[%s3019_s1 + $0x1e0] sm:$0xff]  ;;  %v923_v59 = vshll.u32 %v2394_v53, 16 }
  0x35   : > { %475 = vmatpush.bf16.msrb.mxu1 %v2351_v55  ;;  %1001 = vmatpush.bf16.msrb.mxu0 %v2402_v58  ;;  %v2444_v55 = vld [vmem:[%s3019_s1 + $0x230] sm:$0xff]  ;;  %v920_v58 = vshrl.u32 %v2394_v53, 16  ;;  %v2406_v53 = vld [vmem:[%s3019_s1 + $0x148] sm:$0xff] }
  0x36   : > { %652 = vmatpush.bf16.msrb.mxu2 %v2377_v57  ;;  %1503 = vmatpush.bf16.msrb.mxu3 %v2435_v20  ;;  %v2799_v57 = vld [vmem:[%s2604_s6 + $0x10] sm:$0xff]  ;;  %v2343_v20 = vld [vmem:[%s2604_s6 + $0x8] sm:$0xff] }
  0x39   : > { %476 = vmatpush.bf16.msrb.mxu1 %v2350_v61  ;;  %1002 = vmatpush.bf16.msrb.mxu0 %v2401_v63  ;;  %v2410_v61 = vld [vmem:[%s3019_s1 + $0x168] sm:$0xff] }
  0x3a   : > { %653 = vmatpush.bf16.msrb.mxu2 %v2376_v62  ;;  %v751_v62 = vsel %vm744_vm1, %v748_v13, %v750_v54  ;;  %v2443_v63 = vld [vmem:[%s3019_s1 + $0x228] sm:$0xff]  ;;  %1504 = vmatpush.bf16.msrb.mxu3 %v2434_v56  ;;  %v572_v13 = vor.u32 %v570_v3, %v568_v38  ;;  %v934_v38 = vrot.slane %v932_v30, 2  ;;  %v2425_v3 = vld [vmem:[%s2604_s6 + $0x2c] sm:$0xf0]  ;;  %v1063_v30 = vshrl.u32 %v2652_v40, 16 }
  0x3b   : > { %v2439_v56 = vld [vmem:[%s3019_s1 + $0x208] sm:$0xff] }
  0x3c   : > { %377 = vmatmul.bf16.gmra.mxu0 %v291_v10  ;;  %387 = vmatmul.bf16.gmra.mxu1 %v307_v11  ;;  %v737_v10 = vunpack.c.l.b16 %v2814_v0  ;;  %v738_v11 = vunpack.c.l.b16 %v701_v1 }
  0x3d   : > { %477 = vmatpush.bf16.msrb.mxu1 %v2349_v5  ;;  %1003 = vmatpush.bf16.msrb.mxu0 %v2400_v7  ;;  %v574_v5 = vshll.u32 %v2799_v57, 16  ;;  %v925_v7 = vrot.slane %v923_v59, 2 }
  0x3e   : > { %654 = vmatpush.bf16.msrb.mxu2 %v2375_v6  ;;  %v922_v6 = vrot.slane %v920_v58, 1  ;;  %1505 = vmatpush.bf16.msrb.mxu3 %v2433_v2  ;;  %v2837_v17 = vpack.c.b16 %v738_v11, %v737_v10  ;;  %v2242_v2 = vld [vmem:[%s2604_s6 + $0x2c] sm:$0xe] }
  0x3f   : > { %820 = vmatmul.bf16.gmra.mxu3 %v749_v24  ;;  %v2419_v24 = vld [vmem:[%s3019_s1 + $0x190] sm:$0xff] }
  0x40   : > { %v752_v23 = vrot.slane %v2837_v17, 1 }
  0x41   : > { %478 = vmatpush.bf16.msrb.mxu1 %v2348_v14  ;;  %1004 = vmatpush.bf16.msrb.mxu0 %v2399_v16  ;;  %v576_v14 = vrot.slane %v574_v5, 1  ;;  %v2420_v16 = vld [vmem:[%s3019_s1 + $0x198] sm:$0xff] }
  0x42   : > { %655 = vmatpush.bf16.msrb.mxu2 %v2374_v15  ;;  %v926_v15 = vor.u32 %v925_v7, %v922_v6  ;;  %v753_v31 = vsel %vm744_vm1, %v750_v54, %v752_v23 }
  0x43   : > { %v577_v19 = vsel %vm271_vm0, %v572_v13, %v576_v14  ;;  %v2438_v13 = vld [vmem:[%s3019_s1 + $0x200] sm:$0xff] }
  0x44   : > { %v927_v21 = vsel %vm901_vm2, %v917_v45, %v926_v15  ;;  %v2396_v45 = vld [vmem:[%s2604_s6 + $0x98] sm:$0x30] }
  0x45   : > { %479 = vmatpush.bf16.msrb.mxu1 %v2347_v25  ;;  %1005 = vmatpush.bf16.msrb.mxu0 %v2398_v27  ;;  %v2441_v25 = vld [vmem:[%s3019_s1 + $0x218] sm:$0xff]  ;;  %v2432_v27 = vld [vmem:[%s3019_s1 + $0x1d0] sm:$0xff] }
  0x46   : > { %656 = vmatpush.bf16.msrb.mxu2 %v2373_v26  ;;  %v2370_v26 = vld [vmem:[%s2604_s6 + $0x18] sm:$0xff]  ;;  %1506 = vmatpush.bf16.msrb.mxu3 %v2432_v27  ;;  %v2513_v27 = vld [vmem:[%s2604_s6 + $0x4] sm:$0xe] }
  0x49   : > { %480 = vmatpush.bf16.msrb.mxu1 %v2346_v35  ;;  %1006 = vmatpush.bf16.msrb.mxu0 %v2397_v41  ;;  %v578_v35 = vshrl.u32 %v2799_v57, 16  ;;  %v2430_v57 = vld [vmem:[%s3019_s1 + $0x1c0] sm:$0xff] }
  0x4a   : > { %657 = vmatpush.bf16.msrb.mxu2 %v2372_v36  ;;  %v582_v36 = vshll.u32 %v2370_v26, 16  ;;  %1507 = vmatpush.bf16.msrb.mxu3 %v2431_v34 }
  0x4b   : > { %v580_v41 = vor.u32 %v578_v35, %v576_v14 }
  0x4c   : > { %481 = vmatmul.bf16.vlgmr.msrb.gmra.mxu1 %v2342_v49  ;;  %1007 = vmatmul.bf16.vlgmr.msrb.gmra.mxu0 %v918_v50  ;;  %v1946_v49 = vld [vmem:[%s2604_s6 + $0x20] sm:$0xf]  ;;  %v2371_v50 = vld [vmem:[%s2604_s6 + $0x20] sm:$0x10] }
  0x4d   : > { %1159 = vmatpush.bf16.msra.mxu1 %v2412_v43  ;;  %1626 = vmatpush.bf16.msra.mxu0 %v2445_v46  ;;  %v935_v43 = vor.u32 %v934_v38, %v931_v37  ;;  %v1947_v54 = vor.u32 %v2371_v50, %v1946_v49  ;;  %v1065_v38 = vrot.slane %v1063_v30, 1 }
  0x4e   : > { %1345 = vmatpush.bf16.msra.mxu2 %v2424_v42  ;;  %v584_v42 = vrot.slane %v582_v36, 1  ;;  %1508 = vmatpush.bf16.msrb.mxu3 %v2430_v57  ;;  %v1083_v57 = vshll.u32 %v2712_v4, 16 }
  0x4f   : > { %658 = vmatmul.bf16.vlgmr.msrb.gmra.mxu2 %v569_v48  ;;  %825 = vmatmul.bf16.gmra.mxu3 %v751_v62  ;;  %v2344_v48 = vld [vmem:[%s2604_s6 + $0x10] sm:$0xff]  ;;  %v590_v62 = vshll.u32 %v1947_v54, 16 }
  0x50   : > { %v585_v46 = vsel %vm271_vm0, %v580_v41, %v584_v42 }
  0x51   : > { %1160 = vmatpush.bf16.msra.mxu1 %v2411_v52  ;;  %1627 = vmatpush.bf16.msra.mxu0 %v2444_v55  ;;  %v2079_v52 = vor.u32 %v2396_v45, %v2078_v44  ;;  %v2417_v55 = vld [vmem:[%s3019_s1 + $0x180] sm:$0xff]  ;;  %v592_v6 = vrot.slane %v590_v62, 1  ;;  %v1085_v62 = vrot.slane %v1083_v57, 2 }
  0x52   : > { %1346 = vmatpush.bf16.msra.mxu2 %v2423_v51  ;;  %v936_v51 = vsel %vm901_vm2, %v926_v15, %v935_v43 }
  0x53   : > { %v938_v58 = vshrl.u32 %v2079_v52, 16  ;;  %v941_v59 = vshll.u32 %v2079_v52, 16 }
  0x55   : > { %1161 = vmatpush.bf16.msra.mxu1 %v2410_v61  ;;  %1628 = vmatpush.bf16.msra.mxu0 %v2443_v63  ;;  %v586_v61 = vshrl.u32 %v2370_v26, 16  ;;  %v940_v63 = vrot.slane %v938_v58, 1  ;;  %v943_v1 = vrot.slane %v941_v59, 2 }
  0x56   : > { %1347 = vmatpush.bf16.msra.mxu2 %v2422_v60  ;;  %v2405_v60 = vld [vmem:[%s3019_s1 + $0x140] sm:$0xff] }
  0x57   : > { %v588_v5 = vor.u32 %v586_v61, %v584_v42  ;;  %v944_v7 = vor.u32 %v943_v1, %v940_v63  ;;  %v2258_v63 = vld [vmem:[%s2604_s6 + $0x4c] sm:$0xf]  ;;  %v2429_v1 = vld [vmem:[%s2604_s6 + $0x4c] sm:$0x10] }
  0x59   : > { %1162 = vmatpush.bf16.msra.mxu1 %v2409_v9  ;;  %1629 = vmatpush.bf16.msra.mxu0 %v2442_v12  ;;  %v2243_v9 = vor.u32 %v2425_v3, %v2242_v2  ;;  %v593_v11 = vsel %vm271_vm0, %v588_v5, %v592_v6  ;;  %v2345_v12 = vld [vmem:[%s2604_s6 + $0x18] sm:$0xff]  ;;  %v945_v14 = vsel %vm901_vm2, %v935_v43, %v944_v7 }
  0x5a   : > { %1348 = vmatpush.bf16.msra.mxu2 %v2421_v8  ;;  %v2426_v8 = vld [vmem:[%s2604_s6 + $0x34] sm:$0xff] }
  0x5b   : > { %v1439_v15 = vrot.slane %v2243_v9, 1 }
  0x5c   : > { %486 = vmatmul.bf16.gmra.mxu1 %v2343_v20  ;;  %1012 = vmatmul.bf16.gmra.mxu0 %v927_v21  ;;  %v202_v20 = vld [vmem:[%s2604_s6 + $0x20] sm:$0xf]  ;;  %v594_v21 = vshrl.u32 %v1947_v54, 16 }
  0x5d   : > { %1163 = vmatpush.bf16.msra.mxu1 %v2408_v18  ;;  %1630 = vmatpush.bf16.msra.mxu0 %v2441_v25  ;;  %v1201_v18 = vld [vmem:[%s2604_s6 + $0x4] sm:$0xff]   ;;  %v414_v22 = vunpack.c.l.b16 %v202_v20 }
  0x5e   : > { %1349 = vmatpush.bf16.msra.mxu2 %v2420_v16  ;;  %v1440_v16 = vrot.slane %v2426_v8, 1  ;;  %v1256_v29 = vshll.u32 %v1201_v18, 16  ;;  %v1254_v35 = vshrl.u32 %v1201_v18, 16 }
  0x5f   : > { %663 = vmatmul.bf16.gmra.mxu2 %v577_v19  ;;  %830 = vmatmul.bf16.gmra.mxu3 %v753_v31  ;;  %v2512_v19 = vld [vmem:[%s2604_s6 + $0x4] sm:$0xf0]  ;;  %v419_v25 = vpack.c.b16 %v414_v22, %v414_v22  ;;  %v1066_v31 = vshll.u32 %v2652_v40, 16 }
  0x60   : > { %v1441_v17 = vsel %vm744_vm1, %v1439_v15, %v1440_v16  ;;  %v1258_v36 = vrot.slane %v1256_v29, 1  ;;  %v2514_v44 = vor.u32 %v2513_v27, %v2512_v19  ;;  %v1089_v15 = vshrl.u32 %v2779_v47, 16 }
  0x61   : > { %1164 = vmatpush.bf16.msra.mxu1 %v2407_v28  ;;  %1631 = vmatpush.bf16.msra.mxu0 %v2440_v33  ;;  %v2413_v28 = vld [vmem:[%s2604_s6 + $0xc] sm:$0xff]  ;;  %v1074_v33 = vshll.u32 %v2650_v39, 16  ;;  %v1068_v41 = vrot.slane %v1066_v31, 2 }
  0x62   : > { %1350 = vmatpush.bf16.msra.mxu2 %v2419_v24  ;;  %v596_v24 = vor.u32 %v594_v21, %v592_v6  ;;  %v1261_v37 = vshll.u32 %v2413_v28, 16  ;;  %v1259_v45 = vor.u32 %v1258_v36, %v1254_v35  ;;  %v1564_v49 = vrot.slane %v2514_v44, 1 }
  0x63   : > { %v1076_v43 = vrot.slane %v1074_v33, 2  ;;  %v1069_v40 = vor.u32 %v1068_v41, %v1065_v38  ;;  %v1565_v50 = vrot.slane %v2413_v28, 1  ;;  %v1265_v59 = vshrl.u32 %v2413_v28, 16  ;;  %v2190_v33 = vld [vmem:[%s2604_s6 + $0x24] sm:$0xf] }
  0x65   : > { %1165 = vmatpush.bf16.msra.mxu1 %v2406_v53  ;;  %1632 = vmatpush.bf16.msra.mxu0 %v2439_v56  ;;  %v1566_v53 = vsel %vm744_vm1, %v1564_v49, %v1565_v50  ;;  %v1080_v56 = vshrl.u32 %v2712_v4, 16 }
  0x66   : > { %1351 = vmatpush.bf16.msra.mxu2 %v2418_v32  ;;  %v1071_v32 = vshrl.u32 %v2650_v39, 16  ;;  %v2428_v39 = vld [vmem:[%s2604_s6 + $0x44] sm:$0xff] }
  0x67   : > { %v1444_v54 = vrot.slane %v2428_v39, 1  ;;  %v1082_v61 = vrot.slane %v1080_v56, 1 }
  0x68   : > { %v1073_v42 = vrot.slane %v1071_v32, 1 }
  0x69   : > { %1166 = vmatpush.bf16.msra.mxu1 %v2405_v60  ;;  %1633 = vmatpush.bf16.msra.mxu0 %v2438_v13  ;;  %v1086_v5 = vor.u32 %v1085_v62, %v1082_v61 }
  0x6a   : > { %1352 = vmatpush.bf16.msra.mxu2 %v2417_v55  ;;  %v2414_v55 = vld [vmem:[%s2604_s6 + $0x14] sm:$0xff] }
  0x6b   : > { %v1269_v60 = vshll.u32 %v2414_v55, 16  ;;  %v1567_v6 = vrot.slane %v2414_v55, 1  ;;  %v1273_v18 = vshrl.u32 %v2414_v55, 16 }
  0x6c   : > { %491 = vmatmul.bf16.gmra.mxu1 %v2344_v48  ;;  %1017 = vmatmul.bf16.gmra.mxu0 %v936_v51  ;;  %v1077_v48 = vor.u32 %v1076_v43, %v1073_v42 }
  0x6d   : > { %v1271_v3 = vrot.slane %v1269_v60, 1 }
  0x6e   : > { %v1078_v52 = vsel %vm901_vm2, %v1069_v40, %v1077_v48  ;;  %v1087_v4 = vsel %vm901_vm2, %v1077_v48, %v1086_v5 }
  0x6f   : > { %668 = vmatmul.bf16.gmra.mxu2 %v585_v46  ;;  %835 = vmatmul.bf16.gmra.mxu3 %v752_v23  ;;  %v2427_v23 = vld [vmem:[%s2604_s6 + $0x3c] sm:$0xff]  ;;  %v1263_v46 = vrot.slane %v1261_v37, 1 }
  0x70   : > { %v1442_v26 = vrot.slane %v2427_v23, 1  ;;  %v1091_v23 = vrot.slane %v1089_v15, 1 }
  0x71   : > { %v1264_v51 = vsel %vm271_vm0, %v1259_v45, %v1263_v46  ;;  %v1267_v2 = vor.u32 %v1265_v59, %v1263_v46 }
  0x72   : > { %v1443_v34 = vsel %vm744_vm1, %v1440_v16, %v1442_v26  ;;  %v1445_v58 = vsel %vm744_vm1, %v1442_v26, %v1444_v54  ;;  %v1092_v16 = vshll.u32 %v2779_v47, 16  ;;  %v1275_v26 = vor.u32 %v1273_v18, %v1271_v3 }
  0x73   : > { %v1272_v8 = vsel %vm271_vm0, %v1267_v2, %v1271_v3 }
  0x7c   : > { %496 = vmatmul.bf16.gmra.mxu1 %v2345_v12  ;;  %1022 = vmatmul.bf16.gmra.mxu0 %v945_v14  ;;  %v1568_v12 = vsel %vm744_vm1, %v1565_v50, %v1567_v6  ;;  %v2415_v14 = vld [vmem:[%s2604_s6 + $0x1c] sm:$0xff] }
  0x7d   : > { %v1277_v19 = vshll.u32 %v2415_v14, 16  ;;  %v1569_v47 = vrot.slane %v2415_v14, 1  ;;  %v1281_v46 = vshrl.u32 %v2415_v14, 16 }
  0x7f   : > { %673 = vmatmul.bf16.gmra.mxu2 %v593_v11  ;;  %1509 = vmatmul.bf16.vlgmr.msrb.gmra.mxu3 %v1441_v17  ;;  %v1279_v27 = vrot.slane %v1277_v19, 1  ;;  %v1570_v38 = vsel %vm744_vm1, %v1567_v6, %v1569_v47 }
  0x81   : > { %v1280_v31 = vsel %vm271_vm0, %v1275_v26, %v1279_v27 }
  0x8c   : > { %501 = vmatmul.bf16.gmra.mxu1 %v419_v25  ;;  %1027 = vmatmul.bf16.gmra.mxu0 %v944_v7  ;;  %v2259_v7 = vor.u32 %v2429_v1, %v2258_v63  ;;  %v1041_v25 = vld [vmem:[%s2604_s6 + $0x74] sm:$0x3] }
  0x8d   : > { %v1060_v30 = vunpack.c.l.b16 %v1041_v25 }
  0x8e   : > { %v1446_v13 = vrot.slane %v2259_v7, 1 }
  0x8f   : > { %678 = vmatmul.bf16.gmra.mxu2 %v596_v24  ;;  %1514 = vmatmul.bf16.gmra.mxu3 %v1443_v34  ;;  %v1094_v24 = vrot.slane %v1092_v16, 2  ;;  %v2416_v34 = vld [vmem:[%s2604_s6 + $0x24] sm:$0x10]  ;;  %v1061_v41 = vpack.c.b16 %v1060_v30, %v737_v10 }
  0x90   : > { %v1447_v17 = vsel %vm744_vm1, %v1444_v54, %v1446_v13  ;;  %v2191_v42 = vor.u32 %v2416_v34, %v2190_v33 }
  0x91   : > { %v1095_v29 = vor.u32 %v1094_v24, %v1091_v23  ;;  %v1098_v44 = vshrl.u32 %v1061_v41, 16  ;;  %v1101_v45 = vshll.u32 %v1061_v41, 16 }
  0x92   : > { %v1285_v40 = vshll.u32 %v2191_v42, 16  ;;  %v1571_v10 = vrot.slane %v2191_v42, 1 }
  0x93   : > { %v1096_v37 = vsel %vm901_vm2, %v1086_v5, %v1095_v29  ;;  %v1100_v50 = vrot.slane %v1098_v44, 1  ;;  %v1103_v39 = vrot.slane %v1101_v45, 2  ;;  %v1289_v5 = vshrl.u32 %v2191_v42, 16 }
  0x95   : > { %v1104_v0 = vor.u32 %v1103_v39, %v1100_v50 }
  0x97   : > { %v1105_v57 = vsel %vm901_vm2, %v1095_v29, %v1104_v0 }
  0x9c   : > { %1167 = vmatmul.bf16.vlgmr.msra.gmra.mxu1 %v1078_v52  ;;  %1634 = vmatmul.bf16.vlgmr.msra.gmra.mxu0 %v1566_v53  ;;  %v1287_v52 = vrot.slane %v1285_v40, 1 }
  0x9f   : > { %1353 = vmatmul.bf16.vlgmr.msra.gmra.mxu2 %v1264_v51  ;;  %1519 = vmatmul.bf16.gmra.mxu3 %v1445_v58  ;;  %v1283_v51 = vor.u32 %v1281_v46, %v1279_v27  ;;  %v1572_v58 = vsel %vm744_vm1, %v1569_v47, %v1571_v10 }
  0xa1   : > { %v1288_v54 = vsel %vm271_vm0, %v1283_v51, %v1287_v52 }
  0xa9   : > { %v373_v9 = vpop.f32.mrf.mxu0  ;;  %v2925_v11 = vpop.f32.mrf.mxu1 }
  0xac   : > { %1172 = vmatmul.bf16.gmra.mxu1 %v1087_v4  ;;  %1639 = vmatmul.bf16.gmra.mxu0 %v1568_v12  ;;  %v1291_v12 = vor.u32 %v1289_v5, %v1287_v52 }
  0xaf   : > { %1358 = vmatmul.bf16.gmra.mxu2 %v1272_v8  ;;  %1524 = vmatmul.bf16.gmra.mxu3 %v1447_v17 }
  0xb1   : > { %v375_v21 = vpop.f32.mrf.mxu0  ;;  %v2935_v22 = vpop.f32.mrf.mxu1 }
  0xb2   : > { %v2933_v20 = vpop.f32.mrf.mxu2  ;;  %v816_v28 = vpop.f32.mrf.mxu3 }
  0xb9   : > { %v378_v35 = vpop.f32.mrf.mxu0  ;;  %v2941_v36 = vpop.f32.mrf.mxu1 }
  0xba   : > { %v395_v32 = vpop.f32.mrf.mxu2  ;;  %v818_v43 = vpop.f32.mrf.mxu3 }
  0xbc   : > { %1177 = vmatmul.bf16.gmra.mxu1 %v1096_v37  ;;  %1644 = vmatmul.bf16.gmra.mxu0 %v1570_v38 }
  0xbf   : > { %1363 = vmatmul.bf16.gmra.mxu2 %v1280_v31  ;;  %1529 = vmatmul.bf16.gmra.mxu3 %v1446_v13 }
  0xc1   : > { %v380_v48 = vpop.f32.mrf.mxu0  ;;  %v2947_v49 = vpop.f32.mrf.mxu1 }
  0xc2   : > { %v821_v53 = vpop.f32.mrf.mxu3 }
  0xc9   : > { %v482_v55 = vpop.f32.mrf.mxu1  ;;  %v1008_v56 = vpop.f32.mrf.mxu0 }
  0xca   : > { %v483_v59 = vadd.f32 %v482_v55, %v373_v9  ;;  %v823_v60 = vpop.f32.mrf.mxu3 }
  0xcc   : > { %1182 = vmatmul.bf16.gmra.mxu1 %v1105_v57  ;;  %1649 = vmatmul.bf16.gmra.mxu0 %v1572_v58 }
  0xcf   : > { %1368 = vmatmul.bf16.gmra.mxu2 %v1288_v54 }
  0xd1   : > { %v484_v1 = vpop.f32.mrf.mxu1  ;;  %v1010_v2 = vpop.f32.mrf.mxu0 }
  0xd2   : > { %v659_v61 = vpop.f32.mrf.mxu2  ;;  %v485_v3 = vadd.f32 %v484_v1, %v375_v21  ;;  %v826_v7 = vpop.f32.mrf.mxu3 }
  0xd3   : > { %v683_v62 = vadd.f32 %v659_v61, %v483_v59 }
  0xd5   : > { %v840_v63 = vadd.f32 %v816_v28, %v683_v62 }
  0xd7   : > { %v2952_v6 = vadd.f32 %v1008_v56, %v840_v63 }
  0xd9   : > { %v487_v14 = vpop.f32.mrf.mxu1  ;;  %v1013_v9 = vpop.f32.mrf.mxu0 }
  0xda   : > { %v661_v8 = vpop.f32.mrf.mxu2  ;;  %v488_v15 = vadd.f32 %v487_v14, %v378_v35  ;;  %v828_v17 = vpop.f32.mrf.mxu3 }
  0xdb   : > { %v684_v4 = vadd.f32 %v661_v8, %v485_v3 }
  0xdc   : > { %1187 = vmatmul.bf16.gmra.mxu1 %v1104_v0  ;;  %1654 = vmatmul.bf16.gmra.mxu0 %v1571_v10 }
  0xdd   : > { %v841_v13 = vadd.f32 %v818_v43, %v684_v4 }
  0xdf   : > { %1373 = vmatmul.bf16.gmra.mxu2 %v1291_v12  ;;  %v2954_v16 = vadd.f32 %v1010_v2, %v841_v13 }
  0xe1   : > { %v489_v23 = vpop.f32.mrf.mxu1  ;;  %v1015_v24 = vpop.f32.mrf.mxu0 }
  0xe2   : > { %v664_v18 = vpop.f32.mrf.mxu2  ;;  %v490_v25 = vadd.f32 %v489_v23, %v380_v48  ;;  %v831_v27 = vpop.f32.mrf.mxu3 }
  0xe3   : > { %v685_v19 = vadd.f32 %v664_v18, %v488_v15 }
  0xe5   : > { %v842_v21 = vadd.f32 %v821_v53, %v685_v19 }
  0xe7   : > { %v2956_v26 = vadd.f32 %v1013_v9, %v842_v21 }
  0xe9   : > { %v492_v30 = vpop.f32.mrf.mxu1  ;;  %v1018_v31 = vpop.f32.mrf.mxu0 }
  0xea   : > { %v666_v28 = vpop.f32.mrf.mxu2  ;;  %v493_v32 = vadd.f32 %v492_v30, %v2925_v11  ;;  %v833_v34 = vpop.f32.mrf.mxu3 }
  0xeb   : > { %v686_v29 = vadd.f32 %v666_v28, %v490_v25  ;;  %v2980_v28 = vld [vmem:[%s3020_s2] ss:$0 sm:$0xff] }
  0xed   : > { %v843_v47 = vadd.f32 %v823_v60, %v686_v29 }
  0xef   : > { %v2959_v33 = vadd.f32 %v1015_v24, %v843_v47 }
  0xf1   : > { %v494_v41 = vpop.f32.mrf.mxu1  ;;  %v1020_v42 = vpop.f32.mrf.mxu0 }
  0xf2   : > { %v669_v35 = vpop.f32.mrf.mxu2  ;;  %v495_v43 = vadd.f32 %v494_v41, %v2935_v22  ;;  %v836_v45 = vpop.f32.mrf.mxu3 }
  0xf3   : > { %v687_v37 = vadd.f32 %v669_v35, %v493_v32 }
  0xf5   : > { %v844_v38 = vadd.f32 %v826_v7, %v687_v37 }
  0xf7   : > { %v2962_v44 = vadd.f32 %v1018_v31, %v844_v38 }
  0xf9   : > { %v497_v50 = vpop.f32.mrf.mxu1  ;;  %v1023_v39 = vpop.f32.mrf.mxu0 }
  0xfa   : > { %v671_v46 = vpop.f32.mrf.mxu2  ;;  %v498_v11 = vadd.f32 %v497_v50, %v2941_v36  ;;  %v838_v52 = vpop.f32.mrf.mxu3 }
  0xfb   : > { %v688_v40 = vadd.f32 %v671_v46, %v495_v43 }
  0xfd   : > { %v845_v48 = vadd.f32 %v828_v17, %v688_v40 }
  0xff   : > { %v2965_v51 = vadd.f32 %v1020_v42, %v845_v48 }
 0x101   : > { %v499_v54 = vpop.f32.mrf.mxu1  ;;  %v1025_v55 = vpop.f32.mrf.mxu0 }
 0x102   : > { %v674_v53 = vpop.f32.mrf.mxu2  ;;  %v500_v22 = vadd.f32 %v499_v54, %v2947_v49  ;;  %v1510_v57 = vpop.f32.mrf.mxu3 }
 0x103   : > { %v689_v0 = vadd.f32 %v674_v53, %v498_v11 }
 0x105   : > { %v846_v10 = vadd.f32 %v831_v27, %v689_v0 }
 0x107   : > { %v2968_v56 = vadd.f32 %v1023_v39, %v846_v10 }
 0x109   : > { %v502_v61 = vpop.f32.mrf.mxu1  ;;  %v1028_v62 = vpop.f32.mrf.mxu0 }
 0x10a   : > { %v676_v58 = vpop.f32.mrf.mxu2  ;;  %v503_v36 = vadd.f32 %v502_v61, %v2933_v20  ;;  %v1512_v1 = vpop.f32.mrf.mxu3 }
 0x10b   : > { %v690_v59 = vadd.f32 %v676_v58, %v500_v22 }
 0x10d   : > { %v847_v60 = vadd.f32 %v833_v34, %v690_v59 }
 0x10f   : > { %v2971_v63 = vadd.f32 %v1025_v55, %v847_v60 }
 0x111   : > { %v504_v7 = vpop.f32.mrf.mxu1  ;;  %v1030_v8 = vpop.f32.mrf.mxu0 }
 0x112   : > { %v679_v2 = vpop.f32.mrf.mxu2  ;;  %v1515_v49 = vpop.f32.mrf.mxu3 }
 0x113   : > { %v691_v3 = vadd.f32 %v679_v2, %v503_v36 }
 0x115   : > { %v848_v5 = vadd.f32 %v836_v45, %v691_v3 }
 0x117   : > { %v2973_v4 = vadd.f32 %v1028_v62, %v848_v5 }
 0x119   : > { %v1168_v13 = vpop.f32.mrf.mxu1  ;;  %v1635_v14 = vpop.f32.mrf.mxu0 }
 0x11a   : > { %v681_v12 = vpop.f32.mrf.mxu2  ;;  %v1192_v9 = vadd.f32 %v1168_v13, %v2952_v6  ;;  %v1517_v15 = vpop.f32.mrf.mxu3 }
 0x121   : > { %v1170_v20 = vpop.f32.mrf.mxu1  ;;  %v1637_v19 = vpop.f32.mrf.mxu0 }
 0x122   : > { %v1354_v17 = vpop.f32.mrf.mxu2  ;;  %v1193_v23 = vadd.f32 %v1170_v20, %v2954_v16  ;;  %v1520_v24 = vpop.f32.mrf.mxu3 }
 0x123   : > { %v1378_v18 = vadd.f32 %v1354_v17, %v1192_v9 }
 0x125   : > { %v1534_v21 = vadd.f32 %v1510_v57, %v1378_v18 }
 0x127   : > { %v1659_v27 = vadd.f32 %v1635_v14, %v1534_v21 }
 0x129   : > { %v1173_v6 = vpop.f32.mrf.mxu1  ;;  %v1640_v30 = vpop.f32.mrf.mxu0  ;;  %v1672_v31 = vadd.f32 %v2980_v28, %v1659_v27 }
 0x12a   : > { %v1356_v25 = vpop.f32.mrf.mxu2  ;;  %v1194_v34 = vadd.f32 %v1173_v6, %v2956_v26  ;;  %v1522_v35 = vpop.f32.mrf.mxu3 }
 0x12b   : > { %v1379_v29 = vadd.f32 %v1356_v25, %v1193_v23  ;;  %v1681_v38 = vmax.f32 %v1672_v31, 0.0 }
 0x12d   : > { %v1535_v47 = vadd.f32 %v1512_v1, %v1379_v29 }
 0x12f   : > { %v1660_v32 = vadd.f32 %v1637_v19, %v1535_v47 }
 0x131   : > { %v1673_v16 = vadd.f32 %v2980_v28, %v1660_v32  ;;  %v1175_v45 = vpop.f32.mrf.mxu1  ;;  %v1642_v46 = vpop.f32.mrf.mxu0 }
 0x132   : > { %v1359_v37 = vpop.f32.mrf.mxu2  ;;  %v1195_v26 = vadd.f32 %v1175_v45, %v2959_v33  ;;  %v1525_v48 = vpop.f32.mrf.mxu3 }
 0x133   : > { %v1682_v41 = vmax.f32 %v1673_v16, 0.0  ;;  %v1380_v42 = vadd.f32 %v1359_v37, %v1194_v34 }
 0x135   : > { %v2449_v43 = vpack.c.bf16 %v1682_v41, %v1681_v38  ;;  %v1536_v40 = vadd.f32 %v1515_v49, %v1380_v42 }
 0x137   : > { %2450 = vst [vmem:[%s2989_s9] sm:$0xff] %v2449_v43   ;;  %v1661_v39 = vadd.f32 %v1640_v30, %v1536_v40 }
 0x139   : > { %v1178_v53 = vpop.f32.mrf.mxu1  ;;  %v1645_v0 = vpop.f32.mrf.mxu0  ;;  %v1674_v10 = vadd.f32 %v2980_v28, %v1661_v39 }
 0x13a   : > { %v1361_v50 = vpop.f32.mrf.mxu2  ;;  %v1196_v55 = vadd.f32 %v1178_v53, %v2962_v44  ;;  %v1527_v22 = vpop.f32.mrf.mxu3 }
 0x13b   : > { %v1381_v11 = vadd.f32 %v1361_v50, %v1195_v26  ;;  %v1683_v59 = vmax.f32 %v1674_v10, 0.0 }
 0x13d   : > { %v1537_v52 = vadd.f32 %v1517_v15, %v1381_v11 }
 0x13f   : > { %v1662_v54 = vadd.f32 %v1642_v46, %v1537_v52 }
 0x141   : > { %v1675_v57 = vadd.f32 %v2980_v28, %v1662_v54  ;;  %v1180_v62 = vpop.f32.mrf.mxu1  ;;  %v1647_v36 = vpop.f32.mrf.mxu0 }
 0x142   : > { %v1364_v58 = vpop.f32.mrf.mxu2  ;;  %v1197_v2 = vadd.f32 %v1180_v62, %v2965_v51  ;;  %v1530_v3 = vpop.f32.mrf.mxu3 }
 0x143   : > { %v1684_v60 = vmax.f32 %v1675_v57, 0.0  ;;  %v1382_v33 = vadd.f32 %v1364_v58, %v1196_v55 }
 0x145   : > { %v2454_v61 = vpack.c.bf16 %v1684_v60, %v1683_v59  ;;  %v1538_v1 = vadd.f32 %v1520_v24, %v1382_v33 }
 0x147   : > { %2466 = vst [vmem:[%s2989_s9 + $0x8] sm:$0xff] %v2454_v61   ;;  %v1663_v7 = vadd.f32 %v1645_v0, %v1538_v1 }
 0x149   : > { %v1183_v49 = vpop.f32.mrf.mxu1  ;;  %v1650_v12 = vpop.f32.mrf.mxu0  ;;  %v1676_v13 = vadd.f32 %v2980_v28, %v1663_v7 }
 0x14a   : > { %v1366_v5 = vpop.f32.mrf.mxu2  ;;  %v1198_v9 = vadd.f32 %v1183_v49, %v2968_v56  ;;  %v1532_v15 = vpop.f32.mrf.mxu3 }
 0x14b   : > { %v1383_v8 = vadd.f32 %v1366_v5, %v1197_v2  ;;  %v1685_v20 = vmax.f32 %v1676_v13, 0.0 }
 0x14d   : > { %v1539_v44 = vadd.f32 %v1522_v35, %v1383_v8 }
 0x14f   : > { %v1664_v14 = vadd.f32 %v1647_v36, %v1539_v44 }
 0x151   : > { %v1677_v17 = vadd.f32 %v2980_v28, %v1664_v14  ;;  %v1185_v23 = vpop.f32.mrf.mxu1  ;;  %v1652_v24 = vpop.f32.mrf.mxu0 }
 0x152   : > { %v1369_v18 = vpop.f32.mrf.mxu2  ;;  %v1199_v27 = vadd.f32 %v1185_v23, %v2971_v63 }
 0x153   : > { %v1686_v19 = vmax.f32 %v1677_v17, 0.0  ;;  %v1384_v51 = vadd.f32 %v1369_v18, %v1198_v9 }
 0x155   : > { %v2459_v21 = vpack.c.bf16 %v1686_v19, %v1685_v20  ;;  %v1540_v25 = vadd.f32 %v1525_v48, %v1384_v51 }
 0x157   : > { %2467 = vst [vmem:[%s2989_s9 + $0x10] sm:$0xff] %v2459_v21   ;;  %v1665_v47 = vadd.f32 %v1650_v12, %v1540_v25 }
 0x159   : > { %v1188_v56 = vpop.f32.mrf.mxu1  ;;  %v1655_v31 = vpop.f32.mrf.mxu0  ;;  %v1678_v32 = vadd.f32 %v2980_v28, %v1665_v47 }
 0x15a   : > { %v1371_v29 = vpop.f32.mrf.mxu2  ;;  %v1200_v35 = vadd.f32 %v1188_v56, %v2973_v4 }
 0x15b   : > { %v1385_v6 = vadd.f32 %v1371_v29, %v1199_v27  ;;  %v1687_v38 = vmax.f32 %v1678_v32, 0.0 }
 0x15d   : > { %v1541_v30 = vadd.f32 %v1527_v22, %v1385_v6 }
 0x15f   : > { %v1666_v34 = vadd.f32 %v1652_v24, %v1541_v30 }
 0x161   : > { %v1679_v16 = vadd.f32 %v2980_v28, %v1666_v34  ;;  %v1190_v45 = vpop.f32.mrf.mxu1  ;;  %v1657_v46 = vpop.f32.mrf.mxu0 }
 0x162   : > { %v1374_v37 = vpop.f32.mrf.mxu2 }
 0x163   : > { %v1688_v41 = vmax.f32 %v1679_v16, 0.0  ;;  %v1386_v42 = vadd.f32 %v1374_v37, %v1200_v35 }
 0x165   : > { %v2464_v63 = vpack.c.bf16 %v1688_v41, %v1687_v38  ;;  %v1542_v43 = vadd.f32 %v1530_v3, %v1386_v42 }
 0x167   : > { %2468 = vst [vmem:[%s2989_s9 + $0x18] sm:$0xff] %v2464_v63   ;;  %v1667_v40 = vadd.f32 %v1655_v31, %v1542_v43 }
 0x169   : > { %v1680_v26 = vadd.f32 %v2980_v28, %v1667_v40 }
 0x16a   : > { %v1376_v48 = vpop.f32.mrf.mxu2 }
 0x16b   : > { %v1689_v50 = vmax.f32 %v1680_v26, 0.0 }
 0x16d   : > { %v1698_v39 = vpack.c.bf16 %v1689_v50, %v1689_v50 }
 0x16f   : > { %1707 = vst [vmem:[%s2989_s9 + $0x20] sm:$0xf] %v1698_v39 }
 0x170 PF: > { %s13_s14 = sadd.s32 1, %s2537_s14   ;;  %s3022_s12 = smov %s2533_s13 }
 0x171   : > { %p10_p5 = scmp.ge.s32.totalorder %s13_s14, 6   ;;  %s3023_s13 = smov %s3025_s15 }
 0x173   :  { %12 = sbr.rel (!%p10_p5) target bundleno = 2 (0x2), region = 70 }

// kernel: perceptual_loss.10
= control target key start
LH: loop header
LB: loop body
LE: loop exit
PB: predicated region body
PF: predicated region fallthrough
CT: control target
= control target key end

     0   :  { %s1871_s12 = smov 0   ;;  %s1873_s13 = smov 0   ;;  %s2201_s0 = inlined_call_operand.vmem [shape: bf16[4,105,128], index: 0, kind: input, shape index: {}]   ;;  %s2202_s1 = inlined_call_operand.vmem [shape: bf16[9,128,128], index: 1, kind: input, shape index: {}]   ;;  %s2203_s2 = inlined_call_operand.vmem [shape: f32[1,128], index: 2, kind: input, shape index: {}]   ;;  %s2204_s3 = inlined_call_operand.vmem [shape: bf16[4,20,128], index: 3, kind: output, shape index: {}]  }
   0x1   :  { %s1875_s14 = smov 0  }
   0x2 LB: > { %s25_s15 = sadd.s32 1, %s1845_s13  ;;  %p1259_p0 = scmp.ge.s32.totalorder %s1849_s14, 1  ;;  %s1849_s14 = sphi %s1875_s14, %s13_s14   ;;  %s1845_s13 = sphi %s1873_s13, %s2206_s13   ;;  %s1841_s12 = sphi %s1871_s12, %s2205_s12  }
   0x3   : > { %p27_p1 = scmp.ge.s32.totalorder %s25_s15, 4  ;;  %p151_p2 = scmp.lt.s32.totalorder %s1849_s14, 5 }
   0x5   : > { %s2208_s15 = smov (%p27_p1, %s25_s15), 0  ;;  %p152_p3 = pnand %p1259_p0, %p151_p2 }
   0x6   : > { %p179_p4 = scmp.lt.s32.totalorder (!%p152_p3), %s1841_s12, 3 }
   0x7   : > { %155 = sbr.rel (%p152_p3) target bundleno = 251 (0xfb), region = 32 }
   0xc   : > { %v1725_v0 = vld [vmem:[%s2202_s1 + $0x78] sm:$0xff]  ;;  %v1724_v4 = vld [vmem:[%s2202_s1 + $0x70] sm:$0xff]  ;;  %s2210_s12 = smov (!%p179_p4, %s1841_s12), 3  ;;  %v1723_v8 = vld [vmem:[%s2202_s1 + $0x68] sm:$0xff]  ;;  %vm241_vm0 = vsmask.f32 7424 }
   0xd   : > { %v1716_v1 = vld [vmem:[%s2202_s1 + $0x38] sm:$0xff]  ;;  %307 = vmatpush.bf16.msra.mxu0 %v1725_v0  ;;  %v1715_v5 = vld [vmem:[%s2202_s1 + $0x30] sm:$0xff]  ;;  %s1800_s5 = smul.u32 56, %s2210_s12  ;;  %v1714_v9 = vld [vmem:[%s2202_s1 + $0x28] sm:$0xff]  ;;  %vm536_vm1 = vcmask 1046528   ;;  %vm988_vm4 = vcmask 1044480  }
   0xe   : > { %v1733_v2 = vld [vmem:[%s2202_s1 + $0xb8] sm:$0xff]  ;;  %383 = vmatpush.bf16.msra.mxu1 %v1716_v1  ;;  %v1732_v6 = vld [vmem:[%s2202_s1 + $0xb0] sm:$0xff]  ;;  %v1731_v10 = vld [vmem:[%s2202_s1 + $0xa8] sm:$0xff]  ;;  %vm639_vm2 = vsmask.f32 6400 }
   0xf   : > { %v1742_v3 = vld [vmem:[%s2202_s1 + $0xf8] sm:$0xff]  ;;  %487 = vmatpush.bf16.msra.mxu2 %v1733_v2  ;;  %v1741_v7 = vld [vmem:[%s2202_s1 + $0xf0] sm:$0xff]  ;;  %v1740_v11 = vld [vmem:[%s2202_s1 + $0xe8] sm:$0xff]  ;;  %s1931_s20 = scalar_lea.vmem %s2201_s0, %s1800_s5  ;;  %vm868_vm3 = vsmask.f32 5376  ;;  %s1801_s5 = smul.u32 12, %s2210_s12 }
  0x10   : > { %590 = vmatpush.bf16.msra.mxu3 %v1742_v3  ;;  %v1722_v12 = vld [vmem:[%s2202_s1 + $0x60] sm:$0xff]  ;;  %v215_v16 = vld [vmem:[%s1931_s20 + $0x14] sm:$0x7]  ;;  %v401_v17 = vld [vmem:[%s1931_s20 + $0x8] sm:$0x7] }
  0x11   : > { %308 = vmatpush.bf16.msra.mxu0 %v1724_v4  ;;  %v1713_v13 = vld [vmem:[%s2202_s1 + $0x20] sm:$0xff]  ;;  %v1721_v18 = vld [vmem:[%s2202_s1 + $0x58] sm:$0xff]  ;;  %v1717_v20 = vld [vmem:[%s1931_s20 + $0xc] sm:$0xff]  ;;  %v238_v21 = vunpack.c.l.b16 %v215_v16  ;;  %v420_v25 = vunpack.c.l.b16 %v401_v17  ;;  %s192_s8 = scalar_lea.vmem %s2204_s3, %s1801_s5 }
  0x12   : > { %384 = vmatpush.bf16.msra.mxu1 %v1715_v5  ;;  %v1730_v14 = vld [vmem:[%s2202_s1 + $0xa0] sm:$0xff]  ;;  %v1712_v19 = vld [vmem:[%s2202_s1 + $0x18] sm:$0xff]  ;;  %v1720_v27 = vld [vmem:[%s2202_s1 + $0x50] sm:$0xff]  ;;  %v245_v30 = vshll.u32 %v1717_v20, 16  ;;  %v243_v40 = vshrl.u32 %v1717_v20, 16 }
  0x13   : > { %488 = vmatpush.bf16.msra.mxu2 %v1732_v6  ;;  %v1739_v15 = vld [vmem:[%s2202_s1 + $0xe0] sm:$0xff]  ;;  %v1729_v22 = vld [vmem:[%s2202_s1 + $0x98] sm:$0xff]  ;;  %v1711_v28 = vld [vmem:[%s2202_s1 + $0x10] sm:$0xff]  ;;  %v1970_v29 = vpack.c.b16 %v238_v21, %v238_v21  ;;  %v1978_v33 = vpack.c.b16 %v420_v25, %v420_v25 }
  0x14   : > { %591 = vmatpush.bf16.msra.mxu3 %v1741_v7  ;;  %v1738_v23 = vld [vmem:[%s2202_s1 + $0xd8] sm:$0xff]  ;;  %v1961_v24 = vld [vmem:[%s1931_s20] sm:$0xff]  ;;  %v1728_v31 = vld [vmem:[%s2202_s1 + $0x90] sm:$0xff]  ;;  %v247_v41 = vrot.slane %v245_v30, 1 }
  0x15   : > { %309 = vmatpush.bf16.msra.mxu0 %v1723_v8  ;;  %v510_v26 = vld [vmem:[%s1931_s20 + $0x20] sm:$0x7]  ;;  %v1737_v32 = vld [vmem:[%s2202_s1 + $0xd0] sm:$0xff]  ;;  %v425_v34 = vshll.u32 %v1961_v24, 16  ;;  %v1416_v36 = vld [vmem:[%s1931_s20 + $0x18] sm:$0xe] }
  0x16   : > { %385 = vmatpush.bf16.msra.mxu1 %v1714_v9  ;;  %v533_v35 = vunpack.c.l.b16 %v510_v26  ;;  %v1734_v37 = vld [vmem:[%s1931_s20 + $0x18] sm:$0xf0]  ;;  %v1719_v38 = vld [vmem:[%s2202_s1 + $0x48] sm:$0xff]  ;;  %v250_v42 = vshll.u32 %v1970_v29, 16  ;;  %v423_v43 = vshrl.u32 %v1961_v24, 16  ;;  %v430_v47 = vshll.u32 %v1978_v33, 16 }
  0x17   : > { %489 = vmatpush.bf16.msra.mxu2 %v1731_v10  ;;  %v1710_v39 = vld [vmem:[%s2202_s1 + $0x8] sm:$0xff]  ;;  %v427_v46 = vrot.slane %v425_v34, 1  ;;  %v1998_v48 = vor.u32 %v1734_v37, %v1416_v36  ;;  %v1718_v50 = vld [vmem:[%s2202_s1 + $0x40] sm:$0xff]  ;;  %v248_v52 = vor.u32 %v247_v41, %v243_v40  ;;  %v1751_v60 = vld [vmem:[%s2202_s1 + $0x138] sm:$0xff]  ;;  %v434_v21 = vshrl.u32 %v1978_v33, 16 }
  0x18   : > { %592 = vmatpush.bf16.msra.mxu3 %v1740_v11  ;;  %v1727_v44 = vld [vmem:[%s2202_s1 + $0x88] sm:$0xff]  ;;  %v2000_v49 = vpack.c.b16 %v533_v35, %v533_v35  ;;  %v1709_v51 = vld [vmem:[%s2202_s1] sm:$0xff]  ;;  %v2008_v53 = vrot.slane %v250_v42, 1  ;;  %v2016_v57 = vrot.slane %v430_v47, 1  ;;  %v1759_v61 = vld [vmem:[%s2202_s1 + $0x178] sm:$0xff] }
  0x19   : > { %310 = vmatpush.bf16.msra.mxu0 %v1722_v12  ;;  %v1736_v45 = vld [vmem:[%s2202_s1 + $0xc8] sm:$0xff]  ;;  %v1726_v54 = vld [vmem:[%s2202_s1 + $0x80] sm:$0xff]  ;;  %v428_v56 = vor.u32 %v427_v46, %v423_v43  ;;  %v537_v58 = vrot.slane %v1998_v48, 1  ;;  %v1768_v0 = vld [vmem:[%s2202_s1 + $0x1b8] sm:$0xff] }
  0x1a   : > { %386 = vmatpush.bf16.msra.mxu1 %v1713_v13  ;;  %v1735_v55 = vld [vmem:[%s2202_s1 + $0xc0] sm:$0xff]  ;;  %v538_v59 = vrot.slane %v2000_v49, 1  ;;  %v253_v62 = vsel %vm241_vm0, %v248_v52, %v2008_v53  ;;  %v1778_v2 = vld [vmem:[%s2202_s1 + $0x1f8] sm:$0xff]  ;;  %v1750_v3 = vld [vmem:[%s2202_s1 + $0x130] sm:$0xff]  ;;  %v436_v37 = vor.u32 %v434_v21, %v2016_v57 }
  0x1b   : > { %490 = vmatpush.bf16.msra.mxu2 %v1730_v14  ;;  %v433_v63 = vsel %vm241_vm0, %v428_v56, %v2016_v57  ;;  %v1758_v4 = vld [vmem:[%s2202_s1 + $0x170] sm:$0xff]  ;;  %v1749_v7 = vld [vmem:[%s2202_s1 + $0x128] sm:$0xff]  ;;  %v728_v13 = vld [vmem:[%s1931_s20 + $0x20] sm:$0xf] }
  0x1c   : > { %593 = vmatpush.bf16.msra.mxu3 %v1739_v15  ;;  %v539_v1 = vsel %vm536_vm1, %v537_v58, %v538_v59  ;;  %v1767_v5 = vld [vmem:[%s2202_s1 + $0x1b0] sm:$0xff]  ;;  %v1757_v8 = vld [vmem:[%s2202_s1 + $0x168] sm:$0xff]  ;;  %v837_v14 = vld [vmem:[%s1931_s20] sm:$0xc] }
  0x1d   : > { %311 = vmatpush.bf16.msra.mxu0 %v1721_v18  ;;  %v1777_v6 = vld [vmem:[%s2202_s1 + $0x1f0] sm:$0xff]  ;;  %v613_v9 = vld [vmem:[%s1931_s20 + $0x2c] sm:$0xf]  ;;  %v196_v12 = vld [vmem:[%s1931_s20 + $0x8] sm:$0x3]  ;;  %v862_v25 = vunpack.c.l.b16 %v837_v14 }
  0x1e   : > { %387 = vmatpush.bf16.msra.mxu1 %v1712_v19  ;;  %v1766_v10 = vld [vmem:[%s2202_s1 + $0x1a8] sm:$0xff]  ;;  %v2068_v15 = vld [vmem:[%s1931_s20 + $0x4] sm:$0xf]  ;;  %v636_v18 = vunpack.c.l.b16 %v613_v9  ;;  %v254_v19 = vshrl.u32 %v1970_v29, 16  ;;  %v330_v20 = vunpack.c.l.b16 %v196_v12  ;;  %v1747_v29 = vld [vmem:[%s2202_s1 + $0x118] sm:$0xff] }
  0x1f   : > { %491 = vmatpush.bf16.msra.mxu2 %v1729_v22  ;;  %v1776_v11 = vld [vmem:[%s2202_s1 + $0x1e8] sm:$0xff]  ;;  %v1748_v16 = vld [vmem:[%s2202_s1 + $0x120] sm:$0xff]  ;;  %v863_v26 = vunpack.c.l.b16 %v2068_v15  ;;  %v1755_v30 = vld [vmem:[%s2202_s1 + $0x158] sm:$0xff] }
  0x20   : > { %594 = vmatpush.bf16.msra.mxu3 %v1738_v23  ;;  %v1756_v17 = vld [vmem:[%s2202_s1 + $0x160] sm:$0xff]  ;;  %v1743_v23 = vld [vmem:[%s1931_s20 + $0x24] sm:$0xf0]  ;;  %v1760_v33 = vld [vmem:[%s1931_s20 + $0x8] sm:$0x10]  ;;  %v256_v34 = vor.u32 %v254_v19, %v2008_v53  ;;  %v332_v35 = vpack.c.b16 %v330_v20, %v330_v20  ;;  %v750_v53 = vshrl.u32 %v1998_v48, 16 }
  0x21   : > { %312 = vmatpush.bf16.msra.mxu0 %v1720_v27  ;;  %v1468_v22 = vld [vmem:[%s1931_s20 + $0x24] sm:$0xe]  ;;  %v1764_v40 = vld [vmem:[%s2202_s1 + $0x198] sm:$0xff]  ;;  %v1746_v43 = vld [vmem:[%s2202_s1 + $0x110] sm:$0xff] }
  0x22   : > { %388 = vmatpush.bf16.msra.mxu1 %v1711_v28  ;;  %v1765_v27 = vld [vmem:[%s2202_s1 + $0x1a0] sm:$0xff]  ;;  %v1469_v36 = vor.u32 %v1743_v23, %v1468_v22  ;;  %v1774_v41 = vld [vmem:[%s2202_s1 + $0x1d8] sm:$0xff]  ;;  %v1763_v47 = vld [vmem:[%s2202_s1 + $0x190] sm:$0xff] }
  0x23   : > { %492 = vmatpush.bf16.msra.mxu2 %v1728_v31  ;;  %v1775_v28 = vld [vmem:[%s2202_s1 + $0x1e0] sm:$0xff]  ;;  %v638_v31 = vpack.c.b16 %v636_v18, %v636_v18  ;;  %v1772_v12 = vld [vmem:[%s2202_s1 + $0x1c8] sm:$0xff]  ;;  %v1786_v20 = vld [vmem:[%s2202_s1 + $0x238] sm:$0xff] }
  0x24   : > { %595 = vmatpush.bf16.msra.mxu3 %v1737_v32  ;;  %v1568_v32 = vld [vmem:[%s1931_s20 + $0x8] sm:$0xf]  ;;  %v644_v52 = vshll.u32 %v1469_v36, 16  ;;  %v1744_v18 = vld [vmem:[%s2202_s1 + $0x100] sm:$0xff] }
  0x25   : > { %313 = vmatpush.bf16.msra.mxu0 %v1719_v38  ;;  %v2105_v42 = vor.u32 %v1760_v33, %v1568_v32  ;;  %v652_v46 = vshll.u32 %v638_v31, 16  ;;  %v1752_v19 = vld [vmem:[%s2202_s1 + $0x140] sm:$0xff] }
  0x26   : > { %389 = vmatpush.bf16.msra.mxu1 %v1710_v39  ;;  %v866_v39 = vpack.c.b16 %v863_v26, %v862_v25  ;;  %v1761_v25 = vld [vmem:[%s2202_s1 + $0x180] sm:$0xff] }
  0x27   : > { %493 = vmatpush.bf16.msra.mxu2 %v1727_v44  ;;  %v1754_v44 = vld [vmem:[%s2202_s1 + $0x150] sm:$0xff]  ;;  %v878_v49 = vshrl.u32 %v2105_v42, 16 }
  0x28   : > { %596 = vmatpush.bf16.msra.mxu3 %v1736_v45  ;;  %v649_v45 = vshrl.u32 %v638_v31, 16  ;;  %v870_v58 = vshrl.u32 %v866_v39, 16 }
  0x29   : > { %314 = vmatpush.bf16.msra.mxu0 %v1718_v50  ;;  %v1773_v50 = vld [vmem:[%s2202_s1 + $0x1d0] sm:$0xff]  ;;  %v880_v14 = vrot.slane %v878_v49, 2 }
  0x2a   : > { %390 = vmatpush.bf16.msra.mxu1 %v1709_v51  ;;  %v641_v51 = vshrl.u32 %v1469_v36, 16  ;;  %v872_v9 = vrot.slane %v870_v58, 2  ;;  %v1785_v36 = vld [vmem:[%s2202_s1 + $0x230] sm:$0xff] }
  0x2b   : > { %494 = vmatpush.bf16.msra.mxu2 %v1726_v54  ;;  %v753_v54 = vshll.u32 %v1998_v48, 16  ;;  %v1753_v48 = vld [vmem:[%s2202_s1 + $0x148] sm:$0xff] }
  0x2c   : > { %597 = vmatpush.bf16.msra.mxu3 %v1735_v55  ;;  %315 = vmatmul.bf16.vlgmr.msra.gmra.mxu0 %v253_v62  ;;  %v1745_v55 = vld [vmem:[%s2202_s1 + $0x108] sm:$0xff]  ;;  %v1769_v62 = vld [vmem:[%s1931_s20 + $0xc] sm:$0xf0] }
  0x2d   : > { %707 = vmatpush.bf16.msrb.mxu0 %v1751_v60  ;;  %391 = vmatmul.bf16.vlgmr.msra.gmra.mxu1 %v1961_v24  ;;  %v747_v24 = vunpack.c.l.b16 %v728_v13  ;;  %v1620_v60 = vld [vmem:[%s1931_s20 + $0xc] sm:$0x8] }
  0x2e   : > { %816 = vmatpush.bf16.msrb.mxu1 %v1759_v61  ;;  %495 = vmatmul.bf16.vlgmr.msra.gmra.mxu2 %v433_v63  ;;  %v873_v61 = vshll.u32 %v866_v39, 16  ;;  %v651_v63 = vrot.slane %v649_v45, 1  ;;  %v1782_v39 = vld [vmem:[%s2202_s1 + $0x218] sm:$0xff] }
  0x2f   : > { %598 = vmatmul.bf16.vlgmr.msra.gmra.mxu3 %v539_v1  ;;  %936 = vmatpush.bf16.msrb.mxu2 %v1768_v0  ;;  %v748_v38 = vpack.c.b16 %v747_v24, %v747_v24  ;;  %v654_v0 = vrot.slane %v652_v46, 2  ;;  %v1624_v1 = vld [vmem:[%s1931_s20 + $0x14] sm:$0xf]  ;;  %v1779_v46 = vld [vmem:[%s2202_s1 + $0x200] sm:$0xff] }
  0x30   : > { %1042 = vmatpush.bf16.msrb.mxu3 %v1778_v2  ;;  %v1770_v2 = vld [vmem:[%s1931_s20 + $0x14] sm:$0x10]  ;;  %v875_v13 = vrot.slane %v873_v61, 3 }
  0x31   : > { %708 = vmatpush.bf16.msrb.mxu0 %v1750_v3  ;;  %v758_v56 = vshrl.u32 %v748_v38, 16  ;;  %v761_v57 = vshll.u32 %v748_v38, 16  ;;  %v643_v3 = vrot.slane %v641_v51, 1  ;;  %v655_v22 = vor.u32 %v654_v0, %v651_v63  ;;  %v1783_v38 = vld [vmem:[%s2202_s1 + $0x220] sm:$0xff] }
  0x32   : > { %817 = vmatpush.bf16.msrb.mxu1 %v1758_v4  ;;  %v646_v4 = vrot.slane %v644_v52, 2 }
  0x33   : > { %937 = vmatpush.bf16.msrb.mxu2 %v1767_v5  ;;  %v752_v5 = vrot.slane %v750_v53, 1 }
  0x34   : > { %1043 = vmatpush.bf16.msrb.mxu3 %v1777_v6  ;;  %v755_v6 = vrot.slane %v753_v54, 2  ;;  %v647_v21 = vor.u32 %v646_v4, %v643_v3 }
  0x35   : > { %709 = vmatpush.bf16.msrb.mxu0 %v1749_v7  ;;  %v760_v7 = vrot.slane %v758_v56, 1 }
  0x36   : > { %818 = vmatpush.bf16.msrb.mxu1 %v1757_v8  ;;  %v763_v8 = vrot.slane %v761_v57, 2  ;;  %v756_v23 = vor.u32 %v755_v6, %v752_v5  ;;  %v656_v32 = vsel %vm639_vm2, %v647_v21, %v655_v22 }
  0x37   : > { %938 = vmatpush.bf16.msrb.mxu2 %v1766_v10  ;;  %v1621_v10 = vor.u32 %v1769_v62, %v1620_v60 }
  0x38   : > { %1044 = vmatpush.bf16.msrb.mxu3 %v1776_v11  ;;  %v1762_v11 = vld [vmem:[%s2202_s1 + $0x188] sm:$0xff]  ;;  %v764_v24 = vor.u32 %v763_v8, %v760_v7 }
  0x39   : > { %710 = vmatpush.bf16.msrb.mxu0 %v1748_v16 }
  0x3a   : > { %819 = vmatpush.bf16.msrb.mxu1 %v1756_v17  ;;  %v1625_v17 = vor.u32 %v1770_v2, %v1624_v1  ;;  %v765_v33 = vsel %vm639_vm2, %v756_v23, %v764_v24 }
  0x3b   : > { %939 = vmatpush.bf16.msrb.mxu2 %v1765_v27  ;;  %v1771_v27 = vld [vmem:[%s2202_s1 + $0x1c0] sm:$0xff] }
  0x3c   : > { %1045 = vmatpush.bf16.msrb.mxu3 %v1775_v28  ;;  %320 = vmatmul.bf16.gmra.mxu0 %v256_v34  ;;  %v876_v28 = vor.u32 %v875_v13, %v872_v9  ;;  %v990_v31 = vrot.slane %v1625_v17, 3 }
  0x3d   : > { %711 = vmatpush.bf16.msrb.mxu0 %v1747_v29  ;;  %396 = vmatmul.bf16.gmra.mxu1 %v332_v35 }
  0x3e   : > { %820 = vmatpush.bf16.msrb.mxu1 %v1755_v30  ;;  %500 = vmatmul.bf16.gmra.mxu2 %v436_v37  ;;  %v989_v30 = vrot.slane %v1621_v10, 3  ;;  %v1784_v37 = vld [vmem:[%s2202_s1 + $0x228] sm:$0xff] }
  0x3f   : > { %603 = vmatmul.bf16.gmra.mxu3 %v538_v59  ;;  %940 = vmatpush.bf16.msrb.mxu2 %v1764_v40  ;;  %v881_v59 = vshll.u32 %v2105_v42, 16  ;;  %v1781_v40 = vld [vmem:[%s2202_s1 + $0x210] sm:$0xff] }
  0x40   : > { %1046 = vmatpush.bf16.msrb.mxu3 %v1774_v41  ;;  %v991_v35 = vsel %vm988_vm4, %v989_v30, %v990_v31  ;;  %v1063_v41 = vld [vmem:[%s1931_s20] sm:$0x8] }
  0x41   : > { %712 = vmatpush.bf16.msrb.mxu0 %v1746_v43  ;;  %v883_v16 = vrot.slane %v881_v59, 3  ;;  %v1082_v43 = vunpack.c.l.b16 %v1063_v41 }
  0x42   : > { %821 = vmatpush.bf16.msrb.mxu1 %v1754_v44  ;;  %v1780_v44 = vld [vmem:[%s2202_s1 + $0x208] sm:$0xff] }
  0x43   : > { %941 = vmatpush.bf16.msrb.mxu2 %v1763_v47  ;;  %v884_v29 = vor.u32 %v883_v16, %v880_v14  ;;  %v1083_v45 = vpack.c.b16 %v863_v26, %v1082_v43 }
  0x44   : > { %1047 = vmatpush.bf16.msrb.mxu3 %v1773_v50  ;;  %v1085_v50 = vrot.slane %v2105_v42, 3 }
  0x45   : > { %713 = vmatpush.bf16.msrb.mxu0 %v1745_v55  ;;  %v885_v34 = vsel %vm868_vm3, %v876_v28, %v884_v29  ;;  %v1084_v47 = vrot.slane %v1083_v45, 3 }
  0x46   : > { %822 = vmatpush.bf16.msrb.mxu1 %v1753_v48 }
  0x47   : > { %942 = vmatpush.bf16.msrb.mxu2 %v1762_v11  ;;  %v1086_v51 = vsel %vm988_vm4, %v1084_v47, %v1085_v50 }
  0x48   : > { %1048 = vmatpush.bf16.msrb.mxu3 %v1772_v12 }
  0x49   : > { %714 = vmatpush.bf16.msrb.mxu0 %v1744_v18 }
  0x4a   : > { %823 = vmatpush.bf16.msrb.mxu1 %v1752_v19 }
  0x4b   : > { %943 = vmatpush.bf16.msrb.mxu2 %v1761_v25 }
  0x4c   : > { %1049 = vmatpush.bf16.msrb.mxu3 %v1771_v27  ;;  %715 = vmatmul.bf16.vlgmr.msrb.gmra.mxu0 %v656_v32  ;;  %v1826_v32 = vld [vmem:[%s2203_s2] ss:$0 sm:$0xff] }
  0x4d   : > { %1137 = vmatpush.bf16.msra.mxu0 %v1786_v20  ;;  %824 = vmatmul.bf16.vlgmr.msrb.gmra.mxu1 %v765_v33 }
  0x4e   : > { %1792 = vmatpush.bf16.msra.mxu1 %v1786_v20  ;;  %944 = vmatmul.bf16.vlgmr.msrb.gmra.mxu2 %v885_v34 }
  0x4f   : > { %1050 = vmatmul.bf16.vlgmr.msrb.gmra.mxu3 %v991_v35 }
  0x51   : > { %1138 = vmatpush.bf16.msra.mxu0 %v1785_v36 }
  0x52   : > { %1793 = vmatpush.bf16.msra.mxu1 %v1785_v36 }
  0x55   : > { %1139 = vmatpush.bf16.msra.mxu0 %v1784_v37 }
  0x56   : > { %1794 = vmatpush.bf16.msra.mxu1 %v1784_v37 }
  0x59   : > { %1140 = vmatpush.bf16.msra.mxu0 %v1783_v38 }
  0x5a   : > { %1795 = vmatpush.bf16.msra.mxu1 %v1783_v38 }
  0x5c   : > { %720 = vmatmul.bf16.gmra.mxu0 %v655_v22 }
  0x5d   : > { %1141 = vmatpush.bf16.msra.mxu0 %v1782_v39  ;;  %829 = vmatmul.bf16.gmra.mxu1 %v764_v24 }
  0x5e   : > { %1796 = vmatpush.bf16.msra.mxu1 %v1782_v39  ;;  %949 = vmatmul.bf16.gmra.mxu2 %v884_v29 }
  0x5f   : > { %1055 = vmatmul.bf16.gmra.mxu3 %v990_v31 }
  0x61   : > { %1142 = vmatpush.bf16.msra.mxu0 %v1781_v40 }
  0x62   : > { %1797 = vmatpush.bf16.msra.mxu1 %v1781_v40 }
  0x65   : > { %1143 = vmatpush.bf16.msra.mxu0 %v1780_v44 }
  0x66   : > { %1798 = vmatpush.bf16.msra.mxu1 %v1780_v44 }
  0x69   : > { %1144 = vmatpush.bf16.msra.mxu0 %v1779_v46 }
  0x6a   : > { %1799 = vmatpush.bf16.msra.mxu1 %v1779_v46 }
  0x6c   : > { %1145 = vmatmul.bf16.vlgmr.msra.gmra.mxu0 %v1086_v51 }
  0x6d   : > { %1150 = vmatmul.bf16.vlgmr.msra.gmra.mxu1 %v1085_v50 }
  0xa9   : > { %v316_v52 = vpop.f32.mrf.mxu0 }
  0xaa   : > { %v392_v53 = vpop.f32.mrf.mxu1 }
  0xab   : > { %v393_v11 = vadd.f32 %v392_v53, %v316_v52 }
  0xb1   : > { %v496_v54 = vpop.f32.mrf.mxu2  ;;  %v318_v26 = vpop.f32.mrf.mxu0 }
  0xb2   : > { %v599_v15 = vpop.f32.mrf.mxu3  ;;  %v394_v55 = vpop.f32.mrf.mxu1  ;;  %v505_v12 = vadd.f32 %v496_v54, %v393_v11 }
  0xb3   : > { %v395_v14 = vadd.f32 %v394_v55, %v318_v26 }
  0xb4   : > { %v608_v17 = vadd.f32 %v599_v15, %v505_v12 }
  0xb9   : > { %v498_v56 = vpop.f32.mrf.mxu2  ;;  %v321_v58 = vpop.f32.mrf.mxu0 }
  0xba   : > { %v601_v57 = vpop.f32.mrf.mxu3  ;;  %v397_v60 = vpop.f32.mrf.mxu1  ;;  %v506_v18 = vadd.f32 %v498_v56, %v395_v14 }
  0xbb   : > { %v398_v5 = vadd.f32 %v397_v60, %v321_v58 }
  0xbc   : > { %v609_v25 = vadd.f32 %v601_v57, %v506_v18 }
  0xc1   : > { %v501_v48 = vpop.f32.mrf.mxu2  ;;  %v323_v49 = vpop.f32.mrf.mxu0 }
  0xc2   : > { %v604_v61 = vpop.f32.mrf.mxu3  ;;  %v399_v42 = vpop.f32.mrf.mxu1  ;;  %v507_v6 = vadd.f32 %v501_v48, %v398_v5 }
  0xc4   : > { %v610_v13 = vadd.f32 %v604_v61, %v507_v6 }
  0xc9   : > { %v503_v59 = vpop.f32.mrf.mxu2  ;;  %v716_v63 = vpop.f32.mrf.mxu0 }
  0xca   : > { %v606_v62 = vpop.f32.mrf.mxu3  ;;  %v825_v0 = vpop.f32.mrf.mxu1  ;;  %v725_v23 = vadd.f32 %v716_v63, %v608_v17 }
  0xcc   : > { %v834_v28 = vadd.f32 %v825_v0, %v725_v23 }
  0xd1   : > { %v945_v1 = vpop.f32.mrf.mxu2  ;;  %v718_v3 = vpop.f32.mrf.mxu0 }
  0xd2   : > { %v1051_v2 = vpop.f32.mrf.mxu3  ;;  %v827_v4 = vpop.f32.mrf.mxu1  ;;  %v726_v29 = vadd.f32 %v718_v3, %v609_v25  ;;  %v954_v30 = vadd.f32 %v945_v1, %v834_v28 }
  0xd4   : > { %v835_v37 = vadd.f32 %v827_v4, %v726_v29  ;;  %v1060_v39 = vadd.f32 %v1051_v2, %v954_v30 }
  0xd9   : > { %v947_v7 = vpop.f32.mrf.mxu2  ;;  %v721_v9 = vpop.f32.mrf.mxu0 }
  0xda   : > { %v1053_v8 = vpop.f32.mrf.mxu3  ;;  %v830_v10 = vpop.f32.mrf.mxu1  ;;  %v727_v16 = vadd.f32 %v721_v9, %v610_v13  ;;  %v955_v40 = vadd.f32 %v947_v7, %v835_v37 }
  0xdc   : > { %v836_v24 = vadd.f32 %v830_v10, %v727_v16  ;;  %v1061_v45 = vadd.f32 %v1053_v8, %v955_v40 }
  0xe1   : > { %v950_v19 = vpop.f32.mrf.mxu2  ;;  %v723_v21 = vpop.f32.mrf.mxu0 }
  0xe2   : > { %v1056_v20 = vpop.f32.mrf.mxu3  ;;  %v832_v22 = vpop.f32.mrf.mxu1  ;;  %v956_v27 = vadd.f32 %v950_v19, %v836_v24 }
  0xe4   : > { %v1062_v31 = vadd.f32 %v1056_v20, %v956_v27 }
  0xe9   : > { %v952_v33 = vpop.f32.mrf.mxu2  ;;  %v1146_v35 = vpop.f32.mrf.mxu0 }
  0xea   : > { %v1058_v34 = vpop.f32.mrf.mxu3  ;;  %v1151_v36 = vpop.f32.mrf.mxu1  ;;  %v1155_v43 = vadd.f32 %v1146_v35, %v1060_v39 }
  0xeb   : > { %v1157_v38 = vadd.f32 %v1151_v36, %v1062_v31 }
  0xec   : > { %v1162_v51 = vadd.f32 %v1826_v32, %v1155_v43 }
  0xed   : > { %v1164_v41 = vadd.f32 %v1826_v32, %v1157_v38 }
  0xee   : > { %v1165_v54 = vmax.f32 %v1162_v51, 0.0 }
  0xef   : > { %v1167_v44 = vmax.f32 %v1164_v41, 0.0 }
  0xf1   : > { %v1170_v46 = vpack.c.bf16 %v1167_v44, %v1167_v44  ;;  %v1148_v47 = vpop.f32.mrf.mxu0 }
  0xf2   : > { %v1153_v50 = vpop.f32.mrf.mxu1  ;;  %v1156_v52 = vadd.f32 %v1148_v47, %v1061_v45 }
  0xf3   : > { %1173 = vst [vmem:[%s192_s8 + $0x8] sm:$0x3] %v1170_v46 }
  0xf4   : > { %v1163_v53 = vadd.f32 %v1826_v32, %v1156_v52 }
  0xf6   : > { %v1166_v15 = vmax.f32 %v1163_v53, 0.0 }
  0xf8   : > { %v1790_v26 = vpack.c.bf16 %v1166_v15, %v1165_v54 }
  0xfa   : > { %1791 = vst [vmem:[%s192_s8] sm:$0xff] %v1790_v26  }
  0xfb PF: > { %s13_s14 = sadd.s32 1, %s1849_s14   ;;  %s2205_s12 = smov %s1845_s13 }
  0xfc   : > { %p10_p5 = scmp.ge.s32.totalorder %s13_s14, 6   ;;  %s2206_s13 = smov %s2208_s15 }
  0xfe   :  { %12 = sbr.rel (!%p10_p5) target bundleno = 2 (0x2), region = 70 }

// kernel: perceptual_loss.11
= control target key start
LH: loop header
LB: loop body
LE: loop exit
PB: predicated region body
PF: predicated region fallthrough
CT: control target
= control target key end

     0   :  { %s483_s0 = inlined_call_operand.vmem [shape: bf16[32,128], index: 0, kind: input, shape index: {}]   ;;  %s484_s1 = inlined_call_operand.vmem [shape: bf16[32,128], index: 1, kind: input, shape index: {}]   ;;  %s485_s2 = inlined_call_operand.vmem [shape: f32[1,128], index: 2, kind: input, shape index: {}]   ;;  %s486_s3 = inlined_call_operand.hbm [shape: f32[1,1], index: 3, kind: output, shape index: {}]  }
   0x1   :  { %v245_v0 = vld [vmem:[%s484_s1] sm:$0xff]   ;;  %v252_v1 = vld [vmem:[%s483_s0 + $0x8] sm:$0xff]  }
   0x2   :  { %v237_v2 = vld [vmem:[%s483_s0] sm:$0xff]   ;;  %v348_v3 = vunpack.c.l.bf16 %v245_v0  ;;  %v350_v4 = vunpack.c.l.bf16 %v252_v1 }
   0x3   :  { %v352_v5 = vunpack.c.l.bf16 %v237_v2 }
   0x4   :  { %8 = vsyncpa [#allocation4], 0  ;;  %v253_v6 = vld [vmem:[%s484_s1 + $0x8] sm:$0xff]   ;;  %v105_v7 = vmul.f32 %v348_v3, %v348_v3  ;;  %v39_v8 = vmul.f32 %v350_v4, %v350_v4  ;;  %v363_v10 = vunpack.c.h.bf16 %v245_v0  ;;  %v367_v12 = vunpack.c.h.bf16 %v237_v2  ;;  %s318_s20 = smov [#allocation3]   ;;  %s227_s24 = sshll.u32 %s486_s3, 4  ;;  %s228_s24 = int_to_ptr.hbm [resolvable:$true] %s227_s24 }
   0x5   :  { %v37_v9 = vmul.f32 %v352_v5, %v352_v5  ;;  %v365_v11 = vunpack.c.l.bf16 %v253_v6  ;;  %v375_v16 = vunpack.c.h.bf16 %v253_v6  ;;  %v377_v17 = vunpack.c.h.bf16 %v252_v1  ;;  %s225_s21 = sshll.u32 %s318_s20, 4  ;;  %s226_s21 = int_to_ptr.vmem [resolvable:$true] %s225_s21 }
   0x6   :  { %109 = vadd.xlane.f32.xlu1 %v105_v7  ;;  %45 = vadd.xlane.f32.xlu2 %v39_v8  ;;  %v106_v13 = vmul.f32 %v363_v10, %v363_v10  ;;  %v38_v15 = vmul.f32 %v367_v12, %v367_v12 }
   0x7   :  { %41 = vadd.xlane.f32.xlu0 %v37_v9  ;;  %v107_v14 = vmul.f32 %v365_v11, %v365_v11  ;;  %v108_v18 = vmul.f32 %v375_v16, %v375_v16  ;;  %v40_v19 = vmul.f32 %v377_v17, %v377_v17 }
   0xe   :  { %111 = vadd.xlane.f32.xlu1 %v106_v13  ;;  %113 = vadd.xlane.f32.xlu2 %v107_v14 }
   0xf   :  { %43 = vadd.xlane.f32.xlu0 %v38_v15 }
  0x16   :  { %115 = vadd.xlane.f32.xlu1 %v108_v18 }
  0x17   :  { %47 = vadd.xlane.f32.xlu0 %v40_v19 }
  0x79   :  { %v110_v20 = vpop.xlane.xlu1 %109  ;;  %v383_v21 = vpop.xlane.xlu2 %45 }
  0x7a   :  { %259 = vrsqrt.f32 %v110_v20  ;;  %v385_v22 = vpop.xlane.xlu0 %41  ;;  %vm124_vm0 = vcmp.eq.f32.partialorder %v110_v20, inf  ;;  %vm126_vm1 = vcmp.eq.f32.partialorder %v110_v20, 0.0  ;;  %v127_v40 = vand.u32 2147483648, %v110_v20 }
  0x7b   :  { %261 = vrsqrt.f32 %v383_v21  ;;  %vm80_vm2 = vcmp.eq.f32.partialorder %v383_v21, inf  ;;  %v83_v42 = vand.u32 2147483648, %v383_v21  ;;  %vm56_vm3 = vcmp.eq.f32.partialorder %v385_v22, inf }
  0x7c   :  { %263 = vrsqrt.f32 %v385_v22  ;;  %vm58_vm4 = vcmp.eq.f32.partialorder %v385_v22, 0.0  ;;  %vm82_vm5 = vcmp.eq.f32.partialorder %v383_v21, 0.0  ;;  %v59_v54 = vand.u32 2147483648, %v385_v22 }
  0x80   :  { %v260_v23 = vpop.eup %259 }
  0x81   :  { %v262_v24 = vpop.eup %261  ;;  %v118_v25 = vmul.f32 %v260_v23, %v110_v20  ;;  %v389_v26 = vpop.xlane.xlu1 %111 }
  0x82   :  { %v391_v27 = vpop.xlane.xlu2 %113  ;;  %v264_v28 = vpop.eup %263  ;;  %v74_v29 = vmul.f32 %v262_v24, %v383_v21  ;;  %265 = vrsqrt.f32 %v389_v26  ;;  %vm136_vm6 = vcmp.eq.f32.partialorder %v389_v26, inf  ;;  %vm138_vm7 = vcmp.eq.f32.partialorder %v389_v26, 0.0 }
  0x83   :  { %v395_v30 = vpop.xlane.xlu0 %43  ;;  %v119_v31 = vmul.f32 %v260_v23, %v118_v25  ;;  %v50_v32 = vmul.f32 %v264_v28, %v385_v22  ;;  %267 = vrsqrt.f32 %v391_v27  ;;  %v139_v7 = vand.u32 2147483648, %v389_v26 }
  0x84   :  { %v75_v33 = vmul.f32 %v262_v24, %v74_v29  ;;  %269 = vrsqrt.f32 %v395_v30  ;;  %vm148_vm8 = vcmp.eq.f32.partialorder %v391_v27, inf  ;;  %vm150_vm9 = vcmp.eq.f32.partialorder %v391_v27, 0.0 }
  0x85   :  { %v120_v34 = vmul.f32 0.5, %v119_v31  ;;  %v51_v35 = vmul.f32 %v264_v28, %v50_v32  ;;  %vm68_vm10 = vcmp.eq.f32.partialorder %v395_v30, inf  ;;  %vm70_vm11 = vcmp.eq.f32.partialorder %v395_v30, 0.0 }
  0x86   :  { %v76_v36 = vmul.f32 0.5, %v75_v33 }
  0x87   :  { %v121_v37 = vsub.f32 1.5, %v120_v34  ;;  %v52_v38 = vmul.f32 0.5, %v51_v35 }
  0x88   :  { %v266_v39 = vpop.eup %265  ;;  %v77_v41 = vsub.f32 1.5, %v76_v36  ;;  %v71_v36 = vand.u32 2147483648, %v395_v30 }
  0x89   :  { %v268_v43 = vpop.eup %267  ;;  %v122_v44 = vmul.f32 %v260_v23, %v121_v37  ;;  %v53_v45 = vsub.f32 1.5, %v52_v38  ;;  %v130_v46 = vmul.f32 %v266_v39, %v389_v26  ;;  %v404_v47 = vpop.xlane.xlu1 %115 }
  0x8a   :  { %v78_v48 = vmul.f32 %v262_v24, %v77_v41  ;;  %v142_v49 = vmul.f32 %v268_v43, %v391_v27  ;;  %271 = vrsqrt.f32 %v404_v47  ;;  %v270_v51 = vpop.eup %269  ;;  %v151_v24 = vand.u32 2147483648, %v391_v27 }
  0x8b   :  { %v409_v50 = vpop.xlane.xlu0 %47  ;;  %v123_v52 = vmul.f32 %v122_v44, %v110_v20  ;;  %v54_v53 = vmul.f32 %v264_v28, %v53_v45  ;;  %v131_v55 = vmul.f32 %v266_v39, %v130_v46  ;;  %v62_v58 = vmul.f32 %v270_v51, %v395_v30 }
  0x8c   :  { %v79_v56 = vmul.f32 %v78_v48, %v383_v21  ;;  %v143_v57 = vmul.f32 %v268_v43, %v142_v49  ;;  %273 = vrsqrt.f32 %v409_v50  ;;  %vm160_vm12 = vcmp.eq.f32.partialorder %v404_v47, inf }
  0x8d   :  { %v125_v59 = vsel %vm124_vm0, %v110_v20, %v123_v52  ;;  %v55_v60 = vmul.f32 %v54_v53, %v385_v22  ;;  %v132_v61 = vmul.f32 0.5, %v131_v55  ;;  %v63_v0 = vmul.f32 %v270_v51, %v62_v58 }
  0x8e   :  { %v128_v62 = vsel %vm126_vm1, %v127_v40, %v125_v59  ;;  %v144_v63 = vmul.f32 0.5, %v143_v57  ;;  %v81_v15 = vsel %vm80_vm2, %v383_v21, %v79_v56  ;;  %vm162_vm13 = vcmp.eq.f32.partialorder %v404_v47, 0.0 }
  0x8f   :  { %v165_v1 = vadd.f32 1e-10, %v128_v62  ;;  %v57_v2 = vsel %vm56_vm3, %v385_v22, %v55_v60  ;;  %v133_v6 = vsub.f32 1.5, %v132_v61  ;;  %v64_v14 = vmul.f32 0.5, %v63_v0 }
  0x90   :  { %v272_v8 = vpop.eup %271  ;;  %v60_v9 = vsel %vm58_vm4, %v59_v54, %v57_v2  ;;  %v145_v13 = vsub.f32 1.5, %v144_v63  ;;  %v84_v34 = vsel %vm82_vm5, %v83_v42, %v81_v15  ;;  %vm92_vm14 = vcmp.eq.f32.partialorder %v409_v50, inf }
  0x91   :  { %v97_v18 = vadd.f32 1e-10, %v60_v9  ;;  %v134_v19 = vmul.f32 %v266_v39, %v133_v6  ;;  %v154_v20 = vmul.f32 %v272_v8, %v404_v47  ;;  %v65_v25 = vsub.f32 1.5, %v64_v14 }
  0x92   :  { %v146_v23 = vmul.f32 %v268_v43, %v145_v13  ;;  %v274_v22 = vpop.eup %273  ;;  %275 = vrcp.f32 %v165_v1  ;;  %v99_v43 = vadd.f32 1e-10, %v84_v34  ;;  %v95_v61 = vand.u32 2147483648, %v409_v50 }
  0x93   :  { %v135_v28 = vmul.f32 %v134_v19, %v389_v26  ;;  %v155_v29 = vmul.f32 %v272_v8, %v154_v20  ;;  %v66_v32 = vmul.f32 %v270_v51, %v65_v25  ;;  %v86_v33 = vmul.f32 %v274_v22, %v409_v50  ;;  %v258_v20 = vld [vmem:[%s485_s2] ss:$0 sm:$0xff] }
  0x94   :  { %v147_v31 = vmul.f32 %v146_v23, %v391_v27  ;;  %277 = vrcp.f32 %v97_v18  ;;  %vm94_vm15 = vcmp.eq.f32.partialorder %v409_v50, 0.0  ;;  %vm19_vm0 = vcmask 0  }
  0x95   :  { %v137_v35 = vsel %vm136_vm6, %v389_v26, %v135_v28  ;;  %v156_v37 = vmul.f32 0.5, %v155_v29  ;;  %v67_v40 = vmul.f32 %v66_v32, %v395_v30  ;;  %v87_v41 = vmul.f32 %v274_v22, %v86_v33 }
  0x96   :  { %v140_v38 = vsel %vm138_vm7, %v139_v7, %v137_v35  ;;  %v149_v39 = vsel %vm148_vm8, %v391_v27, %v147_v31  ;;  %v163_v27 = vand.u32 2147483648, %v404_v47  ;;  %v317_v34 = vmov 0.0  }
  0x97   :  { %v166_v21 = vadd.f32 1e-10, %v140_v38  ;;  %v157_v42 = vsub.f32 1.5, %v156_v37  ;;  %v152_v44 = vsel %vm150_vm9, %v151_v24, %v149_v39  ;;  %v69_v45 = vsel %vm68_vm10, %v395_v30, %v67_v40  ;;  %20 = vst.msk [vmem:[#allocation2] sm:$0x1] %vm19_vm0, %v317_v34 }
  0x98   :  { %v88_v26 = vmul.f32 0.5, %v87_v41  ;;  %v167_v46 = vadd.f32 1e-10, %v152_v44  ;;  %v276_v48 = vpop.eup %275  ;;  %v72_v49 = vsel %vm70_vm11, %v71_v36, %v69_v45 }
  0x99   :  { %279 = vrcp.f32 %v166_v21  ;;  %v158_v51 = vmul.f32 %v272_v8, %v157_v42  ;;  %v98_v52 = vadd.f32 1e-10, %v72_v49  ;;  %v177_v63 = vmul.f32 %v276_v48, %v348_v3 }
  0x9a   :  { %v89_v53 = vsub.f32 1.5, %v88_v26  ;;  %281 = vrcp.f32 %v167_v46  ;;  %v278_v54 = vpop.eup %277 }
  0x9b   :  { %v159_v55 = vmul.f32 %v158_v51, %v404_v47  ;;  %283 = vrcp.f32 %v99_v43  ;;  %v173_v62 = vmul.f32 %v278_v54, %v352_v5 }
  0x9c   :  { %285 = vrcp.f32 %v98_v52  ;;  %v90_v56 = vmul.f32 %v274_v22, %v89_v53 }
  0x9d   :  { %v161_v30 = vsel %vm160_vm12, %v404_v47, %v159_v55  ;;  %v181_v14 = vsub.f32 %v173_v62, %v177_v63 }
  0x9e   :  { %v164_v57 = vsel %vm162_vm13, %v163_v27, %v161_v30  ;;  %v91_v58 = vmul.f32 %v90_v56, %v409_v50  ;;  %v189_v40 = vld [vmem:[#allocation2] sm:$0x1] }
  0x9f   :  { %v280_v59 = vpop.eup %279  ;;  %v168_v60 = vadd.f32 1e-10, %v164_v57  ;;  %v185_v19 = vmul.f32 %v181_v14, %v181_v14 }
  0xa0   :  { %v282_v0 = vpop.eup %281  ;;  %v93_v1 = vsel %vm92_vm14, %v409_v50, %v91_v58  ;;  %v178_v6 = vmul.f32 %v280_v59, %v363_v10 }
  0xa1   :  { %v284_v2 = vpop.eup %283  ;;  %287 = vrcp.f32 %v168_v60  ;;  %v96_v47 = vsel %vm94_vm15, %v95_v61, %v93_v1  ;;  %v179_v13 = vmul.f32 %v282_v0, %v365_v11  ;;  %v194_v25 = vmul.f32 %v258_v20, %v185_v19 }
  0xa2   :  { %v286_v7 = vpop.eup %285  ;;  %v100_v8 = vadd.f32 1e-10, %v96_v47  ;;  %v175_v3 = vmul.f32 %v284_v2, %v350_v4 }
  0xa3   :  { %v174_v9 = vmul.f32 %v286_v7, %v367_v12 }
  0xa4   :  { %289 = vrcp.f32 %v100_v8  ;;  %v183_v18 = vsub.f32 %v175_v3, %v179_v13 }
  0xa5   :  { %v182_v5 = vsub.f32 %v174_v9, %v178_v6 }
  0xa6   :  { %v187_v11 = vmul.f32 %v183_v18, %v183_v18 }
  0xa7   :  { %v288_v15 = vpop.eup %287  ;;  %v186_v50 = vmul.f32 %v182_v5, %v182_v5 }
  0xa8   :  { %v180_v10 = vmul.f32 %v288_v15, %v375_v16  ;;  %v196_v29 = vmul.f32 %v258_v20, %v187_v11 }
  0xa9   :  { %v195_v23 = vmul.f32 %v258_v20, %v186_v50 }
  0xaa   :  { %v290_v24 = vpop.eup %289 }
  0xab   :  { %v176_v12 = vmul.f32 %v290_v24, %v377_v17  ;;  %v198_v28 = vadd.f32 %v195_v23, %v194_v25 }
  0xad   :  { %v184_v22 = vsub.f32 %v176_v12, %v180_v10  ;;  %v199_v32 = vadd.f32 %v198_v28, %v196_v29 }
  0xaf   :  { %v188_v4 = vmul.f32 %v184_v22, %v184_v22 }
  0xb1   :  { %v197_v31 = vmul.f32 %v258_v20, %v188_v4 }
  0xb3   :  { %v200_v33 = vadd.f32 %v199_v32, %v197_v31 }
  0xb5   :  { %201 = vadd.xlane.f32.xlu2 %v200_v33 }
 0x128   :  { %v202_v35 = vpop.xlane.xlu2 %201 }
 0x129   :  { %v203_v16 = vrot.slane %v202_v35, 4 }
 0x12b   :  { %v204_v36 = vadd.f32 %v203_v16, %v202_v35 }
 0x12d   :  { %v205_v37 = vrot.slane %v204_v36, 2 }
 0x12f   :  { %v206_v38 = vadd.f32 %v205_v37, %v204_v36 }
 0x131   :  { %v207_v17 = vrot.slane %v206_v38, 1 }
 0x133   :  { %v208_v39 = vadd.f32 %v207_v17, %v206_v38 }
 0x135   :  { %254 = vpush %v208_v39 }
 0x166   :  { %s255_s2 = spop %254 }
 0x167   :  { %v210_v41 = vstv %s255_s2 }
 0x168   :  { %v211_v21 = vadd.f32 %v210_v41, %v189_v40 }
 0x16a   :  { %213 = vst.msk [vmem:[#allocation2] sm:$0x1] %vm19_vm0, %v211_v21 }
 0x171   :  { %v217_v42 = vld [vmem:[#allocation2] sm:$0x1] }
 0x172   :  { %v218_v43 = vmul.f32 0.03125, %v217_v42 }
 0x174   :  { %219 = vst.msk [vmem:[#allocation3] sm:$0x1] %vm19_vm0, %v218_v43 }
 0x175   :  { %230 = dma.vmem_to_hbm [thread:$0]  %s226_s21, 16, %s228_s24, [#allocation4]  }
 0x176   :  { %315 = dma.done.wait [#allocation4], 16  }
 0x177   :  { %316 = vsyncadd [#allocation4], 4294967280 }
 0x178   :  { %235 = vsyncpa [#allocation4], 1 }

</bundles_post_ra>
